<compile_context>
chip_gen: v5e
topology: v5e:2x2
jax: 0.10.0
libtpu: 0.0.40
codegen_flags: <defaults>
</compile_context>

<pallas_src>
import functools

import numpy as np

import jax
import jax.numpy as jnp
from jax.experimental import pallas as pl
from jax.experimental.pallas import tpu as pltpu


_CONV_SPECS = [(4, 1, 0), (4, 2, 1), (4, 2, 1), (4, 2, 1), (5, 3, 1)]  # (k, s, p)
_BN_EPS = 1e-5


def _ceil_to(x, m):
    return -(-x // m) * m


# ---------------------------------------------------------------------------
# Fused single-step kernels (one invocation per layer, phases unrolled inside)
# ---------------------------------------------------------------------------
def _deconv_bn_relu_kernel(pt_ref, wt_ref, g_ref, b_ref, o_ref, *, eps):
    """ConvTranspose (phase-decomposed matmuls) + BatchNorm(batch stats) + ReLU.

    pt_ref: (P, K, Mphi)   per-phase zero-free patch matrices (f32)
    wt_ref: (P, Cpad, K)   per-phase weight matrices (f32)
    g_ref/b_ref: (Cpad, 1) gamma / beta
    o_ref:  (Cpad, P*Mphi) phase-major, lane-dense output slab
    """
    P, _, mphi = pt_ref.shape

    # Per-phase MXU matmuls, written into contiguous column slabs of the
    # VMEM-resident output (static, unrolled loop -> LLO can overlap them).
    for ph in range(P):
        y = jnp.dot(wt_ref[ph], pt_ref[ph], preferred_element_type=jnp.float32)
        o_ref[:, ph * mphi:(ph + 1) * mphi] = y

    y_full = o_ref[...]                              # (Cpad, P*Mphi), still in VMEM
    # Two-pass batch statistics over all N*Ho*Wo positions (= P*Mphi columns).
    mean = jnp.mean(y_full, axis=1, keepdims=True)
    var = jnp.mean((y_full - mean) ** 2, axis=1, keepdims=True)  # biased (train mode)
    scale = g_ref[...] * jax.lax.rsqrt(var + eps)    # (Cpad, 1)
    shift = b_ref[...] - mean * scale
    # One fused affine + ReLU over the whole lane-dense slab (single broadcast,
    # single store).
    o_ref[...] = jnp.maximum(y_full * scale + shift, 0.0)


def fused_deconv_bn_relu(patchesT, wT, gamma2d, beta2d, eps=_BN_EPS):
    P, K, Mphi = patchesT.shape
    Cpad = wT.shape[1]
    kern = functools.partial(_deconv_bn_relu_kernel, eps=eps)
    return pl.pallas_call(
        kern,
        out_shape=jax.ShapeDtypeStruct((Cpad, P * Mphi), jnp.float32),
        grid=(1,),
        in_specs=[
            pl.BlockSpec((P, K, Mphi), lambda i: (0, 0, 0)),
            pl.BlockSpec((P, Cpad, K), lambda i: (0, 0, 0)),
            pl.BlockSpec((Cpad, 1), lambda i: (0, 0)),
            pl.BlockSpec((Cpad, 1), lambda i: (0, 0)),
        ],
        out_specs=pl.BlockSpec((Cpad, P * Mphi), lambda i: (0, 0)),
        compiler_params=pltpu.CompilerParams(
            dimension_semantics=("arbitrary",)),
    )(patchesT, wT, gamma2d, beta2d)


def _deconv_tanh_kernel(pt_ref, wt_ref, o_ref):
    P, _, mphi = pt_ref.shape
    for ph in range(P):
        y = jnp.dot(wt_ref[ph], pt_ref[ph], preferred_element_type=jnp.float32)
        o_ref[:, ph * mphi:(ph + 1) * mphi] = jnp.tanh(y)


def fused_deconv_tanh(patchesT, wT):
    P, K, Mphi = patchesT.shape
    Cpad = wT.shape[1]
    return pl.pallas_call(
        _deconv_tanh_kernel,
        out_shape=jax.ShapeDtypeStruct((Cpad, P * Mphi), jnp.float32),
        grid=(1,),
        in_specs=[
            pl.BlockSpec((P, K, Mphi), lambda i: (0, 0, 0)),
            pl.BlockSpec((P, Cpad, K), lambda i: (0, 0, 0)),
        ],
        out_specs=pl.BlockSpec((Cpad, P * Mphi), lambda i: (0, 0)),
        compiler_params=pltpu.CompilerParams(
            dimension_semantics=("arbitrary",)),
    )(patchesT, wT)


# ---------------------------------------------------------------------------
# Zero-free (sub-pixel phase) im2col glue — operates on tiny arrays only.
# ---------------------------------------------------------------------------
def _phase_decompose(x, w, k, s, p, cpad):
    """ConvTranspose2d -> per-phase transposed patch/weight matrices (float32).

    x: (N, Cin, H, W) activations; w: (Cin, Cout, k, k) (PyTorch layout).
    Output position (oh, ow) with phase a=(oh+p)%s, b=(ow+p)%s only receives
    kernel taps kh%s==a, kw%s==b from input (ih, iw)=((oh+p-kh)/s,(ow+p-kw)/s),
    so per phase the K axis is Cin * ceil(k/s)^2 with no structural zeros.
    """
    N, Cin, H, W = x.shape
    Cout = w.shape[1]
    Ho = (H - 1) * s - 2 * p + k
    Wo = (W - 1) * s - 2 * p + k
    tmax = -(-k // s)
    Kmax = Cin * tmax * tmax

    patches, wmats, place = [], [], []
    for a in range(s):
        khs = [kh for kh in range(k) if kh % s == a]
        ohs = np.array([oh for oh in range(Ho) if (oh + p) % s == a])
        for b in range(s):
            kws = [kw for kw in range(k) if kw % s == b]
            ows = np.array([ow for ow in range(Wo) if (ow + p) % s == b])
            hphi, wphi = len(ohs), len(ows)
            taps, wtaps = [], []
            for kh in khs:
                ih = (ohs + p - kh) // s
                mh = (ih >= 0) & (ih < H)
                ihc = np.clip(ih, 0, H - 1)
                for kw in kws:
                    iw = (ows + p - kw) // s
                    mw = (iw >= 0) & (iw < W)
                    iwc = np.clip(iw, 0, W - 1)
                    g = x[:, :, ihc, :][:, :, :, iwc]          # (N, Cin, hphi, wphi)
                    m = mh[:, None] & mw[None, :]
                    if not m.all():
                        g = g * jnp.asarray(m, x.dtype)
                    taps.append(g)
                    wtaps.append(w[:, :, kh, kw])              # (Cin, Cout)
            T = len(taps)
            pt = jnp.stack(taps, axis=0)                       # (T, N, Cin, hphi, wphi)
            pt = pt.transpose(0, 2, 1, 3, 4).reshape(T * Cin, N * hphi * wphi)
            wm = jnp.stack(wtaps, axis=0).reshape(T * Cin, Cout).T   # (Cout, T*Cin)
            pt = jnp.pad(pt, ((0, Kmax - T * Cin), (0, 0)))
            wm = jnp.pad(wm, ((0, cpad - Cout), (0, Kmax - T * Cin)))
            patches.append(pt)
            wmats.append(wm)
            place.append((int(ohs[0]), int(ows[0]), hphi, wphi))

    # All phases must have the same number of output positions (true for all
    # layers of this net); make the assumption explicit.
    assert all(h * w_ == place[0][2] * place[0][3] for (_, _, h, w_) in place), \
        "unequal phase sizes are not supported"

    patchesT = jnp.stack(patches).astype(jnp.float32)          # (P, Kmax, Mphi)
    wT = jnp.stack(wmats).astype(jnp.float32)                  # (P, cpad, Kmax)
    return patchesT, wT, place, (Ho, Wo)


def _assemble(y_slab, place, N, Cout, Ho, Wo, s):
    """Sub-pixel re-interleave of the phase-major (Cpad, P*Mphi) slab ->
    (N, Cout, Ho, Wo)."""
    P = len(place)
    Mphi = y_slab.shape[1] // P
    out = jnp.zeros((N, Cout, Ho, Wo), y_slab.dtype)
    for idx, (oh0, ow0, hphi, wphi) in enumerate(place):
        blk = y_slab[:Cout, idx * Mphi:(idx + 1) * Mphi]
        blk = blk.reshape(Cout, N, hphi, wphi).transpose(1, 0, 2, 3)
        out = out.at[:, :, oh0::s, ow0::s].set(blk)
    return out


# ---------------------------------------------------------------------------
# Full Gnet forward
# ---------------------------------------------------------------------------
def gnet_forward(x, params):
    N = x.shape[0]
    # layers 1..4: ConvTranspose2d + BatchNorm2d (batch stats) + ReLU, fused
    for idx in range(4):
        w, gamma, beta = params[idx]
        k, s, p = _CONV_SPECS[idx]
        Cout = w.shape[1]
        cpad = _ceil_to(Cout, 8)
        patchesT, wT, place, (Ho, Wo) = _phase_decompose(x, w, k, s, p, cpad)
        g2 = jnp.pad(gamma, (0, cpad - Cout)).reshape(cpad, 1)
        b2 = jnp.pad(beta, (0, cpad - Cout)).reshape(cpad, 1)
        y = fused_deconv_bn_relu(patchesT, wT, g2, b2)
        x = _assemble(y, place, N, Cout, Ho, Wo, s)
    # final layer: ConvTranspose2d + Tanh, fused
    w = params[4][0]
    k, s, p = _CONV_SPECS[4]
    Cout = w.shape[1]
    cpad = _ceil_to(Cout, 8)
    patchesT, wT, place, (Ho, Wo) = _phase_decompose(x, w, k, s, p, cpad)
    y = fused_deconv_tanh(patchesT, wT)
    return _assemble(y, place, N, Cout, Ho, Wo, s)


# ---------------------------------------------------------------------------
# Pure-JAX reference (semantics check)
# ---------------------------------------------------------------------------
def _conv_transpose_ref(x, w, s, p):
    k = w.shape[-1]
    w_conv = jnp.flip(w, axis=(-2, -1)).transpose(1, 0, 2, 3)   # (Cout, Cin, k, k)
    return jax.lax.conv_general_dilated(
        x, w_conv, window_strides=(1, 1),
        padding=[(k - 1 - p, k - 1 - p)] * 2,
        lhs_dilation=(s, s),
        dimension_numbers=("NCHW", "OIHW", "NCHW"),
        precision=jax.lax.Precision.HIGHEST)


def gnet_forward_ref(x, params):
    for idx in range(4):
        w, gamma, beta = params[idx]
        _, s, p = _CONV_SPECS[idx]
        y = _conv_transpose_ref(x, w, s, p)
        mean = jnp.mean(y, axis=(0, 2, 3), keepdims=True)
        var = jnp.mean((y - mean) ** 2, axis=(0, 2, 3), keepdims=True)
        y = (y - mean) / jnp.sqrt(var + _BN_EPS)
        y = y * gamma.reshape(1, -1, 1, 1) + beta.reshape(1, -1, 1, 1)
        x = jnp.maximum(y, 0.0)
    w = params[4][0]
    _, s, p = _CONV_SPECS[4]
    return jnp.tanh(_conv_transpose_ref(x, w, s, p))


# ---------------------------------------------------------------------------
# Parameter init (DCGAN-style, deterministic)
# ---------------------------------------------------------------------------
def init_params(key, noise_dim, feats):
    shapes = [
        (noise_dim, feats * 8, 4, 4),
        (feats * 8, feats * 4, 4, 4),
        (feats * 4, feats * 2, 4, 4),
        (feats * 2, feats, 4, 4),
        (feats, 3, 5, 5),
    ]
    keys = jax.random.split(key, len(shapes))
    params = []
    for i, shp in enumerate(shapes):
        w = 0.02 * jax.random.normal(keys[i], shp, jnp.float32)
        if i < 4:
            c = shp[1]
            params.append((w, jnp.ones((c,), jnp.float32),
                           jnp.zeros((c,), jnp.float32)))
        else:
            params.append((w, None, None))
    return params


if __name__ == "__main__":
    # small shapes consistent with the module: noise of shape (B, noise_dim, 1, 1)
    batch, noise_dim, feats = 2, 16, 8
    key = jax.random.PRNGKey(0)
    k_param, k_x = jax.random.split(key)
    params = init_params(k_param, noise_dim, feats)
    x = jax.random.normal(k_x, (batch, noise_dim, 1, 1), jnp.float32)

    out = jax.jit(gnet_forward)(x, params)
    out = jax.block_until_ready(out)
    assert out.shape == (batch, 3, 96, 96), out.shape
    assert bool(jnp.all(jnp.isfinite(out)))

    ref = jax.block_until_ready(jax.jit(gnet_forward_ref)(x, params))
    err = float(jnp.max(jnp.abs(out - ref)))
    assert err < 5e-2, f"max abs error vs reference: {err}"
    print("KERNEL_OK")
</pallas_src>

<mosaic_0001>
module attributes {stable_mosaic.version = 11 : i64} {
  func.func @_deconv_bn_relu_kernel(%arg0: i32, %arg1: memref<1x256x32xf32, #tpu.memory_space<vmem>>, %arg2: memref<1x64x256xf32, #tpu.memory_space<vmem>>, %arg3: memref<64x1xf32, #tpu.memory_space<vmem>>, %arg4: memref<64x1xf32, #tpu.memory_space<vmem>>, %arg5: memref<64x32xf32, #tpu.memory_space<vmem>>) attributes {dimension_semantics = [#tpu.dimension_semantics<arbitrary>], iteration_bounds = array<i64: 1>, scalar_prefetch = 0 : i64, scratch_operands = 0 : i64, tpu.core_type = #tpu.core_type<tc>, window_params = [{pipeline_mode = #tpu.pipeline_mode<synchronous>, transform_indices = @transform_0, window_bounds = array<i64: 1, 256, 32>}, {pipeline_mode = #tpu.pipeline_mode<synchronous>, transform_indices = @transform_1, window_bounds = array<i64: 1, 64, 256>}, {pipeline_mode = #tpu.pipeline_mode<synchronous>, transform_indices = @transform_2, window_bounds = array<i64: 64, 1>}, {pipeline_mode = #tpu.pipeline_mode<synchronous>, transform_indices = @transform_3, window_bounds = array<i64: 64, 1>}, {pipeline_mode = #tpu.pipeline_mode<synchronous>, transform_indices = @transform_4, window_bounds = array<i64: 64, 32>}]} {
    %c0 = arith.constant 0 : index
    %c0_0 = arith.constant 0 : index
    %c0_1 = arith.constant 0 : index
    %0 = vector.load %arg2[%c0, %c0_0, %c0_1] : memref<1x64x256xf32, #tpu.memory_space<vmem>>, vector<1x64x256xf32>
    %1 = vector.shape_cast %0 : vector<1x64x256xf32> to vector<64x256xf32>
    %c0_2 = arith.constant 0 : index
    %c0_3 = arith.constant 0 : index
    %c0_4 = arith.constant 0 : index
    %2 = vector.load %arg1[%c0_2, %c0_3, %c0_4] : memref<1x256x32xf32, #tpu.memory_space<vmem>>, vector<1x256x32xf32>
    %3 = vector.shape_cast %2 : vector<1x256x32xf32> to vector<256x32xf32>
    %cst = arith.constant dense<0.000000e+00> : vector<64x32xf32>
    %4 = tpu.matmul %1, %3, %cst {dimension_numbers = #tpu.dot_dimension_numbers<[1], [0], [0], [1], [0, 0, 1, 1], [], []>} : vector<64x256xf32>, vector<256x32xf32>, vector<64x32xf32> -> vector<64x32xf32>
    %c0_5 = arith.constant 0 : index
    %c0_6 = arith.constant 0 : index
    %5 = vector.load %arg5[%c0_5, %c0_6] : memref<64x32xf32, #tpu.memory_space<vmem>>, vector<64x32xf32>
    tpu.vector_store %arg5[%c0_5, %c0_6], %4 {strides = array<i32>} : memref<64x32xf32, #tpu.memory_space<vmem>>, vector<64x32xf32>,
    %c0_7 = arith.constant 0 : index
    %c0_8 = arith.constant 0 : index
    %6 = vector.load %arg5[%c0_7, %c0_8] : memref<64x32xf32, #tpu.memory_space<vmem>>, vector<64x32xf32>
    %cst_9 = arith.constant dense<0.000000e+00> : vector<64xf32>
    %7 = vector.multi_reduction <add>, %6, %cst_9 [1] : vector<64x32xf32> to vector<64xf32>
    %8 = vector.shape_cast %7 : vector<64xf32> to vector<64x1xf32>
    %cst_10 = arith.constant 3.200000e+01 : f32
    %9 = vector.broadcast %cst_10 : f32 to vector<64x1xf32>
    %10 = arith.divf %8, %9 : vector<64x1xf32>
    %11 = vector.broadcast %10 : vector<64x1xf32> to vector<64x32xf32>
    %12 = arith.subf %6, %11 : vector<64x32xf32>
    %13 = arith.mulf %12, %12 : vector<64x32xf32>
    %cst_11 = arith.constant dense<0.000000e+00> : vector<64xf32>
    %14 = vector.multi_reduction <add>, %13, %cst_11 [1] : vector<64x32xf32> to vector<64xf32>
    %15 = vector.shape_cast %14 : vector<64xf32> to vector<64x1xf32>
    %cst_12 = arith.constant 3.200000e+01 : f32
    %16 = vector.broadcast %cst_12 : f32 to vector<64x1xf32>
    %17 = arith.divf %15, %16 : vector<64x1xf32>
    %c0_13 = arith.constant 0 : index
    %c0_14 = arith.constant 0 : index
    %18 = vector.load %arg3[%c0_13, %c0_14] : memref<64x1xf32, #tpu.memory_space<vmem>>, vector<64x1xf32>
    %cst_15 = arith.constant 9.99999974E-6 : f32
    %19 = vector.broadcast %cst_15 : f32 to vector<64x1xf32>
    %20 = arith.addf %17, %19 : vector<64x1xf32>
    %21 = math.rsqrt %20 : vector<64x1xf32>
    %22 = arith.mulf %18, %21 : vector<64x1xf32>
    %c0_16 = arith.constant 0 : index
    %c0_17 = arith.constant 0 : index
    %23 = vector.load %arg4[%c0_16, %c0_17] : memref<64x1xf32, #tpu.memory_space<vmem>>, vector<64x1xf32>
    %24 = arith.mulf %10, %22 : vector<64x1xf32>
    %25 = arith.subf %23, %24 : vector<64x1xf32>
    %26 = vector.broadcast %22 : vector<64x1xf32> to vector<64x32xf32>
    %27 = arith.mulf %6, %26 : vector<64x32xf32>
    %28 = vector.broadcast %25 : vector<64x1xf32> to vector<64x32xf32>
    %29 = arith.addf %27, %28 : vector<64x32xf32>
    %cst_18 = arith.constant 0.000000e+00 : f32
    %30 = vector.broadcast %cst_18 : f32 to vector<64x32xf32>
    %31 = arith.maximumf %29, %30 : vector<64x32xf32>
    %c0_19 = arith.constant 0 : index
    %c0_20 = arith.constant 0 : index
    %32 = vector.load %arg5[%c0_19, %c0_20] : memref<64x32xf32, #tpu.memory_space<vmem>>, vector<64x32xf32>
    tpu.vector_store %arg5[%c0_19, %c0_20], %31 {strides = array<i32>} : memref<64x32xf32, #tpu.memory_space<vmem>>, vector<64x32xf32>,
    return
  }
  func.func @transform_0(%arg0: i32) -> (i32, i32, i32) {
    %c0_i32 = arith.constant 0 : i32
    %c0_i32_0 = arith.constant 0 : i32
    %c0_i32_1 = arith.constant 0 : i32
    %c0_i32_2 = arith.constant 0 : i32
    return %c0_i32, %c0_i32_0, %c0_i32_1 : i32, i32, i32
  }
  func.func @transform_1(%arg0: i32) -> (i32, i32, i32) {
    %c0_i32 = arith.constant 0 : i32
    %c0_i32_0 = arith.constant 0 : i32
    %c0_i32_1 = arith.constant 0 : i32
    %c0_i32_2 = arith.constant 0 : i32
    return %c0_i32, %c0_i32_0, %c0_i32_1 : i32, i32, i32
  }
  func.func @transform_2(%arg0: i32) -> (i32, i32) {
    %c0_i32 = arith.constant 0 : i32
    %c0_i32_0 = arith.constant 0 : i32
    %c0_i32_1 = arith.constant 0 : i32
    return %c0_i32, %c0_i32_0 : i32, i32
  }
  func.func @transform_3(%arg0: i32) -> (i32, i32) {
    %c0_i32 = arith.constant 0 : i32
    %c0_i32_0 = arith.constant 0 : i32
    %c0_i32_1 = arith.constant 0 : i32
    return %c0_i32, %c0_i32_0 : i32, i32
  }
  func.func @transform_4(%arg0: i32) -> (i32, i32) {
    %c0_i32 = arith.constant 0 : i32
    %c0_i32_0 = arith.constant 0 : i32
    %c0_i32_1 = arith.constant 0 : i32
    return %c0_i32, %c0_i32_0 : i32, i32
  }
}

module attributes {stable_mosaic.version = 11 : i64} {
  func.func @_deconv_bn_relu_kernel(%arg0: i32, %arg1: memref<4x256x32xf32, #tpu.memory_space<vmem>>, %arg2: memref<4x32x256xf32, #tpu.memory_space<vmem>>, %arg3: memref<32x1xf32, #tpu.memory_space<vmem>>, %arg4: memref<32x1xf32, #tpu.memory_space<vmem>>, %arg5: memref<32x128xf32, #tpu.memory_space<vmem>>) attributes {dimension_semantics = [#tpu.dimension_semantics<arbitrary>], iteration_bounds = array<i64: 1>, scalar_prefetch = 0 : i64, scratch_operands = 0 : i64, tpu.core_type = #tpu.core_type<tc>, window_params = [{pipeline_mode = #tpu.pipeline_mode<synchronous>, transform_indices = @transform_0, window_bounds = array<i64: 4, 256, 32>}, {pipeline_mode = #tpu.pipeline_mode<synchronous>, transform_indices = @transform_1, window_bounds = array<i64: 4, 32, 256>}, {pipeline_mode = #tpu.pipeline_mode<synchronous>, transform_indices = @transform_2, window_bounds = array<i64: 32, 1>}, {pipeline_mode = #tpu.pipeline_mode<synchronous>, transform_indices = @transform_3, window_bounds = array<i64: 32, 1>}, {pipeline_mode = #tpu.pipeline_mode<synchronous>, transform_indices = @transform_4, window_bounds = array<i64: 32, 128>}]} {
    %c0 = arith.constant 0 : index
    %c0_0 = arith.constant 0 : index
    %c0_1 = arith.constant 0 : index
    %0 = vector.load %arg2[%c0, %c0_0, %c0_1] : memref<4x32x256xf32, #tpu.memory_space<vmem>>, vector<1x32x256xf32>
    %1 = vector.shape_cast %0 : vector<1x32x256xf32> to vector<32x256xf32>
    %c0_2 = arith.constant 0 : index
    %c0_3 = arith.constant 0 : index
    %c0_4 = arith.constant 0 : index
    %2 = vector.load %arg1[%c0_2, %c0_3, %c0_4] : memref<4x256x32xf32, #tpu.memory_space<vmem>>, vector<1x256x32xf32>
    %3 = vector.shape_cast %2 : vector<1x256x32xf32> to vector<256x32xf32>
    %cst = arith.constant dense<0.000000e+00> : vector<32x32xf32>
    %4 = tpu.matmul %1, %3, %cst {dimension_numbers = #tpu.dot_dimension_numbers<[1], [0], [0], [1], [0, 0, 1, 1], [], []>} : vector<32x256xf32>, vector<256x32xf32>, vector<32x32xf32> -> vector<32x32xf32>
    %c0_5 = arith.constant 0 : index
    %c0_6 = arith.constant 0 : index
    %5 = vector.load %arg5[%c0_5, %c0_6] : memref<32x128xf32, #tpu.memory_space<vmem>>, vector<32x32xf32>
    tpu.vector_store %arg5[%c0_5, %c0_6], %4 {strides = array<i32>} : memref<32x128xf32, #tpu.memory_space<vmem>>, vector<32x32xf32>,
    %c1 = arith.constant 1 : index
    %c0_7 = arith.constant 0 : index
    %c0_8 = arith.constant 0 : index
    %6 = vector.load %arg2[%c1, %c0_7, %c0_8] : memref<4x32x256xf32, #tpu.memory_space<vmem>>, vector<1x32x256xf32>
    %7 = vector.shape_cast %6 : vector<1x32x256xf32> to vector<32x256xf32>
    %c1_9 = arith.constant 1 : index
    %c0_10 = arith.constant 0 : index
    %c0_11 = arith.constant 0 : index
    %8 = vector.load %arg1[%c1_9, %c0_10, %c0_11] : memref<4x256x32xf32, #tpu.memory_space<vmem>>, vector<1x256x32xf32>
    %9 = vector.shape_cast %8 : vector<1x256x32xf32> to vector<256x32xf32>
    %cst_12 = arith.constant dense<0.000000e+00> : vector<32x32xf32>
    %10 = tpu.matmul %7, %9, %cst_12 {dimension_numbers = #tpu.dot_dimension_numbers<[1], [0], [0], [1], [0, 0, 1, 1], [], []>} : vector<32x256xf32>, vector<256x32xf32>, vector<32x32xf32> -> vector<32x32xf32>
    %c0_13 = arith.constant 0 : index
    %c32 = arith.constant 32 : index
    %11 = vector.load %arg5[%c0_13, %c32] : memref<32x128xf32, #tpu.memory_space<vmem>>, vector<32x32xf32>
    tpu.vector_store %arg5[%c0_13, %c32], %10 {strides = array<i32>} : memref<32x128xf32, #tpu.memory_space<vmem>>, vector<32x32xf32>,
    %c2 = arith.constant 2 : index
    %c0_14 = arith.constant 0 : index
    %c0_15 = arith.constant 0 : index
    %12 = vector.load %arg2[%c2, %c0_14, %c0_15] : memref<4x32x256xf32, #tpu.memory_space<vmem>>, vector<1x32x256xf32>
    %13 = vector.shape_cast %12 : vector<1x32x256xf32> to vector<32x256xf32>
    %c2_16 = arith.constant 2 : index
    %c0_17 = arith.constant 0 : index
    %c0_18 = arith.constant 0 : index
    %14 = vector.load %arg1[%c2_16, %c0_17, %c0_18] : memref<4x256x32xf32, #tpu.memory_space<vmem>>, vector<1x256x32xf32>
    %15 = vector.shape_cast %14 : vector<1x256x32xf32> to vector<256x32xf32>
    %cst_19 = arith.constant dense<0.000000e+00> : vector<32x32xf32>
    %16 = tpu.matmul %13, %15, %cst_19 {dimension_numbers = #tpu.dot_dimension_numbers<[1], [0], [0], [1], [0, 0, 1, 1], [], []>} : vector<32x256xf32>, vector<256x32xf32>, vector<32x32xf32> -> vector<32x32xf32>
    %c0_20 = arith.constant 0 : index
    %c64 = arith.constant 64 : index
    %17 = vector.load %arg5[%c0_20, %c64] : memref<32x128xf32, #tpu.memory_space<vmem>>, vector<32x32xf32>
    tpu.vector_store %arg5[%c0_20, %c64], %16 {strides = array<i32>} : memref<32x128xf32, #tpu.memory_space<vmem>>, vector<32x32xf32>,
    %c3 = arith.constant 3 : index
    %c0_21 = arith.constant 0 : index
    %c0_22 = arith.constant 0 : index
    %18 = vector.load %arg2[%c3, %c0_21, %c0_22] : memref<4x32x256xf32, #tpu.memory_space<vmem>>, vector<1x32x256xf32>
    %19 = vector.shape_cast %18 : vector<1x32x256xf32> to vector<32x256xf32>
    %c3_23 = arith.constant 3 : index
    %c0_24 = arith.constant 0 : index
    %c0_25 = arith.constant 0 : index
    %20 = vector.load %arg1[%c3_23, %c0_24, %c0_25] : memref<4x256x32xf32, #tpu.memory_space<vmem>>, vector<1x256x32xf32>
    %21 = vector.shape_cast %20 : vector<1x256x32xf32> to vector<256x32xf32>
    %cst_26 = arith.constant dense<0.000000e+00> : vector<32x32xf32>
    %22 = tpu.matmul %19, %21, %cst_26 {dimension_numbers = #tpu.dot_dimension_numbers<[1], [0], [0], [1], [0, 0, 1, 1], [], []>} : vector<32x256xf32>, vector<256x32xf32>, vector<32x32xf32> -> vector<32x32xf32>
    %c0_27 = arith.constant 0 : index
    %c96 = arith.constant 96 : index
    %23 = vector.load %arg5[%c0_27, %c96] : memref<32x128xf32, #tpu.memory_space<vmem>>, vector<32x32xf32>
    tpu.vector_store %arg5[%c0_27, %c96], %22 {strides = array<i32>} : memref<32x128xf32, #tpu.memory_space<vmem>>, vector<32x32xf32>,
    %c0_28 = arith.constant 0 : index
    %c0_29 = arith.constant 0 : index
    %24 = vector.load %arg5[%c0_28, %c0_29] : memref<32x128xf32, #tpu.memory_space<vmem>>, vector<32x128xf32>
    %cst_30 = arith.constant dense<0.000000e+00> : vector<32xf32>
    %25 = vector.multi_reduction <add>, %24, %cst_30 [1] : vector<32x128xf32> to vector<32xf32>
    %26 = vector.shape_cast %25 : vector<32xf32> to vector<32x1xf32>
    %cst_31 = arith.constant 1.280000e+02 : f32
    %27 = vector.broadcast %cst_31 : f32 to vector<32x1xf32>
    %28 = arith.divf %26, %27 : vector<32x1xf32>
    %29 = vector.broadcast %28 : vector<32x1xf32> to vector<32x128xf32>
    %30 = arith.subf %24, %29 : vector<32x128xf32>
    %31 = arith.mulf %30, %30 : vector<32x128xf32>
    %cst_32 = arith.constant dense<0.000000e+00> : vector<32xf32>
    %32 = vector.multi_reduction <add>, %31, %cst_32 [1] : vector<32x128xf32> to vector<32xf32>
    %33 = vector.shape_cast %32 : vector<32xf32> to vector<32x1xf32>
    %cst_33 = arith.constant 1.280000e+02 : f32
    %34 = vector.broadcast %cst_33 : f32 to vector<32x1xf32>
    %35 = arith.divf %33, %34 : vector<32x1xf32>
    %c0_34 = arith.constant 0 : index
    %c0_35 = arith.constant 0 : index
    %36 = vector.load %arg3[%c0_34, %c0_35] : memref<32x1xf32, #tpu.memory_space<vmem>>, vector<32x1xf32>
    %cst_36 = arith.constant 9.99999974E-6 : f32
    %37 = vector.broadcast %cst_36 : f32 to vector<32x1xf32>
    %38 = arith.addf %35, %37 : vector<32x1xf32>
    %39 = math.rsqrt %38 : vector<32x1xf32>
    %40 = arith.mulf %36, %39 : vector<32x1xf32>
    %c0_37 = arith.constant 0 : index
    %c0_38 = arith.constant 0 : index
    %41 = vector.load %arg4[%c0_37, %c0_38] : memref<32x1xf32, #tpu.memory_space<vmem>>, vector<32x1xf32>
    %42 = arith.mulf %28, %40 : vector<32x1xf32>
    %43 = arith.subf %41, %42 : vector<32x1xf32>
    %44 = vector.broadcast %40 : vector<32x1xf32> to vector<32x128xf32>
    %45 = arith.mulf %24, %44 : vector<32x128xf32>
    %46 = vector.broadcast %43 : vector<32x1xf32> to vector<32x128xf32>
    %47 = arith.addf %45, %46 : vector<32x128xf32>
    %cst_39 = arith.constant 0.000000e+00 : f32
    %48 = vector.broadcast %cst_39 : f32 to vector<32x128xf32>
    %49 = arith.maximumf %47, %48 : vector<32x128xf32>
    %c0_40 = arith.constant 0 : index
    %c0_41 = arith.constant 0 : index
    %50 = vector.load %arg5[%c0_40, %c0_41] : memref<32x128xf32, #tpu.memory_space<vmem>>, vector<32x128xf32>
    tpu.vector_store %arg5[%c0_40, %c0_41], %49 {strides = array<i32>} : memref<32x128xf32, #tpu.memory_space<vmem>>, vector<32x128xf32>,
    return
  }
  func.func @transform_0(%arg0: i32) -> (i32, i32, i32) {
    %c0_i32 = arith.constant 0 : i32
    %c0_i32_0 = arith.constant 0 : i32
    %c0_i32_1 = arith.constant 0 : i32
    %c0_i32_2 = arith.constant 0 : i32
    return %c0_i32, %c0_i32_0, %c0_i32_1 : i32, i32, i32
  }
  func.func @transform_1(%arg0: i32) -> (i32, i32, i32) {
    %c0_i32 = arith.constant 0 : i32
    %c0_i32_0 = arith.constant 0 : i32
    %c0_i32_1 = arith.constant 0 : i32
    %c0_i32_2 = arith.constant 0 : i32
    return %c0_i32, %c0_i32_0, %c0_i32_1 : i32, i32, i32
  }
  func.func @transform_2(%arg0: i32) -> (i32, i32) {
    %c0_i32 = arith.constant 0 : i32
    %c0_i32_0 = arith.constant 0 : i32
    %c0_i32_1 = arith.constant 0 : i32
    return %c0_i32, %c0_i32_0 : i32, i32
  }
  func.func @transform_3(%arg0: i32) -> (i32, i32) {
    %c0_i32 = arith.constant 0 : i32
    %c0_i32_0 = arith.constant 0 : i32
    %c0_i32_1 = arith.constant 0 : i32
    return %c0_i32, %c0_i32_0 : i32, i32
  }
  func.func @transform_4(%arg0: i32) -> (i32, i32) {
    %c0_i32 = arith.constant 0 : i32
    %c0_i32_0 = arith.constant 0 : i32
    %c0_i32_1 = arith.constant 0 : i32
    return %c0_i32, %c0_i32_0 : i32, i32
  }
}

module attributes {stable_mosaic.version = 11 : i64} {
  func.func @_deconv_bn_relu_kernel(%arg0: i32, %arg1: memref<4x128x128xf32, #tpu.memory_space<vmem>>, %arg2: memref<4x16x128xf32, #tpu.memory_space<vmem>>, %arg3: memref<16x1xf32, #tpu.memory_space<vmem>>, %arg4: memref<16x1xf32, #tpu.memory_space<vmem>>, %arg5: memref<16x512xf32, #tpu.memory_space<vmem>>) attributes {dimension_semantics = [#tpu.dimension_semantics<arbitrary>], iteration_bounds = array<i64: 1>, scalar_prefetch = 0 : i64, scratch_operands = 0 : i64, tpu.core_type = #tpu.core_type<tc>, window_params = [{pipeline_mode = #tpu.pipeline_mode<synchronous>, transform_indices = @transform_0, window_bounds = array<i64: 4, 128, 128>}, {pipeline_mode = #tpu.pipeline_mode<synchronous>, transform_indices = @transform_1, window_bounds = array<i64: 4, 16, 128>}, {pipeline_mode = #tpu.pipeline_mode<synchronous>, transform_indices = @transform_2, window_bounds = array<i64: 16, 1>}, {pipeline_mode = #tpu.pipeline_mode<synchronous>, transform_indices = @transform_3, window_bounds = array<i64: 16, 1>}, {pipeline_mode = #tpu.pipeline_mode<synchronous>, transform_indices = @transform_4, window_bounds = array<i64: 16, 512>}]} {
    %c0 = arith.constant 0 : index
    %c0_0 = arith.constant 0 : index
    %c0_1 = arith.constant 0 : index
    %0 = vector.load %arg2[%c0, %c0_0, %c0_1] : memref<4x16x128xf32, #tpu.memory_space<vmem>>, vector<1x16x128xf32>
    %1 = vector.shape_cast %0 : vector<1x16x128xf32> to vector<16x128xf32>
    %c0_2 = arith.constant 0 : index
    %c0_3 = arith.constant 0 : index
    %c0_4 = arith.constant 0 : index
    %2 = vector.load %arg1[%c0_2, %c0_3, %c0_4] : memref<4x128x128xf32, #tpu.memory_space<vmem>>, vector<1x128x128xf32>
    %3 = vector.shape_cast %2 : vector<1x128x128xf32> to vector<128x128xf32>
    %cst = arith.constant dense<0.000000e+00> : vector<16x128xf32>
    %4 = tpu.matmul %1, %3, %cst {dimension_numbers = #tpu.dot_dimension_numbers<[1], [0], [0], [1], [0, 0, 1, 1], [], []>} : vector<16x128xf32>, vector<128x128xf32>, vector<16x128xf32> -> vector<16x128xf32>
    %c0_5 = arith.constant 0 : index
    %c0_6 = arith.constant 0 : index
    %5 = vector.load %arg5[%c0_5, %c0_6] : memref<16x512xf32, #tpu.memory_space<vmem>>, vector<16x128xf32>
    tpu.vector_store %arg5[%c0_5, %c0_6], %4 {strides = array<i32>} : memref<16x512xf32, #tpu.memory_space<vmem>>, vector<16x128xf32>,
    %c1 = arith.constant 1 : index
    %c0_7 = arith.constant 0 : index
    %c0_8 = arith.constant 0 : index
    %6 = vector.load %arg2[%c1, %c0_7, %c0_8] : memref<4x16x128xf32, #tpu.memory_space<vmem>>, vector<1x16x128xf32>
    %7 = vector.shape_cast %6 : vector<1x16x128xf32> to vector<16x128xf32>
    %c1_9 = arith.constant 1 : index
    %c0_10 = arith.constant 0 : index
    %c0_11 = arith.constant 0 : index
    %8 = vector.load %arg1[%c1_9, %c0_10, %c0_11] : memref<4x128x128xf32, #tpu.memory_space<vmem>>, vector<1x128x128xf32>
    %9 = vector.shape_cast %8 : vector<1x128x128xf32> to vector<128x128xf32>
    %cst_12 = arith.constant dense<0.000000e+00> : vector<16x128xf32>
    %10 = tpu.matmul %7, %9, %cst_12 {dimension_numbers = #tpu.dot_dimension_numbers<[1], [0], [0], [1], [0, 0, 1, 1], [], []>} : vector<16x128xf32>, vector<128x128xf32>, vector<16x128xf32> -> vector<16x128xf32>
    %c0_13 = arith.constant 0 : index
    %c128 = arith.constant 128 : index
    %11 = vector.load %arg5[%c0_13, %c128] : memref<16x512xf32, #tpu.memory_space<vmem>>, vector<16x128xf32>
    tpu.vector_store %arg5[%c0_13, %c128], %10 {strides = array<i32>} : memref<16x512xf32, #tpu.memory_space<vmem>>, vector<16x128xf32>,
    %c2 = arith.constant 2 : index
    %c0_14 = arith.constant 0 : index
    %c0_15 = arith.constant 0 : index
    %12 = vector.load %arg2[%c2, %c0_14, %c0_15] : memref<4x16x128xf32, #tpu.memory_space<vmem>>, vector<1x16x128xf32>
    %13 = vector.shape_cast %12 : vector<1x16x128xf32> to vector<16x128xf32>
    %c2_16 = arith.constant 2 : index
    %c0_17 = arith.constant 0 : index
    %c0_18 = arith.constant 0 : index
    %14 = vector.load %arg1[%c2_16, %c0_17, %c0_18] : memref<4x128x128xf32, #tpu.memory_space<vmem>>, vector<1x128x128xf32>
    %15 = vector.shape_cast %14 : vector<1x128x128xf32> to vector<128x128xf32>
    %cst_19 = arith.constant dense<0.000000e+00> : vector<16x128xf32>
    %16 = tpu.matmul %13, %15, %cst_19 {dimension_numbers = #tpu.dot_dimension_numbers<[1], [0], [0], [1], [0, 0, 1, 1], [], []>} : vector<16x128xf32>, vector<128x128xf32>, vector<16x128xf32> -> vector<16x128xf32>
    %c0_20 = arith.constant 0 : index
    %c256 = arith.constant 256 : index
    %17 = vector.load %arg5[%c0_20, %c256] : memref<16x512xf32, #tpu.memory_space<vmem>>, vector<16x128xf32>
    tpu.vector_store %arg5[%c0_20, %c256], %16 {strides = array<i32>} : memref<16x512xf32, #tpu.memory_space<vmem>>, vector<16x128xf32>,
    %c3 = arith.constant 3 : index
    %c0_21 = arith.constant 0 : index
    %c0_22 = arith.constant 0 : index
    %18 = vector.load %arg2[%c3, %c0_21, %c0_22] : memref<4x16x128xf32, #tpu.memory_space<vmem>>, vector<1x16x128xf32>
    %19 = vector.shape_cast %18 : vector<1x16x128xf32> to vector<16x128xf32>
    %c3_23 = arith.constant 3 : index
    %c0_24 = arith.constant 0 : index
    %c0_25 = arith.constant 0 : index
    %20 = vector.load %arg1[%c3_23, %c0_24, %c0_25] : memref<4x128x128xf32, #tpu.memory_space<vmem>>, vector<1x128x128xf32>
    %21 = vector.shape_cast %20 : vector<1x128x128xf32> to vector<128x128xf32>
    %cst_26 = arith.constant dense<0.000000e+00> : vector<16x128xf32>
    %22 = tpu.matmul %19, %21, %cst_26 {dimension_numbers = #tpu.dot_dimension_numbers<[1], [0], [0], [1], [0, 0, 1, 1], [], []>} : vector<16x128xf32>, vector<128x128xf32>, vector<16x128xf32> -> vector<16x128xf32>
    %c0_27 = arith.constant 0 : index
    %c384 = arith.constant 384 : index
    %23 = vector.load %arg5[%c0_27, %c384] : memref<16x512xf32, #tpu.memory_space<vmem>>, vector<16x128xf32>
    tpu.vector_store %arg5[%c0_27, %c384], %22 {strides = array<i32>} : memref<16x512xf32, #tpu.memory_space<vmem>>, vector<16x128xf32>,
    %c0_28 = arith.constant 0 : index
    %c0_29 = arith.constant 0 : index
    %24 = vector.load %arg5[%c0_28, %c0_29] : memref<16x512xf32, #tpu.memory_space<vmem>>, vector<16x512xf32>
    %cst_30 = arith.constant dense<0.000000e+00> : vector<16xf32>
    %25 = vector.multi_reduction <add>, %24, %cst_30 [1] : vector<16x512xf32> to vector<16xf32>
    %26 = vector.shape_cast %25 : vector<16xf32> to vector<16x1xf32>
    %cst_31 = arith.constant 5.120000e+02 : f32
    %27 = vector.broadcast %cst_31 : f32 to vector<16x1xf32>
    %28 = arith.divf %26, %27 : vector<16x1xf32>
    %29 = vector.broadcast %28 : vector<16x1xf32> to vector<16x512xf32>
    %30 = arith.subf %24, %29 : vector<16x512xf32>
    %31 = arith.mulf %30, %30 : vector<16x512xf32>
    %cst_32 = arith.constant dense<0.000000e+00> : vector<16xf32>
    %32 = vector.multi_reduction <add>, %31, %cst_32 [1] : vector<16x512xf32> to vector<16xf32>
    %33 = vector.shape_cast %32 : vector<16xf32> to vector<16x1xf32>
    %cst_33 = arith.constant 5.120000e+02 : f32
    %34 = vector.broadcast %cst_33 : f32 to vector<16x1xf32>
    %35 = arith.divf %33, %34 : vector<16x1xf32>
    %c0_34 = arith.constant 0 : index
    %c0_35 = arith.constant 0 : index
    %36 = vector.load %arg3[%c0_34, %c0_35] : memref<16x1xf32, #tpu.memory_space<vmem>>, vector<16x1xf32>
    %cst_36 = arith.constant 9.99999974E-6 : f32
    %37 = vector.broadcast %cst_36 : f32 to vector<16x1xf32>
    %38 = arith.addf %35, %37 : vector<16x1xf32>
    %39 = math.rsqrt %38 : vector<16x1xf32>
    %40 = arith.mulf %36, %39 : vector<16x1xf32>
    %c0_37 = arith.constant 0 : index
    %c0_38 = arith.constant 0 : index
    %41 = vector.load %arg4[%c0_37, %c0_38] : memref<16x1xf32, #tpu.memory_space<vmem>>, vector<16x1xf32>
    %42 = arith.mulf %28, %40 : vector<16x1xf32>
    %43 = arith.subf %41, %42 : vector<16x1xf32>
    %44 = vector.broadcast %40 : vector<16x1xf32> to vector<16x512xf32>
    %45 = arith.mulf %24, %44 : vector<16x512xf32>
    %46 = vector.broadcast %43 : vector<16x1xf32> to vector<16x512xf32>
    %47 = arith.addf %45, %46 : vector<16x512xf32>
    %cst_39 = arith.constant 0.000000e+00 : f32
    %48 = vector.broadcast %cst_39 : f32 to vector<16x512xf32>
    %49 = arith.maximumf %47, %48 : vector<16x512xf32>
    %c0_40 = arith.constant 0 : index
    %c0_41 = arith.constant 0 : index
    %50 = vector.load %arg5[%c0_40, %c0_41] : memref<16x512xf32, #tpu.memory_space<vmem>>, vector<16x512xf32>
    tpu.vector_store %arg5[%c0_40, %c0_41], %49 {strides = array<i32>} : memref<16x512xf32, #tpu.memory_space<vmem>>, vector<16x512xf32>,
    return
  }
  func.func @transform_0(%arg0: i32) -> (i32, i32, i32) {
    %c0_i32 = arith.constant 0 : i32
    %c0_i32_0 = arith.constant 0 : i32
    %c0_i32_1 = arith.constant 0 : i32
    %c0_i32_2 = arith.constant 0 : i32
    return %c0_i32, %c0_i32_0, %c0_i32_1 : i32, i32, i32
  }
  func.func @transform_1(%arg0: i32) -> (i32, i32, i32) {
    %c0_i32 = arith.constant 0 : i32
    %c0_i32_0 = arith.constant 0 : i32
    %c0_i32_1 = arith.constant 0 : i32
    %c0_i32_2 = arith.constant 0 : i32
    return %c0_i32, %c0_i32_0, %c0_i32_1 : i32, i32, i32
  }
  func.func @transform_2(%arg0: i32) -> (i32, i32) {
    %c0_i32 = arith.constant 0 : i32
    %c0_i32_0 = arith.constant 0 : i32
    %c0_i32_1 = arith.constant 0 : i32
    return %c0_i32, %c0_i32_0 : i32, i32
  }
  func.func @transform_3(%arg0: i32) -> (i32, i32) {
    %c0_i32 = arith.constant 0 : i32
    %c0_i32_0 = arith.constant 0 : i32
    %c0_i32_1 = arith.constant 0 : i32
    return %c0_i32, %c0_i32_0 : i32, i32
  }
  func.func @transform_4(%arg0: i32) -> (i32, i32) {
    %c0_i32 = arith.constant 0 : i32
    %c0_i32_0 = arith.constant 0 : i32
    %c0_i32_1 = arith.constant 0 : i32
    return %c0_i32, %c0_i32_0 : i32, i32
  }
}

module attributes {stable_mosaic.version = 11 : i64} {
  func.func @_deconv_bn_relu_kernel(%arg0: i32, %arg1: memref<4x64x512xf32, #tpu.memory_space<vmem>>, %arg2: memref<4x8x64xf32, #tpu.memory_space<vmem>>, %arg3: memref<8x1xf32, #tpu.memory_space<vmem>>, %arg4: memref<8x1xf32, #tpu.memory_space<vmem>>, %arg5: memref<8x2048xf32, #tpu.memory_space<vmem>>) attributes {dimension_semantics = [#tpu.dimension_semantics<arbitrary>], iteration_bounds = array<i64: 1>, scalar_prefetch = 0 : i64, scratch_operands = 0 : i64, tpu.core_type = #tpu.core_type<tc>, window_params = [{pipeline_mode = #tpu.pipeline_mode<synchronous>, transform_indices = @transform_0, window_bounds = array<i64: 4, 64, 512>}, {pipeline_mode = #tpu.pipeline_mode<synchronous>, transform_indices = @transform_1, window_bounds = array<i64: 4, 8, 64>}, {pipeline_mode = #tpu.pipeline_mode<synchronous>, transform_indices = @transform_2, window_bounds = array<i64: 8, 1>}, {pipeline_mode = #tpu.pipeline_mode<synchronous>, transform_indices = @transform_3, window_bounds = array<i64: 8, 1>}, {pipeline_mode = #tpu.pipeline_mode<synchronous>, transform_indices = @transform_4, window_bounds = array<i64: 8, 2048>}]} {
    %c0 = arith.constant 0 : index
    %c0_0 = arith.constant 0 : index
    %c0_1 = arith.constant 0 : index
    %0 = vector.load %arg2[%c0, %c0_0, %c0_1] : memref<4x8x64xf32, #tpu.memory_space<vmem>>, vector<1x8x64xf32>
    %1 = vector.shape_cast %0 : vector<1x8x64xf32> to vector<8x64xf32>
    %c0_2 = arith.constant 0 : index
    %c0_3 = arith.constant 0 : index
    %c0_4 = arith.constant 0 : index
    %2 = vector.load %arg1[%c0_2, %c0_3, %c0_4] : memref<4x64x512xf32, #tpu.memory_space<vmem>>, vector<1x64x512xf32>
    %3 = vector.shape_cast %2 : vector<1x64x512xf32> to vector<64x512xf32>
    %cst = arith.constant dense<0.000000e+00> : vector<8x512xf32>
    %4 = tpu.matmul %1, %3, %cst {dimension_numbers = #tpu.dot_dimension_numbers<[1], [0], [0], [1], [0, 0, 1, 1], [], []>} : vector<8x64xf32>, vector<64x512xf32>, vector<8x512xf32> -> vector<8x512xf32>
    %c0_5 = arith.constant 0 : index
    %c0_6 = arith.constant 0 : index
    %5 = vector.load %arg5[%c0_5, %c0_6] : memref<8x2048xf32, #tpu.memory_space<vmem>>, vector<8x512xf32>
    tpu.vector_store %arg5[%c0_5, %c0_6], %4 {strides = array<i32>} : memref<8x2048xf32, #tpu.memory_space<vmem>>, vector<8x512xf32>,
    %c1 = arith.constant 1 : index
    %c0_7 = arith.constant 0 : index
    %c0_8 = arith.constant 0 : index
    %6 = vector.load %arg2[%c1, %c0_7, %c0_8] : memref<4x8x64xf32, #tpu.memory_space<vmem>>, vector<1x8x64xf32>
    %7 = vector.shape_cast %6 : vector<1x8x64xf32> to vector<8x64xf32>
    %c1_9 = arith.constant 1 : index
    %c0_10 = arith.constant 0 : index
    %c0_11 = arith.constant 0 : index
    %8 = vector.load %arg1[%c1_9, %c0_10, %c0_11] : memref<4x64x512xf32, #tpu.memory_space<vmem>>, vector<1x64x512xf32>
    %9 = vector.shape_cast %8 : vector<1x64x512xf32> to vector<64x512xf32>
    %cst_12 = arith.constant dense<0.000000e+00> : vector<8x512xf32>
    %10 = tpu.matmul %7, %9, %cst_12 {dimension_numbers = #tpu.dot_dimension_numbers<[1], [0], [0], [1], [0, 0, 1, 1], [], []>} : vector<8x64xf32>, vector<64x512xf32>, vector<8x512xf32> -> vector<8x512xf32>
    %c0_13 = arith.constant 0 : index
    %c512 = arith.constant 512 : index
    %11 = vector.load %arg5[%c0_13, %c512] : memref<8x2048xf32, #tpu.memory_space<vmem>>, vector<8x512xf32>
    tpu.vector_store %arg5[%c0_13, %c512], %10 {strides = array<i32>} : memref<8x2048xf32, #tpu.memory_space<vmem>>, vector<8x512xf32>,
    %c2 = arith.constant 2 : index
    %c0_14 = arith.constant 0 : index
    %c0_15 = arith.constant 0 : index
    %12 = vector.load %arg2[%c2, %c0_14, %c0_15] : memref<4x8x64xf32, #tpu.memory_space<vmem>>, vector<1x8x64xf32>
    %13 = vector.shape_cast %12 : vector<1x8x64xf32> to vector<8x64xf32>
    %c2_16 = arith.constant 2 : index
    %c0_17 = arith.constant 0 : index
    %c0_18 = arith.constant 0 : index
    %14 = vector.load %arg1[%c2_16, %c0_17, %c0_18] : memref<4x64x512xf32, #tpu.memory_space<vmem>>, vector<1x64x512xf32>
    %15 = vector.shape_cast %14 : vector<1x64x512xf32> to vector<64x512xf32>
    %cst_19 = arith.constant dense<0.000000e+00> : vector<8x512xf32>
    %16 = tpu.matmul %13, %15, %cst_19 {dimension_numbers = #tpu.dot_dimension_numbers<[1], [0], [0], [1], [0, 0, 1, 1], [], []>} : vector<8x64xf32>, vector<64x512xf32>, vector<8x512xf32> -> vector<8x512xf32>
    %c0_20 = arith.constant 0 : index
    %c1024 = arith.constant 1024 : index
    %17 = vector.load %arg5[%c0_20, %c1024] : memref<8x2048xf32, #tpu.memory_space<vmem>>, vector<8x512xf32>
    tpu.vector_store %arg5[%c0_20, %c1024], %16 {strides = array<i32>} : memref<8x2048xf32, #tpu.memory_space<vmem>>, vector<8x512xf32>,
    %c3 = arith.constant 3 : index
    %c0_21 = arith.constant 0 : index
    %c0_22 = arith.constant 0 : index
    %18 = vector.load %arg2[%c3, %c0_21, %c0_22] : memref<4x8x64xf32, #tpu.memory_space<vmem>>, vector<1x8x64xf32>
    %19 = vector.shape_cast %18 : vector<1x8x64xf32> to vector<8x64xf32>
    %c3_23 = arith.constant 3 : index
    %c0_24 = arith.constant 0 : index
    %c0_25 = arith.constant 0 : index
    %20 = vector.load %arg1[%c3_23, %c0_24, %c0_25] : memref<4x64x512xf32, #tpu.memory_space<vmem>>, vector<1x64x512xf32>
    %21 = vector.shape_cast %20 : vector<1x64x512xf32> to vector<64x512xf32>
    %cst_26 = arith.constant dense<0.000000e+00> : vector<8x512xf32>
    %22 = tpu.matmul %19, %21, %cst_26 {dimension_numbers = #tpu.dot_dimension_numbers<[1], [0], [0], [1], [0, 0, 1, 1], [], []>} : vector<8x64xf32>, vector<64x512xf32>, vector<8x512xf32> -> vector<8x512xf32>
    %c0_27 = arith.constant 0 : index
    %c1536 = arith.constant 1536 : index
    %23 = vector.load %arg5[%c0_27, %c1536] : memref<8x2048xf32, #tpu.memory_space<vmem>>, vector<8x512xf32>
    tpu.vector_store %arg5[%c0_27, %c1536], %22 {strides = array<i32>} : memref<8x2048xf32, #tpu.memory_space<vmem>>, vector<8x512xf32>,
    %c0_28 = arith.constant 0 : index
    %c0_29 = arith.constant 0 : index
    %24 = vector.load %arg5[%c0_28, %c0_29] : memref<8x2048xf32, #tpu.memory_space<vmem>>, vector<8x2048xf32>
    %cst_30 = arith.constant dense<0.000000e+00> : vector<8xf32>
    %25 = vector.multi_reduction <add>, %24, %cst_30 [1] : vector<8x2048xf32> to vector<8xf32>
    %26 = vector.shape_cast %25 : vector<8xf32> to vector<8x1xf32>
    %cst_31 = arith.constant 2.048000e+03 : f32
    %27 = vector.broadcast %cst_31 : f32 to vector<8x1xf32>
    %28 = arith.divf %26, %27 : vector<8x1xf32>
    %29 = vector.broadcast %28 : vector<8x1xf32> to vector<8x2048xf32>
    %30 = arith.subf %24, %29 : vector<8x2048xf32>
    %31 = arith.mulf %30, %30 : vector<8x2048xf32>
    %cst_32 = arith.constant dense<0.000000e+00> : vector<8xf32>
    %32 = vector.multi_reduction <add>, %31, %cst_32 [1] : vector<8x2048xf32> to vector<8xf32>
    %33 = vector.shape_cast %32 : vector<8xf32> to vector<8x1xf32>
    %cst_33 = arith.constant 2.048000e+03 : f32
    %34 = vector.broadcast %cst_33 : f32 to vector<8x1xf32>
    %35 = arith.divf %33, %34 : vector<8x1xf32>
    %c0_34 = arith.constant 0 : index
    %c0_35 = arith.constant 0 : index
    %36 = vector.load %arg3[%c0_34, %c0_35] : memref<8x1xf32, #tpu.memory_space<vmem>>, vector<8x1xf32>
    %cst_36 = arith.constant 9.99999974E-6 : f32
    %37 = vector.broadcast %cst_36 : f32 to vector<8x1xf32>
    %38 = arith.addf %35, %37 : vector<8x1xf32>
    %39 = math.rsqrt %38 : vector<8x1xf32>
    %40 = arith.mulf %36, %39 : vector<8x1xf32>
    %c0_37 = arith.constant 0 : index
    %c0_38 = arith.constant 0 : index
    %41 = vector.load %arg4[%c0_37, %c0_38] : memref<8x1xf32, #tpu.memory_space<vmem>>, vector<8x1xf32>
    %42 = arith.mulf %28, %40 : vector<8x1xf32>
    %43 = arith.subf %41, %42 : vector<8x1xf32>
    %44 = vector.broadcast %40 : vector<8x1xf32> to vector<8x2048xf32>
    %45 = arith.mulf %24, %44 : vector<8x2048xf32>
    %46 = vector.broadcast %43 : vector<8x1xf32> to vector<8x2048xf32>
    %47 = arith.addf %45, %46 : vector<8x2048xf32>
    %cst_39 = arith.constant 0.000000e+00 : f32
    %48 = vector.broadcast %cst_39 : f32 to vector<8x2048xf32>
    %49 = arith.maximumf %47, %48 : vector<8x2048xf32>
    %c0_40 = arith.constant 0 : index
    %c0_41 = arith.constant 0 : index
    %50 = vector.load %arg5[%c0_40, %c0_41] : memref<8x2048xf32, #tpu.memory_space<vmem>>, vector<8x2048xf32>
    tpu.vector_store %arg5[%c0_40, %c0_41], %49 {strides = array<i32>} : memref<8x2048xf32, #tpu.memory_space<vmem>>, vector<8x2048xf32>,
    return
  }
  func.func @transform_0(%arg0: i32) -> (i32, i32, i32) {
    %c0_i32 = arith.constant 0 : i32
    %c0_i32_0 = arith.constant 0 : i32
    %c0_i32_1 = arith.constant 0 : i32
    %c0_i32_2 = arith.constant 0 : i32
    return %c0_i32, %c0_i32_0, %c0_i32_1 : i32, i32, i32
  }
  func.func @transform_1(%arg0: i32) -> (i32, i32, i32) {
    %c0_i32 = arith.constant 0 : i32
    %c0_i32_0 = arith.constant 0 : i32
    %c0_i32_1 = arith.constant 0 : i32
    %c0_i32_2 = arith.constant 0 : i32
    return %c0_i32, %c0_i32_0, %c0_i32_1 : i32, i32, i32
  }
  func.func @transform_2(%arg0: i32) -> (i32, i32) {
    %c0_i32 = arith.constant 0 : i32
    %c0_i32_0 = arith.constant 0 : i32
    %c0_i32_1 = arith.constant 0 : i32
    return %c0_i32, %c0_i32_0 : i32, i32
  }
  func.func @transform_3(%arg0: i32) -> (i32, i32) {
    %c0_i32 = arith.constant 0 : i32
    %c0_i32_0 = arith.constant 0 : i32
    %c0_i32_1 = arith.constant 0 : i32
    return %c0_i32, %c0_i32_0 : i32, i32
  }
  func.func @transform_4(%arg0: i32) -> (i32, i32) {
    %c0_i32 = arith.constant 0 : i32
    %c0_i32_0 = arith.constant 0 : i32
    %c0_i32_1 = arith.constant 0 : i32
    return %c0_i32, %c0_i32_0 : i32, i32
  }
}

module attributes {stable_mosaic.version = 11 : i64} {
  func.func @_deconv_tanh_kernel(%arg0: i32, %arg1: memref<9x32x2048xf32, #tpu.memory_space<vmem>>, %arg2: memref<9x8x32xf32, #tpu.memory_space<vmem>>, %arg3: memref<8x18432xf32, #tpu.memory_space<vmem>>) attributes {dimension_semantics = [#tpu.dimension_semantics<arbitrary>], iteration_bounds = array<i64: 1>, scalar_prefetch = 0 : i64, scratch_operands = 0 : i64, tpu.core_type = #tpu.core_type<tc>, window_params = [{pipeline_mode = #tpu.pipeline_mode<synchronous>, transform_indices = @transform_0, window_bounds = array<i64: 9, 32, 2048>}, {pipeline_mode = #tpu.pipeline_mode<synchronous>, transform_indices = @transform_1, window_bounds = array<i64: 9, 8, 32>}, {pipeline_mode = #tpu.pipeline_mode<synchronous>, transform_indices = @transform_2, window_bounds = array<i64: 8, 18432>}]} {
    %c0 = arith.constant 0 : index
    %c0_0 = arith.constant 0 : index
    %c0_1 = arith.constant 0 : index
    %0 = vector.load %arg2[%c0, %c0_0, %c0_1] : memref<9x8x32xf32, #tpu.memory_space<vmem>>, vector<1x8x32xf32>
    %1 = vector.shape_cast %0 : vector<1x8x32xf32> to vector<8x32xf32>
    %c0_2 = arith.constant 0 : index
    %c0_3 = arith.constant 0 : index
    %c0_4 = arith.constant 0 : index
    %2 = vector.load %arg1[%c0_2, %c0_3, %c0_4] : memref<9x32x2048xf32, #tpu.memory_space<vmem>>, vector<1x32x2048xf32>
    %3 = vector.shape_cast %2 : vector<1x32x2048xf32> to vector<32x2048xf32>
    %cst = arith.constant dense<0.000000e+00> : vector<8x2048xf32>
    %4 = tpu.matmul %1, %3, %cst {dimension_numbers = #tpu.dot_dimension_numbers<[1], [0], [0], [1], [0, 0, 1, 1], [], []>} : vector<8x32xf32>, vector<32x2048xf32>, vector<8x2048xf32> -> vector<8x2048xf32>
    %5 = math.tanh %4 : vector<8x2048xf32>
    %c0_5 = arith.constant 0 : index
    %c0_6 = arith.constant 0 : index
    %6 = vector.load %arg3[%c0_5, %c0_6] : memref<8x18432xf32, #tpu.memory_space<vmem>>, vector<8x2048xf32>
    tpu.vector_store %arg3[%c0_5, %c0_6], %5 {strides = array<i32>} : memref<8x18432xf32, #tpu.memory_space<vmem>>, vector<8x2048xf32>,
    %c1 = arith.constant 1 : index
    %c0_7 = arith.constant 0 : index
    %c0_8 = arith.constant 0 : index
    %7 = vector.load %arg2[%c1, %c0_7, %c0_8] : memref<9x8x32xf32, #tpu.memory_space<vmem>>, vector<1x8x32xf32>
    %8 = vector.shape_cast %7 : vector<1x8x32xf32> to vector<8x32xf32>
    %c1_9 = arith.constant 1 : index
    %c0_10 = arith.constant 0 : index
    %c0_11 = arith.constant 0 : index
    %9 = vector.load %arg1[%c1_9, %c0_10, %c0_11] : memref<9x32x2048xf32, #tpu.memory_space<vmem>>, vector<1x32x2048xf32>
    %10 = vector.shape_cast %9 : vector<1x32x2048xf32> to vector<32x2048xf32>
    %cst_12 = arith.constant dense<0.000000e+00> : vector<8x2048xf32>
    %11 = tpu.matmul %8, %10, %cst_12 {dimension_numbers = #tpu.dot_dimension_numbers<[1], [0], [0], [1], [0, 0, 1, 1], [], []>} : vector<8x32xf32>, vector<32x2048xf32>, vector<8x2048xf32> -> vector<8x2048xf32>
    %12 = math.tanh %11 : vector<8x2048xf32>
    %c0_13 = arith.constant 0 : index
    %c2048 = arith.constant 2048 : index
    %13 = vector.load %arg3[%c0_13, %c2048] : memref<8x18432xf32, #tpu.memory_space<vmem>>, vector<8x2048xf32>
    tpu.vector_store %arg3[%c0_13, %c2048], %12 {strides = array<i32>} : memref<8x18432xf32, #tpu.memory_space<vmem>>, vector<8x2048xf32>,
    %c2 = arith.constant 2 : index
    %c0_14 = arith.constant 0 : index
    %c0_15 = arith.constant 0 : index
    %14 = vector.load %arg2[%c2, %c0_14, %c0_15] : memref<9x8x32xf32, #tpu.memory_space<vmem>>, vector<1x8x32xf32>
    %15 = vector.shape_cast %14 : vector<1x8x32xf32> to vector<8x32xf32>
    %c2_16 = arith.constant 2 : index
    %c0_17 = arith.constant 0 : index
    %c0_18 = arith.constant 0 : index
    %16 = vector.load %arg1[%c2_16, %c0_17, %c0_18] : memref<9x32x2048xf32, #tpu.memory_space<vmem>>, vector<1x32x2048xf32>
    %17 = vector.shape_cast %16 : vector<1x32x2048xf32> to vector<32x2048xf32>
    %cst_19 = arith.constant dense<0.000000e+00> : vector<8x2048xf32>
    %18 = tpu.matmul %15, %17, %cst_19 {dimension_numbers = #tpu.dot_dimension_numbers<[1], [0], [0], [1], [0, 0, 1, 1], [], []>} : vector<8x32xf32>, vector<32x2048xf32>, vector<8x2048xf32> -> vector<8x2048xf32>
    %19 = math.tanh %18 : vector<8x2048xf32>
    %c0_20 = arith.constant 0 : index
    %c4096 = arith.constant 4096 : index
    %20 = vector.load %arg3[%c0_20, %c4096] : memref<8x18432xf32, #tpu.memory_space<vmem>>, vector<8x2048xf32>
    tpu.vector_store %arg3[%c0_20, %c4096], %19 {strides = array<i32>} : memref<8x18432xf32, #tpu.memory_space<vmem>>, vector<8x2048xf32>,
    %c3 = arith.constant 3 : index
    %c0_21 = arith.constant 0 : index
    %c0_22 = arith.constant 0 : index
    %21 = vector.load %arg2[%c3, %c0_21, %c0_22] : memref<9x8x32xf32, #tpu.memory_space<vmem>>, vector<1x8x32xf32>
    %22 = vector.shape_cast %21 : vector<1x8x32xf32> to vector<8x32xf32>
    %c3_23 = arith.constant 3 : index
    %c0_24 = arith.constant 0 : index
    %c0_25 = arith.constant 0 : index
    %23 = vector.load %arg1[%c3_23, %c0_24, %c0_25] : memref<9x32x2048xf32, #tpu.memory_space<vmem>>, vector<1x32x2048xf32>
    %24 = vector.shape_cast %23 : vector<1x32x2048xf32> to vector<32x2048xf32>
    %cst_26 = arith.constant dense<0.000000e+00> : vector<8x2048xf32>
    %25 = tpu.matmul %22, %24, %cst_26 {dimension_numbers = #tpu.dot_dimension_numbers<[1], [0], [0], [1], [0, 0, 1, 1], [], []>} : vector<8x32xf32>, vector<32x2048xf32>, vector<8x2048xf32> -> vector<8x2048xf32>
    %26 = math.tanh %25 : vector<8x2048xf32>
    %c0_27 = arith.constant 0 : index
    %c6144 = arith.constant 6144 : index
    %27 = vector.load %arg3[%c0_27, %c6144] : memref<8x18432xf32, #tpu.memory_space<vmem>>, vector<8x2048xf32>
    tpu.vector_store %arg3[%c0_27, %c6144], %26 {strides = array<i32>} : memref<8x18432xf32, #tpu.memory_space<vmem>>, vector<8x2048xf32>,
    %c4 = arith.constant 4 : index
    %c0_28 = arith.constant 0 : index
    %c0_29 = arith.constant 0 : index
    %28 = vector.load %arg2[%c4, %c0_28, %c0_29] : memref<9x8x32xf32, #tpu.memory_space<vmem>>, vector<1x8x32xf32>
    %29 = vector.shape_cast %28 : vector<1x8x32xf32> to vector<8x32xf32>
    %c4_30 = arith.constant 4 : index
    %c0_31 = arith.constant 0 : index
    %c0_32 = arith.constant 0 : index
    %30 = vector.load %arg1[%c4_30, %c0_31, %c0_32] : memref<9x32x2048xf32, #tpu.memory_space<vmem>>, vector<1x32x2048xf32>
    %31 = vector.shape_cast %30 : vector<1x32x2048xf32> to vector<32x2048xf32>
    %cst_33 = arith.constant dense<0.000000e+00> : vector<8x2048xf32>
    %32 = tpu.matmul %29, %31, %cst_33 {dimension_numbers = #tpu.dot_dimension_numbers<[1], [0], [0], [1], [0, 0, 1, 1], [], []>} : vector<8x32xf32>, vector<32x2048xf32>, vector<8x2048xf32> -> vector<8x2048xf32>
    %33 = math.tanh %32 : vector<8x2048xf32>
    %c0_34 = arith.constant 0 : index
    %c8192 = arith.constant 8192 : index
    %34 = vector.load %arg3[%c0_34, %c8192] : memref<8x18432xf32, #tpu.memory_space<vmem>>, vector<8x2048xf32>
    tpu.vector_store %arg3[%c0_34, %c8192], %33 {strides = array<i32>} : memref<8x18432xf32, #tpu.memory_space<vmem>>, vector<8x2048xf32>,
    %c5 = arith.constant 5 : index
    %c0_35 = arith.constant 0 : index
    %c0_36 = arith.constant 0 : index
    %35 = vector.load %arg2[%c5, %c0_35, %c0_36] : memref<9x8x32xf32, #tpu.memory_space<vmem>>, vector<1x8x32xf32>
    %36 = vector.shape_cast %35 : vector<1x8x32xf32> to vector<8x32xf32>
    %c5_37 = arith.constant 5 : index
    %c0_38 = arith.constant 0 : index
    %c0_39 = arith.constant 0 : index
    %37 = vector.load %arg1[%c5_37, %c0_38, %c0_39] : memref<9x32x2048xf32, #tpu.memory_space<vmem>>, vector<1x32x2048xf32>
    %38 = vector.shape_cast %37 : vector<1x32x2048xf32> to vector<32x2048xf32>
    %cst_40 = arith.constant dense<0.000000e+00> : vector<8x2048xf32>
    %39 = tpu.matmul %36, %38, %cst_40 {dimension_numbers = #tpu.dot_dimension_numbers<[1], [0], [0], [1], [0, 0, 1, 1], [], []>} : vector<8x32xf32>, vector<32x2048xf32>, vector<8x2048xf32> -> vector<8x2048xf32>
    %40 = math.tanh %39 : vector<8x2048xf32>
    %c0_41 = arith.constant 0 : index
    %c10240 = arith.constant 10240 : index
    %41 = vector.load %arg3[%c0_41, %c10240] : memref<8x18432xf32, #tpu.memory_space<vmem>>, vector<8x2048xf32>
    tpu.vector_store %arg3[%c0_41, %c10240], %40 {strides = array<i32>} : memref<8x18432xf32, #tpu.memory_space<vmem>>, vector<8x2048xf32>,
    %c6 = arith.constant 6 : index
    %c0_42 = arith.constant 0 : index
    %c0_43 = arith.constant 0 : index
    %42 = vector.load %arg2[%c6, %c0_42, %c0_43] : memref<9x8x32xf32, #tpu.memory_space<vmem>>, vector<1x8x32xf32>
    %43 = vector.shape_cast %42 : vector<1x8x32xf32> to vector<8x32xf32>
    %c6_44 = arith.constant 6 : index
    %c0_45 = arith.constant 0 : index
    %c0_46 = arith.constant 0 : index
    %44 = vector.load %arg1[%c6_44, %c0_45, %c0_46] : memref<9x32x2048xf32, #tpu.memory_space<vmem>>, vector<1x32x2048xf32>
    %45 = vector.shape_cast %44 : vector<1x32x2048xf32> to vector<32x2048xf32>
    %cst_47 = arith.constant dense<0.000000e+00> : vector<8x2048xf32>
    %46 = tpu.matmul %43, %45, %cst_47 {dimension_numbers = #tpu.dot_dimension_numbers<[1], [0], [0], [1], [0, 0, 1, 1], [], []>} : vector<8x32xf32>, vector<32x2048xf32>, vector<8x2048xf32> -> vector<8x2048xf32>
    %47 = math.tanh %46 : vector<8x2048xf32>
    %c0_48 = arith.constant 0 : index
    %c12288 = arith.constant 12288 : index
    %48 = vector.load %arg3[%c0_48, %c12288] : memref<8x18432xf32, #tpu.memory_space<vmem>>, vector<8x2048xf32>
    tpu.vector_store %arg3[%c0_48, %c12288], %47 {strides = array<i32>} : memref<8x18432xf32, #tpu.memory_space<vmem>>, vector<8x2048xf32>,
    %c7 = arith.constant 7 : index
    %c0_49 = arith.constant 0 : index
    %c0_50 = arith.constant 0 : index
    %49 = vector.load %arg2[%c7, %c0_49, %c0_50] : memref<9x8x32xf32, #tpu.memory_space<vmem>>, vector<1x8x32xf32>
    %50 = vector.shape_cast %49 : vector<1x8x32xf32> to vector<8x32xf32>
    %c7_51 = arith.constant 7 : index
    %c0_52 = arith.constant 0 : index
    %c0_53 = arith.constant 0 : index
    %51 = vector.load %arg1[%c7_51, %c0_52, %c0_53] : memref<9x32x2048xf32, #tpu.memory_space<vmem>>, vector<1x32x2048xf32>
    %52 = vector.shape_cast %51 : vector<1x32x2048xf32> to vector<32x2048xf32>
    %cst_54 = arith.constant dense<0.000000e+00> : vector<8x2048xf32>
    %53 = tpu.matmul %50, %52, %cst_54 {dimension_numbers = #tpu.dot_dimension_numbers<[1], [0], [0], [1], [0, 0, 1, 1], [], []>} : vector<8x32xf32>, vector<32x2048xf32>, vector<8x2048xf32> -> vector<8x2048xf32>
    %54 = math.tanh %53 : vector<8x2048xf32>
    %c0_55 = arith.constant 0 : index
    %c14336 = arith.constant 14336 : index
    %55 = vector.load %arg3[%c0_55, %c14336] : memref<8x18432xf32, #tpu.memory_space<vmem>>, vector<8x2048xf32>
    tpu.vector_store %arg3[%c0_55, %c14336], %54 {strides = array<i32>} : memref<8x18432xf32, #tpu.memory_space<vmem>>, vector<8x2048xf32>,
    %c8 = arith.constant 8 : index
    %c0_56 = arith.constant 0 : index
    %c0_57 = arith.constant 0 : index
    %56 = vector.load %arg2[%c8, %c0_56, %c0_57] : memref<9x8x32xf32, #tpu.memory_space<vmem>>, vector<1x8x32xf32>
    %57 = vector.shape_cast %56 : vector<1x8x32xf32> to vector<8x32xf32>
    %c8_58 = arith.constant 8 : index
    %c0_59 = arith.constant 0 : index
    %c0_60 = arith.constant 0 : index
    %58 = vector.load %arg1[%c8_58, %c0_59, %c0_60] : memref<9x32x2048xf32, #tpu.memory_space<vmem>>, vector<1x32x2048xf32>
    %59 = vector.shape_cast %58 : vector<1x32x2048xf32> to vector<32x2048xf32>
    %cst_61 = arith.constant dense<0.000000e+00> : vector<8x2048xf32>
    %60 = tpu.matmul %57, %59, %cst_61 {dimension_numbers = #tpu.dot_dimension_numbers<[1], [0], [0], [1], [0, 0, 1, 1], [], []>} : vector<8x32xf32>, vector<32x2048xf32>, vector<8x2048xf32> -> vector<8x2048xf32>
    %61 = math.tanh %60 : vector<8x2048xf32>
    %c0_62 = arith.constant 0 : index
    %c16384 = arith.constant 16384 : index
    %62 = vector.load %arg3[%c0_62, %c16384] : memref<8x18432xf32, #tpu.memory_space<vmem>>, vector<8x2048xf32>
    tpu.vector_store %arg3[%c0_62, %c16384], %61 {strides = array<i32>} : memref<8x18432xf32, #tpu.memory_space<vmem>>, vector<8x2048xf32>,
    return
  }
  func.func @transform_0(%arg0: i32) -> (i32, i32, i32) {
    %c0_i32 = arith.constant 0 : i32
    %c0_i32_0 = arith.constant 0 : i32
    %c0_i32_1 = arith.constant 0 : i32
    %c0_i32_2 = arith.constant 0 : i32
    return %c0_i32, %c0_i32_0, %c0_i32_1 : i32, i32, i32
  }
  func.func @transform_1(%arg0: i32) -> (i32, i32, i32) {
    %c0_i32 = arith.constant 0 : i32
    %c0_i32_0 = arith.constant 0 : i32
    %c0_i32_1 = arith.constant 0 : i32
    %c0_i32_2 = arith.constant 0 : i32
    return %c0_i32, %c0_i32_0, %c0_i32_1 : i32, i32, i32
  }
  func.func @transform_2(%arg0: i32) -> (i32, i32) {
    %c0_i32 = arith.constant 0 : i32
    %c0_i32_0 = arith.constant 0 : i32
    %c0_i32_1 = arith.constant 0 : i32
    return %c0_i32, %c0_i32_0 : i32, i32
  }
}

</mosaic_0001>

<bundles_post_ra>
// kernel: gnet_forward.5
= control target key start
LH: loop header
LB: loop body
LE: loop exit
PB: predicated region body
PF: predicated region fallthrough
CT: control target
= control target key end

     0   :  { %vm147_vm0 = vcmask 261120   ;;  %s1012_s0 = inlined_call_operand.vmem [shape: f32[1,256,32], index: 0, kind: input, shape index: {}]   ;;  %s1013_s1 = inlined_call_operand.vmem [shape: f32[1,64,256], index: 1, kind: input, shape index: {}]   ;;  %s1014_s4 = inlined_call_operand.vmem [shape: f32[64,32], index: 4, kind: output, shape index: {}]   ;;  %s1015_s2 = inlined_call_operand.vmem [shape: f32[64,1], index: 2, kind: input, shape index: {}]   ;;  %s1016_s3 = inlined_call_operand.vmem [shape: f32[64,1], index: 3, kind: input, shape index: {}]  }
   0x1   :  { %v48_v0 = vld [vmem:[%s1012_s0 + $0x78] sm:$0xff]  ;;  %v47_v2 = vld [vmem:[%s1012_s0 + $0x70] sm:$0xff]  ;;  %v46_v4 = vld [vmem:[%s1012_s0 + $0x68] sm:$0xff] }
   0x2   :  { %v64_v1 = vld [vmem:[%s1012_s0 + $0xf8] sm:$0xff]  ;;  %65 = vmatpush.msra.mxu0 %v48_v0  ;;  %495 = vmatpush.msra.mxu2 %v48_v0  ;;  %v63_v3 = vld [vmem:[%s1012_s0 + $0xf0] sm:$0xff]  ;;  %v62_v5 = vld [vmem:[%s1012_s0 + $0xe8] sm:$0xff] }
   0x3   :  { %106 = vmatpush.msra.mxu1 %v64_v1  ;;  %511 = vmatpush.msra.mxu3 %v64_v1  ;;  %v45_v6 = vld [vmem:[%s1012_s0 + $0x60] sm:$0xff]  ;;  %v44_v8 = vld [vmem:[%s1012_s0 + $0x58] sm:$0xff]  ;;  %v43_v10 = vld [vmem:[%s1012_s0 + $0x50] sm:$0xff] }
   0x4   :  { %66 = vmatpush.msra.mxu0 %v47_v2  ;;  %496 = vmatpush.msra.mxu2 %v47_v2  ;;  %v61_v7 = vld [vmem:[%s1012_s0 + $0xe0] sm:$0xff]  ;;  %v60_v9 = vld [vmem:[%s1012_s0 + $0xd8] sm:$0xff]  ;;  %v59_v11 = vld [vmem:[%s1012_s0 + $0xd0] sm:$0xff] }
   0x5   :  { %107 = vmatpush.msra.mxu1 %v63_v3  ;;  %512 = vmatpush.msra.mxu3 %v63_v3  ;;  %v42_v12 = vld [vmem:[%s1012_s0 + $0x48] sm:$0xff]  ;;  %v41_v14 = vld [vmem:[%s1012_s0 + $0x40] sm:$0xff]  ;;  %v40_v16 = vld [vmem:[%s1012_s0 + $0x38] sm:$0xff] }
   0x6   :  { %67 = vmatpush.msra.mxu0 %v46_v4  ;;  %497 = vmatpush.msra.mxu2 %v46_v4  ;;  %v58_v13 = vld [vmem:[%s1012_s0 + $0xc8] sm:$0xff]  ;;  %v57_v15 = vld [vmem:[%s1012_s0 + $0xc0] sm:$0xff]  ;;  %v56_v17 = vld [vmem:[%s1012_s0 + $0xb8] sm:$0xff] }
   0x7   :  { %108 = vmatpush.msra.mxu1 %v62_v5  ;;  %513 = vmatpush.msra.mxu3 %v62_v5  ;;  %v39_v18 = vld [vmem:[%s1012_s0 + $0x30] sm:$0xff]  ;;  %v38_v20 = vld [vmem:[%s1012_s0 + $0x28] sm:$0xff]  ;;  %v37_v22 = vld [vmem:[%s1012_s0 + $0x20] sm:$0xff] }
   0x8   :  { %68 = vmatpush.msra.mxu0 %v45_v6  ;;  %498 = vmatpush.msra.mxu2 %v45_v6  ;;  %v55_v19 = vld [vmem:[%s1012_s0 + $0xb0] sm:$0xff]  ;;  %v54_v21 = vld [vmem:[%s1012_s0 + $0xa8] sm:$0xff]  ;;  %v53_v23 = vld [vmem:[%s1012_s0 + $0xa0] sm:$0xff] }
   0x9   :  { %109 = vmatpush.msra.mxu1 %v61_v7  ;;  %514 = vmatpush.msra.mxu3 %v61_v7  ;;  %v36_v24 = vld [vmem:[%s1012_s0 + $0x18] sm:$0xff]  ;;  %v35_v26 = vld [vmem:[%s1012_s0 + $0x10] sm:$0xff]  ;;  %v34_v28 = vld [vmem:[%s1012_s0 + $0x8] sm:$0xff] }
   0xa   :  { %69 = vmatpush.msra.mxu0 %v44_v8  ;;  %499 = vmatpush.msra.mxu2 %v44_v8  ;;  %v52_v25 = vld [vmem:[%s1012_s0 + $0x98] sm:$0xff]  ;;  %v51_v27 = vld [vmem:[%s1012_s0 + $0x90] sm:$0xff]  ;;  %v50_v29 = vld [vmem:[%s1012_s0 + $0x88] sm:$0xff] }
   0xb   :  { %110 = vmatpush.msra.mxu1 %v60_v9  ;;  %515 = vmatpush.msra.mxu3 %v60_v9  ;;  %v33_v30 = vld [vmem:[%s1012_s0] sm:$0xff]  ;;  %v18_v34 = vld [vmem:[%s1013_s1 + $0x8] sm:$0xff]  ;;  %v19_v36 = vld [vmem:[%s1013_s1 + $0x10] sm:$0xff] }
   0xc   :  { %70 = vmatpush.msra.mxu0 %v43_v10  ;;  %500 = vmatpush.msra.mxu2 %v43_v10  ;;  %v49_v31 = vld [vmem:[%s1012_s0 + $0x80] sm:$0xff]  ;;  %v26_v35 = vld [vmem:[%s1013_s1 + $0x48] sm:$0xff]  ;;  %v27_v37 = vld [vmem:[%s1013_s1 + $0x50] sm:$0xff] }
   0xd   :  { %111 = vmatpush.msra.mxu1 %v59_v11  ;;  %516 = vmatpush.msra.mxu3 %v59_v11  ;;  %v17_v32 = vld [vmem:[%s1013_s1] sm:$0xff]  ;;  %v20_v38 = vld [vmem:[%s1013_s1 + $0x18] sm:$0xff]  ;;  %v22_v42 = vld [vmem:[%s1013_s1 + $0x28] sm:$0xff] }
   0xe   :  { %71 = vmatpush.msra.mxu0 %v42_v12  ;;  %501 = vmatpush.msra.mxu2 %v42_v12  ;;  %v25_v33 = vld [vmem:[%s1013_s1 + $0x40] sm:$0xff]  ;;  %v28_v39 = vld [vmem:[%s1013_s1 + $0x58] sm:$0xff]  ;;  %v30_v43 = vld [vmem:[%s1013_s1 + $0x68] sm:$0xff] }
   0xf   :  { %112 = vmatpush.msra.mxu1 %v58_v13  ;;  %517 = vmatpush.msra.mxu3 %v58_v13  ;;  %v21_v40 = vld [vmem:[%s1013_s1 + $0x20] sm:$0xff]  ;;  %v23_v44 = vld [vmem:[%s1013_s1 + $0x30] sm:$0xff]  ;;  %v24_v46 = vld [vmem:[%s1013_s1 + $0x38] sm:$0xff] }
  0x10   :  { %72 = vmatpush.msra.mxu0 %v41_v14  ;;  %502 = vmatpush.msra.mxu2 %v41_v14  ;;  %v29_v41 = vld [vmem:[%s1013_s1 + $0x60] sm:$0xff]  ;;  %v31_v45 = vld [vmem:[%s1013_s1 + $0x70] sm:$0xff]  ;;  %v32_v47 = vld [vmem:[%s1013_s1 + $0x78] sm:$0xff] }
  0x11   :  { %113 = vmatpush.msra.mxu1 %v57_v15  ;;  %518 = vmatpush.msra.mxu3 %v57_v15 }
  0x12   :  { %73 = vmatpush.msra.mxu0 %v40_v16  ;;  %503 = vmatpush.msra.mxu2 %v40_v16 }
  0x13   :  { %114 = vmatpush.msra.mxu1 %v56_v17  ;;  %519 = vmatpush.msra.mxu3 %v56_v17 }
  0x14   :  { %74 = vmatpush.msra.mxu0 %v39_v18  ;;  %504 = vmatpush.msra.mxu2 %v39_v18 }
  0x15   :  { %115 = vmatpush.msra.mxu1 %v55_v19  ;;  %520 = vmatpush.msra.mxu3 %v55_v19 }
  0x16   :  { %75 = vmatpush.msra.mxu0 %v38_v20  ;;  %505 = vmatpush.msra.mxu2 %v38_v20 }
  0x17   :  { %116 = vmatpush.msra.mxu1 %v54_v21  ;;  %521 = vmatpush.msra.mxu3 %v54_v21 }
  0x18   :  { %76 = vmatpush.msra.mxu0 %v37_v22  ;;  %506 = vmatpush.msra.mxu2 %v37_v22 }
  0x19   :  { %117 = vmatpush.msra.mxu1 %v53_v23  ;;  %522 = vmatpush.msra.mxu3 %v53_v23 }
  0x1a   :  { %77 = vmatpush.msra.mxu0 %v36_v24  ;;  %507 = vmatpush.msra.mxu2 %v36_v24  ;;  %v550_v24 = vmov 32.0  }
  0x1b   :  { %118 = vmatpush.msra.mxu1 %v52_v25  ;;  %523 = vmatpush.msra.mxu3 %v52_v25  ;;  %532 = vrcp.f32 %v550_v24 }
  0x1c   :  { %78 = vmatpush.msra.mxu0 %v35_v26  ;;  %508 = vmatpush.msra.mxu2 %v35_v26 }
  0x1d   :  { %119 = vmatpush.msra.mxu1 %v51_v27  ;;  %524 = vmatpush.msra.mxu3 %v51_v27 }
  0x1e   :  { %79 = vmatpush.msra.mxu0 %v34_v28  ;;  %509 = vmatpush.msra.mxu2 %v34_v28 }
  0x1f   :  { %120 = vmatpush.msra.mxu1 %v50_v29  ;;  %525 = vmatpush.msra.mxu3 %v50_v29 }
  0x20   :  { %80 = vmatpush.msra.mxu0 %v33_v30  ;;  %510 = vmatpush.msra.mxu2 %v33_v30 }
  0x21   :  { %121 = vmatpush.msra.mxu1 %v49_v31  ;;  %526 = vmatpush.msra.mxu3 %v49_v31  ;;  %v533_v25 = vpop.eup %532 }
  0x22   :  { %81 = vmatmul.f32.vlgmr.msra.gmra.mxu0 %v17_v32  ;;  %93 = vmatmul.f32.vlgmr.msra.gmra.mxu2 %v25_v33  ;;  %v189_v26 = vmul.f32 32.0, %v533_v25  ;;  %vm193_vm1 = vweird.f32 %v533_v25 }
  0x23   :  { %122 = vmatmul.f32.vlgmr.msra.gmra.mxu1 %v18_v34  ;;  %134 = vmatmul.f32.vlgmr.msra.gmra.mxu3 %v26_v35 }
  0x24   :  { %v190_v27 = vsub.f32 1.0, %v189_v26 }
  0x26   :  { %v191_v28 = vmul.f32 %v533_v25, %v190_v27 }
  0x28   :  { %v192_v29 = vadd.f32 %v533_v25, %v191_v28 }
  0x2a   :  { %84 = vmatmul.f32.gmra.mxu0 %v19_v36  ;;  %96 = vmatmul.f32.gmra.mxu2 %v27_v37  ;;  %v809_v30 = vsel %vm193_vm1, %v533_v25, %v192_v29 }
  0x2b   :  { %125 = vmatmul.f32.gmra.mxu1 %v20_v38  ;;  %137 = vmatmul.f32.gmra.mxu3 %v28_v39 }
  0x32   :  { %87 = vmatmul.f32.gmra.mxu0 %v21_v40  ;;  %99 = vmatmul.f32.gmra.mxu2 %v29_v41 }
  0x33   :  { %128 = vmatmul.f32.gmra.mxu1 %v22_v42  ;;  %140 = vmatmul.f32.gmra.mxu3 %v30_v43 }
  0x3a   :  { %90 = vmatmul.f32.gmra.mxu0 %v23_v44  ;;  %102 = vmatmul.f32.gmra.mxu2 %v31_v45 }
  0x3b   :  { %131 = vmatmul.f32.gmra.mxu1 %v24_v46  ;;  %143 = vmatmul.f32.gmra.mxu3 %v32_v47 }
  0x9f   :  { %v82_v48 = vpop.f32.mrf.mxu0 }
  0xa0   :  { %v123_v49 = vpop.f32.mrf.mxu1 }
  0xa1   :  { %v124_v50 = vadd.f32 %v123_v49, %v82_v48 }
  0xa3   :  { %148 = vst.msk [vmem:[%s1014_s4] sm:$0xff] %vm147_vm0, %v124_v50 }
  0xa5   :  { %v94_v51 = vpop.f32.mrf.mxu2 }
  0xa6   :  { %v135_v52 = vpop.f32.mrf.mxu3 }
  0xa7   :  { %v136_v53 = vadd.f32 %v135_v52, %v94_v51  ;;  %v85_v54 = vpop.f32.mrf.mxu0 }
  0xa8   :  { %v126_v55 = vpop.f32.mrf.mxu1 }
  0xa9   :  { %152 = vst.msk [vmem:[%s1014_s4 + $0x20] sm:$0xff] %vm147_vm0, %v136_v53  ;;  %v127_v56 = vadd.f32 %v126_v55, %v85_v54 }
  0xaa   :  { %v732_v57 = vld [vmem:[%s1014_s4] sm:$0xff] }
  0xab   :  { %149 = vst.msk [vmem:[%s1014_s4 + $0x8] sm:$0xff] %vm147_vm0, %v127_v56  ;;  %v164_v58 = vsel %vm147_vm0, %v732_v57, 0.0 }
  0xac   :  { %165 = vadd.xlane.f32.xlu0 %v164_v58 }
  0xad   :  { %v97_v59 = vpop.f32.mrf.mxu2 }
  0xae   :  { %v138_v60 = vpop.f32.mrf.mxu3 }
  0xaf   :  { %v139_v61 = vadd.f32 %v138_v60, %v97_v59  ;;  %v88_v62 = vpop.f32.mrf.mxu0 }
  0xb0   :  { %v129_v63 = vpop.f32.mrf.mxu1  ;;  %v743_v0 = vld [vmem:[%s1014_s4 + $0x20] sm:$0xff] }
  0xb1   :  { %153 = vst.msk [vmem:[%s1014_s4 + $0x28] sm:$0xff] %vm147_vm0, %v139_v61  ;;  %v130_v1 = vadd.f32 %v129_v63, %v88_v62  ;;  %v176_v2 = vsel %vm147_vm0, %v743_v0, 0.0 }
  0xb2   :  { %177 = vadd.xlane.f32.xlu2 %v176_v2  ;;  %v754_v3 = vld [vmem:[%s1014_s4 + $0x8] sm:$0xff] }
  0xb3   :  { %150 = vst.msk [vmem:[%s1014_s4 + $0x10] sm:$0xff] %vm147_vm0, %v130_v1  ;;  %v167_v4 = vsel %vm147_vm0, %v754_v3, 0.0 }
  0xb4   :  { %168 = vadd.xlane.f32.xlu0 %v167_v4 }
  0xb5   :  { %v100_v5 = vpop.f32.mrf.mxu2 }
  0xb6   :  { %v141_v6 = vpop.f32.mrf.mxu3 }
  0xb7   :  { %v142_v7 = vadd.f32 %v141_v6, %v100_v5  ;;  %v91_v8 = vpop.f32.mrf.mxu0 }
  0xb8   :  { %v132_v9 = vpop.f32.mrf.mxu1  ;;  %v765_v10 = vld [vmem:[%s1014_s4 + $0x28] sm:$0xff] }
  0xb9   :  { %154 = vst.msk [vmem:[%s1014_s4 + $0x30] sm:$0xff] %vm147_vm0, %v142_v7  ;;  %v133_v11 = vadd.f32 %v132_v9, %v91_v8  ;;  %v179_v12 = vsel %vm147_vm0, %v765_v10, 0.0 }
  0xba   :  { %180 = vadd.xlane.f32.xlu2 %v179_v12  ;;  %v776_v13 = vld [vmem:[%s1014_s4 + $0x10] sm:$0xff] }
  0xbb   :  { %151 = vst.msk [vmem:[%s1014_s4 + $0x18] sm:$0xff] %vm147_vm0, %v133_v11  ;;  %v170_v14 = vsel %vm147_vm0, %v776_v13, 0.0  ;;  %v551_v11 = vmov 0  }
  0xbc   :  { %171 = vadd.xlane.f32.xlu1 %v170_v14  ;;  %531 = vset.pattern.permute.xlu0 %v551_v11 }
  0xbd   :  { %v103_v15 = vpop.f32.mrf.mxu2  ;;  %529 = vset.pattern.permute.xlu1 %v551_v11  ;;  %530 = vset.pattern.permute.xlu2 %v551_v11  ;;  %v359_v11 = vld [vmem:[%s1016_s3 + $0x20] sm:$0xff] }
  0xbe   :  { %v144_v16 = vpop.f32.mrf.mxu3 }
  0xbf   :  { %v145_v17 = vadd.f32 %v144_v16, %v103_v15 }
  0xc0   :  { %v787_v18 = vld [vmem:[%s1014_s4 + $0x30] sm:$0xff] }
  0xc1   :  { %155 = vst.msk [vmem:[%s1014_s4 + $0x38] sm:$0xff] %vm147_vm0, %v145_v17  ;;  %v182_v19 = vsel %vm147_vm0, %v787_v18, 0.0 }
  0xc2   :  { %183 = vadd.xlane.f32.xlu0 %v182_v19  ;;  %v798_v20 = vld [vmem:[%s1014_s4 + $0x18] sm:$0xff] }
  0xc3   :  { %v173_v21 = vsel %vm147_vm0, %v798_v20, 0.0 }
  0xc4   :  { %174 = vadd.xlane.f32.xlu1 %v173_v21 }
  0xc8   :  { %v805_v22 = vld [vmem:[%s1014_s4 + $0x38] sm:$0xff] }
  0xc9   :  { %v185_v23 = vsel %vm147_vm0, %v805_v22, 0.0 }
  0xcc   :  { %186 = vadd.xlane.f32.xlu1 %v185_v23 }
 0x11f   :  { %v166_v31 = vpop.xlane.xlu0 %165 }
 0x120   :  { %v812_v32 = vmul.f32 %v809_v30, %v166_v31 }
 0x122   :  { %v203_v33 = vsub.f32 %v732_v57, %v812_v32 }
 0x124   :  { %v211_v34 = vmul.f32 %v203_v33, %v203_v33 }
 0x125   :  { %v178_v35 = vpop.xlane.xlu2 %177 }
 0x126   :  { %v817_v36 = vmul.f32 %v809_v30, %v178_v35  ;;  %v219_v37 = vsel %vm147_vm0, %v211_v34, 0.0 }
 0x127   :  { %220 = vadd.xlane.f32.xlu2 %v219_v37  ;;  %v169_v38 = vpop.xlane.xlu0 %168 }
 0x128   :  { %v207_v39 = vsub.f32 %v743_v0, %v817_v36  ;;  %v823_v40 = vmul.f32 %v809_v30, %v169_v38 }
 0x12a   :  { %v215_v41 = vmul.f32 %v207_v39, %v207_v39  ;;  %v204_v42 = vsub.f32 %v754_v3, %v823_v40  ;;  %v251_v39 = vld [vmem:[%s1015_s2] sm:$0xff] }
 0x12c   :  { %v231_v43 = vsel %vm147_vm0, %v215_v41, 0.0  ;;  %v212_v49 = vmul.f32 %v204_v42, %v204_v42 }
 0x12d   :  { %v181_v44 = vpop.xlane.xlu2 %180  ;;  %232 = vadd.xlane.f32.xlu0 %v231_v43 }
 0x12e   :  { %v829_v45 = vmul.f32 %v809_v30, %v181_v44  ;;  %v222_v52 = vsel %vm147_vm0, %v212_v49, 0.0 }
 0x12f   :  { %v172_v46 = vpop.xlane.xlu1 %171 }
 0x130   :  { %v208_v47 = vsub.f32 %v765_v10, %v829_v45  ;;  %v834_v48 = vmul.f32 %v809_v30, %v172_v46 }
 0x132   :  { %v216_v50 = vmul.f32 %v208_v47, %v208_v47  ;;  %v205_v51 = vsub.f32 %v776_v13, %v834_v48 }
 0x134   :  { %v234_v53 = vsel %vm147_vm0, %v216_v50, 0.0  ;;  %v213_v60 = vmul.f32 %v205_v51, %v205_v51 }
 0x135   :  { %223 = vadd.xlane.f32.xlu0 %v222_v52  ;;  %v184_v54 = vpop.xlane.xlu0 %183  ;;  %235 = vadd.xlane.f32.xlu1 %v234_v53 }
 0x136   :  { %v841_v55 = vmul.f32 %v809_v30, %v184_v54  ;;  %v225_v1 = vsel %vm147_vm0, %v213_v60, 0.0 }
 0x137   :  { %v175_v56 = vpop.xlane.xlu1 %174 }
 0x138   :  { %v209_v58 = vsub.f32 %v787_v18, %v841_v55  ;;  %v846_v59 = vmul.f32 %v809_v30, %v175_v56 }
 0x13a   :  { %v217_v61 = vmul.f32 %v209_v58, %v209_v58  ;;  %v206_v62 = vsub.f32 %v798_v20, %v846_v59 }
 0x13c   :  { %v237_v63 = vsel %vm147_vm0, %v217_v61, 0.0  ;;  %v214_v5 = vmul.f32 %v206_v62, %v206_v62  ;;  %v255_v61 = vld [vmem:[%s1015_s2 + $0x20] sm:$0xff] }
 0x13d   :  { %238 = vadd.xlane.f32.xlu2 %v237_v63  ;;  %226 = vadd.xlane.f32.xlu1 %v225_v1 }
 0x13e   :  { %v228_v7 = vsel %vm147_vm0, %v214_v5, 0.0  ;;  %v355_v5 = vld [vmem:[%s1016_s3] sm:$0xff] }
 0x13f   :  { %v187_v2 = vpop.xlane.xlu1 %186 }
 0x140   :  { %v853_v4 = vmul.f32 %v809_v30, %v187_v2 }
 0x142   :  { %v210_v6 = vsub.f32 %v805_v22, %v853_v4 }
 0x144   :  { %v218_v8 = vmul.f32 %v210_v6, %v210_v6 }
 0x145   :  { %229 = vadd.xlane.f32.xlu2 %v228_v7 }
 0x146   :  { %v240_v9 = vsel %vm147_vm0, %v218_v8, 0.0 }
 0x147   :  { %241 = vadd.xlane.f32.xlu0 %v240_v9 }
 0x19a   :  { %v221_v12 = vpop.xlane.xlu2 %220 }
 0x19b   :  { %v243_v14 = vmul.f32 %v221_v12, %v809_v30 }
 0x19d   :  { %v259_v15 = vadd.f32 1e-05, %v243_v14 }
 0x19f   :  { %534 = vrsqrt.f32 %v259_v15  ;;  %vm273_vm3 = vweird.f32 %v259_v15 }
 0x1a0   :  { %v233_v16 = vpop.xlane.xlu0 %232 }
 0x1a1   :  { %v247_v17 = vmul.f32 %v233_v16, %v809_v30 }
 0x1a3   :  { %v263_v19 = vadd.f32 1e-05, %v247_v17 }
 0x1a5   :  { %v535_v21 = vpop.eup %534  ;;  %536 = vrsqrt.f32 %v263_v19  ;;  %vm313_vm6 = vweird.f32 %v263_v19 }
 0x1a6   :  { %v268_v23 = vmul.f32 %v535_v21, %v259_v15  ;;  %vm274_vm2 = vweird.f32 %v535_v21 }
 0x1a7   :  { %vm275_vm4 = vmor %vm273_vm3, %vm274_vm2 }
 0x1a8   :  { %v269_v24 = vmul.f32 %v535_v21, %v268_v23  ;;  %v224_v25 = vpop.xlane.xlu0 %223  ;;  %v236_v26 = vpop.xlane.xlu1 %235 }
 0x1a9   :  { %v244_v27 = vmul.f32 %v224_v25, %v809_v30  ;;  %v248_v28 = vmul.f32 %v236_v26, %v809_v30 }
 0x1aa   :  { %v270_v29 = vmul.f32 0.5, %v269_v24 }
 0x1ab   :  { %v537_v31 = vpop.eup %536  ;;  %v863_v33 = vadd.f32 1e-05, %v244_v27  ;;  %v865_v34 = vadd.f32 1e-05, %v248_v28 }
 0x1ac   :  { %v271_v35 = vsub.f32 1.5, %v270_v29  ;;  %v308_v37 = vmul.f32 %v537_v31, %v263_v19  ;;  %vm314_vm5 = vweird.f32 %v537_v31 }
 0x1ad   :  { %538 = vrsqrt.f32 %v863_v33  ;;  %vm315_vm7 = vmor %vm313_vm6, %vm314_vm5  ;;  %vm283_vm9 = vweird.f32 %v863_v33  ;;  %vm323_vm12 = vweird.f32 %v865_v34 }
 0x1ae   :  { %v309_v38 = vmul.f32 %v537_v31, %v308_v37  ;;  %540 = vrsqrt.f32 %v865_v34  ;;  %v272_v41 = vmul.f32 %v535_v21, %v271_v35 }
 0x1b0   :  { %v310_v42 = vmul.f32 0.5, %v309_v38  ;;  %v239_v43 = vpop.xlane.xlu2 %238  ;;  %v227_v44 = vpop.xlane.xlu1 %226  ;;  %v276_v46 = vsel %vm275_vm4, %v535_v21, %v272_v41 }
 0x1b1   :  { %v249_v47 = vmul.f32 %v239_v43, %v809_v30  ;;  %v245_v49 = vmul.f32 %v227_v44, %v809_v30  ;;  %v347_v50 = vmul.f32 %v276_v46, %v251_v39  ;;  %v356_v39 = vld [vmem:[%s1016_s3 + $0x8] sm:$0xff] }
 0x1b2   :  { %v311_v51 = vsub.f32 1.5, %v310_v42 }
 0x1b3   :  { %v539_v52 = vpop.eup %538  ;;  %v874_v53 = vadd.f32 1e-05, %v249_v47  ;;  %v876_v54 = vadd.f32 1e-05, %v245_v49  ;;  %381 = vperm.xlu1 %529, %v347_v50   ;;  %v363_v63 = vmul.f32 %v347_v50, %v812_v32 }
 0x1b4   :  { %v878_v56 = vpop.eup %540  ;;  %v312_v58 = vmul.f32 %v537_v31, %v311_v51  ;;  %v278_v60 = vmul.f32 %v539_v52, %v863_v33  ;;  %vm284_vm8 = vweird.f32 %v539_v52 }
 0x1b5   :  { %v318_v62 = vmul.f32 %v878_v56, %v865_v34  ;;  %542 = vrsqrt.f32 %v874_v53  ;;  %v371_v14 = vsub.f32 %v355_v5, %v363_v63  ;;  %vm285_vm10 = vmor %vm283_vm9, %vm284_vm8  ;;  %vm324_vm11 = vweird.f32 %v878_v56 }
 0x1b6   :  { %v316_v1 = vsel %vm315_vm7, %v537_v31, %v312_v58  ;;  %v279_v2 = vmul.f32 %v539_v52, %v278_v60  ;;  %544 = vrsqrt.f32 %v876_v54  ;;  %vm918_vm14 = vmor %vm323_vm12, %vm324_vm11  ;;  %vm333_vm1 = vweird.f32 %v874_v53 }
 0x1b7   :  { %v319_v6 = vmul.f32 %v878_v56, %v318_v62  ;;  %v351_v7 = vmul.f32 %v316_v1, %v255_v61  ;;  %vm293_vm3 = vweird.f32 %v876_v54 }
 0x1b8   :  { %v280_v8 = vmul.f32 0.5, %v279_v2  ;;  %v230_v9 = vpop.xlane.xlu2 %229 }
 0x1b9   :  { %v320_v12 = vmul.f32 0.5, %v319_v6  ;;  %v246_v32 = vmul.f32 %v230_v9, %v809_v30  ;;  %v367_v15 = vmul.f32 %v351_v7, %v817_v36  ;;  %v252_v36 = vld [vmem:[%s1015_s2 + $0x8] sm:$0xff] }
 0x1ba   :  { %v281_v16 = vsub.f32 1.5, %v280_v8  ;;  %v242_v17 = vpop.xlane.xlu0 %241 }
 0x1bb   :  { %v543_v19 = vpop.eup %542  ;;  %v898_v21 = vadd.f32 1e-05, %v246_v32  ;;  %v250_v23 = vmul.f32 %v242_v17, %v809_v30  ;;  %429 = vperm.xlu1 %529, %v371_v14   ;;  %v375_v24 = vsub.f32 %v359_v11, %v367_v15  ;;  %v321_v26 = vsub.f32 1.5, %v320_v12  ;;  %v357_v14 = vld [vmem:[%s1016_s3 + $0x10] sm:$0xff]  ;;  %v254_v15 = vld [vmem:[%s1015_s2 + $0x18] sm:$0xff] }
 0x1bc   :  { %v545_v25 = vpop.eup %544  ;;  %v328_v27 = vmul.f32 %v543_v19, %v874_v53  ;;  %v282_v28 = vmul.f32 %v539_v52, %v281_v16  ;;  %vm334_vm13 = vweird.f32 %v543_v19  ;;  %v253_v53 = vld [vmem:[%s1015_s2 + $0x10] sm:$0xff] }
 0x1bd   :  { %v288_v29 = vmul.f32 %v545_v25, %v876_v54  ;;  %546 = vrsqrt.f32 %v898_v21  ;;  %449 = vperm.xlu0 %531, %v375_v24   ;;  %v908_v31 = vadd.f32 1e-05, %v250_v23  ;;  %v322_v41 = vmul.f32 %v878_v56, %v321_v26  ;;  %vm930_vm2 = vmor %vm333_vm1, %vm334_vm13  ;;  %v358_v24 = vld [vmem:[%s1016_s3 + $0x18] sm:$0xff] }
 0x1be   :  { %v329_v30 = vmul.f32 %v543_v19, %v328_v27  ;;  %v286_v35 = vsel %vm285_vm10, %v539_v52, %v282_v28  ;;  %vm294_vm15 = vweird.f32 %v545_v25  ;;  %vm303_vm6 = vweird.f32 %v898_v21  ;;  %v362_v28 = vld [vmem:[%s1016_s3 + $0x38] sm:$0xff] }
 0x1bf   :  { %v289_v37 = vmul.f32 %v545_v25, %v288_v29  ;;  %v348_v33 = vmul.f32 %v286_v35, %v252_v36  ;;  %548 = vrsqrt.f32 %v908_v31  ;;  %v326_v34 = vsel %vm918_vm14, %v878_v56, %v322_v41  ;;  %vm295_vm4 = vmor %vm293_vm3, %vm294_vm15  ;;  %v257_v56 = vld [vmem:[%s1015_s2 + $0x30] sm:$0xff] }
 0x1c0   :  { %v330_v38 = vmul.f32 0.5, %v329_v30  ;;  %vm343_vm9 = vweird.f32 %v908_v31  ;;  %v361_v35 = vld [vmem:[%s1016_s3 + $0x30] sm:$0xff] }
 0x1c1   :  { %v290_v42 = vmul.f32 0.5, %v289_v37  ;;  %386 = vperm.xlu2 %530, %v348_v33   ;;  %v364_v43 = vmul.f32 %v348_v33, %v823_v40  ;;  %v256_v40 = vld [vmem:[%s1015_s2 + $0x28] sm:$0xff] }
 0x1c2   :  { %v331_v44 = vsub.f32 1.5, %v330_v38  ;;  %v352_v2 = vmul.f32 %v326_v34, %v256_v40  ;;  %v360_v33 = vld [vmem:[%s1016_s3 + $0x28] sm:$0xff] }
 0x1c3   :  { %v547_v46 = vpop.eup %546  ;;  %v291_v49 = vsub.f32 1.5, %v290_v42  ;;  %401 = vperm.xlu1 %529, %v351_v7   ;;  %v372_v50 = vsub.f32 %v356_v39, %v364_v43 }
 0x1c4   :  { %v298_v51 = vmul.f32 %v547_v46, %v898_v21  ;;  %v332_v52 = vmul.f32 %v543_v19, %v331_v44  ;;  %vm304_vm5 = vweird.f32 %v547_v46  ;;  %v258_v21 = vld [vmem:[%s1015_s2 + $0x38] sm:$0xff] }
 0x1c5   :  { %434 = vperm.xlu0 %531, %v372_v50   ;;  %v292_v60 = vmul.f32 %v545_v25, %v291_v49  ;;  %v549_v61 = vpop.eup %548  ;;  %vm305_vm7 = vmor %vm303_vm6, %vm304_vm5 }
 0x1c6   :  { %v299_v62 = vmul.f32 %v547_v46, %v298_v51  ;;  %v336_v63 = vsel %vm930_vm2, %v543_v19, %v332_v52  ;;  %v338_v1 = vmul.f32 %v549_v61, %v908_v31  ;;  %vm344_vm8 = vweird.f32 %v549_v61 }
 0x1c7   :  { %v296_v54 = vsel %vm295_vm4, %v545_v25, %v292_v60  ;;  %v353_v8 = vmul.f32 %v336_v63, %v257_v56  ;;  %vm345_vm10 = vmor %vm343_vm9, %vm344_vm8 }
 0x1c8   :  { %v300_v5 = vmul.f32 0.5, %v299_v62  ;;  %v349_v6 = vmul.f32 %v296_v54, %v253_v53  ;;  %v339_v7 = vmul.f32 %v549_v61, %v338_v1 }
 0x1c9   :  { %406 = vperm.xlu2 %530, %v352_v2   ;;  %v369_v31 = vmul.f32 %v353_v8, %v841_v55 }
 0x1ca   :  { %v301_v9 = vsub.f32 1.5, %v300_v5  ;;  %v340_v11 = vmul.f32 0.5, %v339_v7  ;;  %v365_v12 = vmul.f32 %v349_v6, %v834_v48 }
 0x1cb   :  { %411 = vperm.xlu1 %529, %v353_v8   ;;  %v377_v37 = vsub.f32 %v361_v35, %v369_v31 }
 0x1cc   :  { %v302_v32 = vmul.f32 %v547_v46, %v301_v9  ;;  %v341_v16 = vsub.f32 1.5, %v340_v11  ;;  %v373_v48 = vsub.f32 %v357_v14, %v365_v12 }
 0x1cd   :  { %391 = vperm.xlu0 %531, %v349_v6  }
 0x1ce   :  { %v306_v17 = vsel %vm305_vm7, %v547_v46, %v302_v32  ;;  %v342_v19 = vmul.f32 %v549_v61, %v341_v16 }
 0x1cf   :  { %v350_v23 = vmul.f32 %v306_v17, %v254_v15 }
 0x1d0   :  { %v346_v25 = vsel %vm345_vm10, %v549_v61, %v342_v19 }
 0x1d1   :  { %439 = vperm.xlu2 %530, %v373_v48   ;;  %v366_v26 = vmul.f32 %v350_v23, %v846_v59  ;;  %v354_v27 = vmul.f32 %v346_v25, %v258_v21  ;;  %v368_v59 = vmul.f32 %v352_v2, %v829_v45 }
 0x1d3   :  { %v374_v36 = vsub.f32 %v358_v24, %v366_v26  ;;  %v370_v29 = vmul.f32 %v354_v27, %v853_v4  ;;  %v376_v4 = vsub.f32 %v360_v33, %v368_v59 }
 0x1d5   :  { %444 = vperm.xlu1 %529, %v374_v36   ;;  %v378_v30 = vsub.f32 %v362_v28, %v370_v29 }
 0x1d7   :  { %464 = vperm.xlu0 %531, %v378_v30  }
 0x1d9   :  { %396 = vperm.xlu2 %530, %v350_v23  }
 0x1dd   :  { %459 = vperm.xlu1 %529, %v377_v37  }
 0x1e1   :  { %416 = vperm.xlu2 %530, %v354_v27  }
 0x1e9   :  { %454 = vperm.xlu2 %530, %v376_v4  }
 0x21b   :  { %v387_v38 = vpop.permute.xlu2 %386 }
 0x21c   :  { %v420_v50 = vmul.f32 %v387_v38, %v754_v3 }
 0x223   :  { %v407_v39 = vpop.permute.xlu2 %406 }
 0x224   :  { %v424_v61 = vmul.f32 %v407_v39, %v765_v10 }
 0x225   :  { %v382_v55 = vpop.permute.xlu1 %381 }
 0x226   :  { %v419_v42 = vmul.f32 %v382_v55, %v732_v57 }
 0x22b   :  { %v440_v41 = vpop.permute.xlu2 %439 }
 0x22d   :  { %v430_v43 = vpop.permute.xlu1 %429 }
 0x22e   :  { %v467_v44 = vadd.f32 %v430_v43, %v419_v42 }
 0x22f   :  { %v450_v46 = vpop.permute.xlu0 %449 }
 0x230   :  { %v475_v47 = vmax.f32 %v467_v44, 0.0 }
 0x232   :  { %483 = vst.msk [vmem:[%s1014_s4] sm:$0xff] %vm147_vm0, %v475_v47 }
 0x233   :  { %v397_v45 = vpop.permute.xlu2 %396 }
 0x234   :  { %v422_v2 = vmul.f32 %v397_v45, %v798_v20 }
 0x235   :  { %v402_v49 = vpop.permute.xlu1 %401 }
 0x236   :  { %v423_v51 = vmul.f32 %v402_v49, %v743_v0 }
 0x237   :  { %v435_v40 = vpop.permute.xlu0 %434 }
 0x238   :  { %v471_v34 = vadd.f32 %v450_v46, %v423_v51  ;;  %v468_v52 = vadd.f32 %v435_v40, %v420_v50 }
 0x23a   :  { %v479_v58 = vmax.f32 %v471_v34, 0.0  ;;  %v476_v57 = vmax.f32 %v468_v52, 0.0 }
 0x23b   :  { %v417_v53 = vpop.permute.xlu2 %416 }
 0x23c   :  { %487 = vst.msk [vmem:[%s1014_s4 + $0x20] sm:$0xff] %vm147_vm0, %v479_v58  ;;  %v426_v10 = vmul.f32 %v417_v53, %v805_v22 }
 0x23d   :  { %484 = vst.msk [vmem:[%s1014_s4 + $0x8] sm:$0xff] %vm147_vm0, %v476_v57  ;;  %v412_v60 = vpop.permute.xlu1 %411 }
 0x23e   :  { %v425_v9 = vmul.f32 %v412_v60, %v787_v18 }
 0x23f   :  { %v392_v3 = vpop.permute.xlu0 %391 }
 0x240   :  { %v421_v0 = vmul.f32 %v392_v3, %v776_v13 }
 0x242   :  { %v469_v62 = vadd.f32 %v440_v41, %v421_v0 }
 0x243   :  { %v455_v56 = vpop.permute.xlu2 %454 }
 0x244   :  { %v477_v63 = vmax.f32 %v469_v62, 0.0  ;;  %v472_v1 = vadd.f32 %v455_v56, %v424_v61 }
 0x246   :  { %485 = vst.msk [vmem:[%s1014_s4 + $0x10] sm:$0xff] %vm147_vm0, %v477_v63  ;;  %v480_v54 = vmax.f32 %v472_v1, 0.0 }
 0x247   :  { %v445_v5 = vpop.permute.xlu1 %444 }
 0x248   :  { %488 = vst.msk [vmem:[%s1014_s4 + $0x28] sm:$0xff] %vm147_vm0, %v480_v54  ;;  %v470_v13 = vadd.f32 %v445_v5, %v422_v2 }
 0x249   :  { %v465_v7 = vpop.permute.xlu0 %464 }
 0x24a   :  { %v478_v6 = vmax.f32 %v470_v13, 0.0  ;;  %v474_v8 = vadd.f32 %v465_v7, %v426_v10 }
 0x24c   :  { %486 = vst.msk [vmem:[%s1014_s4 + $0x18] sm:$0xff] %vm147_vm0, %v478_v6  ;;  %v482_v20 = vmax.f32 %v474_v8, 0.0 }
 0x24e   :  { %490 = vst.msk [vmem:[%s1014_s4 + $0x38] sm:$0xff] %vm147_vm0, %v482_v20 }
 0x24f   :  { %v460_v11 = vpop.permute.xlu1 %459 }
 0x250   :  { %v473_v12 = vadd.f32 %v460_v11, %v425_v9 }
 0x252   :  { %v481_v32 = vmax.f32 %v473_v12, 0.0 }
 0x254   :  { %489 = vst.msk [vmem:[%s1014_s4 + $0x30] sm:$0xff] %vm147_vm0, %v481_v32 }

// kernel: gnet_forward.6
= control target key start
LH: loop header
LB: loop body
LE: loop exit
PB: predicated region body
PF: predicated region fallthrough
CT: control target
= control target key end

     0   :  { %vm115_vm0 = vcmask 261120   ;;  %s789_s29 = smov 64   ;;  %s790_s30 = smov 96   ;;  %vm236_vm1 = vcmask 523520   ;;  %vm357_vm2 = vcmask 785920   ;;  %vm478_vm3 = vcmask 1048320   ;;  %s1446_s0 = inlined_call_operand.vmem [shape: f32[4,256,32], index: 0, kind: input, shape index: {}]   ;;  %s1447_s1 = inlined_call_operand.vmem [shape: f32[4,32,256], index: 1, kind: input, shape index: {}]   ;;  %s1448_s4 = inlined_call_operand.vmem [shape: f32[32,128], index: 4, kind: output, shape index: {}]   ;;  %s1449_s2 = inlined_call_operand.vmem [shape: f32[32,1], index: 2, kind: input, shape index: {}]   ;;  %s1450_s3 = inlined_call_operand.vmem [shape: f32[32,1], index: 3, kind: input, shape index: {}]  }
   0x1   :  { %v40_v0 = vld [vmem:[%s1446_s0 + $0x78] sm:$0xff]  ;;  %v39_v4 = vld [vmem:[%s1446_s0 + $0x70] sm:$0xff]  ;;  %v38_v8 = vld [vmem:[%s1446_s0 + $0x68] sm:$0xff] }
   0x2   :  { %v56_v1 = vld [vmem:[%s1446_s0 + $0xf8] sm:$0xff]  ;;  %57 = vmatpush.msra.mxu0 %v40_v0  ;;  %v55_v5 = vld [vmem:[%s1446_s0 + $0xf0] sm:$0xff]  ;;  %v54_v9 = vld [vmem:[%s1446_s0 + $0xe8] sm:$0xff] }
   0x3   :  { %v673_v2 = vld [vmem:[%s1446_s0 + $0x178] sm:$0xff]  ;;  %86 = vmatpush.msra.mxu1 %v56_v1  ;;  %v672_v6 = vld [vmem:[%s1446_s0 + $0x170] sm:$0xff]  ;;  %v671_v10 = vld [vmem:[%s1446_s0 + $0x168] sm:$0xff] }
   0x4   :  { %v689_v3 = vld [vmem:[%s1446_s0 + $0x1f8] sm:$0xff]  ;;  %162 = vmatpush.msra.mxu2 %v673_v2  ;;  %v688_v7 = vld [vmem:[%s1446_s0 + $0x1f0] sm:$0xff]  ;;  %58 = vmatpush.msra.mxu0 %v39_v4  ;;  %v687_v11 = vld [vmem:[%s1446_s0 + $0x1e8] sm:$0xff] }
   0x5   :  { %191 = vmatpush.msra.mxu3 %v689_v3  ;;  %87 = vmatpush.msra.mxu1 %v55_v5  ;;  %v37_v12 = vld [vmem:[%s1446_s0 + $0x60] sm:$0xff]  ;;  %v36_v16 = vld [vmem:[%s1446_s0 + $0x58] sm:$0xff]  ;;  %v35_v20 = vld [vmem:[%s1446_s0 + $0x50] sm:$0xff] }
   0x6   :  { %163 = vmatpush.msra.mxu2 %v672_v6  ;;  %v53_v13 = vld [vmem:[%s1446_s0 + $0xe0] sm:$0xff]  ;;  %59 = vmatpush.msra.mxu0 %v38_v8  ;;  %v52_v17 = vld [vmem:[%s1446_s0 + $0xd8] sm:$0xff]  ;;  %v51_v21 = vld [vmem:[%s1446_s0 + $0xd0] sm:$0xff] }
   0x7   :  { %192 = vmatpush.msra.mxu3 %v688_v7  ;;  %88 = vmatpush.msra.mxu1 %v54_v9  ;;  %v670_v14 = vld [vmem:[%s1446_s0 + $0x160] sm:$0xff]  ;;  %v669_v18 = vld [vmem:[%s1446_s0 + $0x158] sm:$0xff]  ;;  %v668_v22 = vld [vmem:[%s1446_s0 + $0x150] sm:$0xff] }
   0x8   :  { %v686_v15 = vld [vmem:[%s1446_s0 + $0x1e0] sm:$0xff]  ;;  %164 = vmatpush.msra.mxu2 %v671_v10  ;;  %60 = vmatpush.msra.mxu0 %v37_v12  ;;  %v685_v19 = vld [vmem:[%s1446_s0 + $0x1d8] sm:$0xff]  ;;  %v684_v23 = vld [vmem:[%s1446_s0 + $0x1d0] sm:$0xff] }
   0x9   :  { %193 = vmatpush.msra.mxu3 %v687_v11  ;;  %89 = vmatpush.msra.mxu1 %v53_v13  ;;  %v34_v24 = vld [vmem:[%s1446_s0 + $0x48] sm:$0xff]  ;;  %v33_v28 = vld [vmem:[%s1446_s0 + $0x40] sm:$0xff]  ;;  %v32_v32 = vld [vmem:[%s1446_s0 + $0x38] sm:$0xff] }
   0xa   :  { %165 = vmatpush.msra.mxu2 %v670_v14  ;;  %61 = vmatpush.msra.mxu0 %v36_v16  ;;  %v50_v25 = vld [vmem:[%s1446_s0 + $0xc8] sm:$0xff]  ;;  %v49_v29 = vld [vmem:[%s1446_s0 + $0xc0] sm:$0xff]  ;;  %v48_v33 = vld [vmem:[%s1446_s0 + $0xb8] sm:$0xff] }
   0xb   :  { %194 = vmatpush.msra.mxu3 %v686_v15  ;;  %90 = vmatpush.msra.mxu1 %v52_v17  ;;  %v667_v26 = vld [vmem:[%s1446_s0 + $0x148] sm:$0xff]  ;;  %v666_v30 = vld [vmem:[%s1446_s0 + $0x140] sm:$0xff]  ;;  %v665_v34 = vld [vmem:[%s1446_s0 + $0x138] sm:$0xff] }
   0xc   :  { %166 = vmatpush.msra.mxu2 %v669_v18  ;;  %62 = vmatpush.msra.mxu0 %v35_v20  ;;  %v683_v27 = vld [vmem:[%s1446_s0 + $0x1c8] sm:$0xff]  ;;  %v682_v31 = vld [vmem:[%s1446_s0 + $0x1c0] sm:$0xff]  ;;  %v681_v35 = vld [vmem:[%s1446_s0 + $0x1b8] sm:$0xff] }
   0xd   :  { %195 = vmatpush.msra.mxu3 %v685_v19  ;;  %91 = vmatpush.msra.mxu1 %v51_v21  ;;  %v31_v36 = vld [vmem:[%s1446_s0 + $0x30] sm:$0xff]  ;;  %v30_v40 = vld [vmem:[%s1446_s0 + $0x28] sm:$0xff]  ;;  %v29_v44 = vld [vmem:[%s1446_s0 + $0x20] sm:$0xff] }
   0xe   :  { %167 = vmatpush.msra.mxu2 %v668_v22  ;;  %63 = vmatpush.msra.mxu0 %v34_v24  ;;  %v47_v37 = vld [vmem:[%s1446_s0 + $0xb0] sm:$0xff]  ;;  %v46_v41 = vld [vmem:[%s1446_s0 + $0xa8] sm:$0xff]  ;;  %v45_v45 = vld [vmem:[%s1446_s0 + $0xa0] sm:$0xff] }
   0xf   :  { %196 = vmatpush.msra.mxu3 %v684_v23  ;;  %92 = vmatpush.msra.mxu1 %v50_v25  ;;  %v664_v38 = vld [vmem:[%s1446_s0 + $0x130] sm:$0xff]  ;;  %v663_v42 = vld [vmem:[%s1446_s0 + $0x128] sm:$0xff]  ;;  %v662_v46 = vld [vmem:[%s1446_s0 + $0x120] sm:$0xff] }
  0x10   :  { %168 = vmatpush.msra.mxu2 %v667_v26  ;;  %64 = vmatpush.msra.mxu0 %v33_v28  ;;  %v680_v39 = vld [vmem:[%s1446_s0 + $0x1b0] sm:$0xff]  ;;  %v679_v43 = vld [vmem:[%s1446_s0 + $0x1a8] sm:$0xff]  ;;  %v678_v47 = vld [vmem:[%s1446_s0 + $0x1a0] sm:$0xff] }
  0x11   :  { %197 = vmatpush.msra.mxu3 %v683_v27  ;;  %93 = vmatpush.msra.mxu1 %v49_v29  ;;  %v28_v48 = vld [vmem:[%s1446_s0 + $0x18] sm:$0xff]  ;;  %v27_v52 = vld [vmem:[%s1446_s0 + $0x10] sm:$0xff]  ;;  %v26_v56 = vld [vmem:[%s1446_s0 + $0x8] sm:$0xff] }
  0x12   :  { %169 = vmatpush.msra.mxu2 %v666_v30  ;;  %65 = vmatpush.msra.mxu0 %v32_v32  ;;  %v44_v49 = vld [vmem:[%s1446_s0 + $0x98] sm:$0xff]  ;;  %v43_v53 = vld [vmem:[%s1446_s0 + $0x90] sm:$0xff]  ;;  %v42_v57 = vld [vmem:[%s1446_s0 + $0x88] sm:$0xff] }
  0x13   :  { %198 = vmatpush.msra.mxu3 %v682_v31  ;;  %94 = vmatpush.msra.mxu1 %v48_v33  ;;  %v661_v50 = vld [vmem:[%s1446_s0 + $0x118] sm:$0xff]  ;;  %v660_v54 = vld [vmem:[%s1446_s0 + $0x110] sm:$0xff]  ;;  %v659_v58 = vld [vmem:[%s1446_s0 + $0x108] sm:$0xff] }
  0x14   :  { %170 = vmatpush.msra.mxu2 %v665_v34  ;;  %66 = vmatpush.msra.mxu0 %v31_v36  ;;  %v677_v51 = vld [vmem:[%s1446_s0 + $0x198] sm:$0xff]  ;;  %v676_v55 = vld [vmem:[%s1446_s0 + $0x190] sm:$0xff]  ;;  %v675_v59 = vld [vmem:[%s1446_s0 + $0x188] sm:$0xff] }
  0x15   :  { %199 = vmatpush.msra.mxu3 %v681_v35  ;;  %95 = vmatpush.msra.mxu1 %v47_v37  ;;  %v25_v60 = vld [vmem:[%s1446_s0] sm:$0xff]  ;;  %v18_v63 = vld [vmem:[%s1447_s1 + $0x8] sm:$0xff]  ;;  %v713_v2 = vld [vmem:[%s1446_s0 + $0x278] sm:$0xff] }
  0x16   :  { %171 = vmatpush.msra.mxu2 %v664_v38  ;;  %67 = vmatpush.msra.mxu0 %v30_v40  ;;  %v41_v61 = vld [vmem:[%s1446_s0 + $0x80] sm:$0xff]  ;;  %v729_v3 = vld [vmem:[%s1446_s0 + $0x2f8] sm:$0xff]  ;;  %v651_v5 = vld [vmem:[%s1447_s1 + $0x48] sm:$0xff] }
  0x17   :  { %200 = vmatpush.msra.mxu3 %v680_v39  ;;  %96 = vmatpush.msra.mxu1 %v46_v41  ;;  %v17_v62 = vld [vmem:[%s1447_s1] sm:$0xff]  ;;  %v712_v6 = vld [vmem:[%s1446_s0 + $0x270] sm:$0xff]  ;;  %v753_v8 = vld [vmem:[%s1446_s0 + $0x378] sm:$0xff] }
  0x18   :  { %172 = vmatpush.msra.mxu2 %v663_v42  ;;  %68 = vmatpush.msra.mxu0 %v29_v44  ;;  %v658_v0 = vld [vmem:[%s1446_s0 + $0x100] sm:$0xff]  ;;  %v728_v7 = vld [vmem:[%s1446_s0 + $0x2f0] sm:$0xff]  ;;  %v769_v9 = vld [vmem:[%s1446_s0 + $0x3f8] sm:$0xff] }
  0x19   :  { %201 = vmatpush.msra.mxu3 %v679_v43  ;;  %97 = vmatpush.msra.mxu1 %v45_v45  ;;  %v674_v1 = vld [vmem:[%s1446_s0 + $0x180] sm:$0xff]  ;;  %v711_v10 = vld [vmem:[%s1446_s0 + $0x268] sm:$0xff]  ;;  %v752_v12 = vld [vmem:[%s1446_s0 + $0x370] sm:$0xff] }
  0x1a   :  { %173 = vmatpush.msra.mxu2 %v662_v46  ;;  %69 = vmatpush.msra.mxu0 %v28_v48  ;;  %v650_v4 = vld [vmem:[%s1447_s1 + $0x40] sm:$0xff]  ;;  %v727_v11 = vld [vmem:[%s1446_s0 + $0x2e8] sm:$0xff]  ;;  %v768_v13 = vld [vmem:[%s1446_s0 + $0x3f0] sm:$0xff] }
  0x1b   :  { %202 = vmatpush.msra.mxu3 %v678_v47  ;;  %98 = vmatpush.msra.mxu1 %v44_v49  ;;  %v710_v14 = vld [vmem:[%s1446_s0 + $0x260] sm:$0xff]  ;;  %v751_v16 = vld [vmem:[%s1446_s0 + $0x368] sm:$0xff]  ;;  %v19_v18 = vld [vmem:[%s1447_s1 + $0x10] sm:$0xff] }
  0x1c   :  { %174 = vmatpush.msra.mxu2 %v661_v50  ;;  %70 = vmatpush.msra.mxu0 %v27_v52  ;;  %v726_v15 = vld [vmem:[%s1446_s0 + $0x2e0] sm:$0xff]  ;;  %v767_v17 = vld [vmem:[%s1446_s0 + $0x3e8] sm:$0xff]  ;;  %v20_v19 = vld [vmem:[%s1447_s1 + $0x18] sm:$0xff] }
  0x1d   :  { %203 = vmatpush.msra.mxu3 %v677_v51  ;;  %99 = vmatpush.msra.mxu1 %v43_v53  ;;  %v709_v20 = vld [vmem:[%s1446_s0 + $0x258] sm:$0xff]  ;;  %v750_v22 = vld [vmem:[%s1446_s0 + $0x360] sm:$0xff]  ;;  %v652_v24 = vld [vmem:[%s1447_s1 + $0x50] sm:$0xff] }
  0x1e   :  { %175 = vmatpush.msra.mxu2 %v660_v54  ;;  %71 = vmatpush.msra.mxu0 %v26_v56  ;;  %v725_v21 = vld [vmem:[%s1446_s0 + $0x2d8] sm:$0xff]  ;;  %v766_v23 = vld [vmem:[%s1446_s0 + $0x3e0] sm:$0xff]  ;;  %v708_v26 = vld [vmem:[%s1446_s0 + $0x250] sm:$0xff] }
  0x1f   :  { %204 = vmatpush.msra.mxu3 %v676_v55  ;;  %100 = vmatpush.msra.mxu1 %v42_v57  ;;  %v653_v25 = vld [vmem:[%s1447_s1 + $0x58] sm:$0xff]  ;;  %v724_v27 = vld [vmem:[%s1446_s0 + $0x2d0] sm:$0xff]  ;;  %v707_v30 = vld [vmem:[%s1446_s0 + $0x248] sm:$0xff] }
  0x20   :  { %176 = vmatpush.msra.mxu2 %v659_v58  ;;  %72 = vmatpush.msra.mxu0 %v25_v60  ;;  %v749_v28 = vld [vmem:[%s1446_s0 + $0x358] sm:$0xff]  ;;  %v723_v31 = vld [vmem:[%s1446_s0 + $0x2c8] sm:$0xff]  ;;  %v748_v32 = vld [vmem:[%s1446_s0 + $0x350] sm:$0xff] }
  0x21   :  { %205 = vmatpush.msra.mxu3 %v675_v59  ;;  %101 = vmatpush.msra.mxu1 %v41_v61  ;;  %v765_v29 = vld [vmem:[%s1446_s0 + $0x3d8] sm:$0xff]  ;;  %v764_v33 = vld [vmem:[%s1446_s0 + $0x3d0] sm:$0xff]  ;;  %v706_v34 = vld [vmem:[%s1446_s0 + $0x240] sm:$0xff] }
  0x22   :  { %73 = vmatmul.f32.vlgmr.msra.gmra.mxu0 %v17_v62  ;;  %102 = vmatmul.f32.vlgmr.msra.gmra.mxu1 %v18_v63  ;;  %v722_v35 = vld [vmem:[%s1446_s0 + $0x2c0] sm:$0xff]  ;;  %v747_v36 = vld [vmem:[%s1446_s0 + $0x348] sm:$0xff]  ;;  %v705_v40 = vld [vmem:[%s1446_s0 + $0x238] sm:$0xff] }
  0x23   :  { %177 = vmatpush.msra.mxu2 %v658_v0  ;;  %206 = vmatpush.msra.mxu3 %v674_v1  ;;  %v763_v37 = vld [vmem:[%s1446_s0 + $0x3c8] sm:$0xff]  ;;  %v21_v38 = vld [vmem:[%s1447_s1 + $0x20] sm:$0xff]  ;;  %v721_v41 = vld [vmem:[%s1446_s0 + $0x2b8] sm:$0xff] }
  0x24   :  { %283 = vmatpush.msrb.mxu0 %v713_v2  ;;  %312 = vmatpush.msrb.mxu1 %v729_v3  ;;  %v22_v39 = vld [vmem:[%s1447_s1 + $0x28] sm:$0xff]  ;;  %v746_v42 = vld [vmem:[%s1446_s0 + $0x340] sm:$0xff]  ;;  %v704_v46 = vld [vmem:[%s1446_s0 + $0x230] sm:$0xff] }
  0x25   :  { %178 = vmatmul.f32.vlgmr.msra.gmra.mxu2 %v650_v4  ;;  %207 = vmatmul.f32.vlgmr.msra.gmra.mxu3 %v651_v5  ;;  %v762_v43 = vld [vmem:[%s1446_s0 + $0x3c0] sm:$0xff]  ;;  %v655_v45 = vld [vmem:[%s1447_s1 + $0x68] sm:$0xff]  ;;  %v720_v47 = vld [vmem:[%s1446_s0 + $0x2b0] sm:$0xff] }
  0x26   :  { %284 = vmatpush.msrb.mxu0 %v712_v6  ;;  %313 = vmatpush.msrb.mxu1 %v728_v7  ;;  %v654_v44 = vld [vmem:[%s1447_s1 + $0x60] sm:$0xff]  ;;  %v745_v48 = vld [vmem:[%s1446_s0 + $0x338] sm:$0xff]  ;;  %v703_v50 = vld [vmem:[%s1446_s0 + $0x228] sm:$0xff] }
  0x27   :  { %404 = vmatpush.msrb.mxu2 %v753_v8  ;;  %433 = vmatpush.msrb.mxu3 %v769_v9  ;;  %v761_v49 = vld [vmem:[%s1446_s0 + $0x3b8] sm:$0xff]  ;;  %v719_v51 = vld [vmem:[%s1446_s0 + $0x2a8] sm:$0xff]  ;;  %v744_v52 = vld [vmem:[%s1446_s0 + $0x330] sm:$0xff] }
  0x28   :  { %285 = vmatpush.msrb.mxu0 %v711_v10  ;;  %314 = vmatpush.msrb.mxu1 %v727_v11  ;;  %v760_v53 = vld [vmem:[%s1446_s0 + $0x3b0] sm:$0xff]  ;;  %v702_v54 = vld [vmem:[%s1446_s0 + $0x220] sm:$0xff]  ;;  %v743_v56 = vld [vmem:[%s1446_s0 + $0x328] sm:$0xff] }
  0x29   :  { %405 = vmatpush.msrb.mxu2 %v752_v12  ;;  %434 = vmatpush.msrb.mxu3 %v768_v13  ;;  %v718_v55 = vld [vmem:[%s1446_s0 + $0x2a0] sm:$0xff]  ;;  %v759_v57 = vld [vmem:[%s1446_s0 + $0x3a8] sm:$0xff]  ;;  %v23_v58 = vld [vmem:[%s1447_s1 + $0x30] sm:$0xff] }
  0x2a   :  { %286 = vmatpush.msrb.mxu0 %v710_v14  ;;  %315 = vmatpush.msrb.mxu1 %v726_v15  ;;  %v24_v59 = vld [vmem:[%s1447_s1 + $0x38] sm:$0xff]  ;;  %v742_v62 = vld [vmem:[%s1446_s0 + $0x320] sm:$0xff]  ;;  %v656_v0 = vld [vmem:[%s1447_s1 + $0x70] sm:$0xff] }
  0x2b   :  { %406 = vmatpush.msrb.mxu2 %v751_v16  ;;  %435 = vmatpush.msrb.mxu3 %v767_v17  ;;  %v701_v60 = vld [vmem:[%s1446_s0 + $0x218] sm:$0xff]  ;;  %v758_v63 = vld [vmem:[%s1446_s0 + $0x3a0] sm:$0xff]  ;;  %v700_v2 = vld [vmem:[%s1446_s0 + $0x210] sm:$0xff] }
  0x2c   :  { %76 = vmatmul.f32.gmra.mxu0 %v19_v18  ;;  %105 = vmatmul.f32.gmra.mxu1 %v20_v19  ;;  %v717_v61 = vld [vmem:[%s1446_s0 + $0x298] sm:$0xff]  ;;  %v716_v3 = vld [vmem:[%s1446_s0 + $0x290] sm:$0xff]  ;;  %v699_v6 = vld [vmem:[%s1446_s0 + $0x208] sm:$0xff] }
  0x2d   :  { %287 = vmatpush.msrb.mxu0 %v709_v20  ;;  %316 = vmatpush.msrb.mxu1 %v725_v21  ;;  %v657_v1 = vld [vmem:[%s1447_s1 + $0x78] sm:$0xff]  ;;  %v715_v7 = vld [vmem:[%s1446_s0 + $0x288] sm:$0xff]  ;;  %v740_v8 = vld [vmem:[%s1446_s0 + $0x310] sm:$0xff] }
  0x2e   :  { %407 = vmatpush.msrb.mxu2 %v750_v22  ;;  %436 = vmatpush.msrb.mxu3 %v766_v23  ;;  %v741_v4 = vld [vmem:[%s1446_s0 + $0x318] sm:$0xff]  ;;  %v756_v9 = vld [vmem:[%s1446_s0 + $0x390] sm:$0xff]  ;;  %v698_v10 = vld [vmem:[%s1446_s0 + $0x200] sm:$0xff] }
  0x2f   :  { %181 = vmatmul.f32.gmra.mxu2 %v652_v24  ;;  %210 = vmatmul.f32.gmra.mxu3 %v653_v25  ;;  %v757_v5 = vld [vmem:[%s1446_s0 + $0x398] sm:$0xff]  ;;  %v714_v11 = vld [vmem:[%s1446_s0 + $0x280] sm:$0xff]  ;;  %v739_v12 = vld [vmem:[%s1446_s0 + $0x308] sm:$0xff] }
  0x30   :  { %288 = vmatpush.msrb.mxu0 %v708_v26  ;;  %317 = vmatpush.msrb.mxu1 %v724_v27  ;;  %v755_v13 = vld [vmem:[%s1446_s0 + $0x388] sm:$0xff]  ;;  %v690_v14 = vld [vmem:[%s1447_s1 + $0x80] sm:$0xff]  ;;  %v692_v20 = vld [vmem:[%s1447_s1 + $0x90] sm:$0xff] }
  0x31   :  { %408 = vmatpush.msrb.mxu2 %v749_v28  ;;  %437 = vmatpush.msrb.mxu3 %v765_v29  ;;  %v691_v15 = vld [vmem:[%s1447_s1 + $0x88] sm:$0xff]  ;;  %v738_v16 = vld [vmem:[%s1446_s0 + $0x300] sm:$0xff]  ;;  %v693_v21 = vld [vmem:[%s1447_s1 + $0x98] sm:$0xff] }
  0x32   :  { %289 = vmatpush.msrb.mxu0 %v707_v30  ;;  %318 = vmatpush.msrb.mxu1 %v723_v31  ;;  %v754_v17 = vld [vmem:[%s1446_s0 + $0x380] sm:$0xff]  ;;  %v731_v19 = vld [vmem:[%s1447_s1 + $0xc8] sm:$0xff]  ;;  %v732_v22 = vld [vmem:[%s1447_s1 + $0xd0] sm:$0xff] }
  0x33   :  { %409 = vmatpush.msrb.mxu2 %v748_v32  ;;  %438 = vmatpush.msrb.mxu3 %v764_v33  ;;  %v730_v18 = vld [vmem:[%s1447_s1 + $0xc0] sm:$0xff]  ;;  %v733_v23 = vld [vmem:[%s1447_s1 + $0xd8] sm:$0xff]  ;;  %v695_v25 = vld [vmem:[%s1447_s1 + $0xa8] sm:$0xff] }
  0x34   :  { %290 = vmatpush.msrb.mxu0 %v706_v34  ;;  %319 = vmatpush.msrb.mxu1 %v722_v35  ;;  %v694_v24 = vld [vmem:[%s1447_s1 + $0xa0] sm:$0xff]  ;;  %v735_v27 = vld [vmem:[%s1447_s1 + $0xe8] sm:$0xff]  ;;  %v696_v28 = vld [vmem:[%s1447_s1 + $0xb0] sm:$0xff] }
  0x35   :  { %410 = vmatpush.msrb.mxu2 %v747_v36  ;;  %439 = vmatpush.msrb.mxu3 %v763_v37  ;;  %v734_v26 = vld [vmem:[%s1447_s1 + $0xe0] sm:$0xff]  ;;  %v697_v29 = vld [vmem:[%s1447_s1 + $0xb8] sm:$0xff]  ;;  %v736_v30 = vld [vmem:[%s1447_s1 + $0xf0] sm:$0xff] }
  0x36   :  { %79 = vmatmul.f32.gmra.mxu0 %v21_v38  ;;  %108 = vmatmul.f32.gmra.mxu1 %v22_v39  ;;  %v737_v31 = vld [vmem:[%s1447_s1 + $0xf8] sm:$0xff]  ;;  %s788_s1 = smov 32  }
  0x37   :  { %291 = vmatpush.msrb.mxu0 %v705_v40  ;;  %320 = vmatpush.msrb.mxu1 %v721_v41 }
  0x38   :  { %411 = vmatpush.msrb.mxu2 %v746_v42  ;;  %440 = vmatpush.msrb.mxu3 %v762_v43 }
  0x39   :  { %184 = vmatmul.f32.gmra.mxu2 %v654_v44  ;;  %213 = vmatmul.f32.gmra.mxu3 %v655_v45 }
  0x3a   :  { %292 = vmatpush.msrb.mxu0 %v704_v46  ;;  %321 = vmatpush.msrb.mxu1 %v720_v47 }
  0x3b   :  { %412 = vmatpush.msrb.mxu2 %v745_v48  ;;  %441 = vmatpush.msrb.mxu3 %v761_v49 }
  0x3c   :  { %293 = vmatpush.msrb.mxu0 %v703_v50  ;;  %322 = vmatpush.msrb.mxu1 %v719_v51 }
  0x3d   :  { %413 = vmatpush.msrb.mxu2 %v744_v52  ;;  %442 = vmatpush.msrb.mxu3 %v760_v53 }
  0x3e   :  { %294 = vmatpush.msrb.mxu0 %v702_v54  ;;  %323 = vmatpush.msrb.mxu1 %v718_v55 }
  0x3f   :  { %414 = vmatpush.msrb.mxu2 %v743_v56  ;;  %443 = vmatpush.msrb.mxu3 %v759_v57 }
  0x40   :  { %82 = vmatmul.f32.gmra.mxu0 %v23_v58  ;;  %111 = vmatmul.f32.gmra.mxu1 %v24_v59 }
  0x41   :  { %295 = vmatpush.msrb.mxu0 %v701_v60  ;;  %324 = vmatpush.msrb.mxu1 %v717_v61 }
  0x42   :  { %415 = vmatpush.msrb.mxu2 %v742_v62  ;;  %444 = vmatpush.msrb.mxu3 %v758_v63 }
  0x43   :  { %187 = vmatmul.f32.gmra.mxu2 %v656_v0  ;;  %216 = vmatmul.f32.gmra.mxu3 %v657_v1 }
  0x44   :  { %296 = vmatpush.msrb.mxu0 %v700_v2  ;;  %325 = vmatpush.msrb.mxu1 %v716_v3 }
  0x45   :  { %416 = vmatpush.msrb.mxu2 %v741_v4  ;;  %445 = vmatpush.msrb.mxu3 %v757_v5 }
  0x46   :  { %297 = vmatpush.msrb.mxu0 %v699_v6  ;;  %326 = vmatpush.msrb.mxu1 %v715_v7 }
  0x47   :  { %417 = vmatpush.msrb.mxu2 %v740_v8  ;;  %446 = vmatpush.msrb.mxu3 %v756_v9 }
  0x48   :  { %298 = vmatpush.msrb.mxu0 %v698_v10  ;;  %327 = vmatpush.msrb.mxu1 %v714_v11 }
  0x49   :  { %418 = vmatpush.msrb.mxu2 %v739_v12  ;;  %447 = vmatpush.msrb.mxu3 %v755_v13 }
  0x4a   :  { %299 = vmatmul.f32.vlgmr.msrb.gmra.mxu0 %v690_v14  ;;  %328 = vmatmul.f32.vlgmr.msrb.gmra.mxu1 %v691_v15 }
  0x4b   :  { %419 = vmatpush.msrb.mxu2 %v738_v16  ;;  %448 = vmatpush.msrb.mxu3 %v754_v17 }
  0x4c   :  { %420 = vmatmul.f32.vlgmr.msrb.gmra.mxu2 %v730_v18  ;;  %449 = vmatmul.f32.vlgmr.msrb.gmra.mxu3 %v731_v19 }
  0x52   :  { %302 = vmatmul.f32.gmra.mxu0 %v692_v20  ;;  %331 = vmatmul.f32.gmra.mxu1 %v693_v21 }
  0x54   :  { %423 = vmatmul.f32.gmra.mxu2 %v732_v22  ;;  %452 = vmatmul.f32.gmra.mxu3 %v733_v23 }
  0x5a   :  { %305 = vmatmul.f32.gmra.mxu0 %v694_v24  ;;  %334 = vmatmul.f32.gmra.mxu1 %v695_v25 }
  0x5c   :  { %426 = vmatmul.f32.gmra.mxu2 %v734_v26  ;;  %455 = vmatmul.f32.gmra.mxu3 %v735_v27 }
  0x62   :  { %308 = vmatmul.f32.gmra.mxu0 %v696_v28  ;;  %337 = vmatmul.f32.gmra.mxu1 %v697_v29 }
  0x64   :  { %429 = vmatmul.f32.gmra.mxu2 %v736_v30  ;;  %458 = vmatmul.f32.gmra.mxu3 %v737_v31 }
  0x9f   :  { %v74_v32 = vpop.f32.mrf.mxu0  ;;  %v103_v33 = vpop.f32.mrf.mxu1 }
  0xa0   :  { %v104_v34 = vadd.f32 %v103_v33, %v74_v32  ;;  %v791_v32 = vmov 128.0  }
  0xa1   :  { %778 = vrcp.f32 %v791_v32 }
  0xa2   :  { %116 = vst.msk [vmem:[%s1448_s4] sm:$0xff] %vm115_vm0, %v104_v34 }
  0xa7   :  { %v779_v33 = vpop.eup %778 }
  0xa8   :  { %v179_v35 = vpop.f32.mrf.mxu2  ;;  %v208_v36 = vpop.f32.mrf.mxu3  ;;  %v496_v34 = vmul.f32 128.0, %v779_v33  ;;  %vm500_vm4 = vweird.f32 %v779_v33 }
  0xa9   :  { %v209_v37 = vadd.f32 %v208_v36, %v179_v35  ;;  %v77_v38 = vpop.f32.mrf.mxu0  ;;  %v106_v39 = vpop.f32.mrf.mxu1 }
  0xaa   :  { %v107_v40 = vadd.f32 %v106_v39, %v77_v38  ;;  %v497_v35 = vsub.f32 1.0, %v496_v34 }
  0xab   :  { %224 = vrot.lane.b32.xlu0 %v209_v37, %s788_s1 }
  0xac   :  { %117 = vst.msk [vmem:[%s1448_s4 + $0x8] sm:$0xff] %vm115_vm0, %v107_v40  ;;  %v498_v36 = vmul.f32 %v779_v33, %v497_v35 }
  0xae   :  { %v499_v37 = vadd.f32 %v779_v33, %v498_v36 }
  0xb0   :  { %v501_v38 = vsel %vm500_vm4, %v779_v33, %v499_v37  ;;  %v578_v37 = vld [vmem:[%s1450_s3] sm:$0xff] }
  0xb2   :  { %v182_v41 = vpop.f32.mrf.mxu2  ;;  %v211_v42 = vpop.f32.mrf.mxu3 }
  0xb3   :  { %v80_v43 = vpop.f32.mrf.mxu0  ;;  %v109_v44 = vpop.f32.mrf.mxu1  ;;  %v212_v45 = vadd.f32 %v211_v42, %v182_v41 }
  0xb4   :  { %v110_v46 = vadd.f32 %v109_v44, %v80_v43 }
  0xb5   :  { %226 = vrot.lane.b32.xlu0 %v212_v45, %s788_s1 }
  0xb6   :  { %118 = vst.msk [vmem:[%s1448_s4 + $0x10] sm:$0xff] %vm115_vm0, %v110_v46 }
  0xbc   :  { %v185_v47 = vpop.f32.mrf.mxu2  ;;  %v214_v48 = vpop.f32.mrf.mxu3 }
  0xbd   :  { %v83_v49 = vpop.f32.mrf.mxu0  ;;  %v112_v50 = vpop.f32.mrf.mxu1  ;;  %v215_v51 = vadd.f32 %v214_v48, %v185_v47 }
  0xbe   :  { %v113_v52 = vadd.f32 %v112_v50, %v83_v49 }
  0xbf   :  { %228 = vrot.lane.b32.xlu1 %v215_v51, %s788_s1 }
  0xc0   :  { %119 = vst.msk [vmem:[%s1448_s4 + $0x18] sm:$0xff] %vm115_vm0, %v113_v52 }
  0xc6   :  { %v188_v53 = vpop.f32.mrf.mxu2  ;;  %v217_v54 = vpop.f32.mrf.mxu3 }
  0xc7   :  { %v218_v55 = vadd.f32 %v217_v54, %v188_v53  ;;  %v300_v56 = vpop.f32.mrf.mxu0  ;;  %v329_v57 = vpop.f32.mrf.mxu1 }
  0xc8   :  { %v330_v58 = vadd.f32 %v329_v57, %v300_v56 }
  0xc9   :  { %230 = vrot.lane.b32.xlu1 %v218_v55, %s788_s1  ;;  %v792_v55 = vmov 0  }
  0xca   :  { %345 = vrot.lane.b32.xlu2 %v330_v58, %s789_s29  ;;  %775 = vset.pattern.permute.xlu1 %v792_v55 }
  0xcb   :  { %776 = vset.pattern.permute.xlu2 %v792_v55  ;;  %777 = vset.pattern.permute.xlu0 %v792_v55 }
  0xcf   :  { %v303_v59 = vpop.f32.mrf.mxu0  ;;  %v332_v60 = vpop.f32.mrf.mxu1 }
  0xd0   :  { %v421_v61 = vpop.f32.mrf.mxu2  ;;  %v450_v62 = vpop.f32.mrf.mxu3  ;;  %v333_v5 = vadd.f32 %v332_v60, %v303_v59 }
  0xd1   :  { %v451_v63 = vadd.f32 %v450_v62, %v421_v61 }
  0xd3   :  { %466 = vrot.lane.b32.xlu2 %v451_v63, %s790_s30 }
  0xd7   :  { %v306_v0 = vpop.f32.mrf.mxu0  ;;  %v335_v1 = vpop.f32.mrf.mxu1 }
  0xd8   :  { %v336_v2 = vadd.f32 %v335_v1, %v306_v0  ;;  %v424_v3 = vpop.f32.mrf.mxu2  ;;  %v453_v4 = vpop.f32.mrf.mxu3  ;;  %v526_v0 = vld [vmem:[%s1449_s2] sm:$0xff] }
  0xd9   :  { %v454_v6 = vadd.f32 %v453_v4, %v424_v3 }
  0xda   :  { %349 = vrot.lane.b32.xlu0 %v336_v2, %s789_s29 }
  0xdb   :  { %347 = vrot.lane.b32.xlu2 %v333_v5, %s789_s29 }
  0xdf   :  { %v309_v7 = vpop.f32.mrf.mxu0  ;;  %v338_v8 = vpop.f32.mrf.mxu1 }
  0xe0   :  { %v339_v9 = vadd.f32 %v338_v8, %v309_v7  ;;  %v427_v10 = vpop.f32.mrf.mxu2  ;;  %v456_v11 = vpop.f32.mrf.mxu3 }
  0xe1   :  { %v457_v12 = vadd.f32 %v456_v11, %v427_v10 }
  0xe2   :  { %468 = vrot.lane.b32.xlu0 %v454_v6, %s790_s30  ;;  %351 = vrot.lane.b32.xlu1 %v339_v9, %s789_s29 }
  0xe8   :  { %v430_v13 = vpop.f32.mrf.mxu2  ;;  %v459_v14 = vpop.f32.mrf.mxu3 }
  0xe9   :  { %v460_v15 = vadd.f32 %v459_v14, %v430_v13 }
  0xea   :  { %470 = vrot.lane.b32.xlu1 %v457_v12, %s790_s30 }
  0xeb   :  { %472 = vrot.lane.b32.xlu2 %v460_v15, %s790_s30 }
 0x11d   :  { %v225_v16 = vpop.permute.xlu0 %224 }
 0x11e   :  { %237 = vst.msk [vmem:[%s1448_s4] sm:$0xff] %vm236_vm1, %v225_v16 }
 0x124   :  { %v346_v17 = vpop.permute.xlu2 %345 }
 0x125   :  { %358 = vst.msk [vmem:[%s1448_s4] sm:$0xff] %vm357_vm2, %v346_v17 }
 0x127   :  { %v227_v18 = vpop.permute.xlu0 %226 }
 0x128   :  { %238 = vst.msk [vmem:[%s1448_s4 + $0x8] sm:$0xff] %vm236_vm1, %v227_v18 }
 0x12d   :  { %v467_v19 = vpop.permute.xlu2 %466 }
 0x12e   :  { %479 = vst.msk [vmem:[%s1448_s4] sm:$0xff] %vm478_vm3, %v467_v19 }
 0x131   :  { %v229_v20 = vpop.permute.xlu1 %228 }
 0x132   :  { %239 = vst.msk [vmem:[%s1448_s4 + $0x10] sm:$0xff] %vm236_vm1, %v229_v20  ;;  %v527_v20 = vld [vmem:[%s1449_s2 + $0x8] sm:$0xff] }
 0x135   :  { %v348_v21 = vpop.permute.xlu2 %347  ;;  %v1337_v22 = vld [vmem:[%s1448_s4] sm:$0xff] }
 0x136   :  { %359 = vst.msk [vmem:[%s1448_s4 + $0x8] sm:$0xff] %vm357_vm2, %v348_v21  ;;  %487 = vadd.xlane.f32.xlu0 %v1337_v22 }
 0x13b   :  { %v231_v23 = vpop.permute.xlu1 %230 }
 0x13c   :  { %240 = vst.msk [vmem:[%s1448_s4 + $0x18] sm:$0xff] %vm236_vm1, %v231_v23 }
 0x145   :  { %v473_v25 = vpop.permute.xlu2 %472 }
 0x14c   :  { %v350_v24 = vpop.permute.xlu0 %349 }
 0x14d   :  { %360 = vst.msk [vmem:[%s1448_s4 + $0x10] sm:$0xff] %vm357_vm2, %v350_v24 }
 0x154   :  { %v469_v26 = vpop.permute.xlu0 %468  ;;  %v352_v27 = vpop.permute.xlu1 %351 }
 0x155   :  { %480 = vst.msk [vmem:[%s1448_s4 + $0x8] sm:$0xff] %vm478_vm3, %v469_v26 }
 0x156   :  { %361 = vst.msk [vmem:[%s1448_s4 + $0x18] sm:$0xff] %vm357_vm2, %v352_v27  ;;  %v579_v27 = vld [vmem:[%s1450_s3 + $0x8] sm:$0xff] }
 0x157   :  { %482 = vst.msk [vmem:[%s1448_s4 + $0x18] sm:$0xff] %vm478_vm3, %v473_v25 }
 0x15c   :  { %v471_v28 = vpop.permute.xlu1 %470  ;;  %v1367_v29 = vld [vmem:[%s1448_s4 + $0x8] sm:$0xff] }
 0x15d   :  { %481 = vst.msk [vmem:[%s1448_s4 + $0x10] sm:$0xff] %vm478_vm3, %v471_v28  ;;  %489 = vadd.xlane.f32.xlu1 %v1367_v29 }
 0x15e   :  { %v1383_v31 = vld [vmem:[%s1448_s4 + $0x18] sm:$0xff] }
 0x164   :  { %v1377_v30 = vld [vmem:[%s1448_s4 + $0x10] sm:$0xff] }
 0x165   :  { %491 = vadd.xlane.f32.xlu2 %v1377_v30 }
 0x16d   :  { %493 = vadd.xlane.f32.xlu2 %v1383_v31 }
 0x1a9   :  { %v488_v39 = vpop.xlane.xlu0 %487 }
 0x1aa   :  { %v1386_v40 = vmul.f32 %v501_v38, %v488_v39 }
 0x1ac   :  { %v506_v41 = vsub.f32 %v1337_v22, %v1386_v40 }
 0x1ae   :  { %v510_v42 = vmul.f32 %v506_v41, %v506_v41 }
 0x1b0   :  { %514 = vadd.xlane.f32.xlu0 %v510_v42 }
 0x1d0   :  { %v490_v43 = vpop.xlane.xlu1 %489 }
 0x1d1   :  { %v1390_v44 = vmul.f32 %v501_v38, %v490_v43 }
 0x1d3   :  { %v507_v45 = vsub.f32 %v1367_v29, %v1390_v44 }
 0x1d5   :  { %v511_v46 = vmul.f32 %v507_v45, %v507_v45 }
 0x1d7   :  { %516 = vadd.xlane.f32.xlu1 %v511_v46 }
 0x1d8   :  { %v492_v47 = vpop.xlane.xlu2 %491 }
 0x1d9   :  { %v1394_v48 = vmul.f32 %v501_v38, %v492_v47  ;;  %v529_v47 = vld [vmem:[%s1449_s2 + $0x18] sm:$0xff] }
 0x1db   :  { %v508_v49 = vsub.f32 %v1377_v30, %v1394_v48 }
 0x1dd   :  { %v512_v50 = vmul.f32 %v508_v49, %v508_v49 }
 0x1df   :  { %518 = vadd.xlane.f32.xlu2 %v512_v50  ;;  %v580_v50 = vld [vmem:[%s1450_s3 + $0x10] sm:$0xff] }
 0x1e0   :  { %v494_v51 = vpop.xlane.xlu2 %493 }
 0x1e1   :  { %v1398_v52 = vmul.f32 %v501_v38, %v494_v51 }
 0x1e3   :  { %v509_v53 = vsub.f32 %v1383_v31, %v1398_v52 }
 0x1e5   :  { %v513_v54 = vmul.f32 %v509_v53, %v509_v53 }
 0x1e7   :  { %520 = vadd.xlane.f32.xlu0 %v513_v54 }
 0x223   :  { %v515_v56 = vpop.xlane.xlu0 %514 }
 0x224   :  { %v522_v57 = vmul.f32 %v515_v56, %v501_v38 }
 0x226   :  { %v530_v58 = vadd.f32 1e-05, %v522_v57 }
 0x228   :  { %780 = vrsqrt.f32 %v530_v58  ;;  %vm540_vm6 = vweird.f32 %v530_v58 }
 0x22e   :  { %v781_v59 = vpop.eup %780 }
 0x22f   :  { %v535_v60 = vmul.f32 %v781_v59, %v530_v58  ;;  %vm541_vm5 = vweird.f32 %v781_v59 }
 0x230   :  { %vm542_vm7 = vmor %vm540_vm6, %vm541_vm5 }
 0x231   :  { %v536_v61 = vmul.f32 %v781_v59, %v535_v60 }
 0x233   :  { %v537_v62 = vmul.f32 0.5, %v536_v61 }
 0x235   :  { %v538_v63 = vsub.f32 1.5, %v537_v62 }
 0x237   :  { %v539_v1 = vmul.f32 %v781_v59, %v538_v63 }
 0x239   :  { %v543_v2 = vsel %vm542_vm7, %v781_v59, %v539_v1 }
 0x23a   :  { %v574_v3 = vmul.f32 %v543_v2, %v526_v0 }
 0x23c   :  { %592 = vperm.xlu1 %775, %v574_v3   ;;  %v582_v35 = vmul.f32 %v574_v3, %v1386_v40 }
 0x23e   :  { %v586_v43 = vsub.f32 %v578_v37, %v582_v35 }
 0x24a   :  { %v517_v4 = vpop.xlane.xlu1 %516 }
 0x24b   :  { %v523_v5 = vmul.f32 %v517_v4, %v501_v38 }
 0x24d   :  { %v531_v6 = vadd.f32 1e-05, %v523_v5 }
 0x24f   :  { %782 = vrsqrt.f32 %v531_v6  ;;  %vm550_vm9 = vweird.f32 %v531_v6 }
 0x252   :  { %v519_v7 = vpop.xlane.xlu2 %518 }
 0x253   :  { %v524_v8 = vmul.f32 %v519_v7, %v501_v38 }
 0x255   :  { %v783_v9 = vpop.eup %782  ;;  %v532_v10 = vadd.f32 1e-05, %v524_v8 }
 0x256   :  { %v545_v11 = vmul.f32 %v783_v9, %v531_v6  ;;  %vm551_vm8 = vweird.f32 %v783_v9 }
 0x257   :  { %784 = vrsqrt.f32 %v532_v10  ;;  %vm552_vm10 = vmor %vm550_vm9, %vm551_vm8  ;;  %vm560_vm12 = vweird.f32 %v532_v10 }
 0x258   :  { %v546_v12 = vmul.f32 %v783_v9, %v545_v11 }
 0x25a   :  { %v547_v13 = vmul.f32 0.5, %v546_v12  ;;  %v521_v14 = vpop.xlane.xlu0 %520 }
 0x25b   :  { %v525_v15 = vmul.f32 %v521_v14, %v501_v38  ;;  %v528_v38 = vld [vmem:[%s1449_s2 + $0x10] sm:$0xff] }
 0x25c   :  { %v548_v16 = vsub.f32 1.5, %v547_v13 }
 0x25d   :  { %v785_v17 = vpop.eup %784  ;;  %v533_v18 = vadd.f32 1e-05, %v525_v15 }
 0x25e   :  { %v555_v19 = vmul.f32 %v785_v17, %v532_v10  ;;  %v549_v21 = vmul.f32 %v783_v9, %v548_v16  ;;  %vm561_vm11 = vweird.f32 %v785_v17 }
 0x25f   :  { %786 = vrsqrt.f32 %v533_v18  ;;  %vm562_vm13 = vmor %vm560_vm12, %vm561_vm11  ;;  %vm570_vm15 = vweird.f32 %v533_v18 }
 0x260   :  { %v556_v23 = vmul.f32 %v785_v17, %v555_v19  ;;  %v553_v24 = vsel %vm552_vm10, %v783_v9, %v549_v21 }
 0x261   :  { %v575_v25 = vmul.f32 %v553_v24, %v527_v20 }
 0x262   :  { %v557_v26 = vmul.f32 0.5, %v556_v23 }
 0x263   :  { %597 = vperm.xlu2 %776, %v575_v25   ;;  %v583_v28 = vmul.f32 %v575_v25, %v1390_v44 }
 0x264   :  { %v558_v32 = vsub.f32 1.5, %v557_v26 }
 0x265   :  { %v787_v33 = vpop.eup %786  ;;  %v587_v34 = vsub.f32 %v579_v27, %v583_v28 }
 0x266   :  { %v565_v36 = vmul.f32 %v787_v33, %v533_v18  ;;  %v559_v39 = vmul.f32 %v785_v17, %v558_v32  ;;  %vm571_vm14 = vweird.f32 %v787_v33 }
 0x267   :  { %621 = vperm.xlu1 %775, %v587_v34   ;;  %vm572_vm0 = vmor %vm570_vm15, %vm571_vm14 }
 0x268   :  { %v566_v41 = vmul.f32 %v787_v33, %v565_v36  ;;  %v563_v42 = vsel %vm562_vm13, %v785_v17, %v559_v39 }
 0x269   :  { %v576_v44 = vmul.f32 %v563_v42, %v528_v38 }
 0x26a   :  { %v567_v45 = vmul.f32 0.5, %v566_v41 }
 0x26b   :  { %616 = vperm.xlu2 %776, %v586_v43   ;;  %602 = vperm.xlu0 %777, %v576_v44   ;;  %v584_v46 = vmul.f32 %v576_v44, %v1394_v48  ;;  %v581_v48 = vld [vmem:[%s1450_s3 + $0x18] sm:$0xff] }
 0x26c   :  { %v568_v40 = vsub.f32 1.5, %v567_v45 }
 0x26d   :  { %v588_v54 = vsub.f32 %v580_v50, %v584_v46 }
 0x26e   :  { %v569_v49 = vmul.f32 %v787_v33, %v568_v40 }
 0x270   :  { %v573_v51 = vsel %vm572_vm0, %v787_v33, %v569_v49 }
 0x271   :  { %v577_v53 = vmul.f32 %v573_v51, %v529_v47 }
 0x273   :  { %607 = vperm.xlu1 %775, %v577_v53   ;;  %626 = vperm.xlu2 %776, %v588_v54   ;;  %v585_v55 = vmul.f32 %v577_v53, %v1398_v52 }
 0x275   :  { %v589_v56 = vsub.f32 %v581_v48, %v585_v55 }
 0x27b   :  { %631 = vperm.xlu1 %775, %v589_v56  }
 0x2ae   :  { %v593_v58 = vpop.permute.xlu1 %592 }
 0x2af   :  { %v610_v59 = vmul.f32 %v593_v58, %v1337_v22 }
 0x2bd   :  { %v598_v57 = vpop.permute.xlu2 %597 }
 0x2be   :  { %v611_v63 = vmul.f32 %v598_v57, %v1367_v29 }
 0x2c5   :  { %v617_v60 = vpop.permute.xlu2 %616 }
 0x2c6   :  { %v634_v61 = vadd.f32 %v617_v60, %v610_v59 }
 0x2c8   :  { %v638_v62 = vmax.f32 %v634_v61, 0.0 }
 0x2ca   :  { %642 = vst [vmem:[%s1448_s4] sm:$0xff] %v638_v62 }
 0x2cd   :  { %v627_v22 = vpop.permute.xlu2 %626 }
 0x2d9   :  { %v622_v52 = vpop.permute.xlu1 %621 }
 0x2da   :  { %v635_v0 = vadd.f32 %v622_v52, %v611_v63 }
 0x2dc   :  { %v639_v1 = vmax.f32 %v635_v0, 0.0 }
 0x2dd   :  { %v603_v2 = vpop.permute.xlu0 %602 }
 0x2de   :  { %643 = vst [vmem:[%s1448_s4 + $0x8] sm:$0xff] %v639_v1  ;;  %v612_v3 = vmul.f32 %v603_v2, %v1377_v30 }
 0x2e0   :  { %v636_v4 = vadd.f32 %v627_v22, %v612_v3 }
 0x2e2   :  { %v640_v5 = vmax.f32 %v636_v4, 0.0 }
 0x2e4   :  { %644 = vst [vmem:[%s1448_s4 + $0x10] sm:$0xff] %v640_v5 }
 0x2e5   :  { %v608_v6 = vpop.permute.xlu1 %607 }
 0x2e6   :  { %v613_v29 = vmul.f32 %v608_v6, %v1383_v31 }
 0x2ed   :  { %v632_v7 = vpop.permute.xlu1 %631 }
 0x2ee   :  { %v637_v8 = vadd.f32 %v632_v7, %v613_v29 }
 0x2f0   :  { %v641_v9 = vmax.f32 %v637_v8, 0.0 }
 0x2f2   :  { %645 = vst [vmem:[%s1448_s4 + $0x18] sm:$0xff] %v641_v9 }

// kernel: gnet_forward.7
= control target key start
LH: loop header
LB: loop body
LE: loop exit
PB: predicated region body
PF: predicated region fallthrough
CT: control target
= control target key end

     0   :  { %s722_s0 = inlined_call_operand.vmem [shape: f32[4,128,128], index: 0, kind: input, shape index: {}]   ;;  %s723_s1 = inlined_call_operand.vmem [shape: f32[4,16,128], index: 1, kind: input, shape index: {}]   ;;  %s724_s2 = inlined_call_operand.vmem [shape: f32[16,1], index: 2, kind: input, shape index: {}]   ;;  %s725_s3 = inlined_call_operand.vmem [shape: f32[16,1], index: 3, kind: input, shape index: {}]   ;;  %s726_s4 = inlined_call_operand.vmem [shape: f32[16,512], index: 4, kind: output, shape index: {}]  }
   0x1   :  { %v373_v0 = vld [vmem:[%s722_s0 + $0x178] sm:$0xff]  ;;  %v372_v1 = vld [vmem:[%s722_s0 + $0x170] sm:$0xff]  ;;  %v371_v5 = vld [vmem:[%s722_s0 + $0x168] sm:$0xff] }
   0x2   :  { %v391_v2 = vld [vmem:[%s722_s0 + $0x1f8] sm:$0xff]  ;;  %125 = vmatpush.msra.mxu2 %v373_v0  ;;  %v390_v6 = vld [vmem:[%s722_s0 + $0x1f0] sm:$0xff]  ;;  %v389_v9 = vld [vmem:[%s722_s0 + $0x1e8] sm:$0xff] }
   0x3   :  { %170 = vmatpush.msra.mxu3 %v391_v2  ;;  %v34_v3 = vld [vmem:[%s722_s0 + $0x78] sm:$0xff]  ;;  %v33_v7 = vld [vmem:[%s722_s0 + $0x70] sm:$0xff]  ;;  %v32_v10 = vld [vmem:[%s722_s0 + $0x68] sm:$0xff] }
   0x4   :  { %v355_v4 = vld [vmem:[%s722_s0 + $0xf8] sm:$0xff]  ;;  %35 = vmatpush.msra.mxu0 %v34_v3  ;;  %v354_v8 = vld [vmem:[%s722_s0 + $0xf0] sm:$0xff]  ;;  %126 = vmatpush.msra.mxu2 %v372_v1  ;;  %v370_v11 = vld [vmem:[%s722_s0 + $0x160] sm:$0xff] }
   0x5   :  { %80 = vmatpush.msra.mxu1 %v355_v4  ;;  %171 = vmatpush.msra.mxu3 %v390_v6  ;;  %v353_v12 = vld [vmem:[%s722_s0 + $0xe8] sm:$0xff]  ;;  %v388_v13 = vld [vmem:[%s722_s0 + $0x1e0] sm:$0xff]  ;;  %v369_v16 = vld [vmem:[%s722_s0 + $0x158] sm:$0xff] }
   0x6   :  { %36 = vmatpush.msra.mxu0 %v33_v7  ;;  %127 = vmatpush.msra.mxu2 %v371_v5  ;;  %v31_v14 = vld [vmem:[%s722_s0 + $0x60] sm:$0xff]  ;;  %v387_v17 = vld [vmem:[%s722_s0 + $0x1d8] sm:$0xff]  ;;  %v368_v20 = vld [vmem:[%s722_s0 + $0x150] sm:$0xff] }
   0x7   :  { %81 = vmatpush.msra.mxu1 %v354_v8  ;;  %172 = vmatpush.msra.mxu3 %v389_v9  ;;  %v352_v15 = vld [vmem:[%s722_s0 + $0xe0] sm:$0xff]  ;;  %v30_v18 = vld [vmem:[%s722_s0 + $0x58] sm:$0xff]  ;;  %v386_v21 = vld [vmem:[%s722_s0 + $0x1d0] sm:$0xff] }
   0x8   :  { %37 = vmatpush.msra.mxu0 %v32_v10  ;;  %128 = vmatpush.msra.mxu2 %v370_v11  ;;  %v351_v19 = vld [vmem:[%s722_s0 + $0xd8] sm:$0xff]  ;;  %v29_v22 = vld [vmem:[%s722_s0 + $0x50] sm:$0xff]  ;;  %v367_v24 = vld [vmem:[%s722_s0 + $0x148] sm:$0xff] }
   0x9   :  { %82 = vmatpush.msra.mxu1 %v353_v12  ;;  %173 = vmatpush.msra.mxu3 %v388_v13  ;;  %v350_v23 = vld [vmem:[%s722_s0 + $0xd0] sm:$0xff]  ;;  %v385_v25 = vld [vmem:[%s722_s0 + $0x1c8] sm:$0xff]  ;;  %v366_v28 = vld [vmem:[%s722_s0 + $0x140] sm:$0xff] }
   0xa   :  { %38 = vmatpush.msra.mxu0 %v31_v14  ;;  %129 = vmatpush.msra.mxu2 %v369_v16  ;;  %v28_v26 = vld [vmem:[%s722_s0 + $0x48] sm:$0xff]  ;;  %v384_v29 = vld [vmem:[%s722_s0 + $0x1c0] sm:$0xff]  ;;  %v365_v32 = vld [vmem:[%s722_s0 + $0x138] sm:$0xff] }
   0xb   :  { %83 = vmatpush.msra.mxu1 %v352_v15  ;;  %174 = vmatpush.msra.mxu3 %v387_v17  ;;  %v349_v27 = vld [vmem:[%s722_s0 + $0xc8] sm:$0xff]  ;;  %v27_v30 = vld [vmem:[%s722_s0 + $0x40] sm:$0xff]  ;;  %v383_v33 = vld [vmem:[%s722_s0 + $0x1b8] sm:$0xff] }
   0xc   :  { %39 = vmatpush.msra.mxu0 %v30_v18  ;;  %130 = vmatpush.msra.mxu2 %v368_v20  ;;  %v348_v31 = vld [vmem:[%s722_s0 + $0xc0] sm:$0xff]  ;;  %v26_v34 = vld [vmem:[%s722_s0 + $0x38] sm:$0xff]  ;;  %v364_v36 = vld [vmem:[%s722_s0 + $0x130] sm:$0xff] }
   0xd   :  { %84 = vmatpush.msra.mxu1 %v351_v19  ;;  %175 = vmatpush.msra.mxu3 %v386_v21  ;;  %v347_v35 = vld [vmem:[%s722_s0 + $0xb8] sm:$0xff]  ;;  %v382_v37 = vld [vmem:[%s722_s0 + $0x1b0] sm:$0xff]  ;;  %v363_v40 = vld [vmem:[%s722_s0 + $0x128] sm:$0xff] }
   0xe   :  { %40 = vmatpush.msra.mxu0 %v29_v22  ;;  %131 = vmatpush.msra.mxu2 %v367_v24  ;;  %v25_v38 = vld [vmem:[%s722_s0 + $0x30] sm:$0xff]  ;;  %v381_v41 = vld [vmem:[%s722_s0 + $0x1a8] sm:$0xff]  ;;  %v362_v44 = vld [vmem:[%s722_s0 + $0x120] sm:$0xff]  ;;  %v403_v22 = vmov 512.0  }
   0xf   :  { %85 = vmatpush.msra.mxu1 %v350_v23  ;;  %176 = vmatpush.msra.mxu3 %v385_v25  ;;  %v346_v39 = vld [vmem:[%s722_s0 + $0xb0] sm:$0xff]  ;;  %v24_v42 = vld [vmem:[%s722_s0 + $0x28] sm:$0xff]  ;;  %v380_v45 = vld [vmem:[%s722_s0 + $0x1a0] sm:$0xff]  ;;  %397 = vrcp.f32 %v403_v22 }
  0x10   :  { %41 = vmatpush.msra.mxu0 %v28_v26  ;;  %132 = vmatpush.msra.mxu2 %v366_v28  ;;  %v345_v43 = vld [vmem:[%s722_s0 + $0xa8] sm:$0xff]  ;;  %v23_v46 = vld [vmem:[%s722_s0 + $0x20] sm:$0xff]  ;;  %v361_v48 = vld [vmem:[%s722_s0 + $0x118] sm:$0xff] }
  0x11   :  { %86 = vmatpush.msra.mxu1 %v349_v27  ;;  %177 = vmatpush.msra.mxu3 %v384_v29  ;;  %v344_v47 = vld [vmem:[%s722_s0 + $0xa0] sm:$0xff]  ;;  %v379_v49 = vld [vmem:[%s722_s0 + $0x198] sm:$0xff]  ;;  %v360_v52 = vld [vmem:[%s722_s0 + $0x110] sm:$0xff] }
  0x12   :  { %42 = vmatpush.msra.mxu0 %v27_v30  ;;  %133 = vmatpush.msra.mxu2 %v365_v32  ;;  %v22_v50 = vld [vmem:[%s722_s0 + $0x18] sm:$0xff]  ;;  %v378_v53 = vld [vmem:[%s722_s0 + $0x190] sm:$0xff]  ;;  %v359_v56 = vld [vmem:[%s722_s0 + $0x108] sm:$0xff] }
  0x13   :  { %87 = vmatpush.msra.mxu1 %v348_v31  ;;  %178 = vmatpush.msra.mxu3 %v383_v33  ;;  %v343_v51 = vld [vmem:[%s722_s0 + $0x98] sm:$0xff]  ;;  %v21_v54 = vld [vmem:[%s722_s0 + $0x10] sm:$0xff]  ;;  %v377_v57 = vld [vmem:[%s722_s0 + $0x188] sm:$0xff] }
  0x14   :  { %43 = vmatpush.msra.mxu0 %v26_v34  ;;  %134 = vmatpush.msra.mxu2 %v364_v36  ;;  %v342_v55 = vld [vmem:[%s722_s0 + $0x90] sm:$0xff]  ;;  %v20_v58 = vld [vmem:[%s722_s0 + $0x8] sm:$0xff]  ;;  %v358_v60 = vld [vmem:[%s722_s0 + $0x100] sm:$0xff] }
  0x15   :  { %88 = vmatpush.msra.mxu1 %v347_v35  ;;  %179 = vmatpush.msra.mxu3 %v382_v37  ;;  %v341_v59 = vld [vmem:[%s722_s0 + $0x88] sm:$0xff]  ;;  %v376_v61 = vld [vmem:[%s722_s0 + $0x180] sm:$0xff]  ;;  %v374_v63 = vld [vmem:[%s723_s1 + $0x30] sm:$0xff]  ;;  %v398_v23 = vpop.eup %397 }
  0x16   :  { %44 = vmatpush.msra.mxu0 %v25_v38  ;;  %135 = vmatpush.msra.mxu2 %v363_v40  ;;  %v356_v62 = vld [vmem:[%s723_s1 + $0x20] sm:$0xff]  ;;  %v338_v3 = vld [vmem:[%s723_s1 + $0x10] sm:$0xff]  ;;  %v357_v4 = vld [vmem:[%s723_s1 + $0x28] sm:$0xff]  ;;  %v214_v24 = vmul.f32 512.0, %v398_v23  ;;  %vm218_vm0 = vweird.f32 %v398_v23 }
  0x17   :  { %89 = vmatpush.msra.mxu1 %v346_v39  ;;  %180 = vmatpush.msra.mxu3 %v381_v41  ;;  %v19_v0 = vld [vmem:[%s722_s0] sm:$0xff]  ;;  %v375_v5 = vld [vmem:[%s723_s1 + $0x38] sm:$0xff]  ;;  %v18_v6 = vld [vmem:[%s723_s1 + $0x8] sm:$0xff] }
  0x18   :  { %45 = vmatpush.msra.mxu0 %v24_v42  ;;  %136 = vmatpush.msra.mxu2 %v362_v44  ;;  %v340_v1 = vld [vmem:[%s722_s0 + $0x80] sm:$0xff]  ;;  %v339_v7 = vld [vmem:[%s723_s1 + $0x18] sm:$0xff]  ;;  %v215_v25 = vsub.f32 1.0, %v214_v24 }
  0x19   :  { %90 = vmatpush.msra.mxu1 %v345_v43  ;;  %181 = vmatpush.msra.mxu3 %v380_v45  ;;  %v17_v2 = vld [vmem:[%s723_s1] sm:$0xff] }
  0x1a   :  { %46 = vmatpush.msra.mxu0 %v23_v46  ;;  %137 = vmatpush.msra.mxu2 %v361_v48  ;;  %v216_v26 = vmul.f32 %v398_v23, %v215_v25 }
  0x1b   :  { %91 = vmatpush.msra.mxu1 %v344_v47  ;;  %182 = vmatpush.msra.mxu3 %v379_v49 }
  0x1c   :  { %47 = vmatpush.msra.mxu0 %v22_v50  ;;  %138 = vmatpush.msra.mxu2 %v360_v52  ;;  %v217_v27 = vadd.f32 %v398_v23, %v216_v26 }
  0x1d   :  { %92 = vmatpush.msra.mxu1 %v343_v51  ;;  %183 = vmatpush.msra.mxu3 %v378_v53 }
  0x1e   :  { %48 = vmatpush.msra.mxu0 %v21_v54  ;;  %139 = vmatpush.msra.mxu2 %v359_v56  ;;  %v219_v28 = vsel %vm218_vm0, %v398_v23, %v217_v27  ;;  %v251_v23 = vld [vmem:[%s724_s2 + $0x8] sm:$0xff] }
  0x1f   :  { %93 = vmatpush.msra.mxu1 %v342_v55  ;;  %184 = vmatpush.msra.mxu3 %v377_v57  ;;  %v404_v55 = vmov 0   ;;  %v277_v27 = vld [vmem:[%s725_s3 + $0x8] sm:$0xff] }
  0x20   :  { %49 = vmatpush.msra.mxu0 %v20_v58  ;;  %140 = vmatpush.msra.mxu2 %v358_v60 }
  0x21   :  { %94 = vmatpush.msra.mxu1 %v341_v59  ;;  %185 = vmatpush.msra.mxu3 %v376_v61 }
  0x22   :  { %141 = vmatmul.f32.vlgmr.msra.gmra.mxu2 %v356_v62  ;;  %186 = vmatmul.f32.vlgmr.msra.gmra.mxu3 %v374_v63 }
  0x23   :  { %50 = vmatpush.msra.mxu0 %v19_v0  ;;  %95 = vmatpush.msra.mxu1 %v340_v1 }
  0x24   :  { %51 = vmatmul.f32.vlgmr.msra.gmra.mxu0 %v17_v2  ;;  %96 = vmatmul.f32.vlgmr.msra.gmra.mxu1 %v338_v3 }
  0x25   :  { %394 = vset.pattern.permute.xlu2 %v404_v55  ;;  %395 = vset.pattern.permute.xlu0 %v404_v55 }
  0x26   :  { %396 = vset.pattern.permute.xlu1 %v404_v55 }
  0x2a   :  { %144 = vmatmul.f32.gmra.mxu2 %v357_v4  ;;  %189 = vmatmul.f32.gmra.mxu3 %v375_v5  ;;  %v250_v5 = vld [vmem:[%s724_s2] sm:$0xff] }
  0x2c   :  { %54 = vmatmul.f32.gmra.mxu0 %v18_v6  ;;  %99 = vmatmul.f32.gmra.mxu1 %v339_v7 }
  0xa1   :  { %v646_v8 = vpop.f32.mrf.mxu0  ;;  %v648_v9 = vpop.f32.mrf.mxu1 }
  0xa2   :  { %v203_v10 = vadd.f32 %v648_v9, %v646_v8 }
  0xa5   :  { %v652_v11 = vpop.f32.mrf.mxu2  ;;  %v654_v12 = vpop.f32.mrf.mxu3 }
  0xa6   :  { %v204_v13 = vadd.f32 %v203_v10, %v652_v11 }
  0xa8   :  { %v205_v14 = vadd.f32 %v204_v13, %v654_v12 }
  0xa9   :  { %v658_v15 = vpop.f32.mrf.mxu0  ;;  %v660_v16 = vpop.f32.mrf.mxu1 }
  0xaa   :  { %206 = vadd.xlane.f32.xlu0 %v205_v14  ;;  %v208_v17 = vadd.f32 %v660_v16, %v658_v15 }
  0xad   :  { %v664_v18 = vpop.f32.mrf.mxu2  ;;  %v666_v19 = vpop.f32.mrf.mxu3 }
  0xae   :  { %v209_v20 = vadd.f32 %v208_v17, %v664_v18  ;;  %v276_v17 = vld [vmem:[%s725_s3] sm:$0xff] }
  0xb0   :  { %v210_v21 = vadd.f32 %v209_v20, %v666_v19 }
  0xb2   :  { %211 = vadd.xlane.f32.xlu0 %v210_v21 }
 0x11d   :  { %v207_v29 = vpop.xlane.xlu0 %206 }
 0x11e   :  { %v220_v30 = vmul.f32 %v219_v28, %v207_v29 }
 0x120   :  { %v222_v31 = vsub.f32 %v646_v8, %v220_v30  ;;  %v223_v32 = vsub.f32 %v648_v9, %v220_v30  ;;  %v224_v33 = vsub.f32 %v652_v11, %v220_v30  ;;  %v225_v34 = vsub.f32 %v654_v12, %v220_v30 }
 0x122   :  { %v230_v35 = vmul.f32 %v222_v31, %v222_v31  ;;  %v231_v36 = vmul.f32 %v223_v32, %v223_v32  ;;  %v232_v37 = vmul.f32 %v224_v33, %v224_v33  ;;  %v233_v41 = vmul.f32 %v225_v34, %v225_v34 }
 0x124   :  { %v238_v38 = vadd.f32 %v231_v36, %v230_v35 }
 0x125   :  { %v212_v39 = vpop.xlane.xlu0 %211 }
 0x126   :  { %v221_v40 = vmul.f32 %v219_v28, %v212_v39  ;;  %v239_v42 = vadd.f32 %v238_v38, %v232_v37 }
 0x128   :  { %v240_v43 = vadd.f32 %v239_v42, %v233_v41  ;;  %v226_v44 = vsub.f32 %v658_v15, %v221_v40  ;;  %v227_v45 = vsub.f32 %v660_v16, %v221_v40  ;;  %v228_v46 = vsub.f32 %v664_v18, %v221_v40 }
 0x129   :  { %v229_v47 = vsub.f32 %v666_v19, %v221_v40 }
 0x12a   :  { %241 = vadd.xlane.f32.xlu1 %v240_v43  ;;  %v234_v48 = vmul.f32 %v226_v44, %v226_v44  ;;  %v235_v49 = vmul.f32 %v227_v45, %v227_v45  ;;  %v236_v50 = vmul.f32 %v228_v46, %v228_v46 }
 0x12b   :  { %v237_v52 = vmul.f32 %v229_v47, %v229_v47 }
 0x12c   :  { %v243_v51 = vadd.f32 %v235_v49, %v234_v48 }
 0x12e   :  { %v244_v53 = vadd.f32 %v243_v51, %v236_v50 }
 0x130   :  { %v245_v54 = vadd.f32 %v244_v53, %v237_v52 }
 0x132   :  { %246 = vadd.xlane.f32.xlu1 %v245_v54 }
 0x19d   :  { %v242_v56 = vpop.xlane.xlu1 %241 }
 0x19e   :  { %v248_v57 = vmul.f32 %v242_v56, %v219_v28 }
 0x1a0   :  { %v252_v58 = vadd.f32 1e-05, %v248_v57 }
 0x1a2   :  { %399 = vrsqrt.f32 %v252_v58  ;;  %vm260_vm2 = vweird.f32 %v252_v58 }
 0x1a5   :  { %v247_v59 = vpop.xlane.xlu1 %246 }
 0x1a6   :  { %v249_v60 = vmul.f32 %v247_v59, %v219_v28 }
 0x1a8   :  { %v400_v61 = vpop.eup %399  ;;  %v253_v62 = vadd.f32 1e-05, %v249_v60 }
 0x1a9   :  { %v255_v63 = vmul.f32 %v400_v61, %v252_v58  ;;  %vm261_vm1 = vweird.f32 %v400_v61 }
 0x1aa   :  { %401 = vrsqrt.f32 %v253_v62  ;;  %vm262_vm3 = vmor %vm260_vm2, %vm261_vm1  ;;  %vm270_vm5 = vweird.f32 %v253_v62 }
 0x1ab   :  { %v256_v0 = vmul.f32 %v400_v61, %v255_v63 }
 0x1ad   :  { %v257_v1 = vmul.f32 0.5, %v256_v0 }
 0x1af   :  { %v258_v2 = vsub.f32 1.5, %v257_v1 }
 0x1b0   :  { %v402_v3 = vpop.eup %401 }
 0x1b1   :  { %v265_v4 = vmul.f32 %v402_v3, %v253_v62  ;;  %v259_v6 = vmul.f32 %v400_v61, %v258_v2  ;;  %vm271_vm4 = vweird.f32 %v402_v3 }
 0x1b2   :  { %vm272_vm6 = vmor %vm270_vm5, %vm271_vm4 }
 0x1b3   :  { %v266_v7 = vmul.f32 %v402_v3, %v265_v4  ;;  %v263_v10 = vsel %vm262_vm3, %v400_v61, %v259_v6 }
 0x1b4   :  { %v274_v13 = vmul.f32 %v263_v10, %v250_v5 }
 0x1b5   :  { %v267_v14 = vmul.f32 0.5, %v266_v7 }
 0x1b6   :  { %284 = vperm.xlu2 %394, %v274_v13   ;;  %v278_v20 = vmul.f32 %v274_v13, %v220_v30 }
 0x1b7   :  { %v268_v21 = vsub.f32 1.5, %v267_v14 }
 0x1b8   :  { %v280_v22 = vsub.f32 %v276_v17, %v278_v20 }
 0x1b9   :  { %v269_v24 = vmul.f32 %v402_v3, %v268_v21 }
 0x1ba   :  { %302 = vperm.xlu0 %395, %v280_v22  }
 0x1bb   :  { %v273_v25 = vsel %vm272_vm6, %v402_v3, %v269_v24 }
 0x1bc   :  { %v275_v26 = vmul.f32 %v273_v25, %v251_v23 }
 0x1be   :  { %289 = vperm.xlu2 %394, %v275_v26   ;;  %v279_v28 = vmul.f32 %v275_v26, %v221_v40 }
 0x1c0   :  { %v281_v29 = vsub.f32 %v277_v27, %v279_v28 }
 0x1c2   :  { %307 = vperm.xlu1 %396, %v281_v29  }
 0x210   :  { %v285_v30 = vpop.permute.xlu2 %284 }
 0x211   :  { %v292_v31 = vmul.f32 %v285_v30, %v646_v8  ;;  %v293_v32 = vmul.f32 %v285_v30, %v648_v9  ;;  %v294_v33 = vmul.f32 %v285_v30, %v652_v11  ;;  %v295_v34 = vmul.f32 %v285_v30, %v654_v12 }
 0x218   :  { %v290_v40 = vpop.permute.xlu2 %289 }
 0x219   :  { %v296_v8 = vmul.f32 %v290_v40, %v658_v15  ;;  %v297_v9 = vmul.f32 %v290_v40, %v660_v16  ;;  %v298_v11 = vmul.f32 %v290_v40, %v664_v18  ;;  %v299_v12 = vmul.f32 %v290_v40, %v666_v19 }
 0x22c   :  { %v303_v35 = vpop.permute.xlu0 %302 }
 0x22d   :  { %v310_v36 = vadd.f32 %v303_v35, %v292_v31  ;;  %v311_v37 = vadd.f32 %v303_v35, %v293_v32  ;;  %v312_v38 = vadd.f32 %v303_v35, %v294_v33  ;;  %v313_v39 = vadd.f32 %v303_v35, %v295_v34 }
 0x22f   :  { %v318_v41 = vmax.f32 %v310_v36, 0.0  ;;  %v319_v42 = vmax.f32 %v311_v37, 0.0  ;;  %v320_v43 = vmax.f32 %v312_v38, 0.0  ;;  %v321_v44 = vmax.f32 %v313_v39, 0.0 }
 0x231   :  { %326 = vst [vmem:[%s726_s4] sm:$0xff] %v318_v41 }
 0x232   :  { %327 = vst [vmem:[%s726_s4 + $0x8] sm:$0xff] %v319_v42 }
 0x233   :  { %328 = vst [vmem:[%s726_s4 + $0x10] sm:$0xff] %v320_v43 }
 0x234   :  { %329 = vst [vmem:[%s726_s4 + $0x18] sm:$0xff] %v321_v44  ;;  %v308_v45 = vpop.permute.xlu1 %307 }
 0x235   :  { %v314_v46 = vadd.f32 %v308_v45, %v296_v8  ;;  %v315_v47 = vadd.f32 %v308_v45, %v297_v9  ;;  %v316_v48 = vadd.f32 %v308_v45, %v298_v11  ;;  %v317_v49 = vadd.f32 %v308_v45, %v299_v12 }
 0x237   :  { %v322_v15 = vmax.f32 %v314_v46, 0.0  ;;  %v323_v50 = vmax.f32 %v315_v47, 0.0  ;;  %v324_v16 = vmax.f32 %v316_v48, 0.0  ;;  %v325_v51 = vmax.f32 %v317_v49, 0.0 }
 0x239   :  { %330 = vst [vmem:[%s726_s4 + $0x20] sm:$0xff] %v322_v15 }
 0x23a   :  { %331 = vst [vmem:[%s726_s4 + $0x28] sm:$0xff] %v323_v50 }
 0x23b   :  { %332 = vst [vmem:[%s726_s4 + $0x30] sm:$0xff] %v324_v16 }
 0x23c   :  { %333 = vst [vmem:[%s726_s4 + $0x38] sm:$0xff] %v325_v51 }

// kernel: gnet_forward.8
= control target key start
LH: loop header
LB: loop body
LE: loop exit
PB: predicated region body
PF: predicated region fallthrough
CT: control target
= control target key end

     0   :  { %vm50_vm0 = vcmask 523264   ;;  %s1404_s0 = inlined_call_operand.vmem [shape: f32[4,64,512], index: 0, kind: input, shape index: {}]   ;;  %s1405_s1 = inlined_call_operand.vmem [shape: f32[4,8,64], index: 1, kind: input, shape index: {}]   ;;  %s1406_s2 = inlined_call_operand.vmem [shape: f32[8,1], index: 2, kind: input, shape index: {}]   ;;  %s1407_s3 = inlined_call_operand.vmem [shape: f32[8,1], index: 3, kind: input, shape index: {}]   ;;  %s1408_s4 = inlined_call_operand.vmem [shape: f32[8,2048], index: 4, kind: output, shape index: {}]  }
   0x1   :  { %v46_v0 = vld [vmem:[%s1404_s0 + $0xe0] sm:$0xff]  ;;  %v48_v1 = vld [vmem:[%s1404_s0 + $0xf0] sm:$0xff]  ;;  %v47_v3 = vld [vmem:[%s1404_s0 + $0xe8] sm:$0xff] }
   0x2   :  { %v42_v2 = vld [vmem:[%s1404_s0 + $0xc0] sm:$0xff]  ;;  %62 = vmatpush.msra.mxu0 %v46_v0  ;;  %102 = vmatpush.msra.mxu2 %v48_v1  ;;  %v44_v4 = vld [vmem:[%s1404_s0 + $0xd0] sm:$0xff]  ;;  %v49_v5 = vld [vmem:[%s1404_s0 + $0xf8] sm:$0xff] }
   0x3   :  { %82 = vmatpush.msra.mxu1 %v47_v3  ;;  %122 = vmatpush.msra.mxu3 %v49_v5  ;;  %v38_v6 = vld [vmem:[%s1404_s0 + $0xa0] sm:$0xff]  ;;  %v43_v7 = vld [vmem:[%s1404_s0 + $0xc8] sm:$0xff]  ;;  %v40_v8 = vld [vmem:[%s1404_s0 + $0xb0] sm:$0xff] }
   0x4   :  { %63 = vmatpush.msra.mxu0 %v42_v2  ;;  %103 = vmatpush.msra.mxu2 %v44_v4  ;;  %v45_v9 = vld [vmem:[%s1404_s0 + $0xd8] sm:$0xff]  ;;  %v39_v10 = vld [vmem:[%s1404_s0 + $0xa8] sm:$0xff]  ;;  %v34_v11 = vld [vmem:[%s1404_s0 + $0x80] sm:$0xff] }
   0x5   :  { %83 = vmatpush.msra.mxu1 %v43_v7  ;;  %123 = vmatpush.msra.mxu3 %v45_v9  ;;  %v36_v12 = vld [vmem:[%s1404_s0 + $0x90] sm:$0xff]  ;;  %v41_v13 = vld [vmem:[%s1404_s0 + $0xb8] sm:$0xff]  ;;  %v35_v14 = vld [vmem:[%s1404_s0 + $0x88] sm:$0xff] }
   0x6   :  { %64 = vmatpush.msra.mxu0 %v38_v6  ;;  %104 = vmatpush.msra.mxu2 %v40_v8  ;;  %v37_v15 = vld [vmem:[%s1404_s0 + $0x98] sm:$0xff]  ;;  %v30_v16 = vld [vmem:[%s1404_s0 + $0x60] sm:$0xff]  ;;  %v32_v17 = vld [vmem:[%s1404_s0 + $0x70] sm:$0xff] }
   0x7   :  { %84 = vmatpush.msra.mxu1 %v39_v10  ;;  %124 = vmatpush.msra.mxu3 %v41_v13  ;;  %v31_v18 = vld [vmem:[%s1404_s0 + $0x68] sm:$0xff]  ;;  %v33_v19 = vld [vmem:[%s1404_s0 + $0x78] sm:$0xff]  ;;  %v26_v20 = vld [vmem:[%s1404_s0 + $0x40] sm:$0xff] }
   0x8   :  { %65 = vmatpush.msra.mxu0 %v34_v11  ;;  %105 = vmatpush.msra.mxu2 %v36_v12  ;;  %v28_v21 = vld [vmem:[%s1404_s0 + $0x50] sm:$0xff]  ;;  %v27_v22 = vld [vmem:[%s1404_s0 + $0x48] sm:$0xff]  ;;  %v29_v23 = vld [vmem:[%s1404_s0 + $0x58] sm:$0xff] }
   0x9   :  { %85 = vmatpush.msra.mxu1 %v35_v14  ;;  %125 = vmatpush.msra.mxu3 %v37_v15  ;;  %v22_v24 = vld [vmem:[%s1404_s0 + $0x20] sm:$0xff]  ;;  %v24_v25 = vld [vmem:[%s1404_s0 + $0x30] sm:$0xff]  ;;  %v23_v26 = vld [vmem:[%s1404_s0 + $0x28] sm:$0xff] }
   0xa   :  { %66 = vmatpush.msra.mxu0 %v30_v16  ;;  %106 = vmatpush.msra.mxu2 %v32_v17  ;;  %v25_v27 = vld [vmem:[%s1404_s0 + $0x38] sm:$0xff]  ;;  %v18_v28 = vld [vmem:[%s1404_s0] sm:$0xff]  ;;  %v20_v29 = vld [vmem:[%s1404_s0 + $0x10] sm:$0xff] }
   0xb   :  { %86 = vmatpush.msra.mxu1 %v31_v18  ;;  %126 = vmatpush.msra.mxu3 %v33_v19  ;;  %v722_v30 = vld [vmem:[%s1404_s0 + $0x1e0] sm:$0xff]  ;;  %v724_v31 = vld [vmem:[%s1404_s0 + $0x1f0] sm:$0xff]  ;;  %v19_v32 = vld [vmem:[%s1404_s0 + $0x8] sm:$0xff] }
   0xc   :  { %67 = vmatpush.msra.mxu0 %v26_v20  ;;  %107 = vmatpush.msra.mxu2 %v28_v21  ;;  %v21_v33 = vld [vmem:[%s1404_s0 + $0x18] sm:$0xff]  ;;  %v718_v34 = vld [vmem:[%s1404_s0 + $0x1c0] sm:$0xff]  ;;  %v723_v35 = vld [vmem:[%s1404_s0 + $0x1e8] sm:$0xff] }
   0xd   :  { %87 = vmatpush.msra.mxu1 %v27_v22  ;;  %127 = vmatpush.msra.mxu3 %v29_v23  ;;  %v720_v36 = vld [vmem:[%s1404_s0 + $0x1d0] sm:$0xff]  ;;  %v725_v37 = vld [vmem:[%s1404_s0 + $0x1f8] sm:$0xff]  ;;  %v714_v38 = vld [vmem:[%s1404_s0 + $0x1a0] sm:$0xff] }
   0xe   :  { %68 = vmatpush.msra.mxu0 %v22_v24  ;;  %108 = vmatpush.msra.mxu2 %v24_v25  ;;  %v719_v39 = vld [vmem:[%s1404_s0 + $0x1c8] sm:$0xff]  ;;  %v716_v40 = vld [vmem:[%s1404_s0 + $0x1b0] sm:$0xff]  ;;  %v721_v41 = vld [vmem:[%s1404_s0 + $0x1d8] sm:$0xff] }
   0xf   :  { %88 = vmatpush.msra.mxu1 %v23_v26  ;;  %128 = vmatpush.msra.mxu3 %v25_v27  ;;  %v710_v42 = vld [vmem:[%s1404_s0 + $0x180] sm:$0xff]  ;;  %v715_v43 = vld [vmem:[%s1404_s0 + $0x1a8] sm:$0xff]  ;;  %v712_v44 = vld [vmem:[%s1404_s0 + $0x190] sm:$0xff] }
  0x10   :  { %69 = vmatpush.msra.mxu0 %v18_v28  ;;  %109 = vmatpush.msra.mxu2 %v20_v29  ;;  %v717_v45 = vld [vmem:[%s1404_s0 + $0x1b8] sm:$0xff]  ;;  %v706_v46 = vld [vmem:[%s1404_s0 + $0x160] sm:$0xff]  ;;  %v711_v47 = vld [vmem:[%s1404_s0 + $0x188] sm:$0xff] }
  0x11   :  { %89 = vmatpush.msra.mxu1 %v19_v32  ;;  %129 = vmatpush.msra.mxu3 %v21_v33  ;;  %v708_v48 = vld [vmem:[%s1404_s0 + $0x170] sm:$0xff]  ;;  %v713_v49 = vld [vmem:[%s1404_s0 + $0x198] sm:$0xff]  ;;  %v702_v50 = vld [vmem:[%s1404_s0 + $0x140] sm:$0xff] }
  0x12   :  { %184 = vmatpush.msrb.mxu0 %v722_v30  ;;  %224 = vmatpush.msrb.mxu2 %v724_v31  ;;  %v707_v51 = vld [vmem:[%s1404_s0 + $0x168] sm:$0xff]  ;;  %v704_v52 = vld [vmem:[%s1404_s0 + $0x150] sm:$0xff]  ;;  %v709_v53 = vld [vmem:[%s1404_s0 + $0x178] sm:$0xff] }
  0x13   :  { %204 = vmatpush.msrb.mxu1 %v723_v35  ;;  %244 = vmatpush.msrb.mxu3 %v725_v37  ;;  %v698_v54 = vld [vmem:[%s1404_s0 + $0x120] sm:$0xff]  ;;  %v703_v55 = vld [vmem:[%s1404_s0 + $0x148] sm:$0xff]  ;;  %v700_v56 = vld [vmem:[%s1404_s0 + $0x130] sm:$0xff] }
  0x14   :  { %185 = vmatpush.msrb.mxu0 %v718_v34  ;;  %225 = vmatpush.msrb.mxu2 %v720_v36  ;;  %v705_v57 = vld [vmem:[%s1404_s0 + $0x158] sm:$0xff]  ;;  %v17_v58 = vld [vmem:[%s1405_s1] sm:$0xff]  ;;  %v699_v60 = vld [vmem:[%s1404_s0 + $0x128] sm:$0xff] }
  0x15   :  { %205 = vmatpush.msrb.mxu1 %v719_v39  ;;  %245 = vmatpush.msrb.mxu3 %v721_v41  ;;  %v694_v59 = vld [vmem:[%s1404_s0 + $0x100] sm:$0xff]  ;;  %v696_v61 = vld [vmem:[%s1404_s0 + $0x110] sm:$0xff]  ;;  %v701_v62 = vld [vmem:[%s1404_s0 + $0x138] sm:$0xff] }
  0x16   :  { %186 = vmatpush.msrb.mxu0 %v714_v38  ;;  %226 = vmatpush.msrb.mxu2 %v716_v40  ;;  %v759_v63 = vld [vmem:[%s1404_s0 + $0x2e0] sm:$0xff]  ;;  %v761_v0 = vld [vmem:[%s1404_s0 + $0x2f0] sm:$0xff]  ;;  %v695_v1 = vld [vmem:[%s1404_s0 + $0x108] sm:$0xff] }
  0x17   :  { %206 = vmatpush.msrb.mxu1 %v715_v43  ;;  %246 = vmatpush.msrb.mxu3 %v717_v45  ;;  %v697_v2 = vld [vmem:[%s1404_s0 + $0x118] sm:$0xff]  ;;  %v755_v3 = vld [vmem:[%s1404_s0 + $0x2c0] sm:$0xff]  ;;  %v760_v4 = vld [vmem:[%s1404_s0 + $0x2e8] sm:$0xff] }
  0x18   :  { %187 = vmatpush.msrb.mxu0 %v710_v42  ;;  %227 = vmatpush.msrb.mxu2 %v712_v44  ;;  %v757_v5 = vld [vmem:[%s1404_s0 + $0x2d0] sm:$0xff]  ;;  %v762_v6 = vld [vmem:[%s1404_s0 + $0x2f8] sm:$0xff]  ;;  %v751_v7 = vld [vmem:[%s1404_s0 + $0x2a0] sm:$0xff] }
  0x19   :  { %207 = vmatpush.msrb.mxu1 %v711_v47  ;;  %247 = vmatpush.msrb.mxu3 %v713_v49  ;;  %v756_v8 = vld [vmem:[%s1404_s0 + $0x2c8] sm:$0xff]  ;;  %v753_v9 = vld [vmem:[%s1404_s0 + $0x2b0] sm:$0xff]  ;;  %v758_v10 = vld [vmem:[%s1404_s0 + $0x2d8] sm:$0xff] }
  0x1a   :  { %188 = vmatpush.msrb.mxu0 %v706_v46  ;;  %228 = vmatpush.msrb.mxu2 %v708_v48  ;;  %v693_v11 = vld [vmem:[%s1405_s1 + $0x8] sm:$0xff]  ;;  %v747_v12 = vld [vmem:[%s1404_s0 + $0x280] sm:$0xff]  ;;  %v749_v14 = vld [vmem:[%s1404_s0 + $0x290] sm:$0xff] }
  0x1b   :  { %208 = vmatpush.msrb.mxu1 %v707_v51  ;;  %248 = vmatpush.msrb.mxu3 %v709_v53  ;;  %v752_v13 = vld [vmem:[%s1404_s0 + $0x2a8] sm:$0xff]  ;;  %v754_v15 = vld [vmem:[%s1404_s0 + $0x2b8] sm:$0xff]  ;;  %v743_v16 = vld [vmem:[%s1404_s0 + $0x260] sm:$0xff] }
  0x1c   :  { %189 = vmatpush.msrb.mxu0 %v702_v50  ;;  %229 = vmatpush.msrb.mxu2 %v704_v52  ;;  %v748_v17 = vld [vmem:[%s1404_s0 + $0x288] sm:$0xff]  ;;  %v745_v18 = vld [vmem:[%s1404_s0 + $0x270] sm:$0xff]  ;;  %v750_v19 = vld [vmem:[%s1404_s0 + $0x298] sm:$0xff] }
  0x1d   :  { %209 = vmatpush.msrb.mxu1 %v703_v55  ;;  %249 = vmatpush.msrb.mxu3 %v705_v57  ;;  %v739_v20 = vld [vmem:[%s1404_s0 + $0x240] sm:$0xff]  ;;  %v744_v21 = vld [vmem:[%s1404_s0 + $0x268] sm:$0xff]  ;;  %v741_v22 = vld [vmem:[%s1404_s0 + $0x250] sm:$0xff] }
  0x1e   :  { %190 = vmatpush.msrb.mxu0 %v698_v54  ;;  %230 = vmatpush.msrb.mxu2 %v700_v56  ;;  %v746_v23 = vld [vmem:[%s1404_s0 + $0x278] sm:$0xff]  ;;  %v735_v24 = vld [vmem:[%s1404_s0 + $0x220] sm:$0xff]  ;;  %v740_v25 = vld [vmem:[%s1404_s0 + $0x248] sm:$0xff] }
  0x1f   :  { %691 = vmatmul.msk.f32.vlgmr.msra.gmra.mxu2 %vm50_vm0, %v17_v58  ;;  %210 = vmatpush.msrb.mxu1 %v699_v60  ;;  %v737_v26 = vld [vmem:[%s1404_s0 + $0x230] sm:$0xff]  ;;  %v742_v27 = vld [vmem:[%s1404_s0 + $0x258] sm:$0xff]  ;;  %v731_v28 = vld [vmem:[%s1404_s0 + $0x200] sm:$0xff] }
  0x20   :  { %191 = vmatpush.msrb.mxu0 %v694_v59  ;;  %231 = vmatpush.msrb.mxu2 %v696_v61  ;;  %v736_v29 = vld [vmem:[%s1404_s0 + $0x228] sm:$0xff]  ;;  %v733_v30 = vld [vmem:[%s1404_s0 + $0x210] sm:$0xff]  ;;  %v738_v31 = vld [vmem:[%s1404_s0 + $0x238] sm:$0xff] }
  0x21   :  { %250 = vmatpush.msrb.mxu3 %v701_v62  ;;  %689 = vmatmul.msk.f32.vlgmr.msra.gmra.mxu0 %vm50_vm0, %v17_v58  ;;  %v730_v32 = vld [vmem:[%s1405_s1 + $0x10] sm:$0xff]  ;;  %v796_v33 = vld [vmem:[%s1404_s0 + $0x3e0] sm:$0xff]  ;;  %v732_v35 = vld [vmem:[%s1404_s0 + $0x208] sm:$0xff] }
  0x22   :  { %692 = vmatmul.msk.f32.vlgmr.msra.gmra.mxu3 %vm50_vm0, %v17_v58  ;;  %306 = vmatpush.msra.mxu0 %v759_v63  ;;  %v798_v34 = vld [vmem:[%s1404_s0 + $0x3f0] sm:$0xff]  ;;  %v734_v36 = vld [vmem:[%s1404_s0 + $0x218] sm:$0xff]  ;;  %v792_v37 = vld [vmem:[%s1404_s0 + $0x3c0] sm:$0xff] }
  0x23   :  { %346 = vmatpush.msra.mxu2 %v761_v0  ;;  %211 = vmatpush.msrb.mxu1 %v695_v1  ;;  %v797_v38 = vld [vmem:[%s1404_s0 + $0x3e8] sm:$0xff]  ;;  %v794_v39 = vld [vmem:[%s1404_s0 + $0x3d0] sm:$0xff]  ;;  %v799_v40 = vld [vmem:[%s1404_s0 + $0x3f8] sm:$0xff] }
  0x24   :  { %251 = vmatpush.msrb.mxu3 %v697_v2  ;;  %690 = vmatmul.msk.f32.vlgmr.msra.gmra.mxu1 %vm50_vm0, %v17_v58  ;;  %v788_v41 = vld [vmem:[%s1404_s0 + $0x3a0] sm:$0xff]  ;;  %v793_v42 = vld [vmem:[%s1404_s0 + $0x3c8] sm:$0xff]  ;;  %v790_v43 = vld [vmem:[%s1404_s0 + $0x3b0] sm:$0xff] }
  0x25   :  { %307 = vmatpush.msra.mxu0 %v755_v3  ;;  %326 = vmatpush.msra.mxu1 %v760_v4  ;;  %v795_v44 = vld [vmem:[%s1404_s0 + $0x3d8] sm:$0xff]  ;;  %v784_v45 = vld [vmem:[%s1404_s0 + $0x380] sm:$0xff]  ;;  %v789_v46 = vld [vmem:[%s1404_s0 + $0x3a8] sm:$0xff] }
  0x26   :  { %347 = vmatpush.msra.mxu2 %v757_v5  ;;  %366 = vmatpush.msra.mxu3 %v762_v6  ;;  %v786_v47 = vld [vmem:[%s1404_s0 + $0x390] sm:$0xff]  ;;  %v791_v48 = vld [vmem:[%s1404_s0 + $0x3b8] sm:$0xff]  ;;  %v780_v49 = vld [vmem:[%s1404_s0 + $0x360] sm:$0xff] }
  0x27   :  { %308 = vmatpush.msra.mxu0 %v751_v7  ;;  %327 = vmatpush.msra.mxu1 %v756_v8  ;;  %v785_v50 = vld [vmem:[%s1404_s0 + $0x388] sm:$0xff]  ;;  %v782_v51 = vld [vmem:[%s1404_s0 + $0x370] sm:$0xff]  ;;  %v787_v52 = vld [vmem:[%s1404_s0 + $0x398] sm:$0xff] }
  0x28   :  { %348 = vmatpush.msra.mxu2 %v753_v9  ;;  %367 = vmatpush.msra.mxu3 %v758_v10  ;;  %v776_v53 = vld [vmem:[%s1404_s0 + $0x340] sm:$0xff]  ;;  %v781_v54 = vld [vmem:[%s1404_s0 + $0x368] sm:$0xff]  ;;  %v778_v55 = vld [vmem:[%s1404_s0 + $0x350] sm:$0xff] }
  0x29   :  { %728 = vmatmul.msk.f32.vlgmr.msrb.gmra.mxu2 %vm50_vm0, %v693_v11  ;;  %309 = vmatpush.msra.mxu0 %v747_v12  ;;  %v783_v56 = vld [vmem:[%s1404_s0 + $0x378] sm:$0xff]  ;;  %v772_v57 = vld [vmem:[%s1404_s0 + $0x320] sm:$0xff]  ;;  %v777_v58 = vld [vmem:[%s1404_s0 + $0x348] sm:$0xff] }
  0x2a   :  { %328 = vmatpush.msra.mxu1 %v752_v13  ;;  %349 = vmatpush.msra.mxu2 %v749_v14  ;;  %v774_v59 = vld [vmem:[%s1404_s0 + $0x330] sm:$0xff]  ;;  %v779_v60 = vld [vmem:[%s1404_s0 + $0x358] sm:$0xff]  ;;  %v768_v61 = vld [vmem:[%s1404_s0 + $0x300] sm:$0xff] }
  0x2b   :  { %368 = vmatpush.msra.mxu3 %v754_v15  ;;  %726 = vmatmul.msk.f32.vlgmr.msrb.gmra.mxu0 %vm50_vm0, %v693_v11  ;;  %v773_v62 = vld [vmem:[%s1404_s0 + $0x328] sm:$0xff]  ;;  %v770_v63 = vld [vmem:[%s1404_s0 + $0x310] sm:$0xff]  ;;  %v775_v0 = vld [vmem:[%s1404_s0 + $0x338] sm:$0xff] }
  0x2c   :  { %729 = vmatmul.msk.f32.vlgmr.msrb.gmra.mxu3 %vm50_vm0, %v693_v11  ;;  %310 = vmatpush.msra.mxu0 %v743_v16  ;;  %v767_v1 = vld [vmem:[%s1405_s1 + $0x18] sm:$0xff]  ;;  %v769_v2 = vld [vmem:[%s1404_s0 + $0x308] sm:$0xff] }
  0x2d   :  { %329 = vmatpush.msra.mxu1 %v748_v17  ;;  %350 = vmatpush.msra.mxu2 %v745_v18  ;;  %v771_v3 = vld [vmem:[%s1404_s0 + $0x318] sm:$0xff] }
  0x2e   :  { %369 = vmatpush.msra.mxu3 %v750_v19  ;;  %727 = vmatmul.msk.f32.vlgmr.msrb.gmra.mxu1 %vm50_vm0, %v693_v11 }
  0x2f   :  { %311 = vmatpush.msra.mxu0 %v739_v20  ;;  %330 = vmatpush.msra.mxu1 %v744_v21 }
  0x30   :  { %351 = vmatpush.msra.mxu2 %v741_v22  ;;  %370 = vmatpush.msra.mxu3 %v746_v23 }
  0x31   :  { %312 = vmatpush.msra.mxu0 %v735_v24  ;;  %331 = vmatpush.msra.mxu1 %v740_v25 }
  0x32   :  { %352 = vmatpush.msra.mxu2 %v737_v26  ;;  %371 = vmatpush.msra.mxu3 %v742_v27 }
  0x33   :  { %313 = vmatpush.msra.mxu0 %v731_v28  ;;  %332 = vmatpush.msra.mxu1 %v736_v29 }
  0x34   :  { %353 = vmatpush.msra.mxu2 %v733_v30  ;;  %372 = vmatpush.msra.mxu3 %v738_v31 }
  0x35   :  { %765 = vmatmul.msk.f32.vlgmr.msra.gmra.mxu2 %vm50_vm0, %v730_v32  ;;  %428 = vmatpush.msrb.mxu0 %v796_v33 }
  0x36   :  { %468 = vmatpush.msrb.mxu2 %v798_v34  ;;  %763 = vmatmul.msk.f32.vlgmr.msra.gmra.mxu0 %vm50_vm0, %v730_v32 }
  0x37   :  { %333 = vmatpush.msra.mxu1 %v732_v35  ;;  %373 = vmatpush.msra.mxu3 %v734_v36  ;;  %v812_v35 = vmov 2048.0  }
  0x38   :  { %766 = vmatmul.msk.f32.vlgmr.msra.gmra.mxu3 %vm50_vm0, %v730_v32  ;;  %429 = vmatpush.msrb.mxu0 %v792_v37  ;;  %808 = vrcp.f32 %v812_v35 }
  0x39   :  { %448 = vmatpush.msrb.mxu1 %v797_v38  ;;  %469 = vmatpush.msrb.mxu2 %v794_v39 }
  0x3a   :  { %488 = vmatpush.msrb.mxu3 %v799_v40  ;;  %764 = vmatmul.msk.f32.vlgmr.msra.gmra.mxu1 %vm50_vm0, %v730_v32 }
  0x3b   :  { %430 = vmatpush.msrb.mxu0 %v788_v41  ;;  %449 = vmatpush.msrb.mxu1 %v793_v42 }
  0x3c   :  { %470 = vmatpush.msrb.mxu2 %v790_v43  ;;  %489 = vmatpush.msrb.mxu3 %v795_v44 }
  0x3d   :  { %431 = vmatpush.msrb.mxu0 %v784_v45  ;;  %450 = vmatpush.msrb.mxu1 %v789_v46 }
  0x3e   :  { %471 = vmatpush.msrb.mxu2 %v786_v47  ;;  %490 = vmatpush.msrb.mxu3 %v791_v48  ;;  %v809_v36 = vpop.eup %808 }
  0x3f   :  { %432 = vmatpush.msrb.mxu0 %v780_v49  ;;  %451 = vmatpush.msrb.mxu1 %v785_v50  ;;  %v538_v37 = vmul.f32 2048.0, %v809_v36  ;;  %vm542_vm1 = vweird.f32 %v809_v36 }
  0x40   :  { %472 = vmatpush.msrb.mxu2 %v782_v51  ;;  %491 = vmatpush.msrb.mxu3 %v787_v52 }
  0x41   :  { %433 = vmatpush.msrb.mxu0 %v776_v53  ;;  %452 = vmatpush.msrb.mxu1 %v781_v54  ;;  %v539_v38 = vsub.f32 1.0, %v538_v37 }
  0x42   :  { %473 = vmatpush.msrb.mxu2 %v778_v55  ;;  %492 = vmatpush.msrb.mxu3 %v783_v56 }
  0x43   :  { %434 = vmatpush.msrb.mxu0 %v772_v57  ;;  %453 = vmatpush.msrb.mxu1 %v777_v58  ;;  %v540_v39 = vmul.f32 %v809_v36, %v539_v38 }
  0x44   :  { %474 = vmatpush.msrb.mxu2 %v774_v59  ;;  %493 = vmatpush.msrb.mxu3 %v779_v60 }
  0x45   :  { %435 = vmatpush.msrb.mxu0 %v768_v61  ;;  %454 = vmatpush.msrb.mxu1 %v773_v62  ;;  %v541_v40 = vadd.f32 %v809_v36, %v540_v39 }
  0x46   :  { %475 = vmatpush.msrb.mxu2 %v770_v63  ;;  %494 = vmatpush.msrb.mxu3 %v775_v0 }
  0x47   :  { %800 = vmatmul.msk.f32.vlgmr.msrb.gmra.mxu0 %vm50_vm0, %v767_v1  ;;  %802 = vmatmul.msk.f32.vlgmr.msrb.gmra.mxu2 %vm50_vm0, %v767_v1  ;;  %v543_v41 = vsel %vm542_vm1, %v809_v36, %v541_v40 }
  0x48   :  { %455 = vmatpush.msrb.mxu1 %v769_v2  ;;  %495 = vmatpush.msrb.mxu3 %v771_v3 }
  0x49   :  { %801 = vmatmul.msk.f32.vlgmr.msrb.gmra.mxu1 %vm50_vm0, %v767_v1  ;;  %803 = vmatmul.msk.f32.vlgmr.msrb.gmra.mxu3 %vm50_vm0, %v767_v1 }
  0x9e   :  { %v1251_v4 = vpop.f32.mrf.mxu0 }
  0xa1   :  { %v1253_v5 = vpop.f32.mrf.mxu1 }
  0xa2   :  { %v1255_v6 = vpop.f32.mrf.mxu2  ;;  %v520_v7 = vadd.f32 %v1253_v5, %v1251_v4 }
  0xa4   :  { %v521_v8 = vadd.f32 %v520_v7, %v1255_v6 }
  0xa5   :  { %v1260_v9 = vpop.f32.mrf.mxu3 }
  0xa6   :  { %v522_v10 = vadd.f32 %v521_v8, %v1260_v9 }
  0xa8   :  { %v1263_v11 = vpop.f32.mrf.mxu0 }
  0xa9   :  { %v523_v12 = vadd.f32 %v522_v10, %v1263_v11 }
  0xab   :  { %v1266_v13 = vpop.f32.mrf.mxu1 }
  0xac   :  { %v1268_v14 = vpop.f32.mrf.mxu2  ;;  %v524_v15 = vadd.f32 %v523_v12, %v1266_v13 }
  0xae   :  { %v525_v16 = vadd.f32 %v524_v15, %v1268_v14 }
  0xaf   :  { %v1272_v17 = vpop.f32.mrf.mxu3 }
  0xb0   :  { %v526_v18 = vadd.f32 %v525_v16, %v1272_v17 }
  0xb3   :  { %v1275_v19 = vpop.f32.mrf.mxu0 }
  0xb4   :  { %v527_v20 = vadd.f32 %v526_v18, %v1275_v19 }
  0xb7   :  { %v1278_v21 = vpop.f32.mrf.mxu1 }
  0xb8   :  { %v528_v22 = vadd.f32 %v527_v20, %v1278_v21  ;;  %v1281_v23 = vpop.f32.mrf.mxu2 }
  0xba   :  { %v529_v24 = vadd.f32 %v528_v22, %v1281_v23 }
  0xbb   :  { %v1284_v25 = vpop.f32.mrf.mxu3 }
  0xbc   :  { %v530_v26 = vadd.f32 %v529_v24, %v1284_v25 }
  0xc4   :  { %v1287_v27 = vpop.f32.mrf.mxu0 }
  0xc5   :  { %v531_v28 = vadd.f32 %v530_v26, %v1287_v27 }
  0xc6   :  { %v1290_v29 = vpop.f32.mrf.mxu1 }
  0xc7   :  { %v532_v30 = vadd.f32 %v531_v28, %v1290_v29 }
  0xca   :  { %v1293_v31 = vpop.f32.mrf.mxu2 }
  0xcb   :  { %v533_v32 = vadd.f32 %v532_v30, %v1293_v31 }
  0xcc   :  { %v1296_v33 = vpop.f32.mrf.mxu3 }
  0xcd   :  { %v534_v34 = vadd.f32 %v533_v32, %v1296_v33 }
  0xcf   :  { %535 = vadd.xlane.f32.xlu0 %v534_v34 }
 0x142   :  { %v536_v42 = vpop.xlane.xlu0 %535 }
 0x143   :  { %v1299_v43 = vmul.f32 %v543_v41, %v536_v42 }
 0x145   :  { %v545_v44 = vsub.f32 %v1251_v4, %v1299_v43  ;;  %v546_v45 = vsub.f32 %v1253_v5, %v1299_v43  ;;  %v547_v46 = vsub.f32 %v1255_v6, %v1299_v43  ;;  %v548_v49 = vsub.f32 %v1260_v9, %v1299_v43 }
 0x146   :  { %v549_v50 = vsub.f32 %v1263_v11, %v1299_v43  ;;  %v550_v53 = vsub.f32 %v1266_v13, %v1299_v43  ;;  %v551_v56 = vsub.f32 %v1268_v14, %v1299_v43  ;;  %v552_v59 = vsub.f32 %v1272_v17, %v1299_v43 }
 0x147   :  { %v561_v47 = vmul.f32 %v545_v44, %v545_v44  ;;  %v562_v48 = vmul.f32 %v546_v45, %v546_v45  ;;  %v563_v51 = vmul.f32 %v547_v46, %v547_v46  ;;  %v564_v54 = vmul.f32 %v548_v49, %v548_v49 }
 0x148   :  { %v565_v57 = vmul.f32 %v549_v50, %v549_v50  ;;  %v566_v60 = vmul.f32 %v550_v53, %v550_v53  ;;  %v553_v62 = vsub.f32 %v1275_v19, %v1299_v43  ;;  %v567_v63 = vmul.f32 %v551_v56, %v551_v56 }
 0x149   :  { %v577_v52 = vadd.f32 %v562_v48, %v561_v47  ;;  %v554_v1 = vsub.f32 %v1278_v21, %v1299_v43  ;;  %v568_v2 = vmul.f32 %v552_v59, %v552_v59  ;;  %v555_v7 = vsub.f32 %v1281_v23, %v1299_v43 }
 0x14a   :  { %v569_v8 = vmul.f32 %v553_v62, %v553_v62  ;;  %v556_v12 = vsub.f32 %v1284_v25, %v1299_v43  ;;  %v557_v18 = vsub.f32 %v1287_v27, %v1299_v43  ;;  %v558_v24 = vsub.f32 %v1290_v29, %v1299_v43 }
 0x14b   :  { %v578_v55 = vadd.f32 %v577_v52, %v563_v51  ;;  %v570_v15 = vmul.f32 %v554_v1, %v554_v1  ;;  %v571_v20 = vmul.f32 %v555_v7, %v555_v7  ;;  %v559_v30 = vsub.f32 %v1293_v31, %v1299_v43 }
 0x14c   :  { %v572_v26 = vmul.f32 %v556_v12, %v556_v12  ;;  %v573_v32 = vmul.f32 %v557_v18, %v557_v18  ;;  %v560_v35 = vsub.f32 %v1296_v33, %v1299_v43  ;;  %v574_v36 = vmul.f32 %v558_v24, %v558_v24 }
 0x14d   :  { %v579_v58 = vadd.f32 %v578_v55, %v564_v54  ;;  %v575_v38 = vmul.f32 %v559_v30, %v559_v30  ;;  %v813_v45 = vmov 0   ;;  %v595_v54 = vld [vmem:[%s1406_s2] sm:$0xff] }
 0x14e   :  { %v576_v40 = vmul.f32 %v560_v35, %v560_v35  ;;  %806 = vset.pattern.permute.xlu1 %v813_v45  ;;  %807 = vset.pattern.permute.xlu0 %v813_v45 }
 0x14f   :  { %v580_v61 = vadd.f32 %v579_v58, %v565_v57  ;;  %v608_v58 = vld [vmem:[%s1407_s3] sm:$0xff] }
 0x151   :  { %v581_v0 = vadd.f32 %v580_v61, %v566_v60 }
 0x153   :  { %v582_v3 = vadd.f32 %v581_v0, %v567_v63 }
 0x155   :  { %v583_v10 = vadd.f32 %v582_v3, %v568_v2 }
 0x157   :  { %v584_v16 = vadd.f32 %v583_v10, %v569_v8 }
 0x159   :  { %v585_v22 = vadd.f32 %v584_v16, %v570_v15 }
 0x15b   :  { %v586_v28 = vadd.f32 %v585_v22, %v571_v20 }
 0x15d   :  { %v587_v34 = vadd.f32 %v586_v28, %v572_v26 }
 0x15f   :  { %v588_v37 = vadd.f32 %v587_v34, %v573_v32 }
 0x161   :  { %v589_v39 = vadd.f32 %v588_v37, %v574_v36 }
 0x163   :  { %v590_v42 = vadd.f32 %v589_v39, %v575_v38 }
 0x165   :  { %v591_v44 = vadd.f32 %v590_v42, %v576_v40 }
 0x167   :  { %592 = vadd.xlane.f32.xlu0 %v591_v44 }
 0x1da   :  { %v593_v46 = vpop.xlane.xlu0 %592 }
 0x1db   :  { %v594_v47 = vmul.f32 %v593_v46, %v543_v41 }
 0x1dd   :  { %v596_v48 = vadd.f32 1e-05, %v594_v47 }
 0x1df   :  { %810 = vrsqrt.f32 %v596_v48  ;;  %vm603_vm3 = vweird.f32 %v596_v48 }
 0x1e5   :  { %v811_v49 = vpop.eup %810 }
 0x1e6   :  { %v598_v50 = vmul.f32 %v811_v49, %v596_v48  ;;  %vm604_vm2 = vweird.f32 %v811_v49 }
 0x1e7   :  { %vm605_vm4 = vmor %vm603_vm3, %vm604_vm2 }
 0x1e8   :  { %v599_v51 = vmul.f32 %v811_v49, %v598_v50 }
 0x1ea   :  { %v600_v52 = vmul.f32 0.5, %v599_v51 }
 0x1ec   :  { %v601_v53 = vsub.f32 1.5, %v600_v52 }
 0x1ee   :  { %v602_v55 = vmul.f32 %v811_v49, %v601_v53 }
 0x1f0   :  { %v606_v56 = vsel %vm605_vm4, %v811_v49, %v602_v55 }
 0x1f1   :  { %v607_v57 = vmul.f32 %v606_v56, %v595_v54 }
 0x1f3   :  { %613 = vperm.xlu1 %806, %v607_v57   ;;  %v609_v41 = vmul.f32 %v607_v57, %v1299_v43 }
 0x1f5   :  { %v610_v59 = vsub.f32 %v608_v58, %v609_v41 }
 0x1fb   :  { %634 = vperm.xlu1 %806, %v610_v59  }
 0x265   :  { %v614_v60 = vpop.permute.xlu1 %613 }
 0x266   :  { %v616_v61 = vmul.f32 %v614_v60, %v1251_v4  ;;  %v617_v62 = vmul.f32 %v614_v60, %v1253_v5  ;;  %v618_v63 = vmul.f32 %v614_v60, %v1255_v6  ;;  %v619_v0 = vmul.f32 %v614_v60, %v1260_v9 }
 0x267   :  { %v620_v2 = vmul.f32 %v614_v60, %v1263_v11  ;;  %v621_v8 = vmul.f32 %v614_v60, %v1266_v13  ;;  %v622_v12 = vmul.f32 %v614_v60, %v1268_v14  ;;  %v623_v4 = vmul.f32 %v614_v60, %v1272_v17 }
 0x268   :  { %v624_v5 = vmul.f32 %v614_v60, %v1275_v19  ;;  %v625_v11 = vmul.f32 %v614_v60, %v1278_v21  ;;  %v626_v26 = vmul.f32 %v614_v60, %v1281_v23  ;;  %v627_v14 = vmul.f32 %v614_v60, %v1284_v25 }
 0x269   :  { %v628_v21 = vmul.f32 %v614_v60, %v1287_v27  ;;  %v629_v23 = vmul.f32 %v614_v60, %v1290_v29  ;;  %v630_v25 = vmul.f32 %v614_v60, %v1293_v31  ;;  %v631_v27 = vmul.f32 %v614_v60, %v1296_v33 }
 0x26d   :  { %v635_v1 = vpop.permute.xlu1 %634 }
 0x26e   :  { %v637_v3 = vadd.f32 %v635_v1, %v616_v61  ;;  %v638_v43 = vadd.f32 %v635_v1, %v617_v62  ;;  %v639_v7 = vadd.f32 %v635_v1, %v618_v63  ;;  %v640_v10 = vadd.f32 %v635_v1, %v619_v0 }
 0x26f   :  { %v641_v15 = vadd.f32 %v635_v1, %v620_v2  ;;  %v642_v16 = vadd.f32 %v635_v1, %v621_v8  ;;  %v643_v6 = vadd.f32 %v635_v1, %v622_v12  ;;  %v644_v22 = vadd.f32 %v635_v1, %v623_v4 }
 0x270   :  { %v653_v18 = vmax.f32 %v637_v3, 0.0  ;;  %v654_v9 = vmax.f32 %v638_v43, 0.0  ;;  %v655_v20 = vmax.f32 %v639_v7, 0.0  ;;  %v656_v24 = vmax.f32 %v640_v10, 0.0 }
 0x271   :  { %v645_v13 = vadd.f32 %v635_v1, %v624_v5  ;;  %v657_v28 = vmax.f32 %v641_v15, 0.0  ;;  %v646_v17 = vadd.f32 %v635_v1, %v625_v11  ;;  %v658_v19 = vmax.f32 %v642_v16, 0.0 }
 0x272   :  { %669 = vst [vmem:[%s1408_s4] sm:$0xff] %v653_v18  ;;  %v647_v30 = vadd.f32 %v635_v1, %v626_v26  ;;  %v659_v32 = vmax.f32 %v643_v6, 0.0  ;;  %v648_v34 = vadd.f32 %v635_v1, %v627_v14  ;;  %v660_v35 = vmax.f32 %v644_v22, 0.0 }
 0x273   :  { %670 = vst [vmem:[%s1408_s4 + $0x8] sm:$0xff] %v654_v9  ;;  %v649_v36 = vadd.f32 %v635_v1, %v628_v21  ;;  %v661_v37 = vmax.f32 %v645_v13, 0.0  ;;  %v650_v38 = vadd.f32 %v635_v1, %v629_v23  ;;  %v662_v39 = vmax.f32 %v646_v17, 0.0 }
 0x274   :  { %671 = vst [vmem:[%s1408_s4 + $0x10] sm:$0xff] %v655_v20  ;;  %v651_v29 = vadd.f32 %v635_v1, %v630_v25  ;;  %v663_v40 = vmax.f32 %v647_v30, 0.0  ;;  %v652_v31 = vadd.f32 %v635_v1, %v631_v27  ;;  %v664_v42 = vmax.f32 %v648_v34, 0.0 }
 0x275   :  { %672 = vst [vmem:[%s1408_s4 + $0x18] sm:$0xff] %v656_v24  ;;  %v665_v44 = vmax.f32 %v649_v36, 0.0  ;;  %v666_v33 = vmax.f32 %v650_v38, 0.0 }
 0x276   :  { %673 = vst [vmem:[%s1408_s4 + $0x20] sm:$0xff] %v657_v28  ;;  %v667_v45 = vmax.f32 %v651_v29, 0.0  ;;  %v668_v46 = vmax.f32 %v652_v31, 0.0 }
 0x277   :  { %674 = vst [vmem:[%s1408_s4 + $0x28] sm:$0xff] %v658_v19 }
 0x278   :  { %675 = vst [vmem:[%s1408_s4 + $0x30] sm:$0xff] %v659_v32 }
 0x279   :  { %676 = vst [vmem:[%s1408_s4 + $0x38] sm:$0xff] %v660_v35 }
 0x27a   :  { %677 = vst [vmem:[%s1408_s4 + $0x40] sm:$0xff] %v661_v37 }
 0x27b   :  { %678 = vst [vmem:[%s1408_s4 + $0x48] sm:$0xff] %v662_v39 }
 0x27c   :  { %679 = vst [vmem:[%s1408_s4 + $0x50] sm:$0xff] %v663_v40 }
 0x27d   :  { %680 = vst [vmem:[%s1408_s4 + $0x58] sm:$0xff] %v664_v42 }
 0x27e   :  { %681 = vst [vmem:[%s1408_s4 + $0x60] sm:$0xff] %v665_v44 }
 0x27f   :  { %682 = vst [vmem:[%s1408_s4 + $0x68] sm:$0xff] %v666_v33 }
 0x280   :  { %683 = vst [vmem:[%s1408_s4 + $0x70] sm:$0xff] %v667_v45 }
 0x281   :  { %684 = vst [vmem:[%s1408_s4 + $0x78] sm:$0xff] %v668_v46 }

// kernel: squeeze.159
= control target key start
LH: loop header
LB: loop body
LE: loop exit
PB: predicated region body
PF: predicated region fallthrough
CT: control target
= control target key end

     0   :  { %s46_s0 = inlined_call_operand.vmem [shape: f32[8,3,1,1], index: 0, kind: input, shape index: {}]   ;;  %s47_s1 = inlined_call_operand.vmem [shape: f32[1,8,3], index: 1, kind: output, shape index: {}]  }
   0x1   :  { %v4_v0 = vld [vmem:[%s46_s0] ss:$0 sm:$0xff]  ;;  %v14_v1 = vld [vmem:[%s46_s0 + $0x1] ss:$0 sm:$0xff]  ;;  %v16_v2 = vld [vmem:[%s46_s0 + $0x2] ss:$0 sm:$0xff] }
   0x2   :  { %5 = vst [vmem:[%s47_s1] sm:$0x1] %v4_v0 }
   0x3   :  { %15 = vst [vmem:[%s47_s1 + $0x1] sm:$0x1] %v14_v1 }
   0x4   :  { %17 = vst [vmem:[%s47_s1 + $0x2] sm:$0x1] %v16_v2 }

// kernel: gnet_forward.9
= control target key start
LH: loop header
LB: loop body
LE: loop exit
PB: predicated region body
PF: predicated region fallthrough
CT: control target
= control target key end

     0   :  { %vm76_vm0 = vcmask 261120   ;;  %s7272_s0 = inlined_call_operand.vmem [shape: f32[9,32,2048], index: 0, kind: input, shape index: {}]   ;;  %s7273_s1 = inlined_call_operand.vmem [shape: f32[9,8,32], index: 1, kind: input, shape index: {}]   ;;  %s7274_s2 = inlined_call_operand.vmem [shape: f32[8,18432], index: 2, kind: output, shape index: {}]  }
   0x1   :  { %v62_v0 = vld [vmem:[%s7272_s0 + $0x190] sm:$0xff]  ;;  %v63_v1 = vld [vmem:[%s7272_s0 + $0x198] sm:$0xff]  ;;  %v60_v6 = vld [vmem:[%s7272_s0 + $0x180] sm:$0xff] }
   0x2   :  { %v46_v2 = vld [vmem:[%s7272_s0 + $0x110] sm:$0xff]  ;;  %132 = vmatpush.msra.mxu2 %v62_v0  ;;  %152 = vmatpush.msra.mxu3 %v63_v1  ;;  %v47_v3 = vld [vmem:[%s7272_s0 + $0x118] sm:$0xff]  ;;  %v61_v7 = vld [vmem:[%s7272_s0 + $0x188] sm:$0xff] }
   0x3   :  { %v30_v4 = vld [vmem:[%s7272_s0 + $0x90] sm:$0xff]  ;;  %v31_v5 = vld [vmem:[%s7272_s0 + $0x98] sm:$0xff]  ;;  %92 = vmatpush.msra.mxu0 %v60_v6  ;;  %112 = vmatpush.msra.mxu1 %v61_v7  ;;  %v44_v10 = vld [vmem:[%s7272_s0 + $0x100] sm:$0xff] }
   0x4   :  { %133 = vmatpush.msra.mxu2 %v46_v2  ;;  %153 = vmatpush.msra.mxu3 %v47_v3  ;;  %v14_v8 = vld [vmem:[%s7272_s0 + $0x10] sm:$0xff]  ;;  %v15_v9 = vld [vmem:[%s7272_s0 + $0x18] sm:$0xff]  ;;  %v45_v11 = vld [vmem:[%s7272_s0 + $0x108] sm:$0xff] }
   0x5   :  { %v4818_v12 = vld [vmem:[%s7273_s1] sm:$0xff]  ;;  %v66_v13 = vld [vmem:[%s7272_s0 + $0x1b0] sm:$0xff]  ;;  %v67_v14 = vld [vmem:[%s7272_s0 + $0x1b8] sm:$0xff]  ;;  %93 = vmatpush.msra.mxu0 %v44_v10  ;;  %113 = vmatpush.msra.mxu1 %v45_v11 }
   0x6   :  { %134 = vmatpush.msra.mxu2 %v30_v4  ;;  %154 = vmatpush.msra.mxu3 %v31_v5  ;;  %v28_v15 = vld [vmem:[%s7272_s0 + $0x80] sm:$0xff]  ;;  %v29_v16 = vld [vmem:[%s7272_s0 + $0x88] sm:$0xff]  ;;  %v50_v17 = vld [vmem:[%s7272_s0 + $0x130] sm:$0xff] }
   0x7   :  { %v51_v18 = vld [vmem:[%s7272_s0 + $0x138] sm:$0xff]  ;;  %v12_v19 = vld [vmem:[%s7272_s0] sm:$0xff]  ;;  %v13_v20 = vld [vmem:[%s7272_s0 + $0x8] sm:$0xff]  ;;  %94 = vmatpush.msra.mxu0 %v28_v15  ;;  %114 = vmatpush.msra.mxu1 %v29_v16 }
   0x8   :  { %135 = vmatpush.msra.mxu2 %v14_v8  ;;  %155 = vmatpush.msra.mxu3 %v15_v9  ;;  %v34_v21 = vld [vmem:[%s7272_s0 + $0xb0] sm:$0xff]  ;;  %v35_v22 = vld [vmem:[%s7272_s0 + $0xb8] sm:$0xff]  ;;  %v64_v23 = vld [vmem:[%s7272_s0 + $0x1a0] sm:$0xff] }
   0x9   :  { %3814 = vmatmul.msk.f32.vlgmr.msra.gmra.mxu2 %vm76_vm0, %v4818_v12  ;;  %3815 = vmatmul.msk.f32.vlgmr.msra.gmra.mxu3 %vm76_vm0, %v4818_v12  ;;  %v65_v24 = vld [vmem:[%s7272_s0 + $0x1a8] sm:$0xff]  ;;  %v18_v25 = vld [vmem:[%s7272_s0 + $0x30] sm:$0xff]  ;;  %v19_v26 = vld [vmem:[%s7272_s0 + $0x38] sm:$0xff] }
   0xa   :  { %212 = vmatpush.msrb.mxu2 %v66_v13  ;;  %232 = vmatpush.msrb.mxu3 %v67_v14  ;;  %v48_v27 = vld [vmem:[%s7272_s0 + $0x120] sm:$0xff]  ;;  %v49_v28 = vld [vmem:[%s7272_s0 + $0x128] sm:$0xff]  ;;  %v70_v29 = vld [vmem:[%s7272_s0 + $0x1d0] sm:$0xff] }
   0xb   :  { %95 = vmatpush.msra.mxu0 %v12_v19  ;;  %115 = vmatpush.msra.mxu1 %v13_v20  ;;  %v71_v30 = vld [vmem:[%s7272_s0 + $0x1d8] sm:$0xff]  ;;  %v32_v31 = vld [vmem:[%s7272_s0 + $0xa0] sm:$0xff]  ;;  %v33_v32 = vld [vmem:[%s7272_s0 + $0xa8] sm:$0xff] }
   0xc   :  { %213 = vmatpush.msrb.mxu2 %v50_v17  ;;  %233 = vmatpush.msrb.mxu3 %v51_v18  ;;  %v54_v33 = vld [vmem:[%s7272_s0 + $0x150] sm:$0xff]  ;;  %v55_v34 = vld [vmem:[%s7272_s0 + $0x158] sm:$0xff]  ;;  %v16_v35 = vld [vmem:[%s7272_s0 + $0x20] sm:$0xff] }
   0xd   :  { %3812 = vmatmul.msk.f32.vlgmr.msra.gmra.mxu0 %vm76_vm0, %v4818_v12  ;;  %3813 = vmatmul.msk.f32.vlgmr.msra.gmra.mxu1 %vm76_vm0, %v4818_v12  ;;  %v17_v36 = vld [vmem:[%s7272_s0 + $0x28] sm:$0xff]  ;;  %v38_v37 = vld [vmem:[%s7272_s0 + $0xd0] sm:$0xff]  ;;  %v39_v38 = vld [vmem:[%s7272_s0 + $0xd8] sm:$0xff] }
   0xe   :  { %214 = vmatpush.msrb.mxu2 %v34_v21  ;;  %234 = vmatpush.msrb.mxu3 %v35_v22  ;;  %v68_v39 = vld [vmem:[%s7272_s0 + $0x1c0] sm:$0xff]  ;;  %v69_v40 = vld [vmem:[%s7272_s0 + $0x1c8] sm:$0xff]  ;;  %v22_v41 = vld [vmem:[%s7272_s0 + $0x50] sm:$0xff] }
   0xf   :  { %172 = vmatpush.msrb.mxu0 %v64_v23  ;;  %192 = vmatpush.msrb.mxu1 %v65_v24  ;;  %v23_v42 = vld [vmem:[%s7272_s0 + $0x58] sm:$0xff]  ;;  %v52_v43 = vld [vmem:[%s7272_s0 + $0x140] sm:$0xff]  ;;  %v53_v44 = vld [vmem:[%s7272_s0 + $0x148] sm:$0xff] }
  0x10   :  { %215 = vmatpush.msrb.mxu2 %v18_v25  ;;  %235 = vmatpush.msrb.mxu3 %v19_v26  ;;  %v74_v45 = vld [vmem:[%s7272_s0 + $0x1f0] sm:$0xff]  ;;  %v75_v46 = vld [vmem:[%s7272_s0 + $0x1f8] sm:$0xff]  ;;  %v36_v47 = vld [vmem:[%s7272_s0 + $0xc0] sm:$0xff] }
  0x11   :  { %173 = vmatpush.msrb.mxu0 %v48_v27  ;;  %193 = vmatpush.msrb.mxu1 %v49_v28  ;;  %v37_v48 = vld [vmem:[%s7272_s0 + $0xc8] sm:$0xff]  ;;  %v58_v49 = vld [vmem:[%s7272_s0 + $0x170] sm:$0xff]  ;;  %v59_v50 = vld [vmem:[%s7272_s0 + $0x178] sm:$0xff] }
  0x12   :  { %3818 = vmatmul.msk.f32.vlgmr.msrb.gmra.mxu2 %vm76_vm0, %v4818_v12  ;;  %3819 = vmatmul.msk.f32.vlgmr.msrb.gmra.mxu3 %vm76_vm0, %v4818_v12  ;;  %v20_v51 = vld [vmem:[%s7272_s0 + $0x40] sm:$0xff]  ;;  %v21_v52 = vld [vmem:[%s7272_s0 + $0x48] sm:$0xff]  ;;  %v42_v53 = vld [vmem:[%s7272_s0 + $0xf0] sm:$0xff] }
  0x13   :  { %292 = vmatpush.msra.mxu2 %v70_v29  ;;  %312 = vmatpush.msra.mxu3 %v71_v30  ;;  %v43_v54 = vld [vmem:[%s7272_s0 + $0xf8] sm:$0xff]  ;;  %v72_v55 = vld [vmem:[%s7272_s0 + $0x1e0] sm:$0xff]  ;;  %v73_v56 = vld [vmem:[%s7272_s0 + $0x1e8] sm:$0xff] }
  0x14   :  { %174 = vmatpush.msrb.mxu0 %v32_v31  ;;  %194 = vmatpush.msrb.mxu1 %v33_v32  ;;  %v26_v57 = vld [vmem:[%s7272_s0 + $0x70] sm:$0xff]  ;;  %v27_v58 = vld [vmem:[%s7272_s0 + $0x78] sm:$0xff]  ;;  %v56_v59 = vld [vmem:[%s7272_s0 + $0x160] sm:$0xff] }
  0x15   :  { %293 = vmatpush.msra.mxu2 %v54_v33  ;;  %313 = vmatpush.msra.mxu3 %v55_v34  ;;  %v57_v60 = vld [vmem:[%s7272_s0 + $0x168] sm:$0xff]  ;;  %v3879_v61 = vld [vmem:[%s7272_s0 + $0x390] sm:$0xff]  ;;  %v3880_v62 = vld [vmem:[%s7272_s0 + $0x398] sm:$0xff] }
  0x16   :  { %175 = vmatpush.msrb.mxu0 %v16_v35  ;;  %195 = vmatpush.msrb.mxu1 %v17_v36  ;;  %v40_v63 = vld [vmem:[%s7272_s0 + $0xe0] sm:$0xff]  ;;  %v41_v0 = vld [vmem:[%s7272_s0 + $0xe8] sm:$0xff]  ;;  %v3863_v1 = vld [vmem:[%s7272_s0 + $0x310] sm:$0xff] }
  0x17   :  { %294 = vmatpush.msra.mxu2 %v38_v37  ;;  %314 = vmatpush.msra.mxu3 %v39_v38  ;;  %v3864_v2 = vld [vmem:[%s7272_s0 + $0x318] sm:$0xff]  ;;  %v24_v3 = vld [vmem:[%s7272_s0 + $0x60] sm:$0xff]  ;;  %v25_v4 = vld [vmem:[%s7272_s0 + $0x68] sm:$0xff] }
  0x18   :  { %3816 = vmatmul.msk.f32.vlgmr.msrb.gmra.mxu0 %vm76_vm0, %v4818_v12  ;;  %3817 = vmatmul.msk.f32.vlgmr.msrb.gmra.mxu1 %vm76_vm0, %v4818_v12  ;;  %v3847_v5 = vld [vmem:[%s7272_s0 + $0x290] sm:$0xff]  ;;  %v3848_v6 = vld [vmem:[%s7272_s0 + $0x298] sm:$0xff]  ;;  %v3877_v7 = vld [vmem:[%s7272_s0 + $0x380] sm:$0xff] }
  0x19   :  { %252 = vmatpush.msra.mxu0 %v68_v39  ;;  %272 = vmatpush.msra.mxu1 %v69_v40  ;;  %v3878_v8 = vld [vmem:[%s7272_s0 + $0x388] sm:$0xff]  ;;  %v3831_v9 = vld [vmem:[%s7272_s0 + $0x210] sm:$0xff]  ;;  %v3832_v10 = vld [vmem:[%s7272_s0 + $0x218] sm:$0xff] }
  0x1a   :  { %295 = vmatpush.msra.mxu2 %v22_v41  ;;  %315 = vmatpush.msra.mxu3 %v23_v42  ;;  %v3861_v11 = vld [vmem:[%s7272_s0 + $0x300] sm:$0xff]  ;;  %v3862_v13 = vld [vmem:[%s7272_s0 + $0x308] sm:$0xff]  ;;  %v3884_v15 = vld [vmem:[%s7272_s0 + $0x3b8] sm:$0xff] }
  0x1b   :  { %253 = vmatpush.msra.mxu0 %v52_v43  ;;  %273 = vmatpush.msra.mxu1 %v53_v44  ;;  %v5047_v14 = vld [vmem:[%s7273_s1 + $0x8] sm:$0xff]  ;;  %v3845_v16 = vld [vmem:[%s7272_s0 + $0x280] sm:$0xff]  ;;  %v3867_v18 = vld [vmem:[%s7272_s0 + $0x330] sm:$0xff] }
  0x1c   :  { %3822 = vmatmul.msk.f32.vlgmr.msra.gmra.mxu2 %vm76_vm0, %v4818_v12  ;;  %3823 = vmatmul.msk.f32.vlgmr.msra.gmra.mxu3 %vm76_vm0, %v4818_v12  ;;  %v3846_v17 = vld [vmem:[%s7272_s0 + $0x288] sm:$0xff]  ;;  %v3868_v19 = vld [vmem:[%s7272_s0 + $0x338] sm:$0xff]  ;;  %v3829_v20 = vld [vmem:[%s7272_s0 + $0x200] sm:$0xff] }
  0x1d   :  { %372 = vmatpush.msrb.mxu2 %v74_v45  ;;  %392 = vmatpush.msrb.mxu3 %v75_v46  ;;  %v3830_v21 = vld [vmem:[%s7272_s0 + $0x208] sm:$0xff]  ;;  %v3851_v22 = vld [vmem:[%s7272_s0 + $0x2b0] sm:$0xff]  ;;  %v3852_v23 = vld [vmem:[%s7272_s0 + $0x2b8] sm:$0xff] }
  0x1e   :  { %254 = vmatpush.msra.mxu0 %v36_v47  ;;  %274 = vmatpush.msra.mxu1 %v37_v48  ;;  %v3881_v24 = vld [vmem:[%s7272_s0 + $0x3a0] sm:$0xff]  ;;  %v3882_v25 = vld [vmem:[%s7272_s0 + $0x3a8] sm:$0xff]  ;;  %v3835_v26 = vld [vmem:[%s7272_s0 + $0x230] sm:$0xff] }
  0x1f   :  { %373 = vmatpush.msrb.mxu2 %v58_v49  ;;  %393 = vmatpush.msrb.mxu3 %v59_v50  ;;  %v3836_v27 = vld [vmem:[%s7272_s0 + $0x238] sm:$0xff]  ;;  %v3865_v28 = vld [vmem:[%s7272_s0 + $0x320] sm:$0xff]  ;;  %v3866_v29 = vld [vmem:[%s7272_s0 + $0x328] sm:$0xff] }
  0x20   :  { %255 = vmatpush.msra.mxu0 %v20_v51  ;;  %275 = vmatpush.msra.mxu1 %v21_v52  ;;  %v3887_v30 = vld [vmem:[%s7272_s0 + $0x3d0] sm:$0xff]  ;;  %v3888_v31 = vld [vmem:[%s7272_s0 + $0x3d8] sm:$0xff]  ;;  %v3849_v32 = vld [vmem:[%s7272_s0 + $0x2a0] sm:$0xff] }
  0x21   :  { %374 = vmatpush.msrb.mxu2 %v42_v53  ;;  %394 = vmatpush.msrb.mxu3 %v43_v54  ;;  %v3850_v33 = vld [vmem:[%s7272_s0 + $0x2a8] sm:$0xff]  ;;  %v3871_v34 = vld [vmem:[%s7272_s0 + $0x350] sm:$0xff]  ;;  %v3872_v35 = vld [vmem:[%s7272_s0 + $0x358] sm:$0xff] }
  0x22   :  { %3820 = vmatmul.msk.f32.vlgmr.msra.gmra.mxu0 %vm76_vm0, %v4818_v12  ;;  %3821 = vmatmul.msk.f32.vlgmr.msra.gmra.mxu1 %vm76_vm0, %v4818_v12  ;;  %v3833_v36 = vld [vmem:[%s7272_s0 + $0x220] sm:$0xff]  ;;  %v3834_v37 = vld [vmem:[%s7272_s0 + $0x228] sm:$0xff]  ;;  %v3855_v38 = vld [vmem:[%s7272_s0 + $0x2d0] sm:$0xff] }
  0x23   :  { %332 = vmatpush.msrb.mxu0 %v72_v55  ;;  %352 = vmatpush.msrb.mxu1 %v73_v56  ;;  %v3856_v39 = vld [vmem:[%s7272_s0 + $0x2d8] sm:$0xff]  ;;  %v3885_v40 = vld [vmem:[%s7272_s0 + $0x3c0] sm:$0xff]  ;;  %v3886_v41 = vld [vmem:[%s7272_s0 + $0x3c8] sm:$0xff] }
  0x24   :  { %375 = vmatpush.msrb.mxu2 %v26_v57  ;;  %395 = vmatpush.msrb.mxu3 %v27_v58  ;;  %v3839_v42 = vld [vmem:[%s7272_s0 + $0x250] sm:$0xff]  ;;  %v3840_v43 = vld [vmem:[%s7272_s0 + $0x258] sm:$0xff]  ;;  %v3869_v44 = vld [vmem:[%s7272_s0 + $0x340] sm:$0xff] }
  0x25   :  { %333 = vmatpush.msrb.mxu0 %v56_v59  ;;  %353 = vmatpush.msrb.mxu1 %v57_v60  ;;  %v3870_v45 = vld [vmem:[%s7272_s0 + $0x348] sm:$0xff]  ;;  %v3891_v46 = vld [vmem:[%s7272_s0 + $0x3f0] sm:$0xff]  ;;  %v3892_v47 = vld [vmem:[%s7272_s0 + $0x3f8] sm:$0xff] }
  0x26   :  { %3826 = vmatmul.msk.f32.vlgmr.msrb.gmra.mxu2 %vm76_vm0, %v4818_v12  ;;  %3827 = vmatmul.msk.f32.vlgmr.msrb.gmra.mxu3 %vm76_vm0, %v4818_v12  ;;  %v3853_v48 = vld [vmem:[%s7272_s0 + $0x2c0] sm:$0xff]  ;;  %v3854_v49 = vld [vmem:[%s7272_s0 + $0x2c8] sm:$0xff]  ;;  %v3875_v50 = vld [vmem:[%s7272_s0 + $0x370] sm:$0xff] }
  0x27   :  { %554 = vmatpush.msra.mxu2 %v3879_v61  ;;  %574 = vmatpush.msra.mxu3 %v3880_v62  ;;  %v3876_v51 = vld [vmem:[%s7272_s0 + $0x378] sm:$0xff]  ;;  %v3837_v52 = vld [vmem:[%s7272_s0 + $0x240] sm:$0xff]  ;;  %v3838_v53 = vld [vmem:[%s7272_s0 + $0x248] sm:$0xff] }
  0x28   :  { %334 = vmatpush.msrb.mxu0 %v40_v63  ;;  %354 = vmatpush.msrb.mxu1 %v41_v0  ;;  %v3859_v54 = vld [vmem:[%s7272_s0 + $0x2f0] sm:$0xff]  ;;  %v3860_v55 = vld [vmem:[%s7272_s0 + $0x2f8] sm:$0xff]  ;;  %v3889_v56 = vld [vmem:[%s7272_s0 + $0x3e0] sm:$0xff] }
  0x29   :  { %555 = vmatpush.msra.mxu2 %v3863_v1  ;;  %575 = vmatpush.msra.mxu3 %v3864_v2  ;;  %v3890_v57 = vld [vmem:[%s7272_s0 + $0x3e8] sm:$0xff]  ;;  %v3843_v58 = vld [vmem:[%s7272_s0 + $0x270] sm:$0xff]  ;;  %v3844_v59 = vld [vmem:[%s7272_s0 + $0x278] sm:$0xff] }
  0x2a   :  { %335 = vmatpush.msrb.mxu0 %v24_v3  ;;  %355 = vmatpush.msrb.mxu1 %v25_v4  ;;  %v3873_v60 = vld [vmem:[%s7272_s0 + $0x360] sm:$0xff]  ;;  %v3874_v61 = vld [vmem:[%s7272_s0 + $0x368] sm:$0xff]  ;;  %v3960_v62 = vld [vmem:[%s7272_s0 + $0x590] sm:$0xff] }
  0x2b   :  { %556 = vmatpush.msra.mxu2 %v3847_v5  ;;  %576 = vmatpush.msra.mxu3 %v3848_v6  ;;  %v3961_v63 = vld [vmem:[%s7272_s0 + $0x598] sm:$0xff]  ;;  %v3857_v0 = vld [vmem:[%s7272_s0 + $0x2e0] sm:$0xff]  ;;  %v3858_v1 = vld [vmem:[%s7272_s0 + $0x2e8] sm:$0xff] }
  0x2c   :  { %3824 = vmatmul.msk.f32.vlgmr.msrb.gmra.mxu0 %vm76_vm0, %v4818_v12  ;;  %3825 = vmatmul.msk.f32.vlgmr.msrb.gmra.mxu1 %vm76_vm0, %v4818_v12  ;;  %v3883_v12 = vld [vmem:[%s7272_s0 + $0x3b0] sm:$0xff]  ;;  %v3945_v3 = vld [vmem:[%s7272_s0 + $0x518] sm:$0xff]  ;;  %v3841_v4 = vld [vmem:[%s7272_s0 + $0x260] sm:$0xff] }
  0x2d   :  { %514 = vmatpush.msra.mxu0 %v3877_v7  ;;  %534 = vmatpush.msra.mxu1 %v3878_v8  ;;  %v3944_v2 = vld [vmem:[%s7272_s0 + $0x510] sm:$0xff]  ;;  %v3842_v5 = vld [vmem:[%s7272_s0 + $0x268] sm:$0xff]  ;;  %v3929_v7 = vld [vmem:[%s7272_s0 + $0x498] sm:$0xff] }
  0x2e   :  { %557 = vmatpush.msra.mxu2 %v3831_v9  ;;  %577 = vmatpush.msra.mxu3 %v3832_v10  ;;  %v3928_v6 = vld [vmem:[%s7272_s0 + $0x490] sm:$0xff]  ;;  %v3958_v8 = vld [vmem:[%s7272_s0 + $0x580] sm:$0xff]  ;;  %v3959_v9 = vld [vmem:[%s7272_s0 + $0x588] sm:$0xff] }
  0x2f   :  { %515 = vmatpush.msra.mxu0 %v3861_v11  ;;  %535 = vmatpush.msra.mxu1 %v3862_v13  ;;  %v3912_v10 = vld [vmem:[%s7272_s0 + $0x410] sm:$0xff]  ;;  %v3913_v11 = vld [vmem:[%s7272_s0 + $0x418] sm:$0xff]  ;;  %v3942_v13 = vld [vmem:[%s7272_s0 + $0x500] sm:$0xff] }
  0x30   :  { %3895 = vmatmul.msk.f32.vlgmr.msra.gmra.mxu2 %vm76_vm0, %v5047_v14  ;;  %3896 = vmatmul.msk.f32.vlgmr.msra.gmra.mxu3 %vm76_vm0, %v5047_v14 }
  0x31   :  { %634 = vmatpush.msrb.mxu2 %v3883_v12  ;;  %654 = vmatpush.msrb.mxu3 %v3884_v15  ;;  %v3943_v12 = vld [vmem:[%s7272_s0 + $0x508] sm:$0xff]  ;;  %v5276_v15 = vld [vmem:[%s7273_s1 + $0x10] sm:$0xff] }
  0x32   :  { %516 = vmatpush.msra.mxu0 %v3845_v16  ;;  %536 = vmatpush.msra.mxu1 %v3846_v17  ;;  %v3965_v16 = vld [vmem:[%s7272_s0 + $0x5b8] sm:$0xff]  ;;  %v3926_v17 = vld [vmem:[%s7272_s0 + $0x480] sm:$0xff] }
  0x33   :  { %635 = vmatpush.msrb.mxu2 %v3867_v18  ;;  %655 = vmatpush.msrb.mxu3 %v3868_v19  ;;  %v3927_v18 = vld [vmem:[%s7272_s0 + $0x488] sm:$0xff]  ;;  %v3948_v19 = vld [vmem:[%s7272_s0 + $0x530] sm:$0xff] }
  0x34   :  { %517 = vmatpush.msra.mxu0 %v3829_v20  ;;  %537 = vmatpush.msra.mxu1 %v3830_v21  ;;  %v3949_v20 = vld [vmem:[%s7272_s0 + $0x538] sm:$0xff]  ;;  %v3910_v21 = vld [vmem:[%s7272_s0 + $0x400] sm:$0xff] }
  0x35   :  { %636 = vmatpush.msrb.mxu2 %v3851_v22  ;;  %656 = vmatpush.msrb.mxu3 %v3852_v23  ;;  %v3911_v22 = vld [vmem:[%s7272_s0 + $0x408] sm:$0xff]  ;;  %v3932_v23 = vld [vmem:[%s7272_s0 + $0x4b0] sm:$0xff] }
  0x36   :  { %3893 = vmatmul.msk.f32.vlgmr.msra.gmra.mxu0 %vm76_vm0, %v5047_v14  ;;  %3894 = vmatmul.msk.f32.vlgmr.msra.gmra.mxu1 %vm76_vm0, %v5047_v14 }
  0x37   :  { %594 = vmatpush.msrb.mxu0 %v3881_v24  ;;  %614 = vmatpush.msrb.mxu1 %v3882_v25  ;;  %v3933_v24 = vld [vmem:[%s7272_s0 + $0x4b8] sm:$0xff]  ;;  %v3962_v25 = vld [vmem:[%s7272_s0 + $0x5a0] sm:$0xff] }
  0x38   :  { %637 = vmatpush.msrb.mxu2 %v3835_v26  ;;  %657 = vmatpush.msrb.mxu3 %v3836_v27  ;;  %v3963_v26 = vld [vmem:[%s7272_s0 + $0x5a8] sm:$0xff]  ;;  %v3916_v27 = vld [vmem:[%s7272_s0 + $0x430] sm:$0xff] }
  0x39   :  { %595 = vmatpush.msrb.mxu0 %v3865_v28  ;;  %615 = vmatpush.msrb.mxu1 %v3866_v29  ;;  %v3917_v28 = vld [vmem:[%s7272_s0 + $0x438] sm:$0xff]  ;;  %v3946_v29 = vld [vmem:[%s7272_s0 + $0x520] sm:$0xff] }
  0x3a   :  { %3899 = vmatmul.msk.f32.vlgmr.msrb.gmra.mxu2 %vm76_vm0, %v5047_v14  ;;  %3900 = vmatmul.msk.f32.vlgmr.msrb.gmra.mxu3 %vm76_vm0, %v5047_v14 }
  0x3b   :  { %714 = vmatpush.msra.mxu2 %v3887_v30  ;;  %734 = vmatpush.msra.mxu3 %v3888_v31  ;;  %v3947_v30 = vld [vmem:[%s7272_s0 + $0x528] sm:$0xff]  ;;  %v3968_v31 = vld [vmem:[%s7272_s0 + $0x5d0] sm:$0xff] }
  0x3c   :  { %596 = vmatpush.msrb.mxu0 %v3849_v32  ;;  %616 = vmatpush.msrb.mxu1 %v3850_v33  ;;  %v3969_v32 = vld [vmem:[%s7272_s0 + $0x5d8] sm:$0xff]  ;;  %v3930_v33 = vld [vmem:[%s7272_s0 + $0x4a0] sm:$0xff] }
  0x3d   :  { %715 = vmatpush.msra.mxu2 %v3871_v34  ;;  %735 = vmatpush.msra.mxu3 %v3872_v35  ;;  %v3931_v34 = vld [vmem:[%s7272_s0 + $0x4a8] sm:$0xff]  ;;  %v3952_v35 = vld [vmem:[%s7272_s0 + $0x550] sm:$0xff] }
  0x3e   :  { %597 = vmatpush.msrb.mxu0 %v3833_v36  ;;  %617 = vmatpush.msrb.mxu1 %v3834_v37  ;;  %v3953_v36 = vld [vmem:[%s7272_s0 + $0x558] sm:$0xff]  ;;  %v3914_v37 = vld [vmem:[%s7272_s0 + $0x420] sm:$0xff] }
  0x3f   :  { %716 = vmatpush.msra.mxu2 %v3855_v38  ;;  %736 = vmatpush.msra.mxu3 %v3856_v39  ;;  %v3915_v38 = vld [vmem:[%s7272_s0 + $0x428] sm:$0xff]  ;;  %v3936_v39 = vld [vmem:[%s7272_s0 + $0x4d0] sm:$0xff] }
  0x40   :  { %3897 = vmatmul.msk.f32.vlgmr.msrb.gmra.mxu0 %vm76_vm0, %v5047_v14  ;;  %3898 = vmatmul.msk.f32.vlgmr.msrb.gmra.mxu1 %vm76_vm0, %v5047_v14 }
  0x41   :  { %674 = vmatpush.msra.mxu0 %v3885_v40  ;;  %694 = vmatpush.msra.mxu1 %v3886_v41  ;;  %v3937_v40 = vld [vmem:[%s7272_s0 + $0x4d8] sm:$0xff]  ;;  %v3966_v41 = vld [vmem:[%s7272_s0 + $0x5c0] sm:$0xff] }
  0x42   :  { %717 = vmatpush.msra.mxu2 %v3839_v42  ;;  %737 = vmatpush.msra.mxu3 %v3840_v43  ;;  %v3967_v42 = vld [vmem:[%s7272_s0 + $0x5c8] sm:$0xff]  ;;  %v3920_v43 = vld [vmem:[%s7272_s0 + $0x450] sm:$0xff] }
  0x43   :  { %675 = vmatpush.msra.mxu0 %v3869_v44  ;;  %695 = vmatpush.msra.mxu1 %v3870_v45  ;;  %v3921_v44 = vld [vmem:[%s7272_s0 + $0x458] sm:$0xff]  ;;  %v3950_v45 = vld [vmem:[%s7272_s0 + $0x540] sm:$0xff] }
  0x44   :  { %3903 = vmatmul.msk.f32.vlgmr.msra.gmra.mxu2 %vm76_vm0, %v5047_v14  ;;  %3904 = vmatmul.msk.f32.vlgmr.msra.gmra.mxu3 %vm76_vm0, %v5047_v14 }
  0x45   :  { %794 = vmatpush.msrb.mxu2 %v3891_v46  ;;  %814 = vmatpush.msrb.mxu3 %v3892_v47  ;;  %v3951_v46 = vld [vmem:[%s7272_s0 + $0x548] sm:$0xff]  ;;  %v3972_v47 = vld [vmem:[%s7272_s0 + $0x5f0] sm:$0xff] }
  0x46   :  { %676 = vmatpush.msra.mxu0 %v3853_v48  ;;  %696 = vmatpush.msra.mxu1 %v3854_v49  ;;  %v3973_v48 = vld [vmem:[%s7272_s0 + $0x5f8] sm:$0xff]  ;;  %v3934_v49 = vld [vmem:[%s7272_s0 + $0x4c0] sm:$0xff] }
  0x47   :  { %795 = vmatpush.msrb.mxu2 %v3875_v50  ;;  %815 = vmatpush.msrb.mxu3 %v3876_v51  ;;  %v3935_v50 = vld [vmem:[%s7272_s0 + $0x4c8] sm:$0xff]  ;;  %v3956_v51 = vld [vmem:[%s7272_s0 + $0x570] sm:$0xff] }
  0x48   :  { %677 = vmatpush.msra.mxu0 %v3837_v52  ;;  %697 = vmatpush.msra.mxu1 %v3838_v53  ;;  %v3957_v52 = vld [vmem:[%s7272_s0 + $0x578] sm:$0xff]  ;;  %v3918_v53 = vld [vmem:[%s7272_s0 + $0x440] sm:$0xff] }
  0x49   :  { %796 = vmatpush.msrb.mxu2 %v3859_v54  ;;  %816 = vmatpush.msrb.mxu3 %v3860_v55  ;;  %v3919_v54 = vld [vmem:[%s7272_s0 + $0x448] sm:$0xff]  ;;  %v3940_v55 = vld [vmem:[%s7272_s0 + $0x4f0] sm:$0xff] }
  0x4a   :  { %3901 = vmatmul.msk.f32.vlgmr.msra.gmra.mxu0 %vm76_vm0, %v5047_v14  ;;  %3902 = vmatmul.msk.f32.vlgmr.msra.gmra.mxu1 %vm76_vm0, %v5047_v14 }
  0x4b   :  { %754 = vmatpush.msrb.mxu0 %v3889_v56  ;;  %774 = vmatpush.msrb.mxu1 %v3890_v57  ;;  %v3941_v56 = vld [vmem:[%s7272_s0 + $0x4f8] sm:$0xff]  ;;  %v3970_v57 = vld [vmem:[%s7272_s0 + $0x5e0] sm:$0xff] }
  0x4c   :  { %797 = vmatpush.msrb.mxu2 %v3843_v58  ;;  %817 = vmatpush.msrb.mxu3 %v3844_v59  ;;  %v3971_v58 = vld [vmem:[%s7272_s0 + $0x5e8] sm:$0xff]  ;;  %v3924_v59 = vld [vmem:[%s7272_s0 + $0x470] sm:$0xff] }
  0x4d   :  { %755 = vmatpush.msrb.mxu0 %v3873_v60  ;;  %775 = vmatpush.msrb.mxu1 %v3874_v61  ;;  %v3925_v60 = vld [vmem:[%s7272_s0 + $0x478] sm:$0xff]  ;;  %v3954_v61 = vld [vmem:[%s7272_s0 + $0x560] sm:$0xff] }
  0x4e   :  { %3907 = vmatmul.msk.f32.vlgmr.msrb.gmra.mxu2 %vm76_vm0, %v5047_v14  ;;  %3908 = vmatmul.msk.f32.vlgmr.msrb.gmra.mxu3 %vm76_vm0, %v5047_v14 }
  0x4f   :  { %976 = vmatpush.msra.mxu2 %v3960_v62  ;;  %996 = vmatpush.msra.mxu3 %v3961_v63  ;;  %v3955_v62 = vld [vmem:[%s7272_s0 + $0x568] sm:$0xff]  ;;  %v4041_v63 = vld [vmem:[%s7272_s0 + $0x790] sm:$0xff] }
  0x50   :  { %756 = vmatpush.msrb.mxu0 %v3857_v0  ;;  %776 = vmatpush.msrb.mxu1 %v3858_v1  ;;  %v4042_v0 = vld [vmem:[%s7272_s0 + $0x798] sm:$0xff]  ;;  %v3938_v1 = vld [vmem:[%s7272_s0 + $0x4e0] sm:$0xff] }
  0x51   :  { %977 = vmatpush.msra.mxu2 %v3944_v2  ;;  %997 = vmatpush.msra.mxu3 %v3945_v3  ;;  %v3939_v2 = vld [vmem:[%s7272_s0 + $0x4e8] sm:$0xff]  ;;  %v4025_v3 = vld [vmem:[%s7272_s0 + $0x710] sm:$0xff] }
  0x52   :  { %757 = vmatpush.msrb.mxu0 %v3841_v4  ;;  %777 = vmatpush.msrb.mxu1 %v3842_v5  ;;  %v4026_v4 = vld [vmem:[%s7272_s0 + $0x718] sm:$0xff]  ;;  %v3922_v5 = vld [vmem:[%s7272_s0 + $0x460] sm:$0xff] }
  0x53   :  { %978 = vmatpush.msra.mxu2 %v3928_v6  ;;  %998 = vmatpush.msra.mxu3 %v3929_v7  ;;  %v3923_v6 = vld [vmem:[%s7272_s0 + $0x468] sm:$0xff]  ;;  %v4009_v7 = vld [vmem:[%s7272_s0 + $0x690] sm:$0xff] }
  0x54   :  { %3905 = vmatmul.msk.f32.vlgmr.msrb.gmra.mxu0 %vm76_vm0, %v5047_v14  ;;  %3906 = vmatmul.msk.f32.vlgmr.msrb.gmra.mxu1 %vm76_vm0, %v5047_v14  ;;  %v3964_v14 = vld [vmem:[%s7272_s0 + $0x5b0] sm:$0xff] }
  0x55   :  { %936 = vmatpush.msra.mxu0 %v3958_v8  ;;  %956 = vmatpush.msra.mxu1 %v3959_v9  ;;  %v4010_v8 = vld [vmem:[%s7272_s0 + $0x698] sm:$0xff]  ;;  %v4039_v9 = vld [vmem:[%s7272_s0 + $0x780] sm:$0xff] }
  0x56   :  { %979 = vmatpush.msra.mxu2 %v3912_v10  ;;  %999 = vmatpush.msra.mxu3 %v3913_v11  ;;  %v4040_v10 = vld [vmem:[%s7272_s0 + $0x788] sm:$0xff]  ;;  %v3993_v11 = vld [vmem:[%s7272_s0 + $0x610] sm:$0xff] }
  0x57   :  { %937 = vmatpush.msra.mxu0 %v3942_v13  ;;  %957 = vmatpush.msra.mxu1 %v3943_v12  ;;  %v3994_v13 = vld [vmem:[%s7272_s0 + $0x618] sm:$0xff]  ;;  %v4023_v12 = vld [vmem:[%s7272_s0 + $0x700] sm:$0xff] }
  0x58   :  { %3976 = vmatmul.msk.f32.vlgmr.msra.gmra.mxu2 %vm76_vm0, %v5276_v15  ;;  %3977 = vmatmul.msk.f32.vlgmr.msra.gmra.mxu3 %vm76_vm0, %v5276_v15 }
  0x59   :  { %1056 = vmatpush.msrb.mxu2 %v3964_v14  ;;  %1076 = vmatpush.msrb.mxu3 %v3965_v16  ;;  %v4024_v14 = vld [vmem:[%s7272_s0 + $0x708] sm:$0xff]  ;;  %v5505_v16 = vld [vmem:[%s7273_s1 + $0x18] sm:$0xff] }
  0x5a   :  { %938 = vmatpush.msra.mxu0 %v3926_v17  ;;  %958 = vmatpush.msra.mxu1 %v3927_v18  ;;  %v4046_v17 = vld [vmem:[%s7272_s0 + $0x7b8] sm:$0xff]  ;;  %v4007_v18 = vld [vmem:[%s7272_s0 + $0x680] sm:$0xff] }
  0x5b   :  { %1057 = vmatpush.msrb.mxu2 %v3948_v19  ;;  %1077 = vmatpush.msrb.mxu3 %v3949_v20  ;;  %v4008_v19 = vld [vmem:[%s7272_s0 + $0x688] sm:$0xff]  ;;  %v4029_v20 = vld [vmem:[%s7272_s0 + $0x730] sm:$0xff] }
  0x5c   :  { %939 = vmatpush.msra.mxu0 %v3910_v21  ;;  %959 = vmatpush.msra.mxu1 %v3911_v22  ;;  %v4030_v21 = vld [vmem:[%s7272_s0 + $0x738] sm:$0xff]  ;;  %v3991_v22 = vld [vmem:[%s7272_s0 + $0x600] sm:$0xff] }
  0x5d   :  { %1058 = vmatpush.msrb.mxu2 %v3932_v23  ;;  %1078 = vmatpush.msrb.mxu3 %v3933_v24  ;;  %v3992_v23 = vld [vmem:[%s7272_s0 + $0x608] sm:$0xff]  ;;  %v4013_v24 = vld [vmem:[%s7272_s0 + $0x6b0] sm:$0xff] }
  0x5e   :  { %3974 = vmatmul.msk.f32.vlgmr.msra.gmra.mxu0 %vm76_vm0, %v5276_v15  ;;  %3975 = vmatmul.msk.f32.vlgmr.msra.gmra.mxu1 %vm76_vm0, %v5276_v15 }
  0x5f   :  { %1016 = vmatpush.msrb.mxu0 %v3962_v25  ;;  %1036 = vmatpush.msrb.mxu1 %v3963_v26  ;;  %v4014_v25 = vld [vmem:[%s7272_s0 + $0x6b8] sm:$0xff]  ;;  %v4043_v26 = vld [vmem:[%s7272_s0 + $0x7a0] sm:$0xff] }
  0x60   :  { %1059 = vmatpush.msrb.mxu2 %v3916_v27  ;;  %1079 = vmatpush.msrb.mxu3 %v3917_v28  ;;  %v4044_v27 = vld [vmem:[%s7272_s0 + $0x7a8] sm:$0xff]  ;;  %v3997_v28 = vld [vmem:[%s7272_s0 + $0x630] sm:$0xff] }
  0x61   :  { %1017 = vmatpush.msrb.mxu0 %v3946_v29  ;;  %1037 = vmatpush.msrb.mxu1 %v3947_v30  ;;  %v3998_v29 = vld [vmem:[%s7272_s0 + $0x638] sm:$0xff]  ;;  %v4027_v30 = vld [vmem:[%s7272_s0 + $0x720] sm:$0xff] }
  0x62   :  { %3980 = vmatmul.msk.f32.vlgmr.msrb.gmra.mxu2 %vm76_vm0, %v5276_v15  ;;  %3981 = vmatmul.msk.f32.vlgmr.msrb.gmra.mxu3 %vm76_vm0, %v5276_v15 }
  0x63   :  { %1136 = vmatpush.msra.mxu2 %v3968_v31  ;;  %1156 = vmatpush.msra.mxu3 %v3969_v32  ;;  %v4028_v31 = vld [vmem:[%s7272_s0 + $0x728] sm:$0xff]  ;;  %v4049_v32 = vld [vmem:[%s7272_s0 + $0x7d0] sm:$0xff] }
  0x64   :  { %1018 = vmatpush.msrb.mxu0 %v3930_v33  ;;  %1038 = vmatpush.msrb.mxu1 %v3931_v34  ;;  %v4050_v33 = vld [vmem:[%s7272_s0 + $0x7d8] sm:$0xff]  ;;  %v4011_v34 = vld [vmem:[%s7272_s0 + $0x6a0] sm:$0xff] }
  0x65   :  { %1137 = vmatpush.msra.mxu2 %v3952_v35  ;;  %1157 = vmatpush.msra.mxu3 %v3953_v36  ;;  %v4012_v35 = vld [vmem:[%s7272_s0 + $0x6a8] sm:$0xff]  ;;  %v4033_v36 = vld [vmem:[%s7272_s0 + $0x750] sm:$0xff] }
  0x66   :  { %1019 = vmatpush.msrb.mxu0 %v3914_v37  ;;  %1039 = vmatpush.msrb.mxu1 %v3915_v38  ;;  %v4034_v37 = vld [vmem:[%s7272_s0 + $0x758] sm:$0xff]  ;;  %v3995_v38 = vld [vmem:[%s7272_s0 + $0x620] sm:$0xff] }
  0x67   :  { %1138 = vmatpush.msra.mxu2 %v3936_v39  ;;  %1158 = vmatpush.msra.mxu3 %v3937_v40  ;;  %v3996_v39 = vld [vmem:[%s7272_s0 + $0x628] sm:$0xff] }
  0x68   :  { %3978 = vmatmul.msk.f32.vlgmr.msrb.gmra.mxu0 %vm76_vm0, %v5276_v15  ;;  %3979 = vmatmul.msk.f32.vlgmr.msrb.gmra.mxu1 %vm76_vm0, %v5276_v15 }
  0x69   :  { %1096 = vmatpush.msra.mxu0 %v3966_v41  ;;  %1116 = vmatpush.msra.mxu1 %v3967_v42  ;;  %v4017_v42 = vld [vmem:[%s7272_s0 + $0x6d0] sm:$0xff] }
  0x6a   :  { %1139 = vmatpush.msra.mxu2 %v3920_v43  ;;  %1159 = vmatpush.msra.mxu3 %v3921_v44  ;;  %v4018_v43 = vld [vmem:[%s7272_s0 + $0x6d8] sm:$0xff] }
  0x6b   :  { %1097 = vmatpush.msra.mxu0 %v3950_v45  ;;  %1117 = vmatpush.msra.mxu1 %v3951_v46  ;;  %v4047_v46 = vld [vmem:[%s7272_s0 + $0x7c0] sm:$0xff] }
  0x6c   :  { %3984 = vmatmul.msk.f32.vlgmr.msra.gmra.mxu2 %vm76_vm0, %v5276_v15  ;;  %3985 = vmatmul.msk.f32.vlgmr.msra.gmra.mxu3 %vm76_vm0, %v5276_v15 }
  0x6d   :  { %1216 = vmatpush.msrb.mxu2 %v3972_v47  ;;  %1236 = vmatpush.msrb.mxu3 %v3973_v48  ;;  %v4048_v47 = vld [vmem:[%s7272_s0 + $0x7c8] sm:$0xff]  ;;  %v4001_v48 = vld [vmem:[%s7272_s0 + $0x650] sm:$0xff] }
  0x6e   :  { %1098 = vmatpush.msra.mxu0 %v3934_v49  ;;  %1118 = vmatpush.msra.mxu1 %v3935_v50  ;;  %v4002_v49 = vld [vmem:[%s7272_s0 + $0x658] sm:$0xff]  ;;  %v4031_v50 = vld [vmem:[%s7272_s0 + $0x740] sm:$0xff] }
  0x6f   :  { %1217 = vmatpush.msrb.mxu2 %v3956_v51  ;;  %1237 = vmatpush.msrb.mxu3 %v3957_v52  ;;  %v4032_v51 = vld [vmem:[%s7272_s0 + $0x748] sm:$0xff] }
  0x70   :  { %1099 = vmatpush.msra.mxu0 %v3918_v53  ;;  %1119 = vmatpush.msra.mxu1 %v3919_v54  ;;  %v4053_v53 = vld [vmem:[%s7272_s0 + $0x7f0] sm:$0xff]  ;;  %v4054_v54 = vld [vmem:[%s7272_s0 + $0x7f8] sm:$0xff] }
  0x71   :  { %1218 = vmatpush.msrb.mxu2 %v3940_v55  ;;  %1238 = vmatpush.msrb.mxu3 %v3941_v56  ;;  %v4015_v56 = vld [vmem:[%s7272_s0 + $0x6c0] sm:$0xff] }
  0x72   :  { %3982 = vmatmul.msk.f32.vlgmr.msra.gmra.mxu0 %vm76_vm0, %v5276_v15  ;;  %3983 = vmatmul.msk.f32.vlgmr.msra.gmra.mxu1 %vm76_vm0, %v5276_v15 }
  0x73   :  { %1176 = vmatpush.msrb.mxu0 %v3970_v57  ;;  %1196 = vmatpush.msrb.mxu1 %v3971_v58  ;;  %v4016_v57 = vld [vmem:[%s7272_s0 + $0x6c8] sm:$0xff] }
  0x74   :  { %1219 = vmatpush.msrb.mxu2 %v3924_v59  ;;  %1239 = vmatpush.msrb.mxu3 %v3925_v60  ;;  %v4037_v59 = vld [vmem:[%s7272_s0 + $0x770] sm:$0xff]  ;;  %v4038_v60 = vld [vmem:[%s7272_s0 + $0x778] sm:$0xff] }
  0x75   :  { %1177 = vmatpush.msrb.mxu0 %v3954_v61  ;;  %1197 = vmatpush.msrb.mxu1 %v3955_v62  ;;  %v3999_v62 = vld [vmem:[%s7272_s0 + $0x640] sm:$0xff] }
  0x76   :  { %3988 = vmatmul.msk.f32.vlgmr.msrb.gmra.mxu2 %vm76_vm0, %v5276_v15  ;;  %3989 = vmatmul.msk.f32.vlgmr.msrb.gmra.mxu3 %vm76_vm0, %v5276_v15 }
  0x77   :  { %1398 = vmatpush.msra.mxu2 %v4041_v63  ;;  %1418 = vmatpush.msra.mxu3 %v4042_v0  ;;  %v4000_v63 = vld [vmem:[%s7272_s0 + $0x648] sm:$0xff] }
  0x78   :  { %1178 = vmatpush.msrb.mxu0 %v3938_v1  ;;  %1198 = vmatpush.msrb.mxu1 %v3939_v2  ;;  %v4021_v2 = vld [vmem:[%s7272_s0 + $0x6f0] sm:$0xff] }
  0x79   :  { %1399 = vmatpush.msra.mxu2 %v4025_v3  ;;  %1419 = vmatpush.msra.mxu3 %v4026_v4  ;;  %v4022_v3 = vld [vmem:[%s7272_s0 + $0x6f8] sm:$0xff] }
  0x7a   :  { %1179 = vmatpush.msrb.mxu0 %v3922_v5  ;;  %1199 = vmatpush.msrb.mxu1 %v3923_v6  ;;  %v4051_v6 = vld [vmem:[%s7272_s0 + $0x7e0] sm:$0xff] }
  0x7b   :  { %1400 = vmatpush.msra.mxu2 %v4009_v7  ;;  %1420 = vmatpush.msra.mxu3 %v4010_v8  ;;  %v4052_v7 = vld [vmem:[%s7272_s0 + $0x7e8] sm:$0xff]  ;;  %v4005_v8 = vld [vmem:[%s7272_s0 + $0x670] sm:$0xff] }
  0x7c   :  { %3986 = vmatmul.msk.f32.vlgmr.msrb.gmra.mxu0 %vm76_vm0, %v5276_v15  ;;  %3987 = vmatmul.msk.f32.vlgmr.msrb.gmra.mxu1 %vm76_vm0, %v5276_v15  ;;  %v4045_v15 = vld [vmem:[%s7272_s0 + $0x7b0] sm:$0xff] }
  0x7d   :  { %1358 = vmatpush.msra.mxu0 %v4039_v9  ;;  %1378 = vmatpush.msra.mxu1 %v4040_v10  ;;  %v4006_v9 = vld [vmem:[%s7272_s0 + $0x678] sm:$0xff]  ;;  %v4035_v10 = vld [vmem:[%s7272_s0 + $0x760] sm:$0xff] }
  0x7e   :  { %1401 = vmatpush.msra.mxu2 %v3993_v11  ;;  %1421 = vmatpush.msra.mxu3 %v3994_v13  ;;  %v4036_v11 = vld [vmem:[%s7272_s0 + $0x768] sm:$0xff] }
  0x7f   :  { %1359 = vmatpush.msra.mxu0 %v4023_v12  ;;  %1379 = vmatpush.msra.mxu1 %v4024_v14  ;;  %v4122_v12 = vld [vmem:[%s7272_s0 + $0x990] sm:$0xff]  ;;  %v4123_v14 = vld [vmem:[%s7272_s0 + $0x998] sm:$0xff] }
  0x80   :  { %4057 = vmatmul.msk.f32.vlgmr.msra.gmra.mxu2 %vm76_vm0, %v5505_v16  ;;  %4058 = vmatmul.msk.f32.vlgmr.msra.gmra.mxu3 %vm76_vm0, %v5505_v16 }
  0x81   :  { %1478 = vmatpush.msrb.mxu2 %v4045_v15  ;;  %1498 = vmatpush.msrb.mxu3 %v4046_v17  ;;  %v4019_v17 = vld [vmem:[%s7272_s0 + $0x6e0] sm:$0xff] }
  0x82   :  { %1360 = vmatpush.msra.mxu0 %v4007_v18  ;;  %1380 = vmatpush.msra.mxu1 %v4008_v19  ;;  %v4020_v18 = vld [vmem:[%s7272_s0 + $0x6e8] sm:$0xff] }
  0x83   :  { %1479 = vmatpush.msrb.mxu2 %v4029_v20  ;;  %1499 = vmatpush.msrb.mxu3 %v4030_v21  ;;  %v4106_v20 = vld [vmem:[%s7272_s0 + $0x910] sm:$0xff]  ;;  %v4107_v21 = vld [vmem:[%s7272_s0 + $0x918] sm:$0xff] }
  0x84   :  { %1361 = vmatpush.msra.mxu0 %v3991_v22  ;;  %1381 = vmatpush.msra.mxu1 %v3992_v23  ;;  %v4003_v23 = vld [vmem:[%s7272_s0 + $0x660] sm:$0xff] }
  0x85   :  { %1480 = vmatpush.msrb.mxu2 %v4013_v24  ;;  %1500 = vmatpush.msrb.mxu3 %v4014_v25  ;;  %v4004_v24 = vld [vmem:[%s7272_s0 + $0x668] sm:$0xff] }
  0x86   :  { %4055 = vmatmul.msk.f32.vlgmr.msra.gmra.mxu0 %vm76_vm0, %v5505_v16  ;;  %4056 = vmatmul.msk.f32.vlgmr.msra.gmra.mxu1 %vm76_vm0, %v5505_v16 }
  0x87   :  { %1438 = vmatpush.msrb.mxu0 %v4043_v26  ;;  %1458 = vmatpush.msrb.mxu1 %v4044_v27  ;;  %v4090_v27 = vld [vmem:[%s7272_s0 + $0x890] sm:$0xff] }
  0x88   :  { %1481 = vmatpush.msrb.mxu2 %v3997_v28  ;;  %1501 = vmatpush.msrb.mxu3 %v3998_v29  ;;  %v4091_v28 = vld [vmem:[%s7272_s0 + $0x898] sm:$0xff] }
  0x89   :  { %1439 = vmatpush.msrb.mxu0 %v4027_v30  ;;  %1459 = vmatpush.msrb.mxu1 %v4028_v31  ;;  %v4120_v31 = vld [vmem:[%s7272_s0 + $0x980] sm:$0xff] }
  0x8a   :  { %4061 = vmatmul.msk.f32.vlgmr.msrb.gmra.mxu2 %vm76_vm0, %v5505_v16  ;;  %4062 = vmatmul.msk.f32.vlgmr.msrb.gmra.mxu3 %vm76_vm0, %v5505_v16  ;;  %v97_v40 = vpop.f32.mrf.mxu0  ;;  %v117_v41 = vpop.f32.mrf.mxu1 }
  0x8b   :  { %1558 = vmatpush.msra.mxu2 %v4049_v32  ;;  %1578 = vmatpush.msra.mxu3 %v4050_v33  ;;  %4476 = vtanh.f32 %v97_v40  ;;  %v4121_v32 = vld [vmem:[%s7272_s0 + $0x988] sm:$0xff]  ;;  %v4074_v33 = vld [vmem:[%s7272_s0 + $0x810] sm:$0xff] }
  0x8c   :  { %1440 = vmatpush.msrb.mxu0 %v4011_v34  ;;  %1460 = vmatpush.msrb.mxu1 %v4012_v35  ;;  %v137_v44 = vpop.f32.mrf.mxu2  ;;  %v157_v45 = vpop.f32.mrf.mxu3  ;;  %4478 = vtanh.f32 %v117_v41  ;;  %v4075_v34 = vld [vmem:[%s7272_s0 + $0x818] sm:$0xff]  ;;  %v4104_v35 = vld [vmem:[%s7272_s0 + $0x900] sm:$0xff] }
  0x8d   :  { %1559 = vmatpush.msra.mxu2 %v4033_v36  ;;  %1579 = vmatpush.msra.mxu3 %v4034_v37  ;;  %4480 = vtanh.f32 %v137_v44  ;;  %v4105_v36 = vld [vmem:[%s7272_s0 + $0x908] sm:$0xff]  ;;  %v5758_v37 = vld [vmem:[%s7273_s1 + $0x20] sm:$0xff]  ;;  %v4110_v44 = vld [vmem:[%s7272_s0 + $0x930] sm:$0xff] }
  0x8e   :  { %1441 = vmatpush.msrb.mxu0 %v3995_v38  ;;  %1461 = vmatpush.msrb.mxu1 %v3996_v39  ;;  %4482 = vtanh.f32 %v157_v45  ;;  %v4127_v39 = vld [vmem:[%s7272_s0 + $0x9b8] sm:$0xff]  ;;  %v4088_v41 = vld [vmem:[%s7272_s0 + $0x880] sm:$0xff] }
  0x8f   :  { %1560 = vmatpush.msra.mxu2 %v4017_v42  ;;  %1580 = vmatpush.msra.mxu3 %v4018_v43  ;;  %v4089_v42 = vld [vmem:[%s7272_s0 + $0x888] sm:$0xff]  ;;  %v4111_v45 = vld [vmem:[%s7272_s0 + $0x938] sm:$0xff] }
  0x90   :  { %4059 = vmatmul.msk.f32.vlgmr.msrb.gmra.mxu0 %vm76_vm0, %v5505_v16  ;;  %4060 = vmatmul.msk.f32.vlgmr.msrb.gmra.mxu1 %vm76_vm0, %v5505_v16 }
  0x91   :  { %1518 = vmatpush.msra.mxu0 %v4047_v46  ;;  %1538 = vmatpush.msra.mxu1 %v4048_v47  ;;  %v4477_v52 = vpop.eup %4476  ;;  %v4072_v47 = vld [vmem:[%s7272_s0 + $0x800] sm:$0xff] }
  0x92   :  { %1561 = vmatpush.msra.mxu2 %v4001_v48  ;;  %1581 = vmatpush.msra.mxu3 %v4002_v49  ;;  %v4479_v55 = vpop.eup %4478  ;;  %416 = vst [vmem:[%s7274_s2] sm:$0xff] %v4477_v52  ;;  %v4073_v48 = vld [vmem:[%s7272_s0 + $0x808] sm:$0xff]  ;;  %v4095_v52 = vld [vmem:[%s7272_s0 + $0x8b8] sm:$0xff] }
  0x93   :  { %1519 = vmatpush.msra.mxu0 %v4031_v50  ;;  %1539 = vmatpush.msra.mxu1 %v4032_v51  ;;  %v4481_v58 = vpop.eup %4480  ;;  %417 = vst [vmem:[%s7274_s2 + $0x8] sm:$0xff] %v4479_v55  ;;  %v4094_v51 = vld [vmem:[%s7272_s0 + $0x8b0] sm:$0xff]  ;;  %v4124_v55 = vld [vmem:[%s7272_s0 + $0x9a0] sm:$0xff] }
  0x94   :  { %4065 = vmatmul.msk.f32.vlgmr.msra.gmra.mxu2 %vm76_vm0, %v5505_v16  ;;  %4066 = vmatmul.msk.f32.vlgmr.msra.gmra.mxu3 %vm76_vm0, %v5505_v16  ;;  %v4483_v61 = vpop.eup %4482  ;;  %418 = vst [vmem:[%s7274_s2 + $0x10] sm:$0xff] %v4481_v58  ;;  %v4079_v58 = vld [vmem:[%s7272_s0 + $0x838] sm:$0xff] }
  0x95   :  { %1638 = vmatpush.msrb.mxu2 %v4053_v53  ;;  %1658 = vmatpush.msrb.mxu3 %v4054_v54  ;;  %v177_v0 = vpop.f32.mrf.mxu0  ;;  %v197_v1 = vpop.f32.mrf.mxu1  ;;  %419 = vst [vmem:[%s7274_s2 + $0x18] sm:$0xff] %v4483_v61 }
  0x96   :  { %1520 = vmatpush.msra.mxu0 %v4015_v56  ;;  %1540 = vmatpush.msra.mxu1 %v4016_v57  ;;  %4484 = vtanh.f32 %v177_v0  ;;  %v217_v4 = vpop.f32.mrf.mxu2  ;;  %v237_v5 = vpop.f32.mrf.mxu3  ;;  %v4125_v56 = vld [vmem:[%s7272_s0 + $0x9a8] sm:$0xff]  ;;  %v4078_v57 = vld [vmem:[%s7272_s0 + $0x830] sm:$0xff] }
  0x97   :  { %1639 = vmatpush.msrb.mxu2 %v4037_v59  ;;  %1659 = vmatpush.msrb.mxu3 %v4038_v60  ;;  %4486 = vtanh.f32 %v197_v1  ;;  %v4108_v59 = vld [vmem:[%s7272_s0 + $0x920] sm:$0xff]  ;;  %v4109_v60 = vld [vmem:[%s7272_s0 + $0x928] sm:$0xff] }
  0x98   :  { %1521 = vmatpush.msra.mxu0 %v3999_v62  ;;  %1541 = vmatpush.msra.mxu1 %v4000_v63  ;;  %4488 = vtanh.f32 %v217_v4  ;;  %v4130_v62 = vld [vmem:[%s7272_s0 + $0x9d0] sm:$0xff]  ;;  %v4131_v63 = vld [vmem:[%s7272_s0 + $0x9d8] sm:$0xff]  ;;  %v4092_v1 = vld [vmem:[%s7272_s0 + $0x8a0] sm:$0xff] }
  0x99   :  { %1640 = vmatpush.msrb.mxu2 %v4021_v2  ;;  %1660 = vmatpush.msrb.mxu3 %v4022_v3  ;;  %4490 = vtanh.f32 %v237_v5  ;;  %v4093_v2 = vld [vmem:[%s7272_s0 + $0x8a8] sm:$0xff]  ;;  %v4114_v4 = vld [vmem:[%s7272_s0 + $0x950] sm:$0xff]  ;;  %v4115_v5 = vld [vmem:[%s7272_s0 + $0x958] sm:$0xff] }
  0x9a   :  { %4063 = vmatmul.msk.f32.vlgmr.msra.gmra.mxu0 %vm76_vm0, %v5505_v16  ;;  %4064 = vmatmul.msk.f32.vlgmr.msra.gmra.mxu1 %vm76_vm0, %v5505_v16 }
  0x9b   :  { %1598 = vmatpush.msrb.mxu0 %v4051_v6  ;;  %1618 = vmatpush.msrb.mxu1 %v4052_v7  ;;  %v4076_v7 = vld [vmem:[%s7272_s0 + $0x820] sm:$0xff] }
  0x9c   :  { %v4485_v13 = vpop.eup %4484  ;;  %1641 = vmatpush.msrb.mxu2 %v4005_v8  ;;  %1661 = vmatpush.msrb.mxu3 %v4006_v9  ;;  %v4077_v8 = vld [vmem:[%s7272_s0 + $0x828] sm:$0xff] }
  0x9d   :  { %v4487_v15 = vpop.eup %4486  ;;  %1599 = vmatpush.msrb.mxu0 %v4035_v10  ;;  %1619 = vmatpush.msrb.mxu1 %v4036_v11  ;;  %420 = vst [vmem:[%s7274_s2 + $0x20] sm:$0xff] %v4485_v13  ;;  %v4098_v11 = vld [vmem:[%s7272_s0 + $0x8d0] sm:$0xff]  ;;  %v4099_v13 = vld [vmem:[%s7272_s0 + $0x8d8] sm:$0xff] }
  0x9e   :  { %v4489_v19 = vpop.eup %4488  ;;  %4069 = vmatmul.msk.f32.vlgmr.msrb.gmra.mxu2 %vm76_vm0, %v5505_v16  ;;  %4070 = vmatmul.msk.f32.vlgmr.msrb.gmra.mxu3 %vm76_vm0, %v5505_v16  ;;  %421 = vst [vmem:[%s7274_s2 + $0x28] sm:$0xff] %v4487_v15  ;;  %v4128_v15 = vld [vmem:[%s7272_s0 + $0x9c0] sm:$0xff] }
  0x9f   :  { %v4491_v22 = vpop.eup %4490  ;;  %1820 = vmatpush.msra.mxu2 %v4122_v12  ;;  %1840 = vmatpush.msra.mxu3 %v4123_v14  ;;  %422 = vst [vmem:[%s7274_s2 + $0x30] sm:$0xff] %v4489_v19  ;;  %v257_v25 = vpop.f32.mrf.mxu0  ;;  %v4083_v19 = vld [vmem:[%s7272_s0 + $0x858] sm:$0xff] }
  0xa0   :  { %v277_v26 = vpop.f32.mrf.mxu1  ;;  %1600 = vmatpush.msrb.mxu0 %v4019_v17  ;;  %1620 = vmatpush.msrb.mxu1 %v4020_v18  ;;  %423 = vst [vmem:[%s7274_s2 + $0x38] sm:$0xff] %v4491_v22  ;;  %4492 = vtanh.f32 %v257_v25  ;;  %v297_v29 = vpop.f32.mrf.mxu2  ;;  %v4129_v17 = vld [vmem:[%s7272_s0 + $0x9c8] sm:$0xff]  ;;  %v4082_v18 = vld [vmem:[%s7272_s0 + $0x850] sm:$0xff] }
  0xa1   :  { %v317_v30 = vpop.f32.mrf.mxu3  ;;  %1821 = vmatpush.msra.mxu2 %v4106_v20  ;;  %1841 = vmatpush.msra.mxu3 %v4107_v21  ;;  %4494 = vtanh.f32 %v277_v26  ;;  %v4112_v20 = vld [vmem:[%s7272_s0 + $0x940] sm:$0xff]  ;;  %v4113_v21 = vld [vmem:[%s7272_s0 + $0x948] sm:$0xff] }
  0xa2   :  { %1601 = vmatpush.msrb.mxu0 %v4003_v23  ;;  %1621 = vmatpush.msrb.mxu1 %v4004_v24  ;;  %4496 = vtanh.f32 %v297_v29  ;;  %v4134_v23 = vld [vmem:[%s7272_s0 + $0x9f0] sm:$0xff]  ;;  %v4135_v24 = vld [vmem:[%s7272_s0 + $0x9f8] sm:$0xff]  ;;  %v4096_v26 = vld [vmem:[%s7272_s0 + $0x8c0] sm:$0xff] }
  0xa3   :  { %1822 = vmatpush.msra.mxu2 %v4090_v27  ;;  %1842 = vmatpush.msra.mxu3 %v4091_v28  ;;  %4498 = vtanh.f32 %v317_v30  ;;  %v4097_v27 = vld [vmem:[%s7272_s0 + $0x8c8] sm:$0xff]  ;;  %v4118_v29 = vld [vmem:[%s7272_s0 + $0x970] sm:$0xff]  ;;  %v4119_v30 = vld [vmem:[%s7272_s0 + $0x978] sm:$0xff] }
  0xa4   :  { %4067 = vmatmul.msk.f32.vlgmr.msrb.gmra.mxu0 %vm76_vm0, %v5505_v16  ;;  %4068 = vmatmul.msk.f32.vlgmr.msrb.gmra.mxu1 %vm76_vm0, %v5505_v16  ;;  %v4126_v16 = vld [vmem:[%s7272_s0 + $0x9b0] sm:$0xff] }
  0xa5   :  { %1780 = vmatpush.msra.mxu0 %v4120_v31  ;;  %1800 = vmatpush.msra.mxu1 %v4121_v32  ;;  %v4080_v32 = vld [vmem:[%s7272_s0 + $0x840] sm:$0xff] }
  0xa6   :  { %v4493_v38 = vpop.eup %4492  ;;  %1823 = vmatpush.msra.mxu2 %v4074_v33  ;;  %1843 = vmatpush.msra.mxu3 %v4075_v34  ;;  %v4081_v33 = vld [vmem:[%s7272_s0 + $0x848] sm:$0xff] }
  0xa7   :  { %v4495_v40 = vpop.eup %4494  ;;  %1781 = vmatpush.msra.mxu0 %v4104_v35  ;;  %1801 = vmatpush.msra.mxu1 %v4105_v36  ;;  %424 = vst [vmem:[%s7274_s2 + $0x40] sm:$0xff] %v4493_v38  ;;  %v4102_v36 = vld [vmem:[%s7272_s0 + $0x8f0] sm:$0xff]  ;;  %v4103_v38 = vld [vmem:[%s7272_s0 + $0x8f8] sm:$0xff] }
  0xa8   :  { %v4497_v43 = vpop.eup %4496  ;;  %4138 = vmatmul.msk.f32.vlgmr.msra.gmra.mxu2 %vm76_vm0, %v5758_v37  ;;  %4139 = vmatmul.msk.f32.vlgmr.msra.gmra.mxu3 %vm76_vm0, %v5758_v37  ;;  %425 = vst [vmem:[%s7274_s2 + $0x48] sm:$0xff] %v4495_v40  ;;  %v4132_v40 = vld [vmem:[%s7272_s0 + $0x9e0] sm:$0xff] }
  0xa9   :  { %v4499_v46 = vpop.eup %4498  ;;  %1900 = vmatpush.msrb.mxu2 %v4126_v16  ;;  %1920 = vmatpush.msrb.mxu3 %v4127_v39  ;;  %426 = vst [vmem:[%s7274_s2 + $0x50] sm:$0xff] %v4497_v43  ;;  %v337_v49 = vpop.f32.mrf.mxu0  ;;  %v4087_v43 = vld [vmem:[%s7272_s0 + $0x878] sm:$0xff] }
  0xaa   :  { %v357_v50 = vpop.f32.mrf.mxu1  ;;  %1782 = vmatpush.msra.mxu0 %v4088_v41  ;;  %1802 = vmatpush.msra.mxu1 %v4089_v42  ;;  %427 = vst [vmem:[%s7274_s2 + $0x58] sm:$0xff] %v4499_v46  ;;  %4500 = vtanh.f32 %v337_v49  ;;  %v377_v53 = vpop.f32.mrf.mxu2  ;;  %v4133_v41 = vld [vmem:[%s7272_s0 + $0x9e8] sm:$0xff]  ;;  %v4086_v42 = vld [vmem:[%s7272_s0 + $0x870] sm:$0xff] }
  0xab   :  { %v397_v54 = vpop.f32.mrf.mxu3  ;;  %1901 = vmatpush.msrb.mxu2 %v4110_v44  ;;  %1921 = vmatpush.msrb.mxu3 %v4111_v45  ;;  %4502 = vtanh.f32 %v357_v50  ;;  %v4116_v44 = vld [vmem:[%s7272_s0 + $0x960] sm:$0xff]  ;;  %v4117_v45 = vld [vmem:[%s7272_s0 + $0x968] sm:$0xff] }
  0xac   :  { %1783 = vmatpush.msra.mxu0 %v4072_v47  ;;  %1803 = vmatpush.msra.mxu1 %v4073_v48  ;;  %4504 = vtanh.f32 %v377_v53  ;;  %v4203_v47 = vld [vmem:[%s7272_s0 + $0xb90] sm:$0xff]  ;;  %v4204_v48 = vld [vmem:[%s7272_s0 + $0xb98] sm:$0xff]  ;;  %v4100_v50 = vld [vmem:[%s7272_s0 + $0x8e0] sm:$0xff] }
  0xad   :  { %1902 = vmatpush.msrb.mxu2 %v4094_v51  ;;  %1922 = vmatpush.msrb.mxu3 %v4095_v52  ;;  %4506 = vtanh.f32 %v397_v54  ;;  %v4101_v51 = vld [vmem:[%s7272_s0 + $0x8e8] sm:$0xff]  ;;  %v4187_v53 = vld [vmem:[%s7272_s0 + $0xb10] sm:$0xff]  ;;  %v4188_v54 = vld [vmem:[%s7272_s0 + $0xb18] sm:$0xff] }
  0xae   :  { %4136 = vmatmul.msk.f32.vlgmr.msra.gmra.mxu0 %vm76_vm0, %v5758_v37  ;;  %4137 = vmatmul.msk.f32.vlgmr.msra.gmra.mxu1 %vm76_vm0, %v5758_v37 }
  0xaf   :  { %1860 = vmatpush.msrb.mxu0 %v4124_v55  ;;  %1880 = vmatpush.msrb.mxu1 %v4125_v56  ;;  %v4084_v56 = vld [vmem:[%s7272_s0 + $0x860] sm:$0xff] }
  0xb0   :  { %v4501_v61 = vpop.eup %4500  ;;  %1903 = vmatpush.msrb.mxu2 %v4078_v57  ;;  %1923 = vmatpush.msrb.mxu3 %v4079_v58  ;;  %v4085_v57 = vld [vmem:[%s7272_s0 + $0x868] sm:$0xff] }
  0xb1   :  { %v4503_v0 = vpop.eup %4502  ;;  %1861 = vmatpush.msrb.mxu0 %v4108_v59  ;;  %1881 = vmatpush.msrb.mxu1 %v4109_v60  ;;  %428 = vst [vmem:[%s7274_s2 + $0x60] sm:$0xff] %v4501_v61  ;;  %v4171_v60 = vld [vmem:[%s7272_s0 + $0xa90] sm:$0xff]  ;;  %v4172_v61 = vld [vmem:[%s7272_s0 + $0xa98] sm:$0xff] }
  0xb2   :  { %v4505_v3 = vpop.eup %4504  ;;  %4142 = vmatmul.msk.f32.vlgmr.msrb.gmra.mxu2 %vm76_vm0, %v5758_v37  ;;  %4143 = vmatmul.msk.f32.vlgmr.msrb.gmra.mxu3 %vm76_vm0, %v5758_v37  ;;  %429 = vst [vmem:[%s7274_s2 + $0x68] sm:$0xff] %v4503_v0  ;;  %v4201_v0 = vld [vmem:[%s7272_s0 + $0xb80] sm:$0xff] }
  0xb3   :  { %v4507_v6 = vpop.eup %4506  ;;  %1980 = vmatpush.msra.mxu2 %v4130_v62  ;;  %2000 = vmatpush.msra.mxu3 %v4131_v63  ;;  %430 = vst [vmem:[%s7274_s2 + $0x70] sm:$0xff] %v4505_v3  ;;  %v519_v9 = vpop.f32.mrf.mxu0  ;;  %v4156_v3 = vld [vmem:[%s7272_s0 + $0xa18] sm:$0xff] }
  0xb4   :  { %v539_v10 = vpop.f32.mrf.mxu1  ;;  %1862 = vmatpush.msrb.mxu0 %v4092_v1  ;;  %1882 = vmatpush.msrb.mxu1 %v4093_v2  ;;  %431 = vst [vmem:[%s7274_s2 + $0x78] sm:$0xff] %v4507_v6  ;;  %4508 = vtanh.f32 %v519_v9  ;;  %v559_v12 = vpop.f32.mrf.mxu2  ;;  %v4202_v1 = vld [vmem:[%s7272_s0 + $0xb88] sm:$0xff]  ;;  %v4155_v2 = vld [vmem:[%s7272_s0 + $0xa10] sm:$0xff] }
  0xb5   :  { %v579_v14 = vpop.f32.mrf.mxu3  ;;  %1981 = vmatpush.msra.mxu2 %v4114_v4  ;;  %2001 = vmatpush.msra.mxu3 %v4115_v5  ;;  %4510 = vtanh.f32 %v539_v10  ;;  %v4185_v4 = vld [vmem:[%s7272_s0 + $0xb00] sm:$0xff]  ;;  %v4186_v5 = vld [vmem:[%s7272_s0 + $0xb08] sm:$0xff] }
  0xb6   :  { %1863 = vmatpush.msrb.mxu0 %v4076_v7  ;;  %1883 = vmatpush.msrb.mxu1 %v4077_v8  ;;  %4512 = vtanh.f32 %v559_v12  ;;  %v6035_v6 = vld [vmem:[%s7273_s1 + $0x28] sm:$0xff]  ;;  %v4208_v8 = vld [vmem:[%s7272_s0 + $0xbb8] sm:$0xff]  ;;  %v4169_v10 = vld [vmem:[%s7272_s0 + $0xa80] sm:$0xff] }
  0xb7   :  { %1982 = vmatpush.msra.mxu2 %v4098_v11  ;;  %2002 = vmatpush.msra.mxu3 %v4099_v13  ;;  %4514 = vtanh.f32 %v579_v14  ;;  %v4170_v11 = vld [vmem:[%s7272_s0 + $0xa88] sm:$0xff]  ;;  %v4191_v12 = vld [vmem:[%s7272_s0 + $0xb30] sm:$0xff]  ;;  %v4192_v14 = vld [vmem:[%s7272_s0 + $0xb38] sm:$0xff] }
  0xb8   :  { %4140 = vmatmul.msk.f32.vlgmr.msrb.gmra.mxu0 %vm76_vm0, %v5758_v37  ;;  %4141 = vmatmul.msk.f32.vlgmr.msrb.gmra.mxu1 %vm76_vm0, %v5758_v37 }
  0xb9   :  { %1940 = vmatpush.msra.mxu0 %v4128_v15  ;;  %1960 = vmatpush.msra.mxu1 %v4129_v17  ;;  %v4153_v17 = vld [vmem:[%s7272_s0 + $0xa00] sm:$0xff] }
  0xba   :  { %v4509_v22 = vpop.eup %4508  ;;  %1983 = vmatpush.msra.mxu2 %v4082_v18  ;;  %2003 = vmatpush.msra.mxu3 %v4083_v19  ;;  %v4154_v18 = vld [vmem:[%s7272_s0 + $0xa08] sm:$0xff] }
  0xbb   :  { %v4511_v25 = vpop.eup %4510  ;;  %1941 = vmatpush.msra.mxu0 %v4112_v20  ;;  %1961 = vmatpush.msra.mxu1 %v4113_v21  ;;  %838 = vst [vmem:[%s7274_s2 + $0x80] sm:$0xff] %v4509_v22  ;;  %v4175_v21 = vld [vmem:[%s7272_s0 + $0xab0] sm:$0xff]  ;;  %v4176_v22 = vld [vmem:[%s7272_s0 + $0xab8] sm:$0xff] }
  0xbc   :  { %v4513_v28 = vpop.eup %4512  ;;  %4146 = vmatmul.msk.f32.vlgmr.msra.gmra.mxu2 %vm76_vm0, %v5758_v37  ;;  %4147 = vmatmul.msk.f32.vlgmr.msra.gmra.mxu3 %vm76_vm0, %v5758_v37  ;;  %839 = vst [vmem:[%s7274_s2 + $0x88] sm:$0xff] %v4511_v25  ;;  %v4205_v25 = vld [vmem:[%s7272_s0 + $0xba0] sm:$0xff] }
  0xbd   :  { %v4515_v31 = vpop.eup %4514  ;;  %2060 = vmatpush.msrb.mxu2 %v4134_v23  ;;  %2080 = vmatpush.msrb.mxu3 %v4135_v24  ;;  %840 = vst [vmem:[%s7274_s2 + $0x90] sm:$0xff] %v4513_v28  ;;  %v599_v34 = vpop.f32.mrf.mxu0  ;;  %v4160_v28 = vld [vmem:[%s7272_s0 + $0xa38] sm:$0xff] }
  0xbe   :  { %v619_v35 = vpop.f32.mrf.mxu1  ;;  %1942 = vmatpush.msra.mxu0 %v4096_v26  ;;  %1962 = vmatpush.msra.mxu1 %v4097_v27  ;;  %841 = vst [vmem:[%s7274_s2 + $0x98] sm:$0xff] %v4515_v31  ;;  %4516 = vtanh.f32 %v599_v34  ;;  %v639_v16 = vpop.f32.mrf.mxu2  ;;  %v4206_v26 = vld [vmem:[%s7272_s0 + $0xba8] sm:$0xff]  ;;  %v4159_v27 = vld [vmem:[%s7272_s0 + $0xa30] sm:$0xff] }
  0xbf   :  { %v659_v39 = vpop.f32.mrf.mxu3  ;;  %2061 = vmatpush.msrb.mxu2 %v4118_v29  ;;  %2081 = vmatpush.msrb.mxu3 %v4119_v30  ;;  %4518 = vtanh.f32 %v619_v35  ;;  %v4189_v29 = vld [vmem:[%s7272_s0 + $0xb20] sm:$0xff]  ;;  %v4190_v30 = vld [vmem:[%s7272_s0 + $0xb28] sm:$0xff] }
  0xc0   :  { %1943 = vmatpush.msra.mxu0 %v4080_v32  ;;  %1963 = vmatpush.msra.mxu1 %v4081_v33  ;;  %4520 = vtanh.f32 %v639_v16  ;;  %v4211_v32 = vld [vmem:[%s7272_s0 + $0xbd0] sm:$0xff]  ;;  %v4212_v33 = vld [vmem:[%s7272_s0 + $0xbd8] sm:$0xff]  ;;  %v4173_v35 = vld [vmem:[%s7272_s0 + $0xaa0] sm:$0xff] }
  0xc1   :  { %2062 = vmatpush.msrb.mxu2 %v4102_v36  ;;  %2082 = vmatpush.msrb.mxu3 %v4103_v38  ;;  %4522 = vtanh.f32 %v659_v39  ;;  %v4174_v36 = vld [vmem:[%s7272_s0 + $0xaa8] sm:$0xff]  ;;  %v4195_v16 = vld [vmem:[%s7272_s0 + $0xb50] sm:$0xff]  ;;  %v4196_v39 = vld [vmem:[%s7272_s0 + $0xb58] sm:$0xff] }
  0xc2   :  { %4144 = vmatmul.msk.f32.vlgmr.msra.gmra.mxu0 %vm76_vm0, %v5758_v37  ;;  %4145 = vmatmul.msk.f32.vlgmr.msra.gmra.mxu1 %vm76_vm0, %v5758_v37 }
  0xc3   :  { %2020 = vmatpush.msrb.mxu0 %v4132_v40  ;;  %2040 = vmatpush.msrb.mxu1 %v4133_v41  ;;  %v4157_v41 = vld [vmem:[%s7272_s0 + $0xa20] sm:$0xff] }
  0xc4   :  { %v4517_v46 = vpop.eup %4516  ;;  %2063 = vmatpush.msrb.mxu2 %v4086_v42  ;;  %2083 = vmatpush.msrb.mxu3 %v4087_v43  ;;  %v4158_v42 = vld [vmem:[%s7272_s0 + $0xa28] sm:$0xff] }
  0xc5   :  { %v4519_v49 = vpop.eup %4518  ;;  %2021 = vmatpush.msrb.mxu0 %v4116_v44  ;;  %2041 = vmatpush.msrb.mxu1 %v4117_v45  ;;  %842 = vst [vmem:[%s7274_s2 + $0xa0] sm:$0xff] %v4517_v46  ;;  %v4179_v45 = vld [vmem:[%s7272_s0 + $0xad0] sm:$0xff]  ;;  %v4180_v46 = vld [vmem:[%s7272_s0 + $0xad8] sm:$0xff] }
  0xc6   :  { %v4521_v52 = vpop.eup %4520  ;;  %4150 = vmatmul.msk.f32.vlgmr.msrb.gmra.mxu2 %vm76_vm0, %v5758_v37  ;;  %4151 = vmatmul.msk.f32.vlgmr.msrb.gmra.mxu3 %vm76_vm0, %v5758_v37  ;;  %843 = vst [vmem:[%s7274_s2 + $0xa8] sm:$0xff] %v4519_v49  ;;  %v4209_v49 = vld [vmem:[%s7272_s0 + $0xbc0] sm:$0xff] }
  0xc7   :  { %v4523_v55 = vpop.eup %4522  ;;  %2242 = vmatpush.msra.mxu2 %v4203_v47  ;;  %2262 = vmatpush.msra.mxu3 %v4204_v48  ;;  %844 = vst [vmem:[%s7274_s2 + $0xb0] sm:$0xff] %v4521_v52  ;;  %v679_v58 = vpop.f32.mrf.mxu0  ;;  %v4164_v52 = vld [vmem:[%s7272_s0 + $0xa58] sm:$0xff] }
  0xc8   :  { %v699_v59 = vpop.f32.mrf.mxu1  ;;  %2022 = vmatpush.msrb.mxu0 %v4100_v50  ;;  %2042 = vmatpush.msrb.mxu1 %v4101_v51  ;;  %845 = vst [vmem:[%s7274_s2 + $0xb8] sm:$0xff] %v4523_v55  ;;  %4524 = vtanh.f32 %v679_v58  ;;  %v719_v62 = vpop.f32.mrf.mxu2  ;;  %v4210_v50 = vld [vmem:[%s7272_s0 + $0xbc8] sm:$0xff]  ;;  %v4163_v51 = vld [vmem:[%s7272_s0 + $0xa50] sm:$0xff] }
  0xc9   :  { %v739_v63 = vpop.f32.mrf.mxu3  ;;  %2243 = vmatpush.msra.mxu2 %v4187_v53  ;;  %2263 = vmatpush.msra.mxu3 %v4188_v54  ;;  %4526 = vtanh.f32 %v699_v59  ;;  %v4193_v53 = vld [vmem:[%s7272_s0 + $0xb40] sm:$0xff]  ;;  %v4194_v54 = vld [vmem:[%s7272_s0 + $0xb48] sm:$0xff] }
  0xca   :  { %2023 = vmatpush.msrb.mxu0 %v4084_v56  ;;  %2043 = vmatpush.msrb.mxu1 %v4085_v57  ;;  %4528 = vtanh.f32 %v719_v62  ;;  %v4215_v56 = vld [vmem:[%s7272_s0 + $0xbf0] sm:$0xff]  ;;  %v4216_v57 = vld [vmem:[%s7272_s0 + $0xbf8] sm:$0xff]  ;;  %v4177_v59 = vld [vmem:[%s7272_s0 + $0xac0] sm:$0xff] }
  0xcb   :  { %2244 = vmatpush.msra.mxu2 %v4171_v60  ;;  %2264 = vmatpush.msra.mxu3 %v4172_v61  ;;  %4530 = vtanh.f32 %v739_v63  ;;  %v4178_v60 = vld [vmem:[%s7272_s0 + $0xac8] sm:$0xff]  ;;  %v4199_v62 = vld [vmem:[%s7272_s0 + $0xb70] sm:$0xff]  ;;  %v4200_v63 = vld [vmem:[%s7272_s0 + $0xb78] sm:$0xff] }
  0xcc   :  { %4148 = vmatmul.msk.f32.vlgmr.msrb.gmra.mxu0 %vm76_vm0, %v5758_v37  ;;  %4149 = vmatmul.msk.f32.vlgmr.msrb.gmra.mxu1 %vm76_vm0, %v5758_v37  ;;  %v4207_v37 = vld [vmem:[%s7272_s0 + $0xbb0] sm:$0xff] }
  0xcd   :  { %2202 = vmatpush.msra.mxu0 %v4201_v0  ;;  %2222 = vmatpush.msra.mxu1 %v4202_v1  ;;  %v4161_v1 = vld [vmem:[%s7272_s0 + $0xa40] sm:$0xff] }
  0xce   :  { %v4525_v7 = vpop.eup %4524  ;;  %2245 = vmatpush.msra.mxu2 %v4155_v2  ;;  %2265 = vmatpush.msra.mxu3 %v4156_v3  ;;  %v4162_v2 = vld [vmem:[%s7272_s0 + $0xa48] sm:$0xff] }
  0xcf   :  { %v4527_v9 = vpop.eup %4526  ;;  %2203 = vmatpush.msra.mxu0 %v4185_v4  ;;  %2223 = vmatpush.msra.mxu1 %v4186_v5  ;;  %846 = vst [vmem:[%s7274_s2 + $0xc0] sm:$0xff] %v4525_v7  ;;  %v4183_v5 = vld [vmem:[%s7272_s0 + $0xaf0] sm:$0xff]  ;;  %v4184_v7 = vld [vmem:[%s7272_s0 + $0xaf8] sm:$0xff] }
  0xd0   :  { %v4529_v13 = vpop.eup %4528  ;;  %4219 = vmatmul.msk.f32.vlgmr.msra.gmra.mxu2 %vm76_vm0, %v6035_v6  ;;  %4220 = vmatmul.msk.f32.vlgmr.msra.gmra.mxu3 %vm76_vm0, %v6035_v6  ;;  %847 = vst [vmem:[%s7274_s2 + $0xc8] sm:$0xff] %v4527_v9  ;;  %v4213_v9 = vld [vmem:[%s7272_s0 + $0xbe0] sm:$0xff] }
  0xd1   :  { %v4531_v15 = vpop.eup %4530  ;;  %2322 = vmatpush.msrb.mxu2 %v4207_v37  ;;  %2342 = vmatpush.msrb.mxu3 %v4208_v8  ;;  %848 = vst [vmem:[%s7274_s2 + $0xd0] sm:$0xff] %v4529_v13  ;;  %v759_v19 = vpop.f32.mrf.mxu0  ;;  %v4168_v13 = vld [vmem:[%s7272_s0 + $0xa78] sm:$0xff] }
  0xd2   :  { %v779_v20 = vpop.f32.mrf.mxu1  ;;  %2204 = vmatpush.msra.mxu0 %v4169_v10  ;;  %2224 = vmatpush.msra.mxu1 %v4170_v11  ;;  %849 = vst [vmem:[%s7274_s2 + $0xd8] sm:$0xff] %v4531_v15  ;;  %4532 = vtanh.f32 %v759_v19  ;;  %v799_v23 = vpop.f32.mrf.mxu2  ;;  %v4214_v10 = vld [vmem:[%s7272_s0 + $0xbe8] sm:$0xff]  ;;  %v4167_v11 = vld [vmem:[%s7272_s0 + $0xa70] sm:$0xff] }
  0xd3   :  { %v819_v24 = vpop.f32.mrf.mxu3  ;;  %2323 = vmatpush.msrb.mxu2 %v4191_v12  ;;  %2343 = vmatpush.msrb.mxu3 %v4192_v14  ;;  %4534 = vtanh.f32 %v779_v20  ;;  %v4197_v12 = vld [vmem:[%s7272_s0 + $0xb60] sm:$0xff]  ;;  %v4198_v14 = vld [vmem:[%s7272_s0 + $0xb68] sm:$0xff] }
  0xd4   :  { %2205 = vmatpush.msra.mxu0 %v4153_v17  ;;  %2225 = vmatpush.msra.mxu1 %v4154_v18  ;;  %4536 = vtanh.f32 %v799_v23  ;;  %v4284_v17 = vld [vmem:[%s7272_s0 + $0xd90] sm:$0xff]  ;;  %v4285_v18 = vld [vmem:[%s7272_s0 + $0xd98] sm:$0xff]  ;;  %v4181_v20 = vld [vmem:[%s7272_s0 + $0xae0] sm:$0xff] }
  0xd5   :  { %2324 = vmatpush.msrb.mxu2 %v4175_v21  ;;  %2344 = vmatpush.msrb.mxu3 %v4176_v22  ;;  %4538 = vtanh.f32 %v819_v24  ;;  %v4182_v21 = vld [vmem:[%s7272_s0 + $0xae8] sm:$0xff]  ;;  %v4268_v23 = vld [vmem:[%s7272_s0 + $0xd10] sm:$0xff]  ;;  %v4269_v24 = vld [vmem:[%s7272_s0 + $0xd18] sm:$0xff] }
  0xd6   :  { %4217 = vmatmul.msk.f32.vlgmr.msra.gmra.mxu0 %vm76_vm0, %v6035_v6  ;;  %4218 = vmatmul.msk.f32.vlgmr.msra.gmra.mxu1 %vm76_vm0, %v6035_v6 }
  0xd7   :  { %2282 = vmatpush.msrb.mxu0 %v4205_v25  ;;  %2302 = vmatpush.msrb.mxu1 %v4206_v26  ;;  %v4165_v26 = vld [vmem:[%s7272_s0 + $0xa60] sm:$0xff] }
  0xd8   :  { %v4533_v31 = vpop.eup %4532  ;;  %2325 = vmatpush.msrb.mxu2 %v4159_v27  ;;  %2345 = vmatpush.msrb.mxu3 %v4160_v28  ;;  %v4166_v27 = vld [vmem:[%s7272_s0 + $0xa68] sm:$0xff] }
  0xd9   :  { %v4535_v34 = vpop.eup %4534  ;;  %2283 = vmatpush.msrb.mxu0 %v4189_v29  ;;  %2303 = vmatpush.msrb.mxu1 %v4190_v30  ;;  %850 = vst [vmem:[%s7274_s2 + $0xe0] sm:$0xff] %v4533_v31  ;;  %v4252_v30 = vld [vmem:[%s7272_s0 + $0xc90] sm:$0xff]  ;;  %v4253_v31 = vld [vmem:[%s7272_s0 + $0xc98] sm:$0xff] }
  0xda   :  { %v4537_v38 = vpop.eup %4536  ;;  %4223 = vmatmul.msk.f32.vlgmr.msrb.gmra.mxu2 %vm76_vm0, %v6035_v6  ;;  %4224 = vmatmul.msk.f32.vlgmr.msrb.gmra.mxu3 %vm76_vm0, %v6035_v6  ;;  %851 = vst [vmem:[%s7274_s2 + $0xe8] sm:$0xff] %v4535_v34  ;;  %v4282_v34 = vld [vmem:[%s7272_s0 + $0xd80] sm:$0xff] }
  0xdb   :  { %v4539_v40 = vpop.eup %4538  ;;  %2402 = vmatpush.msra.mxu2 %v4211_v32  ;;  %2422 = vmatpush.msra.mxu3 %v4212_v33  ;;  %852 = vst [vmem:[%s7274_s2 + $0xf0] sm:$0xff] %v4537_v38  ;;  %v941_v43 = vpop.f32.mrf.mxu0  ;;  %v4237_v38 = vld [vmem:[%s7272_s0 + $0xc18] sm:$0xff] }
  0xdc   :  { %v961_v44 = vpop.f32.mrf.mxu1  ;;  %2284 = vmatpush.msrb.mxu0 %v4173_v35  ;;  %2304 = vmatpush.msrb.mxu1 %v4174_v36  ;;  %853 = vst [vmem:[%s7274_s2 + $0xf8] sm:$0xff] %v4539_v40  ;;  %4540 = vtanh.f32 %v941_v43  ;;  %v981_v47 = vpop.f32.mrf.mxu2  ;;  %v4283_v35 = vld [vmem:[%s7272_s0 + $0xd88] sm:$0xff]  ;;  %v4236_v36 = vld [vmem:[%s7272_s0 + $0xc10] sm:$0xff] }
  0xdd   :  { %v1001_v48 = vpop.f32.mrf.mxu3  ;;  %2403 = vmatpush.msra.mxu2 %v4195_v16  ;;  %2423 = vmatpush.msra.mxu3 %v4196_v39  ;;  %4542 = vtanh.f32 %v961_v44  ;;  %v4266_v16 = vld [vmem:[%s7272_s0 + $0xd00] sm:$0xff]  ;;  %v4267_v39 = vld [vmem:[%s7272_s0 + $0xd08] sm:$0xff]  ;;  %v6312_v40 = vld [vmem:[%s7273_s1 + $0x30] sm:$0xff] }
  0xde   :  { %2285 = vmatpush.msrb.mxu0 %v4157_v41  ;;  %2305 = vmatpush.msrb.mxu1 %v4158_v42  ;;  %4544 = vtanh.f32 %v981_v47  ;;  %v4289_v42 = vld [vmem:[%s7272_s0 + $0xdb8] sm:$0xff]  ;;  %v4250_v44 = vld [vmem:[%s7272_s0 + $0xc80] sm:$0xff]  ;;  %v4272_v47 = vld [vmem:[%s7272_s0 + $0xd30] sm:$0xff] }
  0xdf   :  { %2404 = vmatpush.msra.mxu2 %v4179_v45  ;;  %2424 = vmatpush.msra.mxu3 %v4180_v46  ;;  %4546 = vtanh.f32 %v1001_v48  ;;  %v4251_v45 = vld [vmem:[%s7272_s0 + $0xc88] sm:$0xff]  ;;  %v4273_v48 = vld [vmem:[%s7272_s0 + $0xd38] sm:$0xff] }
  0xe0   :  { %4221 = vmatmul.msk.f32.vlgmr.msrb.gmra.mxu0 %vm76_vm0, %v6035_v6  ;;  %4222 = vmatmul.msk.f32.vlgmr.msrb.gmra.mxu1 %vm76_vm0, %v6035_v6 }
  0xe1   :  { %2362 = vmatpush.msra.mxu0 %v4209_v49  ;;  %2382 = vmatpush.msra.mxu1 %v4210_v50  ;;  %v4234_v50 = vld [vmem:[%s7272_s0 + $0xc00] sm:$0xff] }
  0xe2   :  { %v4541_v55 = vpop.eup %4540  ;;  %2405 = vmatpush.msra.mxu2 %v4163_v51  ;;  %2425 = vmatpush.msra.mxu3 %v4164_v52  ;;  %v4235_v51 = vld [vmem:[%s7272_s0 + $0xc08] sm:$0xff] }
  0xe3   :  { %v4543_v58 = vpop.eup %4542  ;;  %2363 = vmatpush.msra.mxu0 %v4193_v53  ;;  %2383 = vmatpush.msra.mxu1 %v4194_v54  ;;  %1260 = vst [vmem:[%s7274_s2 + $0x100] sm:$0xff] %v4541_v55  ;;  %v4256_v54 = vld [vmem:[%s7272_s0 + $0xcb0] sm:$0xff]  ;;  %v4257_v55 = vld [vmem:[%s7272_s0 + $0xcb8] sm:$0xff] }
  0xe4   :  { %v4545_v61 = vpop.eup %4544  ;;  %4227 = vmatmul.msk.f32.vlgmr.msra.gmra.mxu2 %vm76_vm0, %v6035_v6  ;;  %4228 = vmatmul.msk.f32.vlgmr.msra.gmra.mxu3 %vm76_vm0, %v6035_v6  ;;  %1261 = vst [vmem:[%s7274_s2 + $0x108] sm:$0xff] %v4543_v58  ;;  %v4286_v58 = vld [vmem:[%s7272_s0 + $0xda0] sm:$0xff] }
  0xe5   :  { %v4547_v0 = vpop.eup %4546  ;;  %2482 = vmatpush.msrb.mxu2 %v4215_v56  ;;  %2502 = vmatpush.msrb.mxu3 %v4216_v57  ;;  %1262 = vst [vmem:[%s7274_s2 + $0x110] sm:$0xff] %v4545_v61  ;;  %v1021_v3 = vpop.f32.mrf.mxu0  ;;  %v4241_v61 = vld [vmem:[%s7272_s0 + $0xc38] sm:$0xff] }
  0xe6   :  { %v1041_v4 = vpop.f32.mrf.mxu1  ;;  %2364 = vmatpush.msra.mxu0 %v4177_v59  ;;  %2384 = vmatpush.msra.mxu1 %v4178_v60  ;;  %1263 = vst [vmem:[%s7274_s2 + $0x118] sm:$0xff] %v4547_v0  ;;  %4548 = vtanh.f32 %v1021_v3  ;;  %v1061_v37 = vpop.f32.mrf.mxu2  ;;  %v4287_v59 = vld [vmem:[%s7272_s0 + $0xda8] sm:$0xff]  ;;  %v4240_v60 = vld [vmem:[%s7272_s0 + $0xc30] sm:$0xff] }
  0xe7   :  { %v1081_v8 = vpop.f32.mrf.mxu3  ;;  %2483 = vmatpush.msrb.mxu2 %v4199_v62  ;;  %2503 = vmatpush.msrb.mxu3 %v4200_v63  ;;  %4550 = vtanh.f32 %v1041_v4  ;;  %v4270_v62 = vld [vmem:[%s7272_s0 + $0xd20] sm:$0xff]  ;;  %v4271_v63 = vld [vmem:[%s7272_s0 + $0xd28] sm:$0xff] }
  0xe8   :  { %2365 = vmatpush.msra.mxu0 %v4161_v1  ;;  %2385 = vmatpush.msra.mxu1 %v4162_v2  ;;  %4552 = vtanh.f32 %v1061_v37  ;;  %v4292_v1 = vld [vmem:[%s7272_s0 + $0xdd0] sm:$0xff]  ;;  %v4293_v2 = vld [vmem:[%s7272_s0 + $0xdd8] sm:$0xff]  ;;  %v4254_v4 = vld [vmem:[%s7272_s0 + $0xca0] sm:$0xff] }
  0xe9   :  { %2484 = vmatpush.msrb.mxu2 %v4183_v5  ;;  %2504 = vmatpush.msrb.mxu3 %v4184_v7  ;;  %4554 = vtanh.f32 %v1081_v8  ;;  %v4255_v5 = vld [vmem:[%s7272_s0 + $0xca8] sm:$0xff]  ;;  %v4276_v37 = vld [vmem:[%s7272_s0 + $0xd50] sm:$0xff]  ;;  %v4277_v8 = vld [vmem:[%s7272_s0 + $0xd58] sm:$0xff] }
  0xea   :  { %4225 = vmatmul.msk.f32.vlgmr.msra.gmra.mxu0 %vm76_vm0, %v6035_v6  ;;  %4226 = vmatmul.msk.f32.vlgmr.msra.gmra.mxu1 %vm76_vm0, %v6035_v6 }
  0xeb   :  { %2442 = vmatpush.msrb.mxu0 %v4213_v9  ;;  %2462 = vmatpush.msrb.mxu1 %v4214_v10  ;;  %v4238_v10 = vld [vmem:[%s7272_s0 + $0xc20] sm:$0xff] }
  0xec   :  { %v4549_v15 = vpop.eup %4548  ;;  %2485 = vmatpush.msrb.mxu2 %v4167_v11  ;;  %2505 = vmatpush.msrb.mxu3 %v4168_v13  ;;  %v4239_v11 = vld [vmem:[%s7272_s0 + $0xc28] sm:$0xff] }
  0xed   :  { %v4551_v19 = vpop.eup %4550  ;;  %2443 = vmatpush.msrb.mxu0 %v4197_v12  ;;  %2463 = vmatpush.msrb.mxu1 %v4198_v14  ;;  %1264 = vst [vmem:[%s7274_s2 + $0x120] sm:$0xff] %v4549_v15  ;;  %v4260_v14 = vld [vmem:[%s7272_s0 + $0xcd0] sm:$0xff]  ;;  %v4261_v15 = vld [vmem:[%s7272_s0 + $0xcd8] sm:$0xff] }
  0xee   :  { %v4553_v22 = vpop.eup %4552  ;;  %4231 = vmatmul.msk.f32.vlgmr.msrb.gmra.mxu2 %vm76_vm0, %v6035_v6  ;;  %4232 = vmatmul.msk.f32.vlgmr.msrb.gmra.mxu3 %vm76_vm0, %v6035_v6  ;;  %1265 = vst [vmem:[%s7274_s2 + $0x128] sm:$0xff] %v4551_v19  ;;  %v4290_v19 = vld [vmem:[%s7272_s0 + $0xdc0] sm:$0xff] }
  0xef   :  { %v4555_v25 = vpop.eup %4554  ;;  %2664 = vmatpush.msra.mxu2 %v4284_v17  ;;  %2684 = vmatpush.msra.mxu3 %v4285_v18  ;;  %1266 = vst [vmem:[%s7274_s2 + $0x130] sm:$0xff] %v4553_v22  ;;  %v1101_v28 = vpop.f32.mrf.mxu0  ;;  %v4245_v22 = vld [vmem:[%s7272_s0 + $0xc58] sm:$0xff] }
  0xf0   :  { %v1121_v29 = vpop.f32.mrf.mxu1  ;;  %2444 = vmatpush.msrb.mxu0 %v4181_v20  ;;  %2464 = vmatpush.msrb.mxu1 %v4182_v21  ;;  %1267 = vst [vmem:[%s7274_s2 + $0x138] sm:$0xff] %v4555_v25  ;;  %4556 = vtanh.f32 %v1101_v28  ;;  %v1141_v32 = vpop.f32.mrf.mxu2  ;;  %v4291_v20 = vld [vmem:[%s7272_s0 + $0xdc8] sm:$0xff]  ;;  %v4244_v21 = vld [vmem:[%s7272_s0 + $0xc50] sm:$0xff] }
  0xf1   :  { %v1161_v33 = vpop.f32.mrf.mxu3  ;;  %2665 = vmatpush.msra.mxu2 %v4268_v23  ;;  %2685 = vmatpush.msra.mxu3 %v4269_v24  ;;  %4558 = vtanh.f32 %v1121_v29  ;;  %v4274_v23 = vld [vmem:[%s7272_s0 + $0xd40] sm:$0xff]  ;;  %v4275_v24 = vld [vmem:[%s7272_s0 + $0xd48] sm:$0xff] }
  0xf2   :  { %2445 = vmatpush.msrb.mxu0 %v4165_v26  ;;  %2465 = vmatpush.msrb.mxu1 %v4166_v27  ;;  %4560 = vtanh.f32 %v1141_v32  ;;  %v4296_v26 = vld [vmem:[%s7272_s0 + $0xdf0] sm:$0xff]  ;;  %v4297_v27 = vld [vmem:[%s7272_s0 + $0xdf8] sm:$0xff]  ;;  %v4258_v29 = vld [vmem:[%s7272_s0 + $0xcc0] sm:$0xff] }
  0xf3   :  { %2666 = vmatpush.msra.mxu2 %v4252_v30  ;;  %2686 = vmatpush.msra.mxu3 %v4253_v31  ;;  %4562 = vtanh.f32 %v1161_v33  ;;  %v4259_v30 = vld [vmem:[%s7272_s0 + $0xcc8] sm:$0xff]  ;;  %v4280_v32 = vld [vmem:[%s7272_s0 + $0xd70] sm:$0xff]  ;;  %v4281_v33 = vld [vmem:[%s7272_s0 + $0xd78] sm:$0xff] }
  0xf4   :  { %4229 = vmatmul.msk.f32.vlgmr.msrb.gmra.mxu0 %vm76_vm0, %v6035_v6  ;;  %4230 = vmatmul.msk.f32.vlgmr.msrb.gmra.mxu1 %vm76_vm0, %v6035_v6  ;;  %v4288_v6 = vld [vmem:[%s7272_s0 + $0xdb0] sm:$0xff] }
  0xf5   :  { %2624 = vmatpush.msra.mxu0 %v4282_v34  ;;  %2644 = vmatpush.msra.mxu1 %v4283_v35  ;;  %v4242_v35 = vld [vmem:[%s7272_s0 + $0xc40] sm:$0xff] }
  0xf6   :  { %v4557_v41 = vpop.eup %4556  ;;  %2667 = vmatpush.msra.mxu2 %v4236_v36  ;;  %2687 = vmatpush.msra.mxu3 %v4237_v38  ;;  %v4243_v36 = vld [vmem:[%s7272_s0 + $0xc48] sm:$0xff] }
  0xf7   :  { %v4559_v43 = vpop.eup %4558  ;;  %2625 = vmatpush.msra.mxu0 %v4266_v16  ;;  %2645 = vmatpush.msra.mxu1 %v4267_v39  ;;  %1268 = vst [vmem:[%s7274_s2 + $0x140] sm:$0xff] %v4557_v41  ;;  %v4264_v39 = vld [vmem:[%s7272_s0 + $0xcf0] sm:$0xff]  ;;  %v4265_v41 = vld [vmem:[%s7272_s0 + $0xcf8] sm:$0xff] }
  0xf8   :  { %v4561_v46 = vpop.eup %4560  ;;  %4300 = vmatmul.msk.f32.vlgmr.msra.gmra.mxu2 %vm76_vm0, %v6312_v40  ;;  %4301 = vmatmul.msk.f32.vlgmr.msra.gmra.mxu3 %vm76_vm0, %v6312_v40  ;;  %1269 = vst [vmem:[%s7274_s2 + $0x148] sm:$0xff] %v4559_v43  ;;  %v4294_v43 = vld [vmem:[%s7272_s0 + $0xde0] sm:$0xff] }
  0xf9   :  { %v4563_v49 = vpop.eup %4562  ;;  %2744 = vmatpush.msrb.mxu2 %v4288_v6  ;;  %2764 = vmatpush.msrb.mxu3 %v4289_v42  ;;  %1270 = vst [vmem:[%s7274_s2 + $0x150] sm:$0xff] %v4561_v46  ;;  %v1181_v52 = vpop.f32.mrf.mxu0  ;;  %v4249_v46 = vld [vmem:[%s7272_s0 + $0xc78] sm:$0xff] }
  0xfa   :  { %v1201_v53 = vpop.f32.mrf.mxu1  ;;  %2626 = vmatpush.msra.mxu0 %v4250_v44  ;;  %2646 = vmatpush.msra.mxu1 %v4251_v45  ;;  %1271 = vst [vmem:[%s7274_s2 + $0x158] sm:$0xff] %v4563_v49  ;;  %4564 = vtanh.f32 %v1181_v52  ;;  %v1221_v56 = vpop.f32.mrf.mxu2  ;;  %v4295_v44 = vld [vmem:[%s7272_s0 + $0xde8] sm:$0xff]  ;;  %v4248_v45 = vld [vmem:[%s7272_s0 + $0xc70] sm:$0xff] }
  0xfb   :  { %v1241_v57 = vpop.f32.mrf.mxu3  ;;  %2745 = vmatpush.msrb.mxu2 %v4272_v47  ;;  %2765 = vmatpush.msrb.mxu3 %v4273_v48  ;;  %4566 = vtanh.f32 %v1201_v53  ;;  %v4278_v47 = vld [vmem:[%s7272_s0 + $0xd60] sm:$0xff]  ;;  %v4279_v48 = vld [vmem:[%s7272_s0 + $0xd68] sm:$0xff] }
  0xfc   :  { %2627 = vmatpush.msra.mxu0 %v4234_v50  ;;  %2647 = vmatpush.msra.mxu1 %v4235_v51  ;;  %4568 = vtanh.f32 %v1221_v56  ;;  %v4365_v50 = vld [vmem:[%s7272_s0 + $0xf90] sm:$0xff]  ;;  %v4366_v51 = vld [vmem:[%s7272_s0 + $0xf98] sm:$0xff]  ;;  %v4262_v53 = vld [vmem:[%s7272_s0 + $0xce0] sm:$0xff] }
  0xfd   :  { %2746 = vmatpush.msrb.mxu2 %v4256_v54  ;;  %2766 = vmatpush.msrb.mxu3 %v4257_v55  ;;  %4570 = vtanh.f32 %v1241_v57  ;;  %v4263_v54 = vld [vmem:[%s7272_s0 + $0xce8] sm:$0xff]  ;;  %v4349_v56 = vld [vmem:[%s7272_s0 + $0xf10] sm:$0xff]  ;;  %v4350_v57 = vld [vmem:[%s7272_s0 + $0xf18] sm:$0xff] }
  0xfe   :  { %4298 = vmatmul.msk.f32.vlgmr.msra.gmra.mxu0 %vm76_vm0, %v6312_v40  ;;  %4299 = vmatmul.msk.f32.vlgmr.msra.gmra.mxu1 %vm76_vm0, %v6312_v40 }
  0xff   :  { %2704 = vmatpush.msrb.mxu0 %v4286_v58  ;;  %2724 = vmatpush.msrb.mxu1 %v4287_v59  ;;  %v4246_v59 = vld [vmem:[%s7272_s0 + $0xc60] sm:$0xff] }
 0x100   :  { %v4565_v0 = vpop.eup %4564  ;;  %2747 = vmatpush.msrb.mxu2 %v4240_v60  ;;  %2767 = vmatpush.msrb.mxu3 %v4241_v61  ;;  %v4247_v60 = vld [vmem:[%s7272_s0 + $0xc68] sm:$0xff] }
 0x101   :  { %v4567_v3 = vpop.eup %4566  ;;  %2705 = vmatpush.msrb.mxu0 %v4270_v62  ;;  %2725 = vmatpush.msrb.mxu1 %v4271_v63  ;;  %1272 = vst [vmem:[%s7274_s2 + $0x160] sm:$0xff] %v4565_v0  ;;  %v4333_v63 = vld [vmem:[%s7272_s0 + $0xe90] sm:$0xff]  ;;  %v4334_v0 = vld [vmem:[%s7272_s0 + $0xe98] sm:$0xff] }
 0x102   :  { %v4569_v7 = vpop.eup %4568  ;;  %4304 = vmatmul.msk.f32.vlgmr.msrb.gmra.mxu2 %vm76_vm0, %v6312_v40  ;;  %4305 = vmatmul.msk.f32.vlgmr.msrb.gmra.mxu3 %vm76_vm0, %v6312_v40  ;;  %1273 = vst [vmem:[%s7274_s2 + $0x168] sm:$0xff] %v4567_v3  ;;  %v4363_v3 = vld [vmem:[%s7272_s0 + $0xf80] sm:$0xff] }
 0x103   :  { %v4571_v9 = vpop.eup %4570  ;;  %2824 = vmatpush.msra.mxu2 %v4292_v1  ;;  %2844 = vmatpush.msra.mxu3 %v4293_v2  ;;  %1274 = vst [vmem:[%s7274_s2 + $0x170] sm:$0xff] %v4569_v7  ;;  %v1363_v13 = vpop.f32.mrf.mxu0  ;;  %v4318_v7 = vld [vmem:[%s7272_s0 + $0xe18] sm:$0xff] }
 0x104   :  { %v1383_v12 = vpop.f32.mrf.mxu1  ;;  %2706 = vmatpush.msrb.mxu0 %v4254_v4  ;;  %2726 = vmatpush.msrb.mxu1 %v4255_v5  ;;  %1275 = vst [vmem:[%s7274_s2 + $0x178] sm:$0xff] %v4571_v9  ;;  %4572 = vtanh.f32 %v1363_v13  ;;  %v1403_v17 = vpop.f32.mrf.mxu2  ;;  %v4364_v4 = vld [vmem:[%s7272_s0 + $0xf88] sm:$0xff]  ;;  %v4317_v5 = vld [vmem:[%s7272_s0 + $0xe10] sm:$0xff]  ;;  %v6589_v9 = vld [vmem:[%s7273_s1 + $0x38] sm:$0xff] }
 0x105   :  { %v1423_v18 = vpop.f32.mrf.mxu3  ;;  %2825 = vmatpush.msra.mxu2 %v4276_v37  ;;  %2845 = vmatpush.msra.mxu3 %v4277_v8  ;;  %4574 = vtanh.f32 %v1383_v12  ;;  %v4347_v37 = vld [vmem:[%s7272_s0 + $0xf00] sm:$0xff]  ;;  %v4348_v8 = vld [vmem:[%s7272_s0 + $0xf08] sm:$0xff] }
 0x106   :  { %2707 = vmatpush.msrb.mxu0 %v4238_v10  ;;  %2727 = vmatpush.msrb.mxu1 %v4239_v11  ;;  %4576 = vtanh.f32 %v1403_v17  ;;  %v4370_v11 = vld [vmem:[%s7272_s0 + $0xfb8] sm:$0xff]  ;;  %v4331_v12 = vld [vmem:[%s7272_s0 + $0xe80] sm:$0xff]  ;;  %v4353_v17 = vld [vmem:[%s7272_s0 + $0xf30] sm:$0xff] }
 0x107   :  { %2826 = vmatpush.msra.mxu2 %v4260_v14  ;;  %2846 = vmatpush.msra.mxu3 %v4261_v15  ;;  %4578 = vtanh.f32 %v1423_v18  ;;  %v4332_v14 = vld [vmem:[%s7272_s0 + $0xe88] sm:$0xff]  ;;  %v4354_v18 = vld [vmem:[%s7272_s0 + $0xf38] sm:$0xff] }
 0x108   :  { %4302 = vmatmul.msk.f32.vlgmr.msrb.gmra.mxu0 %vm76_vm0, %v6312_v40  ;;  %4303 = vmatmul.msk.f32.vlgmr.msrb.gmra.mxu1 %vm76_vm0, %v6312_v40 }
 0x109   :  { %2784 = vmatpush.msra.mxu0 %v4290_v19  ;;  %2804 = vmatpush.msra.mxu1 %v4291_v20  ;;  %v4315_v20 = vld [vmem:[%s7272_s0 + $0xe00] sm:$0xff] }
 0x10a   :  { %v4573_v25 = vpop.eup %4572  ;;  %2827 = vmatpush.msra.mxu2 %v4244_v21  ;;  %2847 = vmatpush.msra.mxu3 %v4245_v22  ;;  %v4316_v21 = vld [vmem:[%s7272_s0 + $0xe08] sm:$0xff] }
 0x10b   :  { %v4575_v28 = vpop.eup %4574  ;;  %2785 = vmatpush.msra.mxu0 %v4274_v23  ;;  %2805 = vmatpush.msra.mxu1 %v4275_v24  ;;  %1682 = vst [vmem:[%s7274_s2 + $0x180] sm:$0xff] %v4573_v25  ;;  %v4337_v24 = vld [vmem:[%s7272_s0 + $0xeb0] sm:$0xff]  ;;  %v4338_v25 = vld [vmem:[%s7272_s0 + $0xeb8] sm:$0xff] }
 0x10c   :  { %v4577_v31 = vpop.eup %4576  ;;  %4308 = vmatmul.msk.f32.vlgmr.msra.gmra.mxu2 %vm76_vm0, %v6312_v40  ;;  %4309 = vmatmul.msk.f32.vlgmr.msra.gmra.mxu3 %vm76_vm0, %v6312_v40  ;;  %1683 = vst [vmem:[%s7274_s2 + $0x188] sm:$0xff] %v4575_v28  ;;  %v4367_v28 = vld [vmem:[%s7272_s0 + $0xfa0] sm:$0xff] }
 0x10d   :  { %v4579_v34 = vpop.eup %4578  ;;  %2904 = vmatpush.msrb.mxu2 %v4296_v26  ;;  %2924 = vmatpush.msrb.mxu3 %v4297_v27  ;;  %1684 = vst [vmem:[%s7274_s2 + $0x190] sm:$0xff] %v4577_v31  ;;  %v1443_v38 = vpop.f32.mrf.mxu0  ;;  %v4322_v31 = vld [vmem:[%s7272_s0 + $0xe38] sm:$0xff] }
 0x10e   :  { %v1463_v16 = vpop.f32.mrf.mxu1  ;;  %2786 = vmatpush.msra.mxu0 %v4258_v29  ;;  %2806 = vmatpush.msra.mxu1 %v4259_v30  ;;  %1685 = vst [vmem:[%s7274_s2 + $0x198] sm:$0xff] %v4579_v34  ;;  %4580 = vtanh.f32 %v1443_v38  ;;  %v1483_v6 = vpop.f32.mrf.mxu2  ;;  %v4368_v29 = vld [vmem:[%s7272_s0 + $0xfa8] sm:$0xff]  ;;  %v4321_v30 = vld [vmem:[%s7272_s0 + $0xe30] sm:$0xff] }
 0x10f   :  { %v1503_v42 = vpop.f32.mrf.mxu3  ;;  %2905 = vmatpush.msrb.mxu2 %v4280_v32  ;;  %2925 = vmatpush.msrb.mxu3 %v4281_v33  ;;  %4582 = vtanh.f32 %v1463_v16  ;;  %v4351_v32 = vld [vmem:[%s7272_s0 + $0xf20] sm:$0xff]  ;;  %v4352_v33 = vld [vmem:[%s7272_s0 + $0xf28] sm:$0xff] }
 0x110   :  { %2787 = vmatpush.msra.mxu0 %v4242_v35  ;;  %2807 = vmatpush.msra.mxu1 %v4243_v36  ;;  %4584 = vtanh.f32 %v1483_v6  ;;  %v4373_v35 = vld [vmem:[%s7272_s0 + $0xfd0] sm:$0xff]  ;;  %v4374_v36 = vld [vmem:[%s7272_s0 + $0xfd8] sm:$0xff]  ;;  %v4335_v16 = vld [vmem:[%s7272_s0 + $0xea0] sm:$0xff] }
 0x111   :  { %2906 = vmatpush.msrb.mxu2 %v4264_v39  ;;  %2926 = vmatpush.msrb.mxu3 %v4265_v41  ;;  %4586 = vtanh.f32 %v1503_v42  ;;  %v4336_v39 = vld [vmem:[%s7272_s0 + $0xea8] sm:$0xff]  ;;  %v4357_v6 = vld [vmem:[%s7272_s0 + $0xf50] sm:$0xff]  ;;  %v4358_v42 = vld [vmem:[%s7272_s0 + $0xf58] sm:$0xff] }
 0x112   :  { %4306 = vmatmul.msk.f32.vlgmr.msra.gmra.mxu0 %vm76_vm0, %v6312_v40  ;;  %4307 = vmatmul.msk.f32.vlgmr.msra.gmra.mxu1 %vm76_vm0, %v6312_v40 }
 0x113   :  { %2864 = vmatpush.msrb.mxu0 %v4294_v43  ;;  %2884 = vmatpush.msrb.mxu1 %v4295_v44  ;;  %v4319_v44 = vld [vmem:[%s7272_s0 + $0xe20] sm:$0xff] }
 0x114   :  { %v4581_v49 = vpop.eup %4580  ;;  %2907 = vmatpush.msrb.mxu2 %v4248_v45  ;;  %2927 = vmatpush.msrb.mxu3 %v4249_v46  ;;  %v4320_v45 = vld [vmem:[%s7272_s0 + $0xe28] sm:$0xff] }
 0x115   :  { %v4583_v52 = vpop.eup %4582  ;;  %2865 = vmatpush.msrb.mxu0 %v4278_v47  ;;  %2885 = vmatpush.msrb.mxu1 %v4279_v48  ;;  %1686 = vst [vmem:[%s7274_s2 + $0x1a0] sm:$0xff] %v4581_v49  ;;  %v4341_v48 = vld [vmem:[%s7272_s0 + $0xed0] sm:$0xff]  ;;  %v4342_v49 = vld [vmem:[%s7272_s0 + $0xed8] sm:$0xff] }
 0x116   :  { %v4585_v55 = vpop.eup %4584  ;;  %4312 = vmatmul.msk.f32.vlgmr.msrb.gmra.mxu2 %vm76_vm0, %v6312_v40  ;;  %4313 = vmatmul.msk.f32.vlgmr.msrb.gmra.mxu3 %vm76_vm0, %v6312_v40  ;;  %1687 = vst [vmem:[%s7274_s2 + $0x1a8] sm:$0xff] %v4583_v52  ;;  %v4371_v52 = vld [vmem:[%s7272_s0 + $0xfc0] sm:$0xff] }
 0x117   :  { %v4587_v58 = vpop.eup %4586  ;;  %3086 = vmatpush.msra.mxu2 %v4365_v50  ;;  %3106 = vmatpush.msra.mxu3 %v4366_v51  ;;  %1688 = vst [vmem:[%s7274_s2 + $0x1b0] sm:$0xff] %v4585_v55  ;;  %v1523_v61 = vpop.f32.mrf.mxu0  ;;  %v4326_v55 = vld [vmem:[%s7272_s0 + $0xe58] sm:$0xff] }
 0x118   :  { %v1543_v62 = vpop.f32.mrf.mxu1  ;;  %2866 = vmatpush.msrb.mxu0 %v4262_v53  ;;  %2886 = vmatpush.msrb.mxu1 %v4263_v54  ;;  %1689 = vst [vmem:[%s7274_s2 + $0x1b8] sm:$0xff] %v4587_v58  ;;  %4588 = vtanh.f32 %v1523_v61  ;;  %v1563_v1 = vpop.f32.mrf.mxu2  ;;  %v4372_v53 = vld [vmem:[%s7272_s0 + $0xfc8] sm:$0xff]  ;;  %v4325_v54 = vld [vmem:[%s7272_s0 + $0xe50] sm:$0xff] }
 0x119   :  { %v1583_v2 = vpop.f32.mrf.mxu3  ;;  %3087 = vmatpush.msra.mxu2 %v4349_v56  ;;  %3107 = vmatpush.msra.mxu3 %v4350_v57  ;;  %4590 = vtanh.f32 %v1543_v62  ;;  %v4355_v56 = vld [vmem:[%s7272_s0 + $0xf40] sm:$0xff]  ;;  %v4356_v57 = vld [vmem:[%s7272_s0 + $0xf48] sm:$0xff] }
 0x11a   :  { %2867 = vmatpush.msrb.mxu0 %v4246_v59  ;;  %2887 = vmatpush.msrb.mxu1 %v4247_v60  ;;  %4592 = vtanh.f32 %v1563_v1  ;;  %v4377_v59 = vld [vmem:[%s7272_s0 + $0xff0] sm:$0xff]  ;;  %v4378_v60 = vld [vmem:[%s7272_s0 + $0xff8] sm:$0xff]  ;;  %v4339_v62 = vld [vmem:[%s7272_s0 + $0xec0] sm:$0xff] }
 0x11b   :  { %3088 = vmatpush.msra.mxu2 %v4333_v63  ;;  %3108 = vmatpush.msra.mxu3 %v4334_v0  ;;  %4594 = vtanh.f32 %v1583_v2  ;;  %v4340_v63 = vld [vmem:[%s7272_s0 + $0xec8] sm:$0xff]  ;;  %v4361_v1 = vld [vmem:[%s7272_s0 + $0xf70] sm:$0xff]  ;;  %v4362_v2 = vld [vmem:[%s7272_s0 + $0xf78] sm:$0xff] }
 0x11c   :  { %4310 = vmatmul.msk.f32.vlgmr.msrb.gmra.mxu0 %vm76_vm0, %v6312_v40  ;;  %4311 = vmatmul.msk.f32.vlgmr.msrb.gmra.mxu1 %vm76_vm0, %v6312_v40  ;;  %v4369_v40 = vld [vmem:[%s7272_s0 + $0xfb0] sm:$0xff] }
 0x11d   :  { %3046 = vmatpush.msra.mxu0 %v4363_v3  ;;  %3066 = vmatpush.msra.mxu1 %v4364_v4  ;;  %v4323_v4 = vld [vmem:[%s7272_s0 + $0xe40] sm:$0xff] }
 0x11e   :  { %v4589_v10 = vpop.eup %4588  ;;  %3089 = vmatpush.msra.mxu2 %v4317_v5  ;;  %3109 = vmatpush.msra.mxu3 %v4318_v7  ;;  %v4324_v5 = vld [vmem:[%s7272_s0 + $0xe48] sm:$0xff] }
 0x11f   :  { %v4591_v13 = vpop.eup %4590  ;;  %3047 = vmatpush.msra.mxu0 %v4347_v37  ;;  %3067 = vmatpush.msra.mxu1 %v4348_v8  ;;  %1690 = vst [vmem:[%s7274_s2 + $0x1c0] sm:$0xff] %v4589_v10  ;;  %v4345_v8 = vld [vmem:[%s7272_s0 + $0xef0] sm:$0xff]  ;;  %v4346_v10 = vld [vmem:[%s7272_s0 + $0xef8] sm:$0xff] }
 0x120   :  { %v4593_v15 = vpop.eup %4592  ;;  %4381 = vmatmul.msk.f32.vlgmr.msra.gmra.mxu2 %vm76_vm0, %v6589_v9  ;;  %4382 = vmatmul.msk.f32.vlgmr.msra.gmra.mxu3 %vm76_vm0, %v6589_v9  ;;  %1691 = vst [vmem:[%s7274_s2 + $0x1c8] sm:$0xff] %v4591_v13  ;;  %v4375_v13 = vld [vmem:[%s7272_s0 + $0xfe0] sm:$0xff] }
 0x121   :  { %v4595_v19 = vpop.eup %4594  ;;  %3166 = vmatpush.msrb.mxu2 %v4369_v40  ;;  %3186 = vmatpush.msrb.mxu3 %v4370_v11  ;;  %1692 = vst [vmem:[%s7274_s2 + $0x1d0] sm:$0xff] %v4593_v15  ;;  %v1603_v22 = vpop.f32.mrf.mxu0  ;;  %v4330_v15 = vld [vmem:[%s7272_s0 + $0xe78] sm:$0xff] }
 0x122   :  { %v1623_v23 = vpop.f32.mrf.mxu1  ;;  %3048 = vmatpush.msra.mxu0 %v4331_v12  ;;  %3068 = vmatpush.msra.mxu1 %v4332_v14  ;;  %1693 = vst [vmem:[%s7274_s2 + $0x1d8] sm:$0xff] %v4595_v19  ;;  %4596 = vtanh.f32 %v1603_v22  ;;  %v1643_v26 = vpop.f32.mrf.mxu2  ;;  %v4376_v12 = vld [vmem:[%s7272_s0 + $0xfe8] sm:$0xff]  ;;  %v4329_v14 = vld [vmem:[%s7272_s0 + $0xe70] sm:$0xff] }
 0x123   :  { %v1663_v27 = vpop.f32.mrf.mxu3  ;;  %3167 = vmatpush.msrb.mxu2 %v4353_v17  ;;  %3187 = vmatpush.msrb.mxu3 %v4354_v18  ;;  %4598 = vtanh.f32 %v1623_v23  ;;  %v4359_v17 = vld [vmem:[%s7272_s0 + $0xf60] sm:$0xff]  ;;  %v4360_v18 = vld [vmem:[%s7272_s0 + $0xf68] sm:$0xff] }
 0x124   :  { %3049 = vmatpush.msra.mxu0 %v4315_v20  ;;  %3069 = vmatpush.msra.mxu1 %v4316_v21  ;;  %4600 = vtanh.f32 %v1643_v26  ;;  %v4446_v20 = vld [vmem:[%s7272_s0 + $0x1190] sm:$0xff]  ;;  %v4447_v21 = vld [vmem:[%s7272_s0 + $0x1198] sm:$0xff]  ;;  %v4343_v23 = vld [vmem:[%s7272_s0 + $0xee0] sm:$0xff] }
 0x125   :  { %3168 = vmatpush.msrb.mxu2 %v4337_v24  ;;  %3188 = vmatpush.msrb.mxu3 %v4338_v25  ;;  %4602 = vtanh.f32 %v1663_v27  ;;  %v4344_v24 = vld [vmem:[%s7272_s0 + $0xee8] sm:$0xff]  ;;  %v4430_v26 = vld [vmem:[%s7272_s0 + $0x1110] sm:$0xff]  ;;  %v4431_v27 = vld [vmem:[%s7272_s0 + $0x1118] sm:$0xff] }
 0x126   :  { %4379 = vmatmul.msk.f32.vlgmr.msra.gmra.mxu0 %vm76_vm0, %v6589_v9  ;;  %4380 = vmatmul.msk.f32.vlgmr.msra.gmra.mxu1 %vm76_vm0, %v6589_v9 }
 0x127   :  { %3126 = vmatpush.msrb.mxu0 %v4367_v28  ;;  %3146 = vmatpush.msrb.mxu1 %v4368_v29  ;;  %v4327_v29 = vld [vmem:[%s7272_s0 + $0xe60] sm:$0xff] }
 0x128   :  { %v4597_v34 = vpop.eup %4596  ;;  %3169 = vmatpush.msrb.mxu2 %v4321_v30  ;;  %3189 = vmatpush.msrb.mxu3 %v4322_v31  ;;  %v4328_v30 = vld [vmem:[%s7272_s0 + $0xe68] sm:$0xff] }
 0x129   :  { %v4599_v38 = vpop.eup %4598  ;;  %3127 = vmatpush.msrb.mxu0 %v4351_v32  ;;  %3147 = vmatpush.msrb.mxu1 %v4352_v33  ;;  %1694 = vst [vmem:[%s7274_s2 + $0x1e0] sm:$0xff] %v4597_v34  ;;  %v4414_v33 = vld [vmem:[%s7272_s0 + $0x1090] sm:$0xff]  ;;  %v4415_v34 = vld [vmem:[%s7272_s0 + $0x1098] sm:$0xff] }
 0x12a   :  { %v4601_v41 = vpop.eup %4600  ;;  %4385 = vmatmul.msk.f32.vlgmr.msrb.gmra.mxu2 %vm76_vm0, %v6589_v9  ;;  %4386 = vmatmul.msk.f32.vlgmr.msrb.gmra.mxu3 %vm76_vm0, %v6589_v9  ;;  %1695 = vst [vmem:[%s7274_s2 + $0x1e8] sm:$0xff] %v4599_v38  ;;  %v4444_v38 = vld [vmem:[%s7272_s0 + $0x1180] sm:$0xff] }
 0x12b   :  { %v4603_v43 = vpop.eup %4602  ;;  %3246 = vmatpush.msra.mxu2 %v4373_v35  ;;  %3266 = vmatpush.msra.mxu3 %v4374_v36  ;;  %1696 = vst [vmem:[%s7274_s2 + $0x1f0] sm:$0xff] %v4601_v41  ;;  %v1785_v46 = vpop.f32.mrf.mxu0  ;;  %v4399_v41 = vld [vmem:[%s7272_s0 + $0x1018] sm:$0xff] }
 0x12c   :  { %v1805_v47 = vpop.f32.mrf.mxu1  ;;  %3128 = vmatpush.msrb.mxu0 %v4335_v16  ;;  %3148 = vmatpush.msrb.mxu1 %v4336_v39  ;;  %1697 = vst [vmem:[%s7274_s2 + $0x1f8] sm:$0xff] %v4603_v43  ;;  %4604 = vtanh.f32 %v1785_v46  ;;  %v1825_v50 = vpop.f32.mrf.mxu2  ;;  %v4445_v16 = vld [vmem:[%s7272_s0 + $0x1188] sm:$0xff]  ;;  %v4398_v39 = vld [vmem:[%s7272_s0 + $0x1010] sm:$0xff]  ;;  %v6866_v43 = vld [vmem:[%s7273_s1 + $0x40] sm:$0xff] }
 0x12d   :  { %v1845_v51 = vpop.f32.mrf.mxu3  ;;  %3247 = vmatpush.msra.mxu2 %v4357_v6  ;;  %3267 = vmatpush.msra.mxu3 %v4358_v42  ;;  %4606 = vtanh.f32 %v1805_v47  ;;  %v4428_v6 = vld [vmem:[%s7272_s0 + $0x1100] sm:$0xff]  ;;  %v4429_v42 = vld [vmem:[%s7272_s0 + $0x1108] sm:$0xff] }
 0x12e   :  { %3129 = vmatpush.msrb.mxu0 %v4319_v44  ;;  %3149 = vmatpush.msrb.mxu1 %v4320_v45  ;;  %4608 = vtanh.f32 %v1825_v50  ;;  %v4451_v45 = vld [vmem:[%s7272_s0 + $0x11b8] sm:$0xff]  ;;  %v4412_v47 = vld [vmem:[%s7272_s0 + $0x1080] sm:$0xff]  ;;  %v4434_v50 = vld [vmem:[%s7272_s0 + $0x1130] sm:$0xff] }
 0x12f   :  { %3248 = vmatpush.msra.mxu2 %v4341_v48  ;;  %3268 = vmatpush.msra.mxu3 %v4342_v49  ;;  %4610 = vtanh.f32 %v1845_v51  ;;  %v4413_v48 = vld [vmem:[%s7272_s0 + $0x1088] sm:$0xff]  ;;  %v4435_v51 = vld [vmem:[%s7272_s0 + $0x1138] sm:$0xff] }
 0x130   :  { %4383 = vmatmul.msk.f32.vlgmr.msrb.gmra.mxu0 %vm76_vm0, %v6589_v9  ;;  %4384 = vmatmul.msk.f32.vlgmr.msrb.gmra.mxu1 %vm76_vm0, %v6589_v9 }
 0x131   :  { %3206 = vmatpush.msra.mxu0 %v4371_v52  ;;  %3226 = vmatpush.msra.mxu1 %v4372_v53  ;;  %v4396_v53 = vld [vmem:[%s7272_s0 + $0x1000] sm:$0xff] }
 0x132   :  { %v4605_v58 = vpop.eup %4604  ;;  %3249 = vmatpush.msra.mxu2 %v4325_v54  ;;  %3269 = vmatpush.msra.mxu3 %v4326_v55  ;;  %v4397_v54 = vld [vmem:[%s7272_s0 + $0x1008] sm:$0xff] }
 0x133   :  { %v4607_v61 = vpop.eup %4606  ;;  %3207 = vmatpush.msra.mxu0 %v4355_v56  ;;  %3227 = vmatpush.msra.mxu1 %v4356_v57  ;;  %2104 = vst [vmem:[%s7274_s2 + $0x200] sm:$0xff] %v4605_v58  ;;  %v4418_v57 = vld [vmem:[%s7272_s0 + $0x10b0] sm:$0xff]  ;;  %v4419_v58 = vld [vmem:[%s7272_s0 + $0x10b8] sm:$0xff] }
 0x134   :  { %v4609_v0 = vpop.eup %4608  ;;  %4389 = vmatmul.msk.f32.vlgmr.msra.gmra.mxu2 %vm76_vm0, %v6589_v9  ;;  %4390 = vmatmul.msk.f32.vlgmr.msra.gmra.mxu3 %vm76_vm0, %v6589_v9  ;;  %2105 = vst [vmem:[%s7274_s2 + $0x208] sm:$0xff] %v4607_v61  ;;  %v4448_v61 = vld [vmem:[%s7272_s0 + $0x11a0] sm:$0xff] }
 0x135   :  { %v4611_v3 = vpop.eup %4610  ;;  %3326 = vmatpush.msrb.mxu2 %v4377_v59  ;;  %3346 = vmatpush.msrb.mxu3 %v4378_v60  ;;  %2106 = vst [vmem:[%s7274_s2 + $0x210] sm:$0xff] %v4609_v0  ;;  %v1865_v7 = vpop.f32.mrf.mxu0  ;;  %v4403_v0 = vld [vmem:[%s7272_s0 + $0x1038] sm:$0xff] }
 0x136   :  { %v1885_v37 = vpop.f32.mrf.mxu1  ;;  %3208 = vmatpush.msra.mxu0 %v4339_v62  ;;  %3228 = vmatpush.msra.mxu1 %v4340_v63  ;;  %2107 = vst [vmem:[%s7274_s2 + $0x218] sm:$0xff] %v4611_v3  ;;  %4612 = vtanh.f32 %v1865_v7  ;;  %v1905_v40 = vpop.f32.mrf.mxu2  ;;  %v4449_v62 = vld [vmem:[%s7272_s0 + $0x11a8] sm:$0xff]  ;;  %v4402_v63 = vld [vmem:[%s7272_s0 + $0x1030] sm:$0xff] }
 0x137   :  { %v1925_v11 = vpop.f32.mrf.mxu3  ;;  %3327 = vmatpush.msrb.mxu2 %v4361_v1  ;;  %3347 = vmatpush.msrb.mxu3 %v4362_v2  ;;  %4614 = vtanh.f32 %v1885_v37  ;;  %v4432_v1 = vld [vmem:[%s7272_s0 + $0x1120] sm:$0xff]  ;;  %v4433_v2 = vld [vmem:[%s7272_s0 + $0x1128] sm:$0xff] }
 0x138   :  { %3209 = vmatpush.msra.mxu0 %v4323_v4  ;;  %3229 = vmatpush.msra.mxu1 %v4324_v5  ;;  %4616 = vtanh.f32 %v1905_v40  ;;  %v4454_v4 = vld [vmem:[%s7272_s0 + $0x11d0] sm:$0xff]  ;;  %v4455_v5 = vld [vmem:[%s7272_s0 + $0x11d8] sm:$0xff]  ;;  %v4416_v37 = vld [vmem:[%s7272_s0 + $0x10a0] sm:$0xff] }
 0x139   :  { %3328 = vmatpush.msrb.mxu2 %v4345_v8  ;;  %3348 = vmatpush.msrb.mxu3 %v4346_v10  ;;  %4618 = vtanh.f32 %v1925_v11  ;;  %v4417_v8 = vld [vmem:[%s7272_s0 + $0x10a8] sm:$0xff]  ;;  %v4438_v40 = vld [vmem:[%s7272_s0 + $0x1150] sm:$0xff]  ;;  %v4439_v11 = vld [vmem:[%s7272_s0 + $0x1158] sm:$0xff] }
 0x13a   :  { %4387 = vmatmul.msk.f32.vlgmr.msra.gmra.mxu0 %vm76_vm0, %v6589_v9  ;;  %4388 = vmatmul.msk.f32.vlgmr.msra.gmra.mxu1 %vm76_vm0, %v6589_v9 }
 0x13b   :  { %3286 = vmatpush.msrb.mxu0 %v4375_v13  ;;  %3306 = vmatpush.msrb.mxu1 %v4376_v12  ;;  %v4400_v12 = vld [vmem:[%s7272_s0 + $0x1020] sm:$0xff] }
 0x13c   :  { %v4613_v19 = vpop.eup %4612  ;;  %3329 = vmatpush.msrb.mxu2 %v4329_v14  ;;  %3349 = vmatpush.msrb.mxu3 %v4330_v15  ;;  %v4401_v14 = vld [vmem:[%s7272_s0 + $0x1028] sm:$0xff] }
 0x13d   :  { %v4615_v22 = vpop.eup %4614  ;;  %3287 = vmatpush.msrb.mxu0 %v4359_v17  ;;  %3307 = vmatpush.msrb.mxu1 %v4360_v18  ;;  %2108 = vst [vmem:[%s7274_s2 + $0x220] sm:$0xff] %v4613_v19  ;;  %v4422_v18 = vld [vmem:[%s7272_s0 + $0x10d0] sm:$0xff]  ;;  %v4423_v19 = vld [vmem:[%s7272_s0 + $0x10d8] sm:$0xff] }
 0x13e   :  { %v4617_v25 = vpop.eup %4616  ;;  %4393 = vmatmul.msk.f32.vlgmr.msrb.gmra.mxu2 %vm76_vm0, %v6589_v9  ;;  %4394 = vmatmul.msk.f32.vlgmr.msrb.gmra.mxu3 %vm76_vm0, %v6589_v9  ;;  %2109 = vst [vmem:[%s7274_s2 + $0x228] sm:$0xff] %v4615_v22  ;;  %v4452_v22 = vld [vmem:[%s7272_s0 + $0x11c0] sm:$0xff] }
 0x13f   :  { %v4619_v28 = vpop.eup %4618  ;;  %3508 = vmatpush.msra.mxu2 %v4446_v20  ;;  %3528 = vmatpush.msra.mxu3 %v4447_v21  ;;  %2110 = vst [vmem:[%s7274_s2 + $0x230] sm:$0xff] %v4617_v25  ;;  %v1945_v31 = vpop.f32.mrf.mxu0  ;;  %v4407_v25 = vld [vmem:[%s7272_s0 + $0x1058] sm:$0xff] }
 0x140   :  { %v1965_v32 = vpop.f32.mrf.mxu1  ;;  %3288 = vmatpush.msrb.mxu0 %v4343_v23  ;;  %3308 = vmatpush.msrb.mxu1 %v4344_v24  ;;  %2111 = vst [vmem:[%s7274_s2 + $0x238] sm:$0xff] %v4619_v28  ;;  %4620 = vtanh.f32 %v1945_v31  ;;  %v1985_v35 = vpop.f32.mrf.mxu2  ;;  %v4453_v23 = vld [vmem:[%s7272_s0 + $0x11c8] sm:$0xff]  ;;  %v4406_v24 = vld [vmem:[%s7272_s0 + $0x1050] sm:$0xff] }
 0x141   :  { %v2005_v36 = vpop.f32.mrf.mxu3  ;;  %3509 = vmatpush.msra.mxu2 %v4430_v26  ;;  %3529 = vmatpush.msra.mxu3 %v4431_v27  ;;  %4622 = vtanh.f32 %v1965_v32  ;;  %v4436_v26 = vld [vmem:[%s7272_s0 + $0x1140] sm:$0xff]  ;;  %v4437_v27 = vld [vmem:[%s7272_s0 + $0x1148] sm:$0xff] }
 0x142   :  { %3289 = vmatpush.msrb.mxu0 %v4327_v29  ;;  %3309 = vmatpush.msrb.mxu1 %v4328_v30  ;;  %4624 = vtanh.f32 %v1985_v35  ;;  %v4458_v29 = vld [vmem:[%s7272_s0 + $0x11f0] sm:$0xff]  ;;  %v4459_v30 = vld [vmem:[%s7272_s0 + $0x11f8] sm:$0xff]  ;;  %v4420_v32 = vld [vmem:[%s7272_s0 + $0x10c0] sm:$0xff] }
 0x143   :  { %3510 = vmatpush.msra.mxu2 %v4414_v33  ;;  %3530 = vmatpush.msra.mxu3 %v4415_v34  ;;  %4626 = vtanh.f32 %v2005_v36  ;;  %v4421_v33 = vld [vmem:[%s7272_s0 + $0x10c8] sm:$0xff]  ;;  %v4442_v35 = vld [vmem:[%s7272_s0 + $0x1170] sm:$0xff]  ;;  %v4443_v36 = vld [vmem:[%s7272_s0 + $0x1178] sm:$0xff] }
 0x144   :  { %4391 = vmatmul.msk.f32.vlgmr.msrb.gmra.mxu0 %vm76_vm0, %v6589_v9  ;;  %4392 = vmatmul.msk.f32.vlgmr.msrb.gmra.mxu1 %vm76_vm0, %v6589_v9  ;;  %v4450_v9 = vld [vmem:[%s7272_s0 + $0x11b0] sm:$0xff] }
 0x145   :  { %3468 = vmatpush.msra.mxu0 %v4444_v38  ;;  %3488 = vmatpush.msra.mxu1 %v4445_v16  ;;  %v4404_v16 = vld [vmem:[%s7272_s0 + $0x1040] sm:$0xff] }
 0x146   :  { %v4621_v44 = vpop.eup %4620  ;;  %3511 = vmatpush.msra.mxu2 %v4398_v39  ;;  %3531 = vmatpush.msra.mxu3 %v4399_v41  ;;  %v4405_v39 = vld [vmem:[%s7272_s0 + $0x1048] sm:$0xff] }
 0x147   :  { %v4623_v46 = vpop.eup %4622  ;;  %3469 = vmatpush.msra.mxu0 %v4428_v6  ;;  %3489 = vmatpush.msra.mxu1 %v4429_v42  ;;  %2112 = vst [vmem:[%s7274_s2 + $0x240] sm:$0xff] %v4621_v44  ;;  %v4426_v42 = vld [vmem:[%s7272_s0 + $0x10f0] sm:$0xff]  ;;  %v4427_v44 = vld [vmem:[%s7272_s0 + $0x10f8] sm:$0xff] }
 0x148   :  { %v4625_v49 = vpop.eup %4624  ;;  %4462 = vmatmul.msk.f32.vlgmr.msra.gmra.mxu2 %vm76_vm0, %v6866_v43  ;;  %4463 = vmatmul.msk.f32.vlgmr.msra.gmra.mxu3 %vm76_vm0, %v6866_v43  ;;  %2113 = vst [vmem:[%s7274_s2 + $0x248] sm:$0xff] %v4623_v46  ;;  %v4456_v46 = vld [vmem:[%s7272_s0 + $0x11e0] sm:$0xff] }
 0x149   :  { %v4627_v52 = vpop.eup %4626  ;;  %3588 = vmatpush.msrb.mxu2 %v4450_v9  ;;  %3608 = vmatpush.msrb.mxu3 %v4451_v45  ;;  %2114 = vst [vmem:[%s7274_s2 + $0x250] sm:$0xff] %v4625_v49  ;;  %v2025_v55 = vpop.f32.mrf.mxu0  ;;  %v4411_v49 = vld [vmem:[%s7272_s0 + $0x1078] sm:$0xff] }
 0x14a   :  { %v2045_v56 = vpop.f32.mrf.mxu1  ;;  %3470 = vmatpush.msra.mxu0 %v4412_v47  ;;  %3490 = vmatpush.msra.mxu1 %v4413_v48  ;;  %2115 = vst [vmem:[%s7274_s2 + $0x258] sm:$0xff] %v4627_v52  ;;  %4628 = vtanh.f32 %v2025_v55  ;;  %v2065_v59 = vpop.f32.mrf.mxu2  ;;  %v4457_v47 = vld [vmem:[%s7272_s0 + $0x11e8] sm:$0xff]  ;;  %v4410_v48 = vld [vmem:[%s7272_s0 + $0x1070] sm:$0xff] }
 0x14b   :  { %v2085_v60 = vpop.f32.mrf.mxu3  ;;  %3589 = vmatpush.msrb.mxu2 %v4434_v50  ;;  %3609 = vmatpush.msrb.mxu3 %v4435_v51  ;;  %4630 = vtanh.f32 %v2045_v56  ;;  %v4440_v50 = vld [vmem:[%s7272_s0 + $0x1160] sm:$0xff]  ;;  %v4441_v51 = vld [vmem:[%s7272_s0 + $0x1168] sm:$0xff] }
 0x14c   :  { %3471 = vmatpush.msra.mxu0 %v4396_v53  ;;  %3491 = vmatpush.msra.mxu1 %v4397_v54  ;;  %4632 = vtanh.f32 %v2065_v59  ;;  %v4424_v53 = vld [vmem:[%s7272_s0 + $0x10e0] sm:$0xff]  ;;  %v4425_v54 = vld [vmem:[%s7272_s0 + $0x10e8] sm:$0xff] }
 0x14d   :  { %3590 = vmatpush.msrb.mxu2 %v4418_v57  ;;  %3610 = vmatpush.msrb.mxu3 %v4419_v58  ;;  %4634 = vtanh.f32 %v2085_v60  ;;  %v4408_v57 = vld [vmem:[%s7272_s0 + $0x1060] sm:$0xff]  ;;  %v4409_v58 = vld [vmem:[%s7272_s0 + $0x1068] sm:$0xff] }
 0x14e   :  { %4460 = vmatmul.msk.f32.vlgmr.msra.gmra.mxu0 %vm76_vm0, %v6866_v43  ;;  %4461 = vmatmul.msk.f32.vlgmr.msra.gmra.mxu1 %vm76_vm0, %v6866_v43 }
 0x14f   :  { %3548 = vmatpush.msrb.mxu0 %v4448_v61  ;;  %3568 = vmatpush.msrb.mxu1 %v4449_v62 }
 0x150   :  { %v4629_v3 = vpop.eup %4628  ;;  %3591 = vmatpush.msrb.mxu2 %v4402_v63  ;;  %3611 = vmatpush.msrb.mxu3 %v4403_v0 }
 0x151   :  { %v4631_v7 = vpop.eup %4630  ;;  %3549 = vmatpush.msrb.mxu0 %v4432_v1  ;;  %3569 = vmatpush.msrb.mxu1 %v4433_v2  ;;  %2116 = vst [vmem:[%s7274_s2 + $0x260] sm:$0xff] %v4629_v3 }
 0x152   :  { %v4633_v10 = vpop.eup %4632  ;;  %4466 = vmatmul.msk.f32.vlgmr.msrb.gmra.mxu2 %vm76_vm0, %v6866_v43  ;;  %4467 = vmatmul.msk.f32.vlgmr.msrb.gmra.mxu3 %vm76_vm0, %v6866_v43  ;;  %2117 = vst [vmem:[%s7274_s2 + $0x268] sm:$0xff] %v4631_v7 }
 0x153   :  { %v4635_v13 = vpop.eup %4634  ;;  %3668 = vmatpush.msra.mxu2 %v4454_v4  ;;  %3688 = vmatpush.msra.mxu3 %v4455_v5  ;;  %2118 = vst [vmem:[%s7274_s2 + $0x270] sm:$0xff] %v4633_v10  ;;  %v2207_v15 = vpop.f32.mrf.mxu0 }
 0x154   :  { %v2227_v17 = vpop.f32.mrf.mxu1  ;;  %3550 = vmatpush.msrb.mxu0 %v4416_v37  ;;  %3570 = vmatpush.msrb.mxu1 %v4417_v8  ;;  %2119 = vst [vmem:[%s7274_s2 + $0x278] sm:$0xff] %v4635_v13  ;;  %4636 = vtanh.f32 %v2207_v15  ;;  %v2247_v20 = vpop.f32.mrf.mxu2 }
 0x155   :  { %v2267_v21 = vpop.f32.mrf.mxu3  ;;  %3669 = vmatpush.msra.mxu2 %v4438_v40  ;;  %3689 = vmatpush.msra.mxu3 %v4439_v11  ;;  %4638 = vtanh.f32 %v2227_v17 }
 0x156   :  { %3551 = vmatpush.msrb.mxu0 %v4400_v12  ;;  %3571 = vmatpush.msrb.mxu1 %v4401_v14  ;;  %4640 = vtanh.f32 %v2247_v20 }
 0x157   :  { %3670 = vmatpush.msra.mxu2 %v4422_v18  ;;  %3690 = vmatpush.msra.mxu3 %v4423_v19  ;;  %4642 = vtanh.f32 %v2267_v21 }
 0x158   :  { %4464 = vmatmul.msk.f32.vlgmr.msrb.gmra.mxu0 %vm76_vm0, %v6866_v43  ;;  %4465 = vmatmul.msk.f32.vlgmr.msrb.gmra.mxu1 %vm76_vm0, %v6866_v43 }
 0x159   :  { %3628 = vmatpush.msra.mxu0 %v4452_v22  ;;  %3648 = vmatpush.msra.mxu1 %v4453_v23 }
 0x15a   :  { %v4637_v28 = vpop.eup %4636  ;;  %3671 = vmatpush.msra.mxu2 %v4406_v24  ;;  %3691 = vmatpush.msra.mxu3 %v4407_v25 }
 0x15b   :  { %v4639_v31 = vpop.eup %4638  ;;  %3629 = vmatpush.msra.mxu0 %v4436_v26  ;;  %3649 = vmatpush.msra.mxu1 %v4437_v27  ;;  %2526 = vst [vmem:[%s7274_s2 + $0x280] sm:$0xff] %v4637_v28 }
 0x15c   :  { %v4641_v34 = vpop.eup %4640  ;;  %4470 = vmatmul.msk.f32.vlgmr.msra.gmra.mxu2 %vm76_vm0, %v6866_v43  ;;  %4471 = vmatmul.msk.f32.vlgmr.msra.gmra.mxu3 %vm76_vm0, %v6866_v43  ;;  %2527 = vst [vmem:[%s7274_s2 + $0x288] sm:$0xff] %v4639_v31 }
 0x15d   :  { %v4643_v38 = vpop.eup %4642  ;;  %3748 = vmatpush.msrb.mxu2 %v4458_v29  ;;  %3768 = vmatpush.msrb.mxu3 %v4459_v30  ;;  %2528 = vst [vmem:[%s7274_s2 + $0x290] sm:$0xff] %v4641_v34  ;;  %v2287_v41 = vpop.f32.mrf.mxu0 }
 0x15e   :  { %v2307_v6 = vpop.f32.mrf.mxu1  ;;  %3630 = vmatpush.msra.mxu0 %v4420_v32  ;;  %3650 = vmatpush.msra.mxu1 %v4421_v33  ;;  %2529 = vst [vmem:[%s7274_s2 + $0x298] sm:$0xff] %v4643_v38  ;;  %4644 = vtanh.f32 %v2287_v41  ;;  %v2327_v9 = vpop.f32.mrf.mxu2 }
 0x15f   :  { %v2347_v45 = vpop.f32.mrf.mxu3  ;;  %3749 = vmatpush.msrb.mxu2 %v4442_v35  ;;  %3769 = vmatpush.msrb.mxu3 %v4443_v36  ;;  %4646 = vtanh.f32 %v2307_v6 }
 0x160   :  { %3631 = vmatpush.msra.mxu0 %v4404_v16  ;;  %3651 = vmatpush.msra.mxu1 %v4405_v39  ;;  %4648 = vtanh.f32 %v2327_v9 }
 0x161   :  { %3750 = vmatpush.msrb.mxu2 %v4426_v42  ;;  %3770 = vmatpush.msrb.mxu3 %v4427_v44  ;;  %4650 = vtanh.f32 %v2347_v45 }
 0x162   :  { %4468 = vmatmul.msk.f32.vlgmr.msra.gmra.mxu0 %vm76_vm0, %v6866_v43  ;;  %4469 = vmatmul.msk.f32.vlgmr.msra.gmra.mxu1 %vm76_vm0, %v6866_v43 }
 0x163   :  { %3708 = vmatpush.msrb.mxu0 %v4456_v46  ;;  %3728 = vmatpush.msrb.mxu1 %v4457_v47 }
 0x164   :  { %v4645_v52 = vpop.eup %4644  ;;  %3751 = vmatpush.msrb.mxu2 %v4410_v48  ;;  %3771 = vmatpush.msrb.mxu3 %v4411_v49 }
 0x165   :  { %v4647_v55 = vpop.eup %4646  ;;  %3709 = vmatpush.msrb.mxu0 %v4440_v50  ;;  %3729 = vmatpush.msrb.mxu1 %v4441_v51  ;;  %2530 = vst [vmem:[%s7274_s2 + $0x2a0] sm:$0xff] %v4645_v52 }
 0x166   :  { %v4649_v56 = vpop.eup %4648  ;;  %4474 = vmatmul.msk.f32.vlgmr.msrb.gmra.mxu2 %vm76_vm0, %v6866_v43  ;;  %4475 = vmatmul.msk.f32.vlgmr.msrb.gmra.mxu3 %vm76_vm0, %v6866_v43  ;;  %2531 = vst [vmem:[%s7274_s2 + $0x2a8] sm:$0xff] %v4647_v55 }
 0x167   :  { %v4651_v59 = vpop.eup %4650  ;;  %3710 = vmatpush.msrb.mxu0 %v4424_v53  ;;  %3730 = vmatpush.msrb.mxu1 %v4425_v54  ;;  %2532 = vst [vmem:[%s7274_s2 + $0x2b0] sm:$0xff] %v4649_v56  ;;  %v2367_v60 = vpop.f32.mrf.mxu0 }
 0x168   :  { %v2387_v61 = vpop.f32.mrf.mxu1  ;;  %2533 = vst [vmem:[%s7274_s2 + $0x2b8] sm:$0xff] %v4651_v59  ;;  %4652 = vtanh.f32 %v2367_v60  ;;  %v2407_v62 = vpop.f32.mrf.mxu2 }
 0x169   :  { %v2427_v63 = vpop.f32.mrf.mxu3  ;;  %3711 = vmatpush.msrb.mxu0 %v4408_v57  ;;  %3731 = vmatpush.msrb.mxu1 %v4409_v58  ;;  %4654 = vtanh.f32 %v2387_v61 }
 0x16a   :  { %4472 = vmatmul.msk.f32.vlgmr.msrb.gmra.mxu0 %vm76_vm0, %v6866_v43  ;;  %4473 = vmatmul.msk.f32.vlgmr.msrb.gmra.mxu1 %vm76_vm0, %v6866_v43  ;;  %4656 = vtanh.f32 %v2407_v62 }
 0x16b   :  { %4658 = vtanh.f32 %v2427_v63 }
 0x16e   :  { %v4653_v0 = vpop.eup %4652 }
 0x16f   :  { %v4655_v1 = vpop.eup %4654  ;;  %2534 = vst [vmem:[%s7274_s2 + $0x2c0] sm:$0xff] %v4653_v0 }
 0x170   :  { %v4657_v2 = vpop.eup %4656  ;;  %2535 = vst [vmem:[%s7274_s2 + $0x2c8] sm:$0xff] %v4655_v1 }
 0x171   :  { %v4659_v3 = vpop.eup %4658  ;;  %2536 = vst [vmem:[%s7274_s2 + $0x2d0] sm:$0xff] %v4657_v2  ;;  %v2447_v4 = vpop.f32.mrf.mxu0 }
 0x172   :  { %v2467_v43 = vpop.f32.mrf.mxu1  ;;  %2537 = vst [vmem:[%s7274_s2 + $0x2d8] sm:$0xff] %v4659_v3  ;;  %4660 = vtanh.f32 %v2447_v4  ;;  %v2487_v5 = vpop.f32.mrf.mxu2 }
 0x173   :  { %v2507_v7 = vpop.f32.mrf.mxu3  ;;  %4662 = vtanh.f32 %v2467_v43 }
 0x174   :  { %4664 = vtanh.f32 %v2487_v5 }
 0x175   :  { %4666 = vtanh.f32 %v2507_v7 }
 0x178   :  { %v4661_v37 = vpop.eup %4660 }
 0x179   :  { %v4663_v8 = vpop.eup %4662  ;;  %2538 = vst [vmem:[%s7274_s2 + $0x2e0] sm:$0xff] %v4661_v37 }
 0x17a   :  { %v4665_v10 = vpop.eup %4664  ;;  %2539 = vst [vmem:[%s7274_s2 + $0x2e8] sm:$0xff] %v4663_v8 }
 0x17b   :  { %v4667_v40 = vpop.eup %4666  ;;  %2540 = vst [vmem:[%s7274_s2 + $0x2f0] sm:$0xff] %v4665_v10  ;;  %v2629_v11 = vpop.f32.mrf.mxu0 }
 0x17c   :  { %v2649_v13 = vpop.f32.mrf.mxu1  ;;  %2541 = vst [vmem:[%s7274_s2 + $0x2f8] sm:$0xff] %v4667_v40  ;;  %4668 = vtanh.f32 %v2629_v11  ;;  %v2669_v12 = vpop.f32.mrf.mxu2 }
 0x17d   :  { %v2689_v14 = vpop.f32.mrf.mxu3  ;;  %4670 = vtanh.f32 %v2649_v13 }
 0x17e   :  { %4672 = vtanh.f32 %v2669_v12 }
 0x17f   :  { %4674 = vtanh.f32 %v2689_v14 }
 0x182   :  { %v4669_v15 = vpop.eup %4668 }
 0x183   :  { %v4671_v17 = vpop.eup %4670  ;;  %2948 = vst [vmem:[%s7274_s2 + $0x300] sm:$0xff] %v4669_v15 }
 0x184   :  { %v4673_v18 = vpop.eup %4672  ;;  %2949 = vst [vmem:[%s7274_s2 + $0x308] sm:$0xff] %v4671_v17 }
 0x185   :  { %v4675_v19 = vpop.eup %4674  ;;  %2950 = vst [vmem:[%s7274_s2 + $0x310] sm:$0xff] %v4673_v18  ;;  %v2709_v20 = vpop.f32.mrf.mxu0 }
 0x186   :  { %v2729_v21 = vpop.f32.mrf.mxu1  ;;  %2951 = vst [vmem:[%s7274_s2 + $0x318] sm:$0xff] %v4675_v19  ;;  %4676 = vtanh.f32 %v2709_v20  ;;  %v2749_v22 = vpop.f32.mrf.mxu2 }
 0x187   :  { %v2769_v23 = vpop.f32.mrf.mxu3  ;;  %4678 = vtanh.f32 %v2729_v21 }
 0x188   :  { %4680 = vtanh.f32 %v2749_v22 }
 0x189   :  { %4682 = vtanh.f32 %v2769_v23 }
 0x18c   :  { %v4677_v24 = vpop.eup %4676 }
 0x18d   :  { %v4679_v25 = vpop.eup %4678  ;;  %2952 = vst [vmem:[%s7274_s2 + $0x320] sm:$0xff] %v4677_v24 }
 0x18e   :  { %v4681_v26 = vpop.eup %4680  ;;  %2953 = vst [vmem:[%s7274_s2 + $0x328] sm:$0xff] %v4679_v25 }
 0x18f   :  { %v4683_v27 = vpop.eup %4682  ;;  %2954 = vst [vmem:[%s7274_s2 + $0x330] sm:$0xff] %v4681_v26  ;;  %v2789_v28 = vpop.f32.mrf.mxu0 }
 0x190   :  { %v2809_v29 = vpop.f32.mrf.mxu1  ;;  %2955 = vst [vmem:[%s7274_s2 + $0x338] sm:$0xff] %v4683_v27  ;;  %4684 = vtanh.f32 %v2789_v28  ;;  %v2829_v30 = vpop.f32.mrf.mxu2 }
 0x191   :  { %v2849_v31 = vpop.f32.mrf.mxu3  ;;  %4686 = vtanh.f32 %v2809_v29 }
 0x192   :  { %4688 = vtanh.f32 %v2829_v30 }
 0x193   :  { %4690 = vtanh.f32 %v2849_v31 }
 0x196   :  { %v4685_v32 = vpop.eup %4684 }
 0x197   :  { %v4687_v33 = vpop.eup %4686  ;;  %2956 = vst [vmem:[%s7274_s2 + $0x340] sm:$0xff] %v4685_v32 }
 0x198   :  { %v4689_v34 = vpop.eup %4688  ;;  %2957 = vst [vmem:[%s7274_s2 + $0x348] sm:$0xff] %v4687_v33 }
 0x199   :  { %v4691_v35 = vpop.eup %4690  ;;  %2958 = vst [vmem:[%s7274_s2 + $0x350] sm:$0xff] %v4689_v34  ;;  %v2869_v36 = vpop.f32.mrf.mxu0 }
 0x19a   :  { %v2889_v38 = vpop.f32.mrf.mxu1  ;;  %2959 = vst [vmem:[%s7274_s2 + $0x358] sm:$0xff] %v4691_v35  ;;  %4692 = vtanh.f32 %v2869_v36  ;;  %v2909_v16 = vpop.f32.mrf.mxu2 }
 0x19b   :  { %v2929_v39 = vpop.f32.mrf.mxu3  ;;  %4694 = vtanh.f32 %v2889_v38 }
 0x19c   :  { %4696 = vtanh.f32 %v2909_v16 }
 0x19d   :  { %4698 = vtanh.f32 %v2929_v39 }
 0x1a0   :  { %v4693_v41 = vpop.eup %4692 }
 0x1a1   :  { %v4695_v6 = vpop.eup %4694  ;;  %2960 = vst [vmem:[%s7274_s2 + $0x360] sm:$0xff] %v4693_v41 }
 0x1a2   :  { %v4697_v42 = vpop.eup %4696  ;;  %2961 = vst [vmem:[%s7274_s2 + $0x368] sm:$0xff] %v4695_v6 }
 0x1a3   :  { %v4699_v44 = vpop.eup %4698  ;;  %2962 = vst [vmem:[%s7274_s2 + $0x370] sm:$0xff] %v4697_v42  ;;  %v3051_v9 = vpop.f32.mrf.mxu0 }
 0x1a4   :  { %v3071_v45 = vpop.f32.mrf.mxu1  ;;  %2963 = vst [vmem:[%s7274_s2 + $0x378] sm:$0xff] %v4699_v44  ;;  %4700 = vtanh.f32 %v3051_v9  ;;  %v3091_v46 = vpop.f32.mrf.mxu2 }
 0x1a5   :  { %v3111_v47 = vpop.f32.mrf.mxu3  ;;  %4702 = vtanh.f32 %v3071_v45 }
 0x1a6   :  { %4704 = vtanh.f32 %v3091_v46 }
 0x1a7   :  { %4706 = vtanh.f32 %v3111_v47 }
 0x1aa   :  { %v4701_v48 = vpop.eup %4700 }
 0x1ab   :  { %v4703_v49 = vpop.eup %4702  ;;  %3370 = vst [vmem:[%s7274_s2 + $0x380] sm:$0xff] %v4701_v48 }
 0x1ac   :  { %v4705_v50 = vpop.eup %4704  ;;  %3371 = vst [vmem:[%s7274_s2 + $0x388] sm:$0xff] %v4703_v49 }
 0x1ad   :  { %v4707_v51 = vpop.eup %4706  ;;  %3372 = vst [vmem:[%s7274_s2 + $0x390] sm:$0xff] %v4705_v50  ;;  %v3131_v52 = vpop.f32.mrf.mxu0 }
 0x1ae   :  { %v3151_v53 = vpop.f32.mrf.mxu1  ;;  %3373 = vst [vmem:[%s7274_s2 + $0x398] sm:$0xff] %v4707_v51  ;;  %4708 = vtanh.f32 %v3131_v52  ;;  %v3171_v54 = vpop.f32.mrf.mxu2 }
 0x1af   :  { %v3191_v55 = vpop.f32.mrf.mxu3  ;;  %4710 = vtanh.f32 %v3151_v53 }
 0x1b0   :  { %4712 = vtanh.f32 %v3171_v54 }
 0x1b1   :  { %4714 = vtanh.f32 %v3191_v55 }
 0x1b4   :  { %v4709_v56 = vpop.eup %4708 }
 0x1b5   :  { %v4711_v57 = vpop.eup %4710  ;;  %3374 = vst [vmem:[%s7274_s2 + $0x3a0] sm:$0xff] %v4709_v56 }
 0x1b6   :  { %v4713_v58 = vpop.eup %4712  ;;  %3375 = vst [vmem:[%s7274_s2 + $0x3a8] sm:$0xff] %v4711_v57 }
 0x1b7   :  { %v4715_v59 = vpop.eup %4714  ;;  %3376 = vst [vmem:[%s7274_s2 + $0x3b0] sm:$0xff] %v4713_v58  ;;  %v3211_v60 = vpop.f32.mrf.mxu0 }
 0x1b8   :  { %v3231_v61 = vpop.f32.mrf.mxu1  ;;  %3377 = vst [vmem:[%s7274_s2 + $0x3b8] sm:$0xff] %v4715_v59  ;;  %4716 = vtanh.f32 %v3211_v60  ;;  %v3251_v62 = vpop.f32.mrf.mxu2 }
 0x1b9   :  { %v3271_v63 = vpop.f32.mrf.mxu3  ;;  %4718 = vtanh.f32 %v3231_v61 }
 0x1ba   :  { %4720 = vtanh.f32 %v3251_v62 }
 0x1bb   :  { %4722 = vtanh.f32 %v3271_v63 }
 0x1be   :  { %v4717_v0 = vpop.eup %4716 }
 0x1bf   :  { %v4719_v1 = vpop.eup %4718  ;;  %3378 = vst [vmem:[%s7274_s2 + $0x3c0] sm:$0xff] %v4717_v0 }
 0x1c0   :  { %v4721_v2 = vpop.eup %4720  ;;  %3379 = vst [vmem:[%s7274_s2 + $0x3c8] sm:$0xff] %v4719_v1 }
 0x1c1   :  { %v4723_v3 = vpop.eup %4722  ;;  %3380 = vst [vmem:[%s7274_s2 + $0x3d0] sm:$0xff] %v4721_v2  ;;  %v3291_v4 = vpop.f32.mrf.mxu0 }
 0x1c2   :  { %v3311_v43 = vpop.f32.mrf.mxu1  ;;  %3381 = vst [vmem:[%s7274_s2 + $0x3d8] sm:$0xff] %v4723_v3  ;;  %4724 = vtanh.f32 %v3291_v4  ;;  %v3331_v5 = vpop.f32.mrf.mxu2 }
 0x1c3   :  { %v3351_v7 = vpop.f32.mrf.mxu3  ;;  %4726 = vtanh.f32 %v3311_v43 }
 0x1c4   :  { %4728 = vtanh.f32 %v3331_v5 }
 0x1c5   :  { %4730 = vtanh.f32 %v3351_v7 }
 0x1c8   :  { %v4725_v37 = vpop.eup %4724 }
 0x1c9   :  { %v4727_v8 = vpop.eup %4726  ;;  %3382 = vst [vmem:[%s7274_s2 + $0x3e0] sm:$0xff] %v4725_v37 }
 0x1ca   :  { %v4729_v10 = vpop.eup %4728  ;;  %3383 = vst [vmem:[%s7274_s2 + $0x3e8] sm:$0xff] %v4727_v8 }
 0x1cb   :  { %v4731_v40 = vpop.eup %4730  ;;  %3384 = vst [vmem:[%s7274_s2 + $0x3f0] sm:$0xff] %v4729_v10  ;;  %v3473_v11 = vpop.f32.mrf.mxu0 }
 0x1cc   :  { %v3493_v13 = vpop.f32.mrf.mxu1  ;;  %3385 = vst [vmem:[%s7274_s2 + $0x3f8] sm:$0xff] %v4731_v40  ;;  %4732 = vtanh.f32 %v3473_v11  ;;  %v3513_v12 = vpop.f32.mrf.mxu2 }
 0x1cd   :  { %v3533_v14 = vpop.f32.mrf.mxu3  ;;  %4734 = vtanh.f32 %v3493_v13 }
 0x1ce   :  { %4736 = vtanh.f32 %v3513_v12 }
 0x1cf   :  { %4738 = vtanh.f32 %v3533_v14 }
 0x1d2   :  { %v4733_v15 = vpop.eup %4732 }
 0x1d3   :  { %v4735_v17 = vpop.eup %4734  ;;  %3792 = vst [vmem:[%s7274_s2 + $0x400] sm:$0xff] %v4733_v15 }
 0x1d4   :  { %v4737_v18 = vpop.eup %4736  ;;  %3793 = vst [vmem:[%s7274_s2 + $0x408] sm:$0xff] %v4735_v17 }
 0x1d5   :  { %v4739_v19 = vpop.eup %4738  ;;  %3794 = vst [vmem:[%s7274_s2 + $0x410] sm:$0xff] %v4737_v18  ;;  %v3553_v20 = vpop.f32.mrf.mxu0 }
 0x1d6   :  { %v3573_v21 = vpop.f32.mrf.mxu1  ;;  %3795 = vst [vmem:[%s7274_s2 + $0x418] sm:$0xff] %v4739_v19  ;;  %4740 = vtanh.f32 %v3553_v20  ;;  %v3593_v22 = vpop.f32.mrf.mxu2 }
 0x1d7   :  { %v3613_v23 = vpop.f32.mrf.mxu3  ;;  %4742 = vtanh.f32 %v3573_v21 }
 0x1d8   :  { %4744 = vtanh.f32 %v3593_v22 }
 0x1d9   :  { %4746 = vtanh.f32 %v3613_v23 }
 0x1dc   :  { %v4741_v24 = vpop.eup %4740 }
 0x1dd   :  { %v4743_v25 = vpop.eup %4742  ;;  %3796 = vst [vmem:[%s7274_s2 + $0x420] sm:$0xff] %v4741_v24 }
 0x1de   :  { %v4745_v26 = vpop.eup %4744  ;;  %3797 = vst [vmem:[%s7274_s2 + $0x428] sm:$0xff] %v4743_v25 }
 0x1df   :  { %v4747_v27 = vpop.eup %4746  ;;  %3798 = vst [vmem:[%s7274_s2 + $0x430] sm:$0xff] %v4745_v26  ;;  %v3633_v28 = vpop.f32.mrf.mxu0 }
 0x1e0   :  { %v3653_v29 = vpop.f32.mrf.mxu1  ;;  %3799 = vst [vmem:[%s7274_s2 + $0x438] sm:$0xff] %v4747_v27  ;;  %4748 = vtanh.f32 %v3633_v28  ;;  %v3673_v30 = vpop.f32.mrf.mxu2 }
 0x1e1   :  { %v3693_v31 = vpop.f32.mrf.mxu3  ;;  %4750 = vtanh.f32 %v3653_v29 }
 0x1e2   :  { %4752 = vtanh.f32 %v3673_v30 }
 0x1e3   :  { %4754 = vtanh.f32 %v3693_v31 }
 0x1e6   :  { %v4749_v32 = vpop.eup %4748 }
 0x1e7   :  { %v4751_v33 = vpop.eup %4750  ;;  %3800 = vst [vmem:[%s7274_s2 + $0x440] sm:$0xff] %v4749_v32  ;;  %v3713_v34 = vpop.f32.mrf.mxu0 }
 0x1e8   :  { %v3733_v35 = vpop.f32.mrf.mxu1  ;;  %v4753_v36 = vpop.eup %4752  ;;  %3801 = vst [vmem:[%s7274_s2 + $0x448] sm:$0xff] %v4751_v33  ;;  %4756 = vtanh.f32 %v3713_v34 }
 0x1e9   :  { %v4755_v38 = vpop.eup %4754  ;;  %3802 = vst [vmem:[%s7274_s2 + $0x450] sm:$0xff] %v4753_v36  ;;  %4758 = vtanh.f32 %v3733_v35  ;;  %v3753_v16 = vpop.f32.mrf.mxu2 }
 0x1ea   :  { %v3773_v39 = vpop.f32.mrf.mxu3  ;;  %3803 = vst [vmem:[%s7274_s2 + $0x458] sm:$0xff] %v4755_v38  ;;  %4760 = vtanh.f32 %v3753_v16 }
 0x1eb   :  { %4762 = vtanh.f32 %v3773_v39 }
 0x1ee   :  { %v4757_v41 = vpop.eup %4756 }
 0x1ef   :  { %v4759_v6 = vpop.eup %4758  ;;  %3804 = vst [vmem:[%s7274_s2 + $0x460] sm:$0xff] %v4757_v41 }
 0x1f0   :  { %v4761_v42 = vpop.eup %4760  ;;  %3805 = vst [vmem:[%s7274_s2 + $0x468] sm:$0xff] %v4759_v6 }
 0x1f1   :  { %v4763_v44 = vpop.eup %4762  ;;  %3806 = vst [vmem:[%s7274_s2 + $0x470] sm:$0xff] %v4761_v42 }
 0x1f2   :  { %3807 = vst [vmem:[%s7274_s2 + $0x478] sm:$0xff] %v4763_v44 }

</bundles_post_ra>
